<compile_context>
chip_gen: v7x
topology: tpu7x:2x2x1
jax: 0.10.0
libtpu: 0.0.40
codegen_flags: <defaults>
</compile_context>

<pallas_src>
import functools
import math

import jax
import jax.numpy as jnp
from jax import lax
from jax.experimental import pallas as pl
from jax.experimental.pallas import tpu as pltpu

# ----------------------------- config --------------------------------------
VOCAB = 128
HIDDEN = 768          # must be 768 to match fc1 = Linear(768, 64)
NUM_HEADS = 6         # 6 x 128 -> head slices are 128-lane aligned
HEAD_DIM = HIDDEN // NUM_HEADS
INTERMEDIATE = 512
NUM_LAYERS = 2
MAX_POS = 32
TYPE_VOCAB = 2
FC1_DIM = 64
NUM_CLASSES = 2
LN_EPS = 1e-12


# --------------------------- in-kernel helpers -------------------------------
def _gelu(x):
    # tanh-approx GELU.  TODO(synk): HF BERT uses erf-GELU (~1e-3 deviation).
    return 0.5 * x * (1.0 + jnp.tanh(0.7978845608028654 * (x + 0.044715 * x * x * x)))


def _layer_norm(x, g, b, eps=LN_EPS):
    mu = jnp.mean(x, axis=-1, keepdims=True)
    var = jnp.mean((x - mu) * (x - mu), axis=-1, keepdims=True)
    return (x - mu) * lax.rsqrt(var + eps) * g + b


def _bf16_dot(a_f32, w_bf16, b_f32):
    """bf16 MXU matmul with f32 accumulation + f32 bias."""
    return jnp.dot(a_f32.astype(jnp.bfloat16), w_bf16,
                   preferred_element_type=jnp.float32) + b_f32


# --------------------- single fused BERT-classifier kernel -------------------
def _bert_fused_kernel(batch, seq,
                       x0_ref, mask_ref, embg_ref, embb_ref,
                       wqkv_ref, bqkv_ref, wo_ref, bo_ref,
                       ln1g_ref, ln1b_ref, wi_ref, bi_ref,
                       wf_ref, bf_ref, ln2g_ref, ln2b_ref,
                       wp_ref, bp_ref, w1_ref, b1_ref, w2_ref, b2_ref,
                       out_ref, x_sc, ctx_sc):
    """Grid axis 0 = encoder layer.  Hidden state lives in VMEM scratch x_sc."""
    l = pl.program_id(0)
    scale = 1.0 / math.sqrt(HEAD_DIM)

    # layer 0: apply the embedding LayerNorm into the resident hidden state.
    @pl.when(l == 0)
    def _():
        x_sc[...] = _layer_norm(x0_ref[...], embg_ref[...], embb_ref[...])

    x = x_sc[...]                                            # (B*S, H) f32

    # fused QKV projection on the whole (B*S, H) slab; downcast to bf16 once.
    qkv = _bf16_dot(x, wqkv_ref[...], bqkv_ref[...]).astype(jnp.bfloat16)

    # multi-head self-attention, static unroll over (batch, head).
    # Head slices are 128-lane aligned; ctx heads are written straight into
    # a VMEM scratch (no concatenate).
    for b in range(batch):
        r0 = b * seq
        mask_b = jnp.broadcast_to(mask_ref[b:b + 1, :], (seq, seq))  # hoisted
        for h in range(NUM_HEADS):
            lo = h * HEAD_DIM
            q_h = qkv[r0:r0 + seq, lo:lo + HEAD_DIM]
            k_h = qkv[r0:r0 + seq, HIDDEN + lo:HIDDEN + lo + HEAD_DIM]
            v_h = qkv[r0:r0 + seq, 2 * HIDDEN + lo:2 * HIDDEN + lo + HEAD_DIM]
            # contract on the head dim directly -> no k.T materialization
            s = lax.dot_general(q_h, k_h, (((1,), (1,)), ((), ())),
                                preferred_element_type=jnp.float32) * scale
            s = s + mask_b
            mx = jnp.max(s, axis=-1, keepdims=True)
            p = jnp.exp(s - mx)
            p = p / jnp.sum(p, axis=-1, keepdims=True)        # exact softmax
            ctx_sc[r0:r0 + seq, lo:lo + HEAD_DIM] = jnp.dot(
                p.astype(jnp.bfloat16), v_h, preferred_element_type=jnp.float32)

    # output projection + residual + LayerNorm (fused epilogue)
    attn_out = _bf16_dot(ctx_sc[...], wo_ref[...], bo_ref[...])
    x1 = _layer_norm(x + attn_out, ln1g_ref[...], ln1b_ref[...])

    # feed-forward (GELU) + residual + LayerNorm, written back to resident state
    inter = _gelu(_bf16_dot(x1, wi_ref[...], bi_ref[...]))
    ffn = _bf16_dot(inter, wf_ref[...], bf_ref[...])
    x_out = _layer_norm(x1 + ffn, ln2g_ref[...], ln2b_ref[...])
    x_sc[...] = x_out

    # final layer: pooler(tanh) -> dropout(identity) -> fc1/relu
    # -> dropout(identity) -> fc2 -> log_softmax on the CLS rows.
    @pl.when(l == pl.num_programs(0) - 1)
    def _():
        cls = jnp.concatenate(
            [x_out[b * seq:b * seq + 1, :] for b in range(batch)], axis=0)  # (B, H)
        pooled = jnp.tanh(_bf16_dot(cls, wp_ref[...], bp_ref[...]))
        h1 = jnp.maximum(_bf16_dot(pooled, w1_ref[...], b1_ref[...]), 0.0)
        logits = _bf16_dot(h1, w2_ref[...], b2_ref[...])
        mx2 = jnp.max(logits, axis=-1, keepdims=True)
        lse = jnp.log(jnp.sum(jnp.exp(logits - mx2), axis=-1, keepdims=True)) + mx2
        out_ref[...] = (logits - lse).astype(out_ref.dtype)


def _const_spec(shape):
    """Full-array block, same block every grid step (loaded once)."""
    nd = len(shape)
    return pl.BlockSpec(shape, lambda l, _nd=nd: (0,) * _nd)


def _layer_spec(shape):
    """Per-layer block of a layer-stacked (L, ...) array; leading dim squeezed."""
    tail = tuple(shape[1:])
    nz = (0,) * len(tail)
    return pl.BlockSpec((None,) + tail, lambda l, _nz=nz: (l,) + _nz)


def bert_fused_pallas(p, x0, mask_bias, batch, seq):
    """x0: (B*S, HIDDEN) f32 embedding sums; mask_bias: (B, S) additive f32."""
    return pl.pallas_call(
        functools.partial(_bert_fused_kernel, batch, seq),
        out_shape=jax.ShapeDtypeStruct((batch, NUM_CLASSES), jnp.float32),
        grid=(NUM_LAYERS,),
        in_specs=[
            _const_spec(x0.shape),             # x0 (B*S, H)
            _const_spec(mask_bias.shape),      # mask (B, S)
            _const_spec(p["emb_ln_g"].shape),
            _const_spec(p["emb_ln_b"].shape),
            _layer_spec(p["wqkv"].shape), _layer_spec(p["bqkv"].shape),
            _layer_spec(p["wo"].shape), _layer_spec(p["bo"].shape),
            _layer_spec(p["ln1_g"].shape), _layer_spec(p["ln1_b"].shape),
            _layer_spec(p["wi"].shape), _layer_spec(p["bi"].shape),
            _layer_spec(p["wf"].shape), _layer_spec(p["bf"].shape),
            _layer_spec(p["ln2_g"].shape), _layer_spec(p["ln2_b"].shape),
            _const_spec(p["wp"].shape), _const_spec(p["bp"].shape),
            _const_spec(p["w1"].shape), _const_spec(p["b1"].shape),
            _const_spec(p["w2"].shape), _const_spec(p["b2"].shape),
        ],
        out_specs=pl.BlockSpec((batch, NUM_CLASSES), lambda l: (0, 0)),
        scratch_shapes=[
            pltpu.VMEM((batch * seq, HIDDEN), jnp.float32),   # resident hidden state
            pltpu.VMEM((batch * seq, HIDDEN), jnp.float32),   # attention context
        ],
        compiler_params=pltpu.CompilerParams(
            dimension_semantics=("arbitrary",),               # layers are sequential
            vmem_limit_bytes=24 * 1024 * 1024),
    )(x0, mask_bias, p["emb_ln_g"], p["emb_ln_b"],
      p["wqkv"], p["bqkv"], p["wo"], p["bo"], p["ln1_g"], p["ln1_b"],
      p["wi"], p["bi"], p["wf"], p["bf"], p["ln2_g"], p["ln2_b"],
      p["wp"], p["bp"], p["w1"], p["b1"], p["w2"], p["b2"])


# --------------------------- parameter init ----------------------------------
def init_params(key):
    keys = iter(jax.random.split(key, 16))

    def w_bf16(k, shape):
        return (jax.random.normal(k, shape, jnp.float32) * 0.02).astype(jnp.bfloat16)

    L = NUM_LAYERS
    p = {}
    p["word_emb"] = jax.random.normal(next(keys), (VOCAB, HIDDEN), jnp.float32) * 0.02
    p["pos_emb"] = jax.random.normal(next(keys), (MAX_POS, HIDDEN), jnp.float32) * 0.02
    p["type_emb"] = jax.random.normal(next(keys), (TYPE_VOCAB, HIDDEN), jnp.float32) * 0.02
    p["emb_ln_g"] = jnp.ones((1, HIDDEN), jnp.float32)
    p["emb_ln_b"] = jnp.zeros((1, HIDDEN), jnp.float32)
    # per-layer weights stacked on a leading L axis (enables cross-layer prefetch)
    p["wqkv"] = w_bf16(next(keys), (L, HIDDEN, 3 * HIDDEN))       # fused Q|K|V
    p["bqkv"] = jnp.zeros((L, 1, 3 * HIDDEN), jnp.float32)
    p["wo"] = w_bf16(next(keys), (L, HIDDEN, HIDDEN))
    p["bo"] = jnp.zeros((L, 1, HIDDEN), jnp.float32)
    p["ln1_g"] = jnp.ones((L, 1, HIDDEN), jnp.float32)
    p["ln1_b"] = jnp.zeros((L, 1, HIDDEN), jnp.float32)
    p["wi"] = w_bf16(next(keys), (L, HIDDEN, INTERMEDIATE))
    p["bi"] = jnp.zeros((L, 1, INTERMEDIATE), jnp.float32)
    p["wf"] = w_bf16(next(keys), (L, INTERMEDIATE, HIDDEN))
    p["bf"] = jnp.zeros((L, 1, HIDDEN), jnp.float32)
    p["ln2_g"] = jnp.ones((L, 1, HIDDEN), jnp.float32)
    p["ln2_b"] = jnp.zeros((L, 1, HIDDEN), jnp.float32)
    # pooler + classifier head
    p["wp"] = w_bf16(next(keys), (HIDDEN, HIDDEN))
    p["bp"] = jnp.zeros((1, HIDDEN), jnp.float32)
    p["w1"] = w_bf16(next(keys), (HIDDEN, FC1_DIM))
    p["b1"] = jnp.zeros((1, FC1_DIM), jnp.float32)
    p["w2"] = w_bf16(next(keys), (FC1_DIM, NUM_CLASSES))
    p["b2"] = jnp.zeros((1, NUM_CLASSES), jnp.float32)
    return p


# ------------------------------ forward -------------------------------------
def bert_classifier_forward(params, input_ids, attention_mask):
    B, S = input_ids.shape
    # embedding gather/adds are plain-JAX glue; everything else is one kernel.
    emb = (jnp.take(params["word_emb"], input_ids, axis=0)
           + params["pos_emb"][:S][None, :, :]
           + params["type_emb"][0][None, None, :])
    x0 = emb.reshape(B * S, HIDDEN)
    mask_bias = (1.0 - attention_mask.astype(jnp.float32)) * -1e9   # (B, S) additive
    return bert_fused_pallas(params, x0, mask_bias, B, S)


# ------------------------------ main -----------------------------------------
if __name__ == "__main__":
    key = jax.random.PRNGKey(0)
    pkey, ikey = jax.random.split(key)
    params = init_params(pkey)

    B, S = 2, 8
    input_ids = jax.random.randint(ikey, (B, S), 0, VOCAB, dtype=jnp.int32)
    attention_mask = jnp.array([[1, 1, 1, 1, 1, 1, 1, 1],
                                [1, 1, 1, 1, 1, 0, 0, 0]], dtype=jnp.int32)

    fwd = jax.jit(bert_classifier_forward)
    log_probs = jax.block_until_ready(fwd(params, input_ids, attention_mask))

    assert log_probs.shape == (B, NUM_CLASSES)
    # log_softmax rows must sum (in prob space) to ~1
    assert bool(jnp.all(jnp.abs(jnp.sum(jnp.exp(log_probs), axis=1) - 1.0) < 1e-4))
    print("KERNEL_OK")
</pallas_src>

<mosaic_0001>
module attributes {stable_mosaic.version = 11 : i64} {
  func.func @_bert_fused_kernel(%arg0: i32, %arg1: memref<16x768xf32, #tpu.memory_space<vmem>>, %arg2: memref<2x8xf32, #tpu.memory_space<vmem>>, %arg3: memref<1x768xf32, #tpu.memory_space<vmem>>, %arg4: memref<1x768xf32, #tpu.memory_space<vmem>>, %arg5: memref<1x768x2304xbf16, #tpu.memory_space<vmem>>, %arg6: memref<1x1x2304xf32, #tpu.memory_space<vmem>>, %arg7: memref<1x768x768xbf16, #tpu.memory_space<vmem>>, %arg8: memref<1x1x768xf32, #tpu.memory_space<vmem>>, %arg9: memref<1x1x768xf32, #tpu.memory_space<vmem>>, %arg10: memref<1x1x768xf32, #tpu.memory_space<vmem>>, %arg11: memref<1x768x512xbf16, #tpu.memory_space<vmem>>, %arg12: memref<1x1x512xf32, #tpu.memory_space<vmem>>, %arg13: memref<1x512x768xbf16, #tpu.memory_space<vmem>>, %arg14: memref<1x1x768xf32, #tpu.memory_space<vmem>>, %arg15: memref<1x1x768xf32, #tpu.memory_space<vmem>>, %arg16: memref<1x1x768xf32, #tpu.memory_space<vmem>>, %arg17: memref<768x768xbf16, #tpu.memory_space<vmem>>, %arg18: memref<1x768xf32, #tpu.memory_space<vmem>>, %arg19: memref<768x64xbf16, #tpu.memory_space<vmem>>, %arg20: memref<1x64xf32, #tpu.memory_space<vmem>>, %arg21: memref<64x2xbf16, #tpu.memory_space<vmem>>, %arg22: memref<1x2xf32, #tpu.memory_space<vmem>>, %arg23: memref<2x2xf32, #tpu.memory_space<vmem>>, %arg24: memref<16x768xf32, #tpu.memory_space<vmem>>, %arg25: memref<16x768xf32, #tpu.memory_space<vmem>>) attributes {dimension_semantics = [#tpu.dimension_semantics<arbitrary>], iteration_bounds = array<i64: 2>, scalar_prefetch = 0 : i64, scratch_operands = 2 : i64, tpu.core_type = #tpu.core_type<tc>, window_params = [{pipeline_mode = #tpu.pipeline_mode<synchronous>, transform_indices = @transform_0, window_bounds = array<i64: 16, 768>}, {pipeline_mode = #tpu.pipeline_mode<synchronous>, transform_indices = @transform_1, window_bounds = array<i64: 2, 8>}, {pipeline_mode = #tpu.pipeline_mode<synchronous>, transform_indices = @transform_2, window_bounds = array<i64: 1, 768>}, {pipeline_mode = #tpu.pipeline_mode<synchronous>, transform_indices = @transform_3, window_bounds = array<i64: 1, 768>}, {transform_indices = @transform_4, window_bounds = array<i64: 1, 768, 2304>}, {transform_indices = @transform_5, window_bounds = array<i64: 1, 1, 2304>}, {transform_indices = @transform_6, window_bounds = array<i64: 1, 768, 768>}, {transform_indices = @transform_7, window_bounds = array<i64: 1, 1, 768>}, {transform_indices = @transform_8, window_bounds = array<i64: 1, 1, 768>}, {transform_indices = @transform_9, window_bounds = array<i64: 1, 1, 768>}, {transform_indices = @transform_10, window_bounds = array<i64: 1, 768, 512>}, {transform_indices = @transform_11, window_bounds = array<i64: 1, 1, 512>}, {transform_indices = @transform_12, window_bounds = array<i64: 1, 512, 768>}, {transform_indices = @transform_13, window_bounds = array<i64: 1, 1, 768>}, {transform_indices = @transform_14, window_bounds = array<i64: 1, 1, 768>}, {transform_indices = @transform_15, window_bounds = array<i64: 1, 1, 768>}, {pipeline_mode = #tpu.pipeline_mode<synchronous>, transform_indices = @transform_16, window_bounds = array<i64: 768, 768>}, {pipeline_mode = #tpu.pipeline_mode<synchronous>, transform_indices = @transform_17, window_bounds = array<i64: 1, 768>}, {pipeline_mode = #tpu.pipeline_mode<synchronous>, transform_indices = @transform_18, window_bounds = array<i64: 768, 64>}, {pipeline_mode = #tpu.pipeline_mode<synchronous>, transform_indices = @transform_19, window_bounds = array<i64: 1, 64>}, {pipeline_mode = #tpu.pipeline_mode<synchronous>, transform_indices = @transform_20, window_bounds = array<i64: 64, 2>}, {pipeline_mode = #tpu.pipeline_mode<synchronous>, transform_indices = @transform_21, window_bounds = array<i64: 1, 2>}, {pipeline_mode = #tpu.pipeline_mode<synchronous>, transform_indices = @transform_22, window_bounds = array<i64: 2, 2>}]} {
    %c0_i32 = arith.constant 0 : i32
    %0 = arith.cmpi eq, %arg0, %c0_i32 : i32
    %1 = arith.extui %0 : i1 to i32
    %c0_i32_0 = arith.constant 0 : i32
    %2 = arith.cmpi ne, %1, %c0_i32_0 : i32
    scf.if %2 {
      %c0_141 = arith.constant 0 : index
      %c0_142 = arith.constant 0 : index
      %347 = vector.load %arg1[%c0_141, %c0_142] : memref<16x768xf32, #tpu.memory_space<vmem>>, vector<16x768xf32>
      %c0_143 = arith.constant 0 : index
      %c0_144 = arith.constant 0 : index
      %348 = vector.load %arg3[%c0_143, %c0_144] : memref<1x768xf32, #tpu.memory_space<vmem>>, vector<1x768xf32>
      %c0_145 = arith.constant 0 : index
      %c0_146 = arith.constant 0 : index
      %349 = vector.load %arg4[%c0_145, %c0_146] : memref<1x768xf32, #tpu.memory_space<vmem>>, vector<1x768xf32>
      %cst_147 = arith.constant dense<0.000000e+00> : vector<16xf32>
      %350 = vector.multi_reduction <add>, %347, %cst_147 [1] : vector<16x768xf32> to vector<16xf32>
      %351 = vector.shape_cast %350 : vector<16xf32> to vector<16x1xf32>
      %cst_148 = arith.constant 7.680000e+02 : f32
      %352 = vector.broadcast %cst_148 : f32 to vector<16x1xf32>
      %353 = arith.divf %351, %352 : vector<16x1xf32>
      %354 = vector.broadcast %353 : vector<16x1xf32> to vector<16x768xf32>
      %355 = arith.subf %347, %354 : vector<16x768xf32>
      %356 = vector.broadcast %353 : vector<16x1xf32> to vector<16x768xf32>
      %357 = arith.subf %347, %356 : vector<16x768xf32>
      %358 = arith.mulf %355, %357 : vector<16x768xf32>
      %cst_149 = arith.constant dense<0.000000e+00> : vector<16xf32>
      %359 = vector.multi_reduction <add>, %358, %cst_149 [1] : vector<16x768xf32> to vector<16xf32>
      %360 = vector.shape_cast %359 : vector<16xf32> to vector<16x1xf32>
      %cst_150 = arith.constant 7.680000e+02 : f32
      %361 = vector.broadcast %cst_150 : f32 to vector<16x1xf32>
      %362 = arith.divf %360, %361 : vector<16x1xf32>
      %363 = vector.broadcast %353 : vector<16x1xf32> to vector<16x768xf32>
      %364 = arith.subf %347, %363 : vector<16x768xf32>
      %cst_151 = arith.constant 9.99999996E-13 : f32
      %365 = vector.broadcast %cst_151 : f32 to vector<16x1xf32>
      %366 = arith.addf %362, %365 : vector<16x1xf32>
      %367 = math.rsqrt %366 : vector<16x1xf32>
      %368 = vector.broadcast %367 : vector<16x1xf32> to vector<16x768xf32>
      %369 = arith.mulf %364, %368 : vector<16x768xf32>
      %370 = vector.broadcast %348 : vector<1x768xf32> to vector<16x768xf32>
      %371 = arith.mulf %369, %370 : vector<16x768xf32>
      %372 = vector.broadcast %349 : vector<1x768xf32> to vector<16x768xf32>
      %373 = arith.addf %371, %372 : vector<16x768xf32>
      %c0_152 = arith.constant 0 : index
      %c0_153 = arith.constant 0 : index
      %374 = vector.load %arg24[%c0_152, %c0_153] : memref<16x768xf32, #tpu.memory_space<vmem>>, vector<16x768xf32>
      tpu.vector_store %arg24[%c0_152, %c0_153], %373 {strides = array<i32>} : memref<16x768xf32, #tpu.memory_space<vmem>>, vector<16x768xf32>,
    } else {
    }
    %c0 = arith.constant 0 : index
    %c0_1 = arith.constant 0 : index
    %3 = vector.load %arg24[%c0, %c0_1] : memref<16x768xf32, #tpu.memory_space<vmem>>, vector<16x768xf32>
    %c0_2 = arith.constant 0 : index
    %c0_3 = arith.constant 0 : index
    %c0_4 = arith.constant 0 : index
    %4 = vector.load %arg5[%c0_2, %c0_3, %c0_4] : memref<1x768x2304xbf16, #tpu.memory_space<vmem>>, vector<1x768x2304xbf16>
    %5 = vector.shape_cast %4 : vector<1x768x2304xbf16> to vector<768x2304xbf16>
    %c0_5 = arith.constant 0 : index
    %c0_6 = arith.constant 0 : index
    %c0_7 = arith.constant 0 : index
    %6 = vector.load %arg6[%c0_5, %c0_6, %c0_7] : memref<1x1x2304xf32, #tpu.memory_space<vmem>>, vector<1x1x2304xf32>
    %7 = vector.shape_cast %6 : vector<1x1x2304xf32> to vector<1x2304xf32>
    %8 = arith.truncf %3 : vector<16x768xf32> to vector<16x768xbf16>
    %cst = arith.constant dense<0.000000e+00> : vector<16x2304xf32>
    %9 = tpu.matmul %8, %5, %cst {dimension_numbers = #tpu.dot_dimension_numbers<[1], [0], [0], [1], [0, 0, 1, 1], [], []>} : vector<16x768xbf16>, vector<768x2304xbf16>, vector<16x2304xf32> -> vector<16x2304xf32>
    %10 = vector.broadcast %7 : vector<1x2304xf32> to vector<16x2304xf32>
    %11 = arith.addf %9, %10 : vector<16x2304xf32>
    %12 = arith.truncf %11 : vector<16x2304xf32> to vector<16x2304xbf16>
    %c0_8 = arith.constant 0 : index
    %c0_9 = arith.constant 0 : index
    %13 = vector.load %arg2[%c0_8, %c0_9] : memref<2x8xf32, #tpu.memory_space<vmem>>, vector<1x8xf32>
    %14 = vector.shape_cast %13 : vector<1x8xf32> to vector<1x8xf32>
    %15 = vector.broadcast %14 : vector<1x8xf32> to vector<8x8xf32>
    %16 = vector.extract_strided_slice %12 {offsets = [0, 0], sizes = [8, 128], strides = [1, 1]} : vector<16x2304xbf16> to vector<8x128xbf16>
    %17 = vector.extract_strided_slice %12 {offsets = [0, 768], sizes = [8, 128], strides = [1, 1]} : vector<16x2304xbf16> to vector<8x128xbf16>
    %18 = vector.extract_strided_slice %12 {offsets = [0, 1536], sizes = [8, 128], strides = [1, 1]} : vector<16x2304xbf16> to vector<8x128xbf16>
    %cst_10 = arith.constant dense<0.000000e+00> : vector<8x8xf32>
    %19 = tpu.matmul %16, %17, %cst_10 {dimension_numbers = #tpu.dot_dimension_numbers<[1], [1], [0], [0], [0, 0, 1, 0], [], []>} : vector<8x128xbf16>, vector<8x128xbf16>, vector<8x8xf32> -> vector<8x8xf32>
    %cst_11 = arith.constant 0.0883883461 : f32
    %20 = vector.broadcast %cst_11 : f32 to vector<8x8xf32>
    %21 = arith.mulf %19, %20 : vector<8x8xf32>
    %22 = arith.addf %21, %15 : vector<8x8xf32>
    %cst_12 = arith.constant dense<0xFF800000> : vector<8xf32>
    %23 = vector.multi_reduction <maximumf>, %22, %cst_12 [1] : vector<8x8xf32> to vector<8xf32>
    %24 = vector.shape_cast %23 : vector<8xf32> to vector<8x1xf32>
    %25 = vector.broadcast %24 : vector<8x1xf32> to vector<8x8xf32>
    %26 = arith.subf %22, %25 : vector<8x8xf32>
    %27 = math.exp %26 : vector<8x8xf32>
    %cst_13 = arith.constant dense<0.000000e+00> : vector<8xf32>
    %28 = vector.multi_reduction <add>, %27, %cst_13 [1] : vector<8x8xf32> to vector<8xf32>
    %29 = vector.shape_cast %28 : vector<8xf32> to vector<8x1xf32>
    %30 = vector.broadcast %29 : vector<8x1xf32> to vector<8x8xf32>
    %31 = arith.divf %27, %30 : vector<8x8xf32>
    %32 = arith.truncf %31 : vector<8x8xf32> to vector<8x8xbf16>
    %cst_14 = arith.constant dense<0.000000e+00> : vector<8x128xf32>
    %33 = tpu.matmul %32, %18, %cst_14 {dimension_numbers = #tpu.dot_dimension_numbers<[1], [0], [0], [1], [0, 0, 1, 1], [], []>} : vector<8x8xbf16>, vector<8x128xbf16>, vector<8x128xf32> -> vector<8x128xf32>
    %c0_15 = arith.constant 0 : index
    %c0_16 = arith.constant 0 : index
    %34 = vector.load %arg25[%c0_15, %c0_16] : memref<16x768xf32, #tpu.memory_space<vmem>>, vector<8x128xf32>
    tpu.vector_store %arg25[%c0_15, %c0_16], %33 {strides = array<i32>} : memref<16x768xf32, #tpu.memory_space<vmem>>, vector<8x128xf32>,
    %35 = vector.extract_strided_slice %12 {offsets = [0, 128], sizes = [8, 128], strides = [1, 1]} : vector<16x2304xbf16> to vector<8x128xbf16>
    %36 = vector.extract_strided_slice %12 {offsets = [0, 896], sizes = [8, 128], strides = [1, 1]} : vector<16x2304xbf16> to vector<8x128xbf16>
    %37 = vector.extract_strided_slice %12 {offsets = [0, 1664], sizes = [8, 128], strides = [1, 1]} : vector<16x2304xbf16> to vector<8x128xbf16>
    %cst_17 = arith.constant dense<0.000000e+00> : vector<8x8xf32>
    %38 = tpu.matmul %35, %36, %cst_17 {dimension_numbers = #tpu.dot_dimension_numbers<[1], [1], [0], [0], [0, 0, 1, 0], [], []>} : vector<8x128xbf16>, vector<8x128xbf16>, vector<8x8xf32> -> vector<8x8xf32>
    %cst_18 = arith.constant 0.0883883461 : f32
    %39 = vector.broadcast %cst_18 : f32 to vector<8x8xf32>
    %40 = arith.mulf %38, %39 : vector<8x8xf32>
    %41 = arith.addf %40, %15 : vector<8x8xf32>
    %cst_19 = arith.constant dense<0xFF800000> : vector<8xf32>
    %42 = vector.multi_reduction <maximumf>, %41, %cst_19 [1] : vector<8x8xf32> to vector<8xf32>
    %43 = vector.shape_cast %42 : vector<8xf32> to vector<8x1xf32>
    %44 = vector.broadcast %43 : vector<8x1xf32> to vector<8x8xf32>
    %45 = arith.subf %41, %44 : vector<8x8xf32>
    %46 = math.exp %45 : vector<8x8xf32>
    %cst_20 = arith.constant dense<0.000000e+00> : vector<8xf32>
    %47 = vector.multi_reduction <add>, %46, %cst_20 [1] : vector<8x8xf32> to vector<8xf32>
    %48 = vector.shape_cast %47 : vector<8xf32> to vector<8x1xf32>
    %49 = vector.broadcast %48 : vector<8x1xf32> to vector<8x8xf32>
    %50 = arith.divf %46, %49 : vector<8x8xf32>
    %51 = arith.truncf %50 : vector<8x8xf32> to vector<8x8xbf16>
    %cst_21 = arith.constant dense<0.000000e+00> : vector<8x128xf32>
    %52 = tpu.matmul %51, %37, %cst_21 {dimension_numbers = #tpu.dot_dimension_numbers<[1], [0], [0], [1], [0, 0, 1, 1], [], []>} : vector<8x8xbf16>, vector<8x128xbf16>, vector<8x128xf32> -> vector<8x128xf32>
    %c0_22 = arith.constant 0 : index
    %c128 = arith.constant 128 : index
    %53 = vector.load %arg25[%c0_22, %c128] : memref<16x768xf32, #tpu.memory_space<vmem>>, vector<8x128xf32>
    tpu.vector_store %arg25[%c0_22, %c128], %52 {strides = array<i32>} : memref<16x768xf32, #tpu.memory_space<vmem>>, vector<8x128xf32>,
    %54 = vector.extract_strided_slice %12 {offsets = [0, 256], sizes = [8, 128], strides = [1, 1]} : vector<16x2304xbf16> to vector<8x128xbf16>
    %55 = vector.extract_strided_slice %12 {offsets = [0, 1024], sizes = [8, 128], strides = [1, 1]} : vector<16x2304xbf16> to vector<8x128xbf16>
    %56 = vector.extract_strided_slice %12 {offsets = [0, 1792], sizes = [8, 128], strides = [1, 1]} : vector<16x2304xbf16> to vector<8x128xbf16>
    %cst_23 = arith.constant dense<0.000000e+00> : vector<8x8xf32>
    %57 = tpu.matmul %54, %55, %cst_23 {dimension_numbers = #tpu.dot_dimension_numbers<[1], [1], [0], [0], [0, 0, 1, 0], [], []>} : vector<8x128xbf16>, vector<8x128xbf16>, vector<8x8xf32> -> vector<8x8xf32>
    %cst_24 = arith.constant 0.0883883461 : f32
    %58 = vector.broadcast %cst_24 : f32 to vector<8x8xf32>
    %59 = arith.mulf %57, %58 : vector<8x8xf32>
    %60 = arith.addf %59, %15 : vector<8x8xf32>
    %cst_25 = arith.constant dense<0xFF800000> : vector<8xf32>
    %61 = vector.multi_reduction <maximumf>, %60, %cst_25 [1] : vector<8x8xf32> to vector<8xf32>
    %62 = vector.shape_cast %61 : vector<8xf32> to vector<8x1xf32>
    %63 = vector.broadcast %62 : vector<8x1xf32> to vector<8x8xf32>
    %64 = arith.subf %60, %63 : vector<8x8xf32>
    %65 = math.exp %64 : vector<8x8xf32>
    %cst_26 = arith.constant dense<0.000000e+00> : vector<8xf32>
    %66 = vector.multi_reduction <add>, %65, %cst_26 [1] : vector<8x8xf32> to vector<8xf32>
    %67 = vector.shape_cast %66 : vector<8xf32> to vector<8x1xf32>
    %68 = vector.broadcast %67 : vector<8x1xf32> to vector<8x8xf32>
    %69 = arith.divf %65, %68 : vector<8x8xf32>
    %70 = arith.truncf %69 : vector<8x8xf32> to vector<8x8xbf16>
    %cst_27 = arith.constant dense<0.000000e+00> : vector<8x128xf32>
    %71 = tpu.matmul %70, %56, %cst_27 {dimension_numbers = #tpu.dot_dimension_numbers<[1], [0], [0], [1], [0, 0, 1, 1], [], []>} : vector<8x8xbf16>, vector<8x128xbf16>, vector<8x128xf32> -> vector<8x128xf32>
    %c0_28 = arith.constant 0 : index
    %c256 = arith.constant 256 : index
    %72 = vector.load %arg25[%c0_28, %c256] : memref<16x768xf32, #tpu.memory_space<vmem>>, vector<8x128xf32>
    tpu.vector_store %arg25[%c0_28, %c256], %71 {strides = array<i32>} : memref<16x768xf32, #tpu.memory_space<vmem>>, vector<8x128xf32>,
    %73 = vector.extract_strided_slice %12 {offsets = [0, 384], sizes = [8, 128], strides = [1, 1]} : vector<16x2304xbf16> to vector<8x128xbf16>
    %74 = vector.extract_strided_slice %12 {offsets = [0, 1152], sizes = [8, 128], strides = [1, 1]} : vector<16x2304xbf16> to vector<8x128xbf16>
    %75 = vector.extract_strided_slice %12 {offsets = [0, 1920], sizes = [8, 128], strides = [1, 1]} : vector<16x2304xbf16> to vector<8x128xbf16>
    %cst_29 = arith.constant dense<0.000000e+00> : vector<8x8xf32>
    %76 = tpu.matmul %73, %74, %cst_29 {dimension_numbers = #tpu.dot_dimension_numbers<[1], [1], [0], [0], [0, 0, 1, 0], [], []>} : vector<8x128xbf16>, vector<8x128xbf16>, vector<8x8xf32> -> vector<8x8xf32>
    %cst_30 = arith.constant 0.0883883461 : f32
    %77 = vector.broadcast %cst_30 : f32 to vector<8x8xf32>
    %78 = arith.mulf %76, %77 : vector<8x8xf32>
    %79 = arith.addf %78, %15 : vector<8x8xf32>
    %cst_31 = arith.constant dense<0xFF800000> : vector<8xf32>
    %80 = vector.multi_reduction <maximumf>, %79, %cst_31 [1] : vector<8x8xf32> to vector<8xf32>
    %81 = vector.shape_cast %80 : vector<8xf32> to vector<8x1xf32>
    %82 = vector.broadcast %81 : vector<8x1xf32> to vector<8x8xf32>
    %83 = arith.subf %79, %82 : vector<8x8xf32>
    %84 = math.exp %83 : vector<8x8xf32>
    %cst_32 = arith.constant dense<0.000000e+00> : vector<8xf32>
    %85 = vector.multi_reduction <add>, %84, %cst_32 [1] : vector<8x8xf32> to vector<8xf32>
    %86 = vector.shape_cast %85 : vector<8xf32> to vector<8x1xf32>
    %87 = vector.broadcast %86 : vector<8x1xf32> to vector<8x8xf32>
    %88 = arith.divf %84, %87 : vector<8x8xf32>
    %89 = arith.truncf %88 : vector<8x8xf32> to vector<8x8xbf16>
    %cst_33 = arith.constant dense<0.000000e+00> : vector<8x128xf32>
    %90 = tpu.matmul %89, %75, %cst_33 {dimension_numbers = #tpu.dot_dimension_numbers<[1], [0], [0], [1], [0, 0, 1, 1], [], []>} : vector<8x8xbf16>, vector<8x128xbf16>, vector<8x128xf32> -> vector<8x128xf32>
    %c0_34 = arith.constant 0 : index
    %c384 = arith.constant 384 : index
    %91 = vector.load %arg25[%c0_34, %c384] : memref<16x768xf32, #tpu.memory_space<vmem>>, vector<8x128xf32>
    tpu.vector_store %arg25[%c0_34, %c384], %90 {strides = array<i32>} : memref<16x768xf32, #tpu.memory_space<vmem>>, vector<8x128xf32>,
    %92 = vector.extract_strided_slice %12 {offsets = [0, 512], sizes = [8, 128], strides = [1, 1]} : vector<16x2304xbf16> to vector<8x128xbf16>
    %93 = vector.extract_strided_slice %12 {offsets = [0, 1280], sizes = [8, 128], strides = [1, 1]} : vector<16x2304xbf16> to vector<8x128xbf16>
    %94 = vector.extract_strided_slice %12 {offsets = [0, 2048], sizes = [8, 128], strides = [1, 1]} : vector<16x2304xbf16> to vector<8x128xbf16>
    %cst_35 = arith.constant dense<0.000000e+00> : vector<8x8xf32>
    %95 = tpu.matmul %92, %93, %cst_35 {dimension_numbers = #tpu.dot_dimension_numbers<[1], [1], [0], [0], [0, 0, 1, 0], [], []>} : vector<8x128xbf16>, vector<8x128xbf16>, vector<8x8xf32> -> vector<8x8xf32>
    %cst_36 = arith.constant 0.0883883461 : f32
    %96 = vector.broadcast %cst_36 : f32 to vector<8x8xf32>
    %97 = arith.mulf %95, %96 : vector<8x8xf32>
    %98 = arith.addf %97, %15 : vector<8x8xf32>
    %cst_37 = arith.constant dense<0xFF800000> : vector<8xf32>
    %99 = vector.multi_reduction <maximumf>, %98, %cst_37 [1] : vector<8x8xf32> to vector<8xf32>
    %100 = vector.shape_cast %99 : vector<8xf32> to vector<8x1xf32>
    %101 = vector.broadcast %100 : vector<8x1xf32> to vector<8x8xf32>
    %102 = arith.subf %98, %101 : vector<8x8xf32>
    %103 = math.exp %102 : vector<8x8xf32>
    %cst_38 = arith.constant dense<0.000000e+00> : vector<8xf32>
    %104 = vector.multi_reduction <add>, %103, %cst_38 [1] : vector<8x8xf32> to vector<8xf32>
    %105 = vector.shape_cast %104 : vector<8xf32> to vector<8x1xf32>
    %106 = vector.broadcast %105 : vector<8x1xf32> to vector<8x8xf32>
    %107 = arith.divf %103, %106 : vector<8x8xf32>
    %108 = arith.truncf %107 : vector<8x8xf32> to vector<8x8xbf16>
    %cst_39 = arith.constant dense<0.000000e+00> : vector<8x128xf32>
    %109 = tpu.matmul %108, %94, %cst_39 {dimension_numbers = #tpu.dot_dimension_numbers<[1], [0], [0], [1], [0, 0, 1, 1], [], []>} : vector<8x8xbf16>, vector<8x128xbf16>, vector<8x128xf32> -> vector<8x128xf32>
    %c0_40 = arith.constant 0 : index
    %c512 = arith.constant 512 : index
    %110 = vector.load %arg25[%c0_40, %c512] : memref<16x768xf32, #tpu.memory_space<vmem>>, vector<8x128xf32>
    tpu.vector_store %arg25[%c0_40, %c512], %109 {strides = array<i32>} : memref<16x768xf32, #tpu.memory_space<vmem>>, vector<8x128xf32>,
    %111 = vector.extract_strided_slice %12 {offsets = [0, 640], sizes = [8, 128], strides = [1, 1]} : vector<16x2304xbf16> to vector<8x128xbf16>
    %112 = vector.extract_strided_slice %12 {offsets = [0, 1408], sizes = [8, 128], strides = [1, 1]} : vector<16x2304xbf16> to vector<8x128xbf16>
    %113 = vector.extract_strided_slice %12 {offsets = [0, 2176], sizes = [8, 128], strides = [1, 1]} : vector<16x2304xbf16> to vector<8x128xbf16>
    %cst_41 = arith.constant dense<0.000000e+00> : vector<8x8xf32>
    %114 = tpu.matmul %111, %112, %cst_41 {dimension_numbers = #tpu.dot_dimension_numbers<[1], [1], [0], [0], [0, 0, 1, 0], [], []>} : vector<8x128xbf16>, vector<8x128xbf16>, vector<8x8xf32> -> vector<8x8xf32>
    %cst_42 = arith.constant 0.0883883461 : f32
    %115 = vector.broadcast %cst_42 : f32 to vector<8x8xf32>
    %116 = arith.mulf %114, %115 : vector<8x8xf32>
    %117 = arith.addf %116, %15 : vector<8x8xf32>
    %cst_43 = arith.constant dense<0xFF800000> : vector<8xf32>
    %118 = vector.multi_reduction <maximumf>, %117, %cst_43 [1] : vector<8x8xf32> to vector<8xf32>
    %119 = vector.shape_cast %118 : vector<8xf32> to vector<8x1xf32>
    %120 = vector.broadcast %119 : vector<8x1xf32> to vector<8x8xf32>
    %121 = arith.subf %117, %120 : vector<8x8xf32>
    %122 = math.exp %121 : vector<8x8xf32>
    %cst_44 = arith.constant dense<0.000000e+00> : vector<8xf32>
    %123 = vector.multi_reduction <add>, %122, %cst_44 [1] : vector<8x8xf32> to vector<8xf32>
    %124 = vector.shape_cast %123 : vector<8xf32> to vector<8x1xf32>
    %125 = vector.broadcast %124 : vector<8x1xf32> to vector<8x8xf32>
    %126 = arith.divf %122, %125 : vector<8x8xf32>
    %127 = arith.truncf %126 : vector<8x8xf32> to vector<8x8xbf16>
    %cst_45 = arith.constant dense<0.000000e+00> : vector<8x128xf32>
    %128 = tpu.matmul %127, %113, %cst_45 {dimension_numbers = #tpu.dot_dimension_numbers<[1], [0], [0], [1], [0, 0, 1, 1], [], []>} : vector<8x8xbf16>, vector<8x128xbf16>, vector<8x128xf32> -> vector<8x128xf32>
    %c0_46 = arith.constant 0 : index
    %c640 = arith.constant 640 : index
    %129 = vector.load %arg25[%c0_46, %c640] : memref<16x768xf32, #tpu.memory_space<vmem>>, vector<8x128xf32>
    tpu.vector_store %arg25[%c0_46, %c640], %128 {strides = array<i32>} : memref<16x768xf32, #tpu.memory_space<vmem>>, vector<8x128xf32>,
    %c1 = arith.constant 1 : index
    %c0_47 = arith.constant 0 : index
    %130 = vector.load %arg2[%c1, %c0_47] : memref<2x8xf32, #tpu.memory_space<vmem>>, vector<1x8xf32>
    %131 = vector.shape_cast %130 : vector<1x8xf32> to vector<1x8xf32>
    %132 = vector.broadcast %131 : vector<1x8xf32> to vector<8x8xf32>
    %133 = vector.extract_strided_slice %12 {offsets = [8, 0], sizes = [8, 128], strides = [1, 1]} : vector<16x2304xbf16> to vector<8x128xbf16>
    %134 = vector.extract_strided_slice %12 {offsets = [8, 768], sizes = [8, 128], strides = [1, 1]} : vector<16x2304xbf16> to vector<8x128xbf16>
    %135 = vector.extract_strided_slice %12 {offsets = [8, 1536], sizes = [8, 128], strides = [1, 1]} : vector<16x2304xbf16> to vector<8x128xbf16>
    %cst_48 = arith.constant dense<0.000000e+00> : vector<8x8xf32>
    %136 = tpu.matmul %133, %134, %cst_48 {dimension_numbers = #tpu.dot_dimension_numbers<[1], [1], [0], [0], [0, 0, 1, 0], [], []>} : vector<8x128xbf16>, vector<8x128xbf16>, vector<8x8xf32> -> vector<8x8xf32>
    %cst_49 = arith.constant 0.0883883461 : f32
    %137 = vector.broadcast %cst_49 : f32 to vector<8x8xf32>
    %138 = arith.mulf %136, %137 : vector<8x8xf32>
    %139 = arith.addf %138, %132 : vector<8x8xf32>
    %cst_50 = arith.constant dense<0xFF800000> : vector<8xf32>
    %140 = vector.multi_reduction <maximumf>, %139, %cst_50 [1] : vector<8x8xf32> to vector<8xf32>
    %141 = vector.shape_cast %140 : vector<8xf32> to vector<8x1xf32>
    %142 = vector.broadcast %141 : vector<8x1xf32> to vector<8x8xf32>
    %143 = arith.subf %139, %142 : vector<8x8xf32>
    %144 = math.exp %143 : vector<8x8xf32>
    %cst_51 = arith.constant dense<0.000000e+00> : vector<8xf32>
    %145 = vector.multi_reduction <add>, %144, %cst_51 [1] : vector<8x8xf32> to vector<8xf32>
    %146 = vector.shape_cast %145 : vector<8xf32> to vector<8x1xf32>
    %147 = vector.broadcast %146 : vector<8x1xf32> to vector<8x8xf32>
    %148 = arith.divf %144, %147 : vector<8x8xf32>
    %149 = arith.truncf %148 : vector<8x8xf32> to vector<8x8xbf16>
    %cst_52 = arith.constant dense<0.000000e+00> : vector<8x128xf32>
    %150 = tpu.matmul %149, %135, %cst_52 {dimension_numbers = #tpu.dot_dimension_numbers<[1], [0], [0], [1], [0, 0, 1, 1], [], []>} : vector<8x8xbf16>, vector<8x128xbf16>, vector<8x128xf32> -> vector<8x128xf32>
    %c8 = arith.constant 8 : index
    %c0_53 = arith.constant 0 : index
    %151 = vector.load %arg25[%c8, %c0_53] : memref<16x768xf32, #tpu.memory_space<vmem>>, vector<8x128xf32>
    tpu.vector_store %arg25[%c8, %c0_53], %150 {strides = array<i32>} : memref<16x768xf32, #tpu.memory_space<vmem>>, vector<8x128xf32>,
    %152 = vector.extract_strided_slice %12 {offsets = [8, 128], sizes = [8, 128], strides = [1, 1]} : vector<16x2304xbf16> to vector<8x128xbf16>
    %153 = vector.extract_strided_slice %12 {offsets = [8, 896], sizes = [8, 128], strides = [1, 1]} : vector<16x2304xbf16> to vector<8x128xbf16>
    %154 = vector.extract_strided_slice %12 {offsets = [8, 1664], sizes = [8, 128], strides = [1, 1]} : vector<16x2304xbf16> to vector<8x128xbf16>
    %cst_54 = arith.constant dense<0.000000e+00> : vector<8x8xf32>
    %155 = tpu.matmul %152, %153, %cst_54 {dimension_numbers = #tpu.dot_dimension_numbers<[1], [1], [0], [0], [0, 0, 1, 0], [], []>} : vector<8x128xbf16>, vector<8x128xbf16>, vector<8x8xf32> -> vector<8x8xf32>
    %cst_55 = arith.constant 0.0883883461 : f32
    %156 = vector.broadcast %cst_55 : f32 to vector<8x8xf32>
    %157 = arith.mulf %155, %156 : vector<8x8xf32>
    %158 = arith.addf %157, %132 : vector<8x8xf32>
    %cst_56 = arith.constant dense<0xFF800000> : vector<8xf32>
    %159 = vector.multi_reduction <maximumf>, %158, %cst_56 [1] : vector<8x8xf32> to vector<8xf32>
    %160 = vector.shape_cast %159 : vector<8xf32> to vector<8x1xf32>
    %161 = vector.broadcast %160 : vector<8x1xf32> to vector<8x8xf32>
    %162 = arith.subf %158, %161 : vector<8x8xf32>
    %163 = math.exp %162 : vector<8x8xf32>
    %cst_57 = arith.constant dense<0.000000e+00> : vector<8xf32>
    %164 = vector.multi_reduction <add>, %163, %cst_57 [1] : vector<8x8xf32> to vector<8xf32>
    %165 = vector.shape_cast %164 : vector<8xf32> to vector<8x1xf32>
    %166 = vector.broadcast %165 : vector<8x1xf32> to vector<8x8xf32>
    %167 = arith.divf %163, %166 : vector<8x8xf32>
    %168 = arith.truncf %167 : vector<8x8xf32> to vector<8x8xbf16>
    %cst_58 = arith.constant dense<0.000000e+00> : vector<8x128xf32>
    %169 = tpu.matmul %168, %154, %cst_58 {dimension_numbers = #tpu.dot_dimension_numbers<[1], [0], [0], [1], [0, 0, 1, 1], [], []>} : vector<8x8xbf16>, vector<8x128xbf16>, vector<8x128xf32> -> vector<8x128xf32>
    %c8_59 = arith.constant 8 : index
    %c128_60 = arith.constant 128 : index
    %170 = vector.load %arg25[%c8_59, %c128_60] : memref<16x768xf32, #tpu.memory_space<vmem>>, vector<8x128xf32>
    tpu.vector_store %arg25[%c8_59, %c128_60], %169 {strides = array<i32>} : memref<16x768xf32, #tpu.memory_space<vmem>>, vector<8x128xf32>,
    %171 = vector.extract_strided_slice %12 {offsets = [8, 256], sizes = [8, 128], strides = [1, 1]} : vector<16x2304xbf16> to vector<8x128xbf16>
    %172 = vector.extract_strided_slice %12 {offsets = [8, 1024], sizes = [8, 128], strides = [1, 1]} : vector<16x2304xbf16> to vector<8x128xbf16>
    %173 = vector.extract_strided_slice %12 {offsets = [8, 1792], sizes = [8, 128], strides = [1, 1]} : vector<16x2304xbf16> to vector<8x128xbf16>
    %cst_61 = arith.constant dense<0.000000e+00> : vector<8x8xf32>
    %174 = tpu.matmul %171, %172, %cst_61 {dimension_numbers = #tpu.dot_dimension_numbers<[1], [1], [0], [0], [0, 0, 1, 0], [], []>} : vector<8x128xbf16>, vector<8x128xbf16>, vector<8x8xf32> -> vector<8x8xf32>
    %cst_62 = arith.constant 0.0883883461 : f32
    %175 = vector.broadcast %cst_62 : f32 to vector<8x8xf32>
    %176 = arith.mulf %174, %175 : vector<8x8xf32>
    %177 = arith.addf %176, %132 : vector<8x8xf32>
    %cst_63 = arith.constant dense<0xFF800000> : vector<8xf32>
    %178 = vector.multi_reduction <maximumf>, %177, %cst_63 [1] : vector<8x8xf32> to vector<8xf32>
    %179 = vector.shape_cast %178 : vector<8xf32> to vector<8x1xf32>
    %180 = vector.broadcast %179 : vector<8x1xf32> to vector<8x8xf32>
    %181 = arith.subf %177, %180 : vector<8x8xf32>
    %182 = math.exp %181 : vector<8x8xf32>
    %cst_64 = arith.constant dense<0.000000e+00> : vector<8xf32>
    %183 = vector.multi_reduction <add>, %182, %cst_64 [1] : vector<8x8xf32> to vector<8xf32>
    %184 = vector.shape_cast %183 : vector<8xf32> to vector<8x1xf32>
    %185 = vector.broadcast %184 : vector<8x1xf32> to vector<8x8xf32>
    %186 = arith.divf %182, %185 : vector<8x8xf32>
    %187 = arith.truncf %186 : vector<8x8xf32> to vector<8x8xbf16>
    %cst_65 = arith.constant dense<0.000000e+00> : vector<8x128xf32>
    %188 = tpu.matmul %187, %173, %cst_65 {dimension_numbers = #tpu.dot_dimension_numbers<[1], [0], [0], [1], [0, 0, 1, 1], [], []>} : vector<8x8xbf16>, vector<8x128xbf16>, vector<8x128xf32> -> vector<8x128xf32>
    %c8_66 = arith.constant 8 : index
    %c256_67 = arith.constant 256 : index
    %189 = vector.load %arg25[%c8_66, %c256_67] : memref<16x768xf32, #tpu.memory_space<vmem>>, vector<8x128xf32>
    tpu.vector_store %arg25[%c8_66, %c256_67], %188 {strides = array<i32>} : memref<16x768xf32, #tpu.memory_space<vmem>>, vector<8x128xf32>,
    %190 = vector.extract_strided_slice %12 {offsets = [8, 384], sizes = [8, 128], strides = [1, 1]} : vector<16x2304xbf16> to vector<8x128xbf16>
    %191 = vector.extract_strided_slice %12 {offsets = [8, 1152], sizes = [8, 128], strides = [1, 1]} : vector<16x2304xbf16> to vector<8x128xbf16>
    %192 = vector.extract_strided_slice %12 {offsets = [8, 1920], sizes = [8, 128], strides = [1, 1]} : vector<16x2304xbf16> to vector<8x128xbf16>
    %cst_68 = arith.constant dense<0.000000e+00> : vector<8x8xf32>
    %193 = tpu.matmul %190, %191, %cst_68 {dimension_numbers = #tpu.dot_dimension_numbers<[1], [1], [0], [0], [0, 0, 1, 0], [], []>} : vector<8x128xbf16>, vector<8x128xbf16>, vector<8x8xf32> -> vector<8x8xf32>
    %cst_69 = arith.constant 0.0883883461 : f32
    %194 = vector.broadcast %cst_69 : f32 to vector<8x8xf32>
    %195 = arith.mulf %193, %194 : vector<8x8xf32>
    %196 = arith.addf %195, %132 : vector<8x8xf32>
    %cst_70 = arith.constant dense<0xFF800000> : vector<8xf32>
    %197 = vector.multi_reduction <maximumf>, %196, %cst_70 [1] : vector<8x8xf32> to vector<8xf32>
    %198 = vector.shape_cast %197 : vector<8xf32> to vector<8x1xf32>
    %199 = vector.broadcast %198 : vector<8x1xf32> to vector<8x8xf32>
    %200 = arith.subf %196, %199 : vector<8x8xf32>
    %201 = math.exp %200 : vector<8x8xf32>
    %cst_71 = arith.constant dense<0.000000e+00> : vector<8xf32>
    %202 = vector.multi_reduction <add>, %201, %cst_71 [1] : vector<8x8xf32> to vector<8xf32>
    %203 = vector.shape_cast %202 : vector<8xf32> to vector<8x1xf32>
    %204 = vector.broadcast %203 : vector<8x1xf32> to vector<8x8xf32>
    %205 = arith.divf %201, %204 : vector<8x8xf32>
    %206 = arith.truncf %205 : vector<8x8xf32> to vector<8x8xbf16>
    %cst_72 = arith.constant dense<0.000000e+00> : vector<8x128xf32>
    %207 = tpu.matmul %206, %192, %cst_72 {dimension_numbers = #tpu.dot_dimension_numbers<[1], [0], [0], [1], [0, 0, 1, 1], [], []>} : vector<8x8xbf16>, vector<8x128xbf16>, vector<8x128xf32> -> vector<8x128xf32>
    %c8_73 = arith.constant 8 : index
    %c384_74 = arith.constant 384 : index
    %208 = vector.load %arg25[%c8_73, %c384_74] : memref<16x768xf32, #tpu.memory_space<vmem>>, vector<8x128xf32>
    tpu.vector_store %arg25[%c8_73, %c384_74], %207 {strides = array<i32>} : memref<16x768xf32, #tpu.memory_space<vmem>>, vector<8x128xf32>,
    %209 = vector.extract_strided_slice %12 {offsets = [8, 512], sizes = [8, 128], strides = [1, 1]} : vector<16x2304xbf16> to vector<8x128xbf16>
    %210 = vector.extract_strided_slice %12 {offsets = [8, 1280], sizes = [8, 128], strides = [1, 1]} : vector<16x2304xbf16> to vector<8x128xbf16>
    %211 = vector.extract_strided_slice %12 {offsets = [8, 2048], sizes = [8, 128], strides = [1, 1]} : vector<16x2304xbf16> to vector<8x128xbf16>
    %cst_75 = arith.constant dense<0.000000e+00> : vector<8x8xf32>
    %212 = tpu.matmul %209, %210, %cst_75 {dimension_numbers = #tpu.dot_dimension_numbers<[1], [1], [0], [0], [0, 0, 1, 0], [], []>} : vector<8x128xbf16>, vector<8x128xbf16>, vector<8x8xf32> -> vector<8x8xf32>
    %cst_76 = arith.constant 0.0883883461 : f32
    %213 = vector.broadcast %cst_76 : f32 to vector<8x8xf32>
    %214 = arith.mulf %212, %213 : vector<8x8xf32>
    %215 = arith.addf %214, %132 : vector<8x8xf32>
    %cst_77 = arith.constant dense<0xFF800000> : vector<8xf32>
    %216 = vector.multi_reduction <maximumf>, %215, %cst_77 [1] : vector<8x8xf32> to vector<8xf32>
    %217 = vector.shape_cast %216 : vector<8xf32> to vector<8x1xf32>
    %218 = vector.broadcast %217 : vector<8x1xf32> to vector<8x8xf32>
    %219 = arith.subf %215, %218 : vector<8x8xf32>
    %220 = math.exp %219 : vector<8x8xf32>
    %cst_78 = arith.constant dense<0.000000e+00> : vector<8xf32>
    %221 = vector.multi_reduction <add>, %220, %cst_78 [1] : vector<8x8xf32> to vector<8xf32>
    %222 = vector.shape_cast %221 : vector<8xf32> to vector<8x1xf32>
    %223 = vector.broadcast %222 : vector<8x1xf32> to vector<8x8xf32>
    %224 = arith.divf %220, %223 : vector<8x8xf32>
    %225 = arith.truncf %224 : vector<8x8xf32> to vector<8x8xbf16>
    %cst_79 = arith.constant dense<0.000000e+00> : vector<8x128xf32>
    %226 = tpu.matmul %225, %211, %cst_79 {dimension_numbers = #tpu.dot_dimension_numbers<[1], [0], [0], [1], [0, 0, 1, 1], [], []>} : vector<8x8xbf16>, vector<8x128xbf16>, vector<8x128xf32> -> vector<8x128xf32>
    %c8_80 = arith.constant 8 : index
    %c512_81 = arith.constant 512 : index
    %227 = vector.load %arg25[%c8_80, %c512_81] : memref<16x768xf32, #tpu.memory_space<vmem>>, vector<8x128xf32>
    tpu.vector_store %arg25[%c8_80, %c512_81], %226 {strides = array<i32>} : memref<16x768xf32, #tpu.memory_space<vmem>>, vector<8x128xf32>,
    %228 = vector.extract_strided_slice %12 {offsets = [8, 640], sizes = [8, 128], strides = [1, 1]} : vector<16x2304xbf16> to vector<8x128xbf16>
    %229 = vector.extract_strided_slice %12 {offsets = [8, 1408], sizes = [8, 128], strides = [1, 1]} : vector<16x2304xbf16> to vector<8x128xbf16>
    %230 = vector.extract_strided_slice %12 {offsets = [8, 2176], sizes = [8, 128], strides = [1, 1]} : vector<16x2304xbf16> to vector<8x128xbf16>
    %cst_82 = arith.constant dense<0.000000e+00> : vector<8x8xf32>
    %231 = tpu.matmul %228, %229, %cst_82 {dimension_numbers = #tpu.dot_dimension_numbers<[1], [1], [0], [0], [0, 0, 1, 0], [], []>} : vector<8x128xbf16>, vector<8x128xbf16>, vector<8x8xf32> -> vector<8x8xf32>
    %cst_83 = arith.constant 0.0883883461 : f32
    %232 = vector.broadcast %cst_83 : f32 to vector<8x8xf32>
    %233 = arith.mulf %231, %232 : vector<8x8xf32>
    %234 = arith.addf %233, %132 : vector<8x8xf32>
    %cst_84 = arith.constant dense<0xFF800000> : vector<8xf32>
    %235 = vector.multi_reduction <maximumf>, %234, %cst_84 [1] : vector<8x8xf32> to vector<8xf32>
    %236 = vector.shape_cast %235 : vector<8xf32> to vector<8x1xf32>
    %237 = vector.broadcast %236 : vector<8x1xf32> to vector<8x8xf32>
    %238 = arith.subf %234, %237 : vector<8x8xf32>
    %239 = math.exp %238 : vector<8x8xf32>
    %cst_85 = arith.constant dense<0.000000e+00> : vector<8xf32>
    %240 = vector.multi_reduction <add>, %239, %cst_85 [1] : vector<8x8xf32> to vector<8xf32>
    %241 = vector.shape_cast %240 : vector<8xf32> to vector<8x1xf32>
    %242 = vector.broadcast %241 : vector<8x1xf32> to vector<8x8xf32>
    %243 = arith.divf %239, %242 : vector<8x8xf32>
    %244 = arith.truncf %243 : vector<8x8xf32> to vector<8x8xbf16>
    %cst_86 = arith.constant dense<0.000000e+00> : vector<8x128xf32>
    %245 = tpu.matmul %244, %230, %cst_86 {dimension_numbers = #tpu.dot_dimension_numbers<[1], [0], [0], [1], [0, 0, 1, 1], [], []>} : vector<8x8xbf16>, vector<8x128xbf16>, vector<8x128xf32> -> vector<8x128xf32>
    %c8_87 = arith.constant 8 : index
    %c640_88 = arith.constant 640 : index
    %246 = vector.load %arg25[%c8_87, %c640_88] : memref<16x768xf32, #tpu.memory_space<vmem>>, vector<8x128xf32>
    tpu.vector_store %arg25[%c8_87, %c640_88], %245 {strides = array<i32>} : memref<16x768xf32, #tpu.memory_space<vmem>>, vector<8x128xf32>,
    %c0_89 = arith.constant 0 : index
    %c0_90 = arith.constant 0 : index
    %247 = vector.load %arg25[%c0_89, %c0_90] : memref<16x768xf32, #tpu.memory_space<vmem>>, vector<16x768xf32>
    %c0_91 = arith.constant 0 : index
    %c0_92 = arith.constant 0 : index
    %c0_93 = arith.constant 0 : index
    %248 = vector.load %arg7[%c0_91, %c0_92, %c0_93] : memref<1x768x768xbf16, #tpu.memory_space<vmem>>, vector<1x768x768xbf16>
    %249 = vector.shape_cast %248 : vector<1x768x768xbf16> to vector<768x768xbf16>
    %c0_94 = arith.constant 0 : index
    %c0_95 = arith.constant 0 : index
    %c0_96 = arith.constant 0 : index
    %250 = vector.load %arg8[%c0_94, %c0_95, %c0_96] : memref<1x1x768xf32, #tpu.memory_space<vmem>>, vector<1x1x768xf32>
    %251 = vector.shape_cast %250 : vector<1x1x768xf32> to vector<1x768xf32>
    %252 = arith.truncf %247 : vector<16x768xf32> to vector<16x768xbf16>
    %cst_97 = arith.constant dense<0.000000e+00> : vector<16x768xf32>
    %253 = tpu.matmul %252, %249, %cst_97 {dimension_numbers = #tpu.dot_dimension_numbers<[1], [0], [0], [1], [0, 0, 1, 1], [], []>} : vector<16x768xbf16>, vector<768x768xbf16>, vector<16x768xf32> -> vector<16x768xf32>
    %254 = vector.broadcast %251 : vector<1x768xf32> to vector<16x768xf32>
    %255 = arith.addf %253, %254 : vector<16x768xf32>
    %256 = arith.addf %3, %255 : vector<16x768xf32>
    %c0_98 = arith.constant 0 : index
    %c0_99 = arith.constant 0 : index
    %c0_100 = arith.constant 0 : index
    %257 = vector.load %arg9[%c0_98, %c0_99, %c0_100] : memref<1x1x768xf32, #tpu.memory_space<vmem>>, vector<1x1x768xf32>
    %258 = vector.shape_cast %257 : vector<1x1x768xf32> to vector<1x768xf32>
    %c0_101 = arith.constant 0 : index
    %c0_102 = arith.constant 0 : index
    %c0_103 = arith.constant 0 : index
    %259 = vector.load %arg10[%c0_101, %c0_102, %c0_103] : memref<1x1x768xf32, #tpu.memory_space<vmem>>, vector<1x1x768xf32>
    %260 = vector.shape_cast %259 : vector<1x1x768xf32> to vector<1x768xf32>
    %cst_104 = arith.constant dense<0.000000e+00> : vector<16xf32>
    %261 = vector.multi_reduction <add>, %256, %cst_104 [1] : vector<16x768xf32> to vector<16xf32>
    %262 = vector.shape_cast %261 : vector<16xf32> to vector<16x1xf32>
    %cst_105 = arith.constant 7.680000e+02 : f32
    %263 = vector.broadcast %cst_105 : f32 to vector<16x1xf32>
    %264 = arith.divf %262, %263 : vector<16x1xf32>
    %265 = vector.broadcast %264 : vector<16x1xf32> to vector<16x768xf32>
    %266 = arith.subf %256, %265 : vector<16x768xf32>
    %267 = vector.broadcast %264 : vector<16x1xf32> to vector<16x768xf32>
    %268 = arith.subf %256, %267 : vector<16x768xf32>
    %269 = arith.mulf %266, %268 : vector<16x768xf32>
    %cst_106 = arith.constant dense<0.000000e+00> : vector<16xf32>
    %270 = vector.multi_reduction <add>, %269, %cst_106 [1] : vector<16x768xf32> to vector<16xf32>
    %271 = vector.shape_cast %270 : vector<16xf32> to vector<16x1xf32>
    %cst_107 = arith.constant 7.680000e+02 : f32
    %272 = vector.broadcast %cst_107 : f32 to vector<16x1xf32>
    %273 = arith.divf %271, %272 : vector<16x1xf32>
    %274 = vector.broadcast %264 : vector<16x1xf32> to vector<16x768xf32>
    %275 = arith.subf %256, %274 : vector<16x768xf32>
    %cst_108 = arith.constant 9.99999996E-13 : f32
    %276 = vector.broadcast %cst_108 : f32 to vector<16x1xf32>
    %277 = arith.addf %273, %276 : vector<16x1xf32>
    %278 = math.rsqrt %277 : vector<16x1xf32>
    %279 = vector.broadcast %278 : vector<16x1xf32> to vector<16x768xf32>
    %280 = arith.mulf %275, %279 : vector<16x768xf32>
    %281 = vector.broadcast %258 : vector<1x768xf32> to vector<16x768xf32>
    %282 = arith.mulf %280, %281 : vector<16x768xf32>
    %283 = vector.broadcast %260 : vector<1x768xf32> to vector<16x768xf32>
    %284 = arith.addf %282, %283 : vector<16x768xf32>
    %c0_109 = arith.constant 0 : index
    %c0_110 = arith.constant 0 : index
    %c0_111 = arith.constant 0 : index
    %285 = vector.load %arg11[%c0_109, %c0_110, %c0_111] : memref<1x768x512xbf16, #tpu.memory_space<vmem>>, vector<1x768x512xbf16>
    %286 = vector.shape_cast %285 : vector<1x768x512xbf16> to vector<768x512xbf16>
    %c0_112 = arith.constant 0 : index
    %c0_113 = arith.constant 0 : index
    %c0_114 = arith.constant 0 : index
    %287 = vector.load %arg12[%c0_112, %c0_113, %c0_114] : memref<1x1x512xf32, #tpu.memory_space<vmem>>, vector<1x1x512xf32>
    %288 = vector.shape_cast %287 : vector<1x1x512xf32> to vector<1x512xf32>
    %289 = arith.truncf %284 : vector<16x768xf32> to vector<16x768xbf16>
    %cst_115 = arith.constant dense<0.000000e+00> : vector<16x512xf32>
    %290 = tpu.matmul %289, %286, %cst_115 {dimension_numbers = #tpu.dot_dimension_numbers<[1], [0], [0], [1], [0, 0, 1, 1], [], []>} : vector<16x768xbf16>, vector<768x512xbf16>, vector<16x512xf32> -> vector<16x512xf32>
    %291 = vector.broadcast %288 : vector<1x512xf32> to vector<16x512xf32>
    %292 = arith.addf %290, %291 : vector<16x512xf32>
    %cst_116 = arith.constant 5.000000e-01 : f32
    %293 = vector.broadcast %cst_116 : f32 to vector<16x512xf32>
    %294 = arith.mulf %293, %292 : vector<16x512xf32>
    %cst_117 = arith.constant 4.471500e-02 : f32
    %295 = vector.broadcast %cst_117 : f32 to vector<16x512xf32>
    %296 = arith.mulf %295, %292 : vector<16x512xf32>
    %297 = arith.mulf %296, %292 : vector<16x512xf32>
    %298 = arith.mulf %297, %292 : vector<16x512xf32>
    %299 = arith.addf %292, %298 : vector<16x512xf32>
    %cst_118 = arith.constant 0.797884583 : f32
    %300 = vector.broadcast %cst_118 : f32 to vector<16x512xf32>
    %301 = arith.mulf %300, %299 : vector<16x512xf32>
    %302 = math.tanh %301 : vector<16x512xf32>
    %cst_119 = arith.constant 1.000000e+00 : f32
    %303 = vector.broadcast %cst_119 : f32 to vector<16x512xf32>
    %304 = arith.addf %303, %302 : vector<16x512xf32>
    %305 = arith.mulf %294, %304 : vector<16x512xf32>
    %c0_120 = arith.constant 0 : index
    %c0_121 = arith.constant 0 : index
    %c0_122 = arith.constant 0 : index
    %306 = vector.load %arg13[%c0_120, %c0_121, %c0_122] : memref<1x512x768xbf16, #tpu.memory_space<vmem>>, vector<1x512x768xbf16>
    %307 = vector.shape_cast %306 : vector<1x512x768xbf16> to vector<512x768xbf16>
    %c0_123 = arith.constant 0 : index
    %c0_124 = arith.constant 0 : index
    %c0_125 = arith.constant 0 : index
    %308 = vector.load %arg14[%c0_123, %c0_124, %c0_125] : memref<1x1x768xf32, #tpu.memory_space<vmem>>, vector<1x1x768xf32>
    %309 = vector.shape_cast %308 : vector<1x1x768xf32> to vector<1x768xf32>
    %310 = arith.truncf %305 : vector<16x512xf32> to vector<16x512xbf16>
    %cst_126 = arith.constant dense<0.000000e+00> : vector<16x768xf32>
    %311 = tpu.matmul %310, %307, %cst_126 {dimension_numbers = #tpu.dot_dimension_numbers<[1], [0], [0], [1], [0, 0, 1, 1], [], []>} : vector<16x512xbf16>, vector<512x768xbf16>, vector<16x768xf32> -> vector<16x768xf32>
    %312 = vector.broadcast %309 : vector<1x768xf32> to vector<16x768xf32>
    %313 = arith.addf %311, %312 : vector<16x768xf32>
    %314 = arith.addf %284, %313 : vector<16x768xf32>
    %c0_127 = arith.constant 0 : index
    %c0_128 = arith.constant 0 : index
    %c0_129 = arith.constant 0 : index
    %315 = vector.load %arg15[%c0_127, %c0_128, %c0_129] : memref<1x1x768xf32, #tpu.memory_space<vmem>>, vector<1x1x768xf32>
    %316 = vector.shape_cast %315 : vector<1x1x768xf32> to vector<1x768xf32>
    %c0_130 = arith.constant 0 : index
    %c0_131 = arith.constant 0 : index
    %c0_132 = arith.constant 0 : index
    %317 = vector.load %arg16[%c0_130, %c0_131, %c0_132] : memref<1x1x768xf32, #tpu.memory_space<vmem>>, vector<1x1x768xf32>
    %318 = vector.shape_cast %317 : vector<1x1x768xf32> to vector<1x768xf32>
    %cst_133 = arith.constant dense<0.000000e+00> : vector<16xf32>
    %319 = vector.multi_reduction <add>, %314, %cst_133 [1] : vector<16x768xf32> to vector<16xf32>
    %320 = vector.shape_cast %319 : vector<16xf32> to vector<16x1xf32>
    %cst_134 = arith.constant 7.680000e+02 : f32
    %321 = vector.broadcast %cst_134 : f32 to vector<16x1xf32>
    %322 = arith.divf %320, %321 : vector<16x1xf32>
    %323 = vector.broadcast %322 : vector<16x1xf32> to vector<16x768xf32>
    %324 = arith.subf %314, %323 : vector<16x768xf32>
    %325 = vector.broadcast %322 : vector<16x1xf32> to vector<16x768xf32>
    %326 = arith.subf %314, %325 : vector<16x768xf32>
    %327 = arith.mulf %324, %326 : vector<16x768xf32>
    %cst_135 = arith.constant dense<0.000000e+00> : vector<16xf32>
    %328 = vector.multi_reduction <add>, %327, %cst_135 [1] : vector<16x768xf32> to vector<16xf32>
    %329 = vector.shape_cast %328 : vector<16xf32> to vector<16x1xf32>
    %cst_136 = arith.constant 7.680000e+02 : f32
    %330 = vector.broadcast %cst_136 : f32 to vector<16x1xf32>
    %331 = arith.divf %329, %330 : vector<16x1xf32>
    %332 = vector.broadcast %322 : vector<16x1xf32> to vector<16x768xf32>
    %333 = arith.subf %314, %332 : vector<16x768xf32>
    %cst_137 = arith.constant 9.99999996E-13 : f32
    %334 = vector.broadcast %cst_137 : f32 to vector<16x1xf32>
    %335 = arith.addf %331, %334 : vector<16x1xf32>
    %336 = math.rsqrt %335 : vector<16x1xf32>
    %337 = vector.broadcast %336 : vector<16x1xf32> to vector<16x768xf32>
    %338 = arith.mulf %333, %337 : vector<16x768xf32>
    %339 = vector.broadcast %316 : vector<1x768xf32> to vector<16x768xf32>
    %340 = arith.mulf %338, %339 : vector<16x768xf32>
    %341 = vector.broadcast %318 : vector<1x768xf32> to vector<16x768xf32>
    %342 = arith.addf %340, %341 : vector<16x768xf32>
    %c0_138 = arith.constant 0 : index
    %c0_139 = arith.constant 0 : index
    %343 = vector.load %arg24[%c0_138, %c0_139] : memref<16x768xf32, #tpu.memory_space<vmem>>, vector<16x768xf32>
    tpu.vector_store %arg24[%c0_138, %c0_139], %342 {strides = array<i32>} : memref<16x768xf32, #tpu.memory_space<vmem>>, vector<16x768xf32>,
    %c1_i32 = arith.constant 1 : i32
    %344 = arith.cmpi eq, %arg0, %c1_i32 : i32
    %345 = arith.extui %344 : i1 to i32
    %c0_i32_140 = arith.constant 0 : i32
    %346 = arith.cmpi ne, %345, %c0_i32_140 : i32
    scf.if %346 {
      %347 = vector.extract_strided_slice %342 {offsets = [0, 0], sizes = [1, 768], strides = [1, 1]} : vector<16x768xf32> to vector<1x768xf32>
      %348 = vector.extract_strided_slice %342 {offsets = [8, 0], sizes = [1, 768], strides = [1, 1]} : vector<16x768xf32> to vector<1x768xf32>
      %349 = tpu.concatenate %347, %348 in 0 : vector<1x768xf32>, vector<1x768xf32> -> vector<2x768xf32>
      %c0_141 = arith.constant 0 : index
      %c0_142 = arith.constant 0 : index
      %350 = vector.load %arg17[%c0_141, %c0_142] : memref<768x768xbf16, #tpu.memory_space<vmem>>, vector<768x768xbf16>
      %c0_143 = arith.constant 0 : index
      %c0_144 = arith.constant 0 : index
      %351 = vector.load %arg18[%c0_143, %c0_144] : memref<1x768xf32, #tpu.memory_space<vmem>>, vector<1x768xf32>
      %352 = arith.truncf %349 : vector<2x768xf32> to vector<2x768xbf16>
      %cst_145 = arith.constant dense<0.000000e+00> : vector<2x768xf32>
      %353 = tpu.matmul %352, %350, %cst_145 {dimension_numbers = #tpu.dot_dimension_numbers<[1], [0], [0], [1], [0, 0, 1, 1], [], []>} : vector<2x768xbf16>, vector<768x768xbf16>, vector<2x768xf32> -> vector<2x768xf32>
      %354 = vector.broadcast %351 : vector<1x768xf32> to vector<2x768xf32>
      %355 = arith.addf %353, %354 : vector<2x768xf32>
      %356 = math.tanh %355 : vector<2x768xf32>
      %c0_146 = arith.constant 0 : index
      %c0_147 = arith.constant 0 : index
      %357 = vector.load %arg19[%c0_146, %c0_147] : memref<768x64xbf16, #tpu.memory_space<vmem>>, vector<768x64xbf16>
      %c0_148 = arith.constant 0 : index
      %c0_149 = arith.constant 0 : index
      %358 = vector.load %arg20[%c0_148, %c0_149] : memref<1x64xf32, #tpu.memory_space<vmem>>, vector<1x64xf32>
      %359 = arith.truncf %356 : vector<2x768xf32> to vector<2x768xbf16>
      %cst_150 = arith.constant dense<0.000000e+00> : vector<2x64xf32>
      %360 = tpu.matmul %359, %357, %cst_150 {dimension_numbers = #tpu.dot_dimension_numbers<[1], [0], [0], [1], [0, 0, 1, 1], [], []>} : vector<2x768xbf16>, vector<768x64xbf16>, vector<2x64xf32> -> vector<2x64xf32>
      %361 = vector.broadcast %358 : vector<1x64xf32> to vector<2x64xf32>
      %362 = arith.addf %360, %361 : vector<2x64xf32>
      %cst_151 = arith.constant 0.000000e+00 : f32
      %363 = vector.broadcast %cst_151 : f32 to vector<2x64xf32>
      %364 = arith.maximumf %362, %363 : vector<2x64xf32>
      %c0_152 = arith.constant 0 : index
      %c0_153 = arith.constant 0 : index
      %365 = vector.load %arg21[%c0_152, %c0_153] : memref<64x2xbf16, #tpu.memory_space<vmem>>, vector<64x2xbf16>
      %c0_154 = arith.constant 0 : index
      %c0_155 = arith.constant 0 : index
      %366 = vector.load %arg22[%c0_154, %c0_155] : memref<1x2xf32, #tpu.memory_space<vmem>>, vector<1x2xf32>
      %367 = arith.truncf %364 : vector<2x64xf32> to vector<2x64xbf16>
      %cst_156 = arith.constant dense<0.000000e+00> : vector<2x2xf32>
      %368 = tpu.matmul %367, %365, %cst_156 {dimension_numbers = #tpu.dot_dimension_numbers<[1], [0], [0], [1], [0, 0, 1, 1], [], []>} : vector<2x64xbf16>, vector<64x2xbf16>, vector<2x2xf32> -> vector<2x2xf32>
      %369 = vector.broadcast %366 : vector<1x2xf32> to vector<2x2xf32>
      %370 = arith.addf %368, %369 : vector<2x2xf32>
      %cst_157 = arith.constant dense<0xFF800000> : vector<2xf32>
      %371 = vector.multi_reduction <maximumf>, %370, %cst_157 [1] : vector<2x2xf32> to vector<2xf32>
      %372 = vector.shape_cast %371 : vector<2xf32> to vector<2x1xf32>
      %373 = vector.broadcast %372 : vector<2x1xf32> to vector<2x2xf32>
      %374 = arith.subf %370, %373 : vector<2x2xf32>
      %375 = math.exp %374 : vector<2x2xf32>
      %cst_158 = arith.constant dense<0.000000e+00> : vector<2xf32>
      %376 = vector.multi_reduction <add>, %375, %cst_158 [1] : vector<2x2xf32> to vector<2xf32>
      %377 = vector.shape_cast %376 : vector<2xf32> to vector<2x1xf32>
      %378 = math.log %377 : vector<2x1xf32>
      %379 = arith.addf %378, %372 : vector<2x1xf32>
      %380 = vector.broadcast %379 : vector<2x1xf32> to vector<2x2xf32>
      %381 = arith.subf %370, %380 : vector<2x2xf32>
      %c0_159 = arith.constant 0 : index
      %c0_160 = arith.constant 0 : index
      %382 = vector.load %arg23[%c0_159, %c0_160] : memref<2x2xf32, #tpu.memory_space<vmem>>, vector<2x2xf32>
      tpu.vector_store %arg23[%c0_159, %c0_160], %381 {strides = array<i32>} : memref<2x2xf32, #tpu.memory_space<vmem>>, vector<2x2xf32>,
    } else {
    }
    return
  }
  func.func @transform_0(%arg0: i32) -> (i32, i32) {
    %c0_i32 = arith.constant 0 : i32
    %c0_i32_0 = arith.constant 0 : i32
    %c0_i32_1 = arith.constant 0 : i32
    return %c0_i32, %c0_i32_0 : i32, i32
  }
  func.func @transform_1(%arg0: i32) -> (i32, i32) {
    %c0_i32 = arith.constant 0 : i32
    %c0_i32_0 = arith.constant 0 : i32
    %c0_i32_1 = arith.constant 0 : i32
    return %c0_i32, %c0_i32_0 : i32, i32
  }
  func.func @transform_2(%arg0: i32) -> (i32, i32) {
    %c0_i32 = arith.constant 0 : i32
    %c0_i32_0 = arith.constant 0 : i32
    %c0_i32_1 = arith.constant 0 : i32
    return %c0_i32, %c0_i32_0 : i32, i32
  }
  func.func @transform_3(%arg0: i32) -> (i32, i32) {
    %c0_i32 = arith.constant 0 : i32
    %c0_i32_0 = arith.constant 0 : i32
    %c0_i32_1 = arith.constant 0 : i32
    return %c0_i32, %c0_i32_0 : i32, i32
  }
  func.func @transform_4(%arg0: i32) -> (i32, i32, i32) {
    %c0_i32 = arith.constant 0 : i32
    %c0_i32_0 = arith.constant 0 : i32
    %c0_i32_1 = arith.constant 0 : i32
    return %arg0, %c0_i32, %c0_i32_0 : i32, i32, i32
  }
  func.func @transform_5(%arg0: i32) -> (i32, i32, i32) {
    %c0_i32 = arith.constant 0 : i32
    %c0_i32_0 = arith.constant 0 : i32
    %c0_i32_1 = arith.constant 0 : i32
    return %arg0, %c0_i32, %c0_i32_0 : i32, i32, i32
  }
  func.func @transform_6(%arg0: i32) -> (i32, i32, i32) {
    %c0_i32 = arith.constant 0 : i32
    %c0_i32_0 = arith.constant 0 : i32
    %c0_i32_1 = arith.constant 0 : i32
    return %arg0, %c0_i32, %c0_i32_0 : i32, i32, i32
  }
  func.func @transform_7(%arg0: i32) -> (i32, i32, i32) {
    %c0_i32 = arith.constant 0 : i32
    %c0_i32_0 = arith.constant 0 : i32
    %c0_i32_1 = arith.constant 0 : i32
    return %arg0, %c0_i32, %c0_i32_0 : i32, i32, i32
  }
  func.func @transform_8(%arg0: i32) -> (i32, i32, i32) {
    %c0_i32 = arith.constant 0 : i32
    %c0_i32_0 = arith.constant 0 : i32
    %c0_i32_1 = arith.constant 0 : i32
    return %arg0, %c0_i32, %c0_i32_0 : i32, i32, i32
  }
  func.func @transform_9(%arg0: i32) -> (i32, i32, i32) {
    %c0_i32 = arith.constant 0 : i32
    %c0_i32_0 = arith.constant 0 : i32
    %c0_i32_1 = arith.constant 0 : i32
    return %arg0, %c0_i32, %c0_i32_0 : i32, i32, i32
  }
  func.func @transform_10(%arg0: i32) -> (i32, i32, i32) {
    %c0_i32 = arith.constant 0 : i32
    %c0_i32_0 = arith.constant 0 : i32
    %c0_i32_1 = arith.constant 0 : i32
    return %arg0, %c0_i32, %c0_i32_0 : i32, i32, i32
  }
  func.func @transform_11(%arg0: i32) -> (i32, i32, i32) {
    %c0_i32 = arith.constant 0 : i32
    %c0_i32_0 = arith.constant 0 : i32
    %c0_i32_1 = arith.constant 0 : i32
    return %arg0, %c0_i32, %c0_i32_0 : i32, i32, i32
  }
  func.func @transform_12(%arg0: i32) -> (i32, i32, i32) {
    %c0_i32 = arith.constant 0 : i32
    %c0_i32_0 = arith.constant 0 : i32
    %c0_i32_1 = arith.constant 0 : i32
    return %arg0, %c0_i32, %c0_i32_0 : i32, i32, i32
  }
  func.func @transform_13(%arg0: i32) -> (i32, i32, i32) {
    %c0_i32 = arith.constant 0 : i32
    %c0_i32_0 = arith.constant 0 : i32
    %c0_i32_1 = arith.constant 0 : i32
    return %arg0, %c0_i32, %c0_i32_0 : i32, i32, i32
  }
  func.func @transform_14(%arg0: i32) -> (i32, i32, i32) {
    %c0_i32 = arith.constant 0 : i32
    %c0_i32_0 = arith.constant 0 : i32
    %c0_i32_1 = arith.constant 0 : i32
    return %arg0, %c0_i32, %c0_i32_0 : i32, i32, i32
  }
  func.func @transform_15(%arg0: i32) -> (i32, i32, i32) {
    %c0_i32 = arith.constant 0 : i32
    %c0_i32_0 = arith.constant 0 : i32
    %c0_i32_1 = arith.constant 0 : i32
    return %arg0, %c0_i32, %c0_i32_0 : i32, i32, i32
  }
  func.func @transform_16(%arg0: i32) -> (i32, i32) {
    %c0_i32 = arith.constant 0 : i32
    %c0_i32_0 = arith.constant 0 : i32
    %c0_i32_1 = arith.constant 0 : i32
    return %c0_i32, %c0_i32_0 : i32, i32
  }
  func.func @transform_17(%arg0: i32) -> (i32, i32) {
    %c0_i32 = arith.constant 0 : i32
    %c0_i32_0 = arith.constant 0 : i32
    %c0_i32_1 = arith.constant 0 : i32
    return %c0_i32, %c0_i32_0 : i32, i32
  }
  func.func @transform_18(%arg0: i32) -> (i32, i32) {
    %c0_i32 = arith.constant 0 : i32
    %c0_i32_0 = arith.constant 0 : i32
    %c0_i32_1 = arith.constant 0 : i32
    return %c0_i32, %c0_i32_0 : i32, i32
  }
  func.func @transform_19(%arg0: i32) -> (i32, i32) {
    %c0_i32 = arith.constant 0 : i32
    %c0_i32_0 = arith.constant 0 : i32
    %c0_i32_1 = arith.constant 0 : i32
    return %c0_i32, %c0_i32_0 : i32, i32
  }
  func.func @transform_20(%arg0: i32) -> (i32, i32) {
    %c0_i32 = arith.constant 0 : i32
    %c0_i32_0 = arith.constant 0 : i32
    %c0_i32_1 = arith.constant 0 : i32
    return %c0_i32, %c0_i32_0 : i32, i32
  }
  func.func @transform_21(%arg0: i32) -> (i32, i32) {
    %c0_i32 = arith.constant 0 : i32
    %c0_i32_0 = arith.constant 0 : i32
    %c0_i32_1 = arith.constant 0 : i32
    return %c0_i32, %c0_i32_0 : i32, i32
  }
  func.func @transform_22(%arg0: i32) -> (i32, i32) {
    %c0_i32 = arith.constant 0 : i32
    %c0_i32_0 = arith.constant 0 : i32
    %c0_i32_1 = arith.constant 0 : i32
    return %c0_i32, %c0_i32_0 : i32, i32
  }
}

</mosaic_0001>

<bundles_post_ra>
// kernel: bert_classifier_forward.1
= control target key start
LH: loop header
LB: loop body
LE: loop exit
PB: predicated region body
PF: predicated region fallthrough
CT: control target
= control target key end

     0   :  { %s27197_s0 = inlined_call_operand.vmem [shape: f32[16,768], index: 0, kind: input, shape index: {}]   ;;  %s27198_s1 = inlined_call_operand.vmem [shape: f32[2,8], index: 1, kind: input, shape index: {}]   ;;  %s27199_s2 = inlined_call_operand.hbm [shape: f32[1,768], index: 2, kind: input, shape index: {}]   ;;  %s27200_s3 = inlined_call_operand.hbm [shape: f32[1,768], index: 3, kind: input, shape index: {}]   ;;  %s27201_s4 = inlined_call_operand.hbm [shape: bf16[2,768,2304], index: 4, kind: input, shape index: {}]   ;;  %s27202_s5 = inlined_call_operand.hbm [shape: f32[2,1,2304], index: 5, kind: input, shape index: {}]   ;;  %s27203_s6 = inlined_call_operand.hbm [shape: bf16[2,768,768], index: 6, kind: input, shape index: {}]   ;;  %s27204_s7 = inlined_call_operand.hbm [shape: f32[2,1,768], index: 7, kind: input, shape index: {}]   ;;  %s27205_s8 = inlined_call_operand.hbm [shape: f32[2,1,768], index: 8, kind: input, shape index: {}]   ;;  %s27206_s9 = inlined_call_operand.hbm [shape: f32[2,1,768], index: 9, kind: input, shape index: {}]   ;;  %s27207_s10 = inlined_call_operand.hbm [shape: bf16[2,768,512], index: 10, kind: input, shape index: {}]   ;;  %s27208_s11 = inlined_call_operand.hbm [shape: f32[2,1,512], index: 11, kind: input, shape index: {}]   ;;  %s27209_s12 = inlined_call_operand.hbm [shape: bf16[2,512,768], index: 12, kind: input, shape index: {}]   ;;  %s27210_s13 = inlined_call_operand.hbm [shape: f32[2,1,768], index: 13, kind: input, shape index: {}]   ;;  %s27211_s14 = inlined_call_operand.hbm [shape: f32[2,1,768], index: 14, kind: input, shape index: {}]   ;;  %s27212_s15 = inlined_call_operand.hbm [shape: f32[2,1,768], index: 15, kind: input, shape index: {}]   ;;  %s27213_s16 = inlined_call_operand.hbm [shape: bf16[768,768], index: 16, kind: input, shape index: {}]   ;;  %s27214_s17 = inlined_call_operand.hbm [shape: f32[1,768], index: 17, kind: input, shape index: {}]   ;;  %s27215_s18 = inlined_call_operand.vmem [shape: bf16[768,64], index: 18, kind: input, shape index: {}]   ;;  %s27216_s19 = inlined_call_operand.hbm [shape: f32[1,64], index: 19, kind: input, shape index: {}]   ;;  %s27217_s20 = inlined_call_operand.vmem [shape: bf16[64,2], index: 20, kind: input, shape index: {}]   ;;  %s27218_s21 = inlined_call_operand.hbm [shape: f32[1,2], index: 21, kind: input, shape index: {}]   ;;  %s27219_s22 = inlined_call_operand.hbm [shape: f32[2,2], index: 22, kind: output, shape index: {}]  }
   0x1   :  { %27269 = sst [smem:[#allocation42_spill]] %s27197_s0 }
   0x2   :  { %27270 = sst [smem:[#allocation43_spill]] %s27198_s1 }
   0x3   :  { %27271 = sst [smem:[#allocation44_spill]] %s27199_s2 }
   0x4   :  { %27272 = sst [smem:[#allocation45_spill]] %s27200_s3 }
   0x5   :  { %27273 = sst [smem:[#allocation46_spill]] %s27201_s4 }
   0x6   :  { %27274 = sst [smem:[#allocation47_spill]] %s27202_s5 }
   0x7   :  { %27275 = sst [smem:[#allocation48_spill]] %s27203_s6 }
   0x8   :  { %27276 = sst [smem:[#allocation49_spill]] %s27204_s7 }
   0x9   :  { %27277 = sst [smem:[#allocation50_spill]] %s27205_s8 }
   0xa   :  { %27278 = sst [smem:[#allocation51_spill]] %s27206_s9 }
   0xb   :  { %27279 = sst [smem:[#allocation52_spill]] %s27212_s15 }
   0xc   :  { %27280 = sst [smem:[#allocation53_spill]] %s27213_s16 }
   0xd   :  { %27281 = sst [smem:[#allocation54_spill]] %s27215_s18 }
   0xe   :  { %27282 = sst [smem:[#allocation55_spill]] %s27216_s19 }
   0xf   :  { %27283 = sst [smem:[#allocation56_spill]] %s27217_s20 }
  0x10   :  { %27284 = sst [smem:[#allocation57_spill]] %s27218_s21 }
  0x11   :  { %27285 = sst [smem:[#allocation58_spill]] %s27219_s22 }
  0x12   :  { %27 = vsyncpa [#allocation5], 0 }
  0x13   :  { %28 = vsyncpa [#allocation8], 0 }
  0x14   :  { %29 = vsyncpa [#allocation23], 0 }
  0x15   :  { %30 = vsyncpa [#allocation26], 0 }
  0x16   :  { %31 = vsyncpa [#allocation6], 0  ;;  %s23970_s3 = smov 0   ;;  %s23972_s28 = smov 0  }
  0x17   :  { %s23974_s29 = smov 0   ;;  %s23976_s30 = smov 0  }
  0x18 LB: > { %27286 = sst [smem:[#allocation35_spill]] %s23816_s28  ;;  %s23989_s4 = sadd.s32 4294967295, %s23824_s30   ;;  %s23824_s30 = sphi %s23976_s30, %s27360_s30   ;;  %s23820_s29 = sphi %s23974_s29, %s27363_s29   ;;  %s23816_s28 = sphi %s23972_s28, %s27362_s28   ;;  %s23812_s3 = sphi %s23970_s3, %s27361_s3  }
  0x19   : > { %27287 = sst [smem:[#allocation36_spill]] %s23820_s29  ;;  %p141_p0 = scmp.ne.s32.totalorder %s23816_s28, %s23812_s3 }
  0x1a   : > { %27288 = sst [smem:[#allocation37_spill]] %s23989_s4  ;;  %p27234_p1 = scmp.eq.s32.totalorder %s23989_s4, 0 }
  0x1b   : > { %p17695_p2 = scmp.ge.s32.totalorder %s23824_s30, 1  ;;  %p585_p3 = scmp.lt.s32.totalorder %s23824_s30, 3 }
  0x1c   : > { %p23998_p5 = por %p27234_p1, %p141_p0  ;;  %s23826_s1 = smov [#allocation4]  }
  0x1d   : > { %p24002_p6 = pnand %p17695_p2, %p585_p3  ;;  %s604_s5 = sshll.u32 %s23826_s1, 4  ;;  %s605_s5 = int_to_ptr.vmem [resolvable:$true] %s604_s5 }
  0x1e   : > { %s27289_s0 = scalar_select %p23998_p5, 1, 0 }
  0x1f   : > { %s27291_s23 = scalar_select %p24002_p6, 1, 0 }
  0x20   : > { %27290 = sst [smem:[#allocation38_spill]] %s27289_s0  ;;  %p20199_p7 = pneg %p24002_p6 }
  0x21   : > { %27292 = sst [smem:[#allocation39_spill]] %s27291_s23  ;;  %s24009_s24 = sadd.s32 1, %s23824_s30  }
  0x22   : > { %27293 = sst [smem:[#allocation40_spill]] %s24009_s24  ;;  %p24013_p8 = pnand %p20199_p7, %p27234_p1 }
  0x23   : > { %s125_s25 = ssub.s32 %s23824_s30, %s24009_s24  ;;  %s128_s2 = sadd.s32 1, %s23820_s29 }
  0x24   : > { %s27294_s6 = scalar_select %p24013_p8, 1, 0 }
  0x25   : > { %p24019_p9 = scmp.eq.s32.totalorder %s125_s25, 0  ;;  %s27296_s1 = sld [smem:[#allocation44_spill]] }
  0x26   : > { %p24034_p12 = pneg %p24013_p8 }
  0x27   : > { %s27295_s26 = scalar_select %p24019_p9, 1, 0 }
  0x28   : > { %s27297_s0 = scalar_select %p24034_p12, 1, 0 }
  0x2b   : > { %s23212_s22 = scalar_lea.hbm %s27296_s1, 96 }
  0x2c   : > { %p23213_p11 = scmp.ne.s32.totalorder %s27296_s1, %s23212_s22  ;;  %p23219_p2 = scmp.lt.u32.totalorder %s23212_s22, %s27296_s1 }
  0x2e   : > { %p23215_p13 = pnand %p24034_p12, %p23213_p11 }
  0x30   : > { %p23216_p0 = pneg %p23215_p13 }
  0x32   : > { %p23221_p3 = pnand %p23219_p2, %p23216_p0 }
  0x34   : > { %23224 = shalt.err (!%p23221_p3)
}
  0x35   : > { %s23225_s27 = scalar_lea.vmem %s605_s5, 96  ;;  %p23233_p10 = scmp.lt.s32.totalorder %s605_s5, %s605_s5 }
  0x36   : > { %p23226_p7 = scmp.ne.s32.totalorder %s605_s5, %s23225_s27  ;;  %p23234_p5 = scmp.lt.s32.totalorder %s23225_s27, %s23225_s27 }
  0x38   : > { %p23228_p4 = pnand %p23226_p7, %p24034_p12  ;;  %p23235_p6 = por %p23234_p5, %p23233_p10 }
  0x3a   : > { %p23229_p1 = pneg %p23228_p4 }
  0x3c   : > { %p23236_p9 = pnand %p23235_p6, %p23229_p1 }
  0x3e   : > { %23239 = shalt.err (!%p23236_p9)
}
  0x3f   : > { %20202 = dma.hbm_to_vmem [thread:$0]  (!%p24013_p8), %s27296_s1, 96, %s605_s5, [#allocation5]  }
  0x40   : > { %p27298_p4 = scmp.ne.s32.totalorder %s27295_s26, 0  ;;  %p136_p1 = scmp.eq.s32.totalorder %s23824_s30, 0 }
  0x41   : > { %p20261_p5 = scmp.lt.s32.totalorder %s23824_s30, 2  ;;  %s678_s24 = sand.u32 1, %s23824_s30  }
  0x42   : > { %s24053_s22 = scalar_select %p27298_p4, %s23820_s29, %s128_s2  }
  0x43   : > { %s24059_s3 = sand.u32 1, %s23820_s29   ;;  %p27300_p6 = scmp.ne.s32.totalorder %s23820_s29, %s23816_s28 }
  0x44   : > { %27299 = sst [smem:[#allocation41_spill]] %s24053_s22  ;;  %s20120_s25 = smul.u32 6912, %s24059_s3 }
  0x45   : > { %p137_p9 = por %p136_p1, %p27300_p6  ;;  %s20121_s27 = smul.u32 110592, %s23824_s30 }
  0x46   : > { %s27302_s5 = sld [smem:[#allocation46_spill]]  ;;  %s682_s2 = scalar_lea.vmem [#allocation9], %s20120_s25 }
  0x47   : > { %p24066_p10 = pnand %p20261_p5, %p137_p9  ;;  %s689_s1 = sshll.u32 %s682_s2, 4  ;;  %s24075_s1 = int_to_ptr.vmem [resolvable:$true] %s689_s1 }
  0x48   : > { %s24077_s22 = scalar_lea.sflag [#allocation5], %s678_s24 }
  0x49   : > { %s27301_s18 = scalar_select %p24066_p10, 1, 0 }
  0x4a   : > { %p24083_p13 = pneg %p24066_p10 }
  0x4c   : > { %s24073_s26 = scalar_lea.hbm %s27302_s5, %s20121_s27  ;;  %s23245_s25 = scalar_lea.hbm %s27302_s5, 221184 }
  0x4d   : > { %s23240_s29 = scalar_lea.hbm %s24073_s26, 110592  ;;  %p23246_p3 = scmp.lt.u32.totalorder %s24073_s26, %s27302_s5 }
  0x4e   : > { %p23241_p11 = scmp.ne.s32.totalorder %s24073_s26, %s23240_s29  ;;  %p23247_p7 = scmp.lt.u32.totalorder %s23245_s25, %s23240_s29 }
  0x4f   : > { %s27303_s28 = scalar_select %p24083_p13, 1, 0 }
  0x50   : > { %p23243_p0 = pnand %p24083_p13, %p23241_p11  ;;  %p23248_p4 = por %p23247_p7, %p23246_p3 }
  0x51   : > { %p23249_p1 = scmp.lt.u32.totalorder %s23240_s29, %s24073_s26 }
  0x52   : > { %p23244_p2 = pneg %p23243_p0 }
  0x53   : > { %p23250_p5 = por %p23249_p1, %p23248_p4 }
  0x55   : > { %p23251_p6 = pnand %p23250_p5, %p23244_p2 }
  0x57   : > { %23254 = shalt.err (!%p23251_p6)
}
  0x58   : > { %s23255_s24 = scalar_lea.vmem %s24075_s1, 110592  ;;  %s23827_s4 = smov [#allocation9]  }
  0x59   : > { %p23256_p9 = scmp.ne.s32.totalorder %s24075_s1, %s23255_s24  ;;  %s23260_s27 = sshll.u32 %s23827_s4, 4  ;;  %s23261_s27 = int_to_ptr.vmem [resolvable:$false] %s23260_s27 }
  0x5a   : > { %s23262_s20 = scalar_lea.vmem %s23261_s27, 221184  ;;  %p23263_p8 = scmp.lt.s32.totalorder %s24075_s1, %s23261_s27 }
  0x5b   : > { %p23258_p11 = pnand %p23256_p9, %p24083_p13  ;;  %p23264_p12 = scmp.lt.s32.totalorder %s23262_s20, %s23255_s24 }
  0x5d   : > { %p23259_p0 = pneg %p23258_p11  ;;  %p23265_p3 = por %p23264_p12, %p23263_p8 }
  0x5f   : > { %p23266_p7 = pnand %p23265_p3, %p23259_p0 }
  0x61   : > { %23269 = shalt.err (!%p23266_p7)
}
  0x62   : > { %s23828_s29 = smov 1152   ;;  %s23829_s25 = smov 72  }
  0x63   : > { %20221 = dma.hbm_to_vmem [thread:$0]  (!%p24066_p10), %s24073_s26, 110592, %s24075_s1, %s24077_s22, %s23828_s29, %s23828_s29, %s23829_s25  }
  0x64   : > { %s20122_s2 = smul.u32 18, %s24059_s3  ;;  %s27304_s20 = sld [smem:[#allocation47_spill]] }
  0x65   : > { %s20123_s4 = smul.u32 288, %s23824_s30 }
  0x66   : > { %s20124_s5 = smul.u32 2304, %s24059_s3  ;;  %s703_s15 = scalar_lea.vmem [#allocation10], %s20122_s2 }
  0x67   : > { %s711_s21 = sshll.u32 %s703_s15, 4  ;;  %s712_s21 = int_to_ptr.vmem [resolvable:$true] %s711_s21 }
  0x6a   : > { %s24113_s23 = scalar_lea.hbm %s27304_s20, %s20123_s4  ;;  %s23275_s29 = scalar_lea.hbm %s27304_s20, 576 }
  0x6b   : > { %s23270_s19 = scalar_lea.hbm %s24113_s23, 288  ;;  %p23276_p4 = scmp.lt.u32.totalorder %s24113_s23, %s27304_s20 }
  0x6c   : > { %p23271_p8 = scmp.ne.s32.totalorder %s24113_s23, %s23270_s19  ;;  %p23277_p1 = scmp.lt.u32.totalorder %s23275_s29, %s23270_s19 }
  0x6d   : > { %p23279_p6 = scmp.lt.u32.totalorder %s23270_s19, %s24113_s23 }
  0x6e   : > { %p23273_p12 = pnand %p23271_p8, %p24083_p13  ;;  %p23278_p5 = por %p23277_p1, %p23276_p4 }
  0x70   : > { %p23274_p2 = pneg %p23273_p12  ;;  %p23280_p9 = por %p23279_p6, %p23278_p5 }
  0x72   : > { %p23281_p11 = pnand %p23280_p9, %p23274_p2 }
  0x74   : > { %23284 = shalt.err (!%p23281_p11)
}
  0x75   : > { %s23285_s15 = scalar_lea.vmem %s712_s21, 288  ;;  %s23830_s2 = smov [#allocation10]  }
  0x76   : > { %p23286_p0 = scmp.ne.s32.totalorder %s712_s21, %s23285_s15  ;;  %s23290_s4 = sshll.u32 %s23830_s2, 4  ;;  %s23291_s4 = int_to_ptr.vmem [resolvable:$false] %s23290_s4 }
  0x77   : > { %s23292_s24 = scalar_lea.vmem %s23291_s4, 576  ;;  %p23293_p8 = scmp.lt.s32.totalorder %s712_s21, %s23291_s4 }
  0x78   : > { %p23288_p3 = pnand %p23286_p0, %p24083_p13  ;;  %p23294_p12 = scmp.lt.s32.totalorder %s23292_s24, %s23285_s15 }
  0x7a   : > { %p23289_p7 = pneg %p23288_p3  ;;  %p23295_p10 = por %p23294_p12, %p23293_p8 }
  0x7c   : > { %p23296_p1 = pnand %p23295_p10, %p23289_p7 }
  0x7e   : > { %23299 = shalt.err (!%p23296_p1)
}
  0x7f   : > { %p27305_p4 = scmp.ne.s32.totalorder %s27301_s18, 0  ;;  %s20125_s19 = smul.u32 36864, %s23824_s30 }
  0x80   : > { %s722_s1 = scalar_lea.vmem [#allocation11], %s20124_s5  ;;  %s24139_s29 = smul.u32 6, %s24059_s3 }
  0x81   : > { %20224 = dma.hbm_to_vmem [thread:$0]  (!%p27305_p4), %s24113_s23, 288, %s712_s21, %s24077_s22  }
  0x82   : > { %s729_s26 = sshll.u32 %s722_s1, 4  ;;  %s27306_s15 = sld [smem:[#allocation48_spill]]  ;;  %s24136_s26 = int_to_ptr.vmem [resolvable:$true] %s729_s26 }
  0x83   : > { %s24147_s4 = smul.u32 96, %s23824_s30 }
  0x88   : > { %s24144_s2 = scalar_lea.hbm %s27306_s15, %s20125_s19  ;;  %s23305_s24 = scalar_lea.hbm %s27306_s15, 73728 }
  0x89   : > { %s23300_s21 = scalar_lea.hbm %s24144_s2, 36864  ;;  %p23306_p6 = scmp.lt.u32.totalorder %s24144_s2, %s27306_s15 }
  0x8a   : > { %p23301_p10 = scmp.ne.s32.totalorder %s24144_s2, %s23300_s21  ;;  %p23307_p9 = scmp.lt.u32.totalorder %s23305_s24, %s23300_s21 }
  0x8b   : > { %p23309_p0 = scmp.lt.u32.totalorder %s23300_s21, %s24144_s2 }
  0x8c   : > { %p23303_p2 = pnand %p23301_p10, %p24083_p13  ;;  %p23308_p11 = por %p23307_p9, %p23306_p6 }
  0x8e   : > { %p23304_p5 = pneg %p23303_p2  ;;  %p23310_p3 = por %p23309_p0, %p23308_p11 }
  0x90   : > { %p23311_p7 = pnand %p23310_p3, %p23304_p5 }
  0x92   : > { %23314 = shalt.err (!%p23311_p7)
}
  0x93   : > { %s23315_s19 = scalar_lea.vmem %s24136_s26, 36864  ;;  %s23831_s25 = smov [#allocation11]  }
  0x94   : > { %p23316_p8 = scmp.ne.s32.totalorder %s24136_s26, %s23315_s19  ;;  %s23320_s27 = sshll.u32 %s23831_s25, 4  ;;  %s23321_s27 = int_to_ptr.vmem [resolvable:$false] %s23320_s27 }
  0x95   : > { %s23322_s20 = scalar_lea.vmem %s23321_s27, 73728  ;;  %p23323_p10 = scmp.lt.s32.totalorder %s24136_s26, %s23321_s27 }
  0x96   : > { %p23318_p12 = pnand %p23316_p8, %p24083_p13  ;;  %p23324_p2 = scmp.lt.s32.totalorder %s23322_s20, %s23315_s19 }
  0x98   : > { %p23319_p1 = pneg %p23318_p12  ;;  %p23325_p6 = por %p23324_p2, %p23323_p10 }
  0x9a   : > { %p23326_p9 = pnand %p23325_p6, %p23319_p1 }
  0x9c   : > { %23329 = shalt.err (!%p23326_p9)
}
  0x9d   : > { %s27257_s21 = smov 384   ;;  %s27260_s23 = smov 24  }
  0x9e   : > { %20227 = dma.hbm_to_vmem [thread:$0]  (!%p27305_p4), %s24144_s2, 36864, %s24136_s26, %s24077_s22, %s27257_s21, %s27257_s21, %s27260_s23  }
  0x9f   : > { %s27307_s7 = sld [smem:[#allocation49_spill]]  ;;  %s743_s19 = scalar_lea.vmem [#allocation12], %s24139_s29 }
  0xa0   : > { %s751_s25 = sshll.u32 %s743_s19, 4  ;;  %s27308_s8 = sld [smem:[#allocation50_spill]]  ;;  %s752_s25 = int_to_ptr.vmem [resolvable:$true] %s751_s25 }
  0xa5   : > { %s24178_s1 = scalar_lea.hbm %s27307_s7, %s24147_s4  ;;  %s23335_s5 = scalar_lea.hbm %s27307_s7, 192 }
  0xa6   : > { %s24185_s15 = scalar_lea.hbm %s27308_s8, %s24147_s4  ;;  %s23330_s16 = scalar_lea.hbm %s24178_s1, 96 }
  0xa7   : > { %p23331_p5 = scmp.ne.s32.totalorder %s24178_s1, %s23330_s16  ;;  %p23336_p3 = scmp.lt.u32.totalorder %s24178_s1, %s27307_s7 }
  0xa8   : > { %p23337_p7 = scmp.lt.u32.totalorder %s23335_s5, %s23330_s16  ;;  %p23339_p12 = scmp.lt.u32.totalorder %s23330_s16, %s24178_s1 }
  0xa9   : > { %p23333_p11 = pnand %p23331_p5, %p24083_p13 }
  0xaa   : > { %p23338_p8 = por %p23337_p7, %p23336_p3 }
  0xab   : > { %p23334_p0 = pneg %p23333_p11 }
  0xac   : > { %p23340_p1 = por %p23339_p12, %p23338_p8 }
  0xae   : > { %p23341_p10 = pnand %p23340_p1, %p23334_p0 }
  0xb0   : > { %23344 = shalt.err (!%p23341_p10)
}
  0xb1   : > { %s23345_s19 = scalar_lea.vmem %s752_s25, 96  ;;  %s23834_s27 = smov [#allocation12]  }
  0xb2   : > { %p23346_p2 = scmp.ne.s32.totalorder %s752_s25, %s23345_s19  ;;  %s23350_s20 = sshll.u32 %s23834_s27, 4  ;;  %s23351_s20 = int_to_ptr.vmem [resolvable:$false] %s23350_s20 }
  0xb3   : > { %s23352_s26 = scalar_lea.vmem %s23351_s20, 192  ;;  %p23353_p5 = scmp.lt.s32.totalorder %s752_s25, %s23351_s20 }
  0xb4   : > { %p23348_p6 = pnand %p23346_p2, %p24083_p13  ;;  %p23354_p11 = scmp.lt.s32.totalorder %s23352_s26, %s23345_s19 }
  0xb6   : > { %p23349_p9 = pneg %p23348_p6  ;;  %p23355_p4 = por %p23354_p11, %p23353_p5 }
  0xb8   : > { %p23356_p3 = pnand %p23355_p4, %p23349_p9 }
  0xba   : > { %23359 = shalt.err (!%p23356_p3)
}
  0xbb   : > { %p27309_p7 = scmp.ne.s32.totalorder %s27301_s18, 0  ;;  %s762_s16 = scalar_lea.vmem [#allocation13], %s24139_s29 }
  0xbc   : > { %s770_s21 = sshll.u32 %s762_s16, 4  ;;  %s27310_s9 = sld [smem:[#allocation51_spill]]  ;;  %s771_s21 = int_to_ptr.vmem [resolvable:$true] %s770_s21 }
  0xbd   : > { %20230 = dma.hbm_to_vmem [thread:$0]  (!%p27309_p7), %s24178_s1, 96, %s752_s25, %s24077_s22  }
  0xbe   : > { %s23360_s19 = scalar_lea.hbm %s24185_s15, 96  ;;  %s23365_s26 = scalar_lea.hbm %s27308_s8, 192 }
  0xbf   : > { %p23361_p4 = scmp.ne.s32.totalorder %s24185_s15, %s23360_s19  ;;  %p23366_p12 = scmp.lt.u32.totalorder %s24185_s15, %s27308_s8 }
  0xc0   : > { %p23367_p1 = scmp.lt.u32.totalorder %s23365_s26, %s23360_s19  ;;  %p23369_p2 = scmp.lt.u32.totalorder %s23360_s19, %s24185_s15 }
  0xc1   : > { %p23363_p0 = pnand %p23361_p4, %p24083_p13 }
  0xc2   : > { %s24210_s24 = scalar_lea.hbm %s27310_s9, %s24147_s4  ;;  %p23368_p10 = por %p23367_p1, %p23366_p12 }
  0xc3   : > { %p23364_p8 = pneg %p23363_p0 }
  0xc4   : > { %p23370_p6 = por %p23369_p2, %p23368_p10 }
  0xc6   : > { %p23371_p9 = pnand %p23370_p6, %p23364_p8 }
  0xc8   : > { %23374 = shalt.err (!%p23371_p9)
}
  0xc9   : > { %s23375_s1 = scalar_lea.vmem %s771_s21, 96  ;;  %s23835_s25 = smov [#allocation13]  }
  0xca   : > { %p23376_p5 = scmp.ne.s32.totalorder %s771_s21, %s23375_s1  ;;  %s23380_s16 = sshll.u32 %s23835_s25, 4  ;;  %s23381_s16 = int_to_ptr.vmem [resolvable:$false] %s23380_s16 }
  0xcb   : > { %s23382_s2 = scalar_lea.vmem %s23381_s16, 192  ;;  %p23383_p4 = scmp.lt.s32.totalorder %s771_s21, %s23381_s16 }
  0xcc   : > { %p23378_p11 = pnand %p23376_p5, %p24083_p13  ;;  %p23384_p0 = scmp.lt.s32.totalorder %s23382_s2, %s23375_s1 }
  0xce   : > { %p23379_p3 = pneg %p23378_p11  ;;  %p23385_p7 = por %p23384_p0, %p23383_p4 }
  0xd0   : > { %p23386_p1 = pnand %p23385_p7, %p23379_p3 }
  0xd2   : > { %23389 = shalt.err (!%p23386_p1)
}
  0xd3   : > { %p27311_p12 = scmp.ne.s32.totalorder %s27301_s18, 0  ;;  %s781_s7 = scalar_lea.vmem [#allocation14], %s24139_s29 }
  0xd4   : > { %s789_s23 = sshll.u32 %s781_s7, 4  ;;  %s27262_s5 = smul.u32 1536, %s24059_s3  ;;  %s790_s23 = int_to_ptr.vmem [resolvable:$true] %s789_s23 }
  0xd5   : > { %20233 = dma.hbm_to_vmem [thread:$0]  (!%p27311_p12), %s24185_s15, 96, %s771_s21, %s24077_s22  }
  0xd6   : > { %s20133_s19 = smul.u32 24576, %s23824_s30  ;;  %s23390_s27 = scalar_lea.hbm %s24210_s24, 96 }
  0xd7   : > { %p23391_p7 = scmp.ne.s32.totalorder %s24210_s24, %s23390_s27  ;;  %s23395_s1 = scalar_lea.hbm %s27310_s9, 192 }
  0xd8   : > { %p23396_p2 = scmp.lt.u32.totalorder %s24210_s24, %s27310_s9  ;;  %p23397_p6 = scmp.lt.u32.totalorder %s23395_s1, %s23390_s27 }
  0xd9   : > { %p23393_p8 = pnand %p23391_p7, %p24083_p13  ;;  %p23399_p5 = scmp.lt.u32.totalorder %s23390_s27, %s24210_s24 }
  0xda   : > { %p23398_p9 = por %p23397_p6, %p23396_p2 }
  0xdb   : > { %p23394_p10 = pneg %p23393_p8 }
  0xdc   : > { %p23400_p11 = por %p23399_p5, %p23398_p9 }
  0xde   : > { %p23401_p3 = pnand %p23400_p11, %p23394_p10 }
  0xe0   : > { %23404 = shalt.err (!%p23401_p3)
}
  0xe1   : > { %s23405_s15 = scalar_lea.vmem %s790_s23, 96  ;;  %s23836_s21 = smov [#allocation14]  }
  0xe2   : > { %p23406_p4 = scmp.ne.s32.totalorder %s790_s23, %s23405_s15  ;;  %s23410_s2 = sshll.u32 %s23836_s21, 4  ;;  %s23411_s2 = int_to_ptr.vmem [resolvable:$false] %s23410_s2 }
  0xe3   : > { %s23412_s7 = scalar_lea.vmem %s23411_s2, 192  ;;  %p23413_p7 = scmp.lt.s32.totalorder %s790_s23, %s23411_s2 }
  0xe4   : > { %p23408_p0 = pnand %p23406_p4, %p24083_p13  ;;  %p23414_p8 = scmp.lt.s32.totalorder %s23412_s7, %s23405_s15 }
  0xe6   : > { %p23409_p1 = pneg %p23408_p0  ;;  %p23415_p12 = por %p23414_p8, %p23413_p7 }
  0xe8   : > { %p23416_p2 = pnand %p23415_p12, %p23409_p1 }
  0xea   : > { %23419 = shalt.err (!%p23416_p2)
}
  0xeb   : > { %p27312_p6 = scmp.ne.s32.totalorder %s27301_s18, 0  ;;  %s24256_s26 = scalar_lea.hbm %s27207_s10, %s20133_s19 }
  0xec   : > { %s800_s1 = scalar_lea.vmem [#allocation15], %s27262_s5  ;;  %s23420_s16 = scalar_lea.hbm %s24256_s26, 24576 }
  0xed   : > { %20236 = dma.hbm_to_vmem [thread:$0]  (!%p27312_p6), %s24210_s24, 96, %s790_s23, %s24077_s22  }
  0xee   : > { %s807_s25 = sshll.u32 %s800_s1, 4  ;;  %p23421_p12 = scmp.ne.s32.totalorder %s24256_s26, %s23420_s16  ;;  %s24260_s25 = int_to_ptr.vmem [resolvable:$true] %s807_s25 }
  0xef   : > { %s23425_s15 = scalar_lea.hbm %s27207_s10, 49152  ;;  %p23426_p5 = scmp.lt.u32.totalorder %s24256_s26, %s27207_s10 }
  0xf0   : > { %p23423_p10 = pnand %p23421_p12, %p24083_p13  ;;  %p23427_p11 = scmp.lt.u32.totalorder %s23425_s15, %s23420_s16 }
  0xf1   : > { %p23429_p4 = scmp.lt.u32.totalorder %s23420_s16, %s24256_s26 }
  0xf2   : > { %p23424_p9 = pneg %p23423_p10  ;;  %p23428_p3 = por %p23427_p11, %p23426_p5 }
  0xf4   : > { %p23430_p0 = por %p23429_p4, %p23428_p3 }
  0xf6   : > { %p23431_p1 = pnand %p23430_p0, %p23424_p9 }
  0xf8   : > { %23434 = shalt.err (!%p23431_p1)
}
  0xf9   : > { %s23435_s7 = scalar_lea.vmem %s24260_s25, 24576  ;;  %s23837_s27 = smov [#allocation15]  }
  0xfa   : > { %p23436_p7 = scmp.ne.s32.totalorder %s24260_s25, %s23435_s7  ;;  %s23440_s20 = sshll.u32 %s23837_s27, 4  ;;  %s23441_s20 = int_to_ptr.vmem [resolvable:$false] %s23440_s20 }
  0xfb   : > { %s23442_s1 = scalar_lea.vmem %s23441_s20, 49152  ;;  %p23443_p12 = scmp.lt.s32.totalorder %s24260_s25, %s23441_s20 }
  0xfc   : > { %p23438_p8 = pnand %p23436_p7, %p24083_p13  ;;  %p23444_p10 = scmp.lt.s32.totalorder %s23442_s1, %s23435_s7 }
  0xfe   : > { %p23439_p2 = pneg %p23438_p8  ;;  %p23445_p5 = por %p23444_p10, %p23443_p12 }
 0x100   : > { %p23446_p11 = pnand %p23445_p5, %p23439_p2 }
 0x102   : > { %23449 = shalt.err (!%p23446_p11)
}
 0x103   : > { %s23838_s16 = smov 256   ;;  %s23839_s24 = smov 16  }
 0x104   : > { %20239 = dma.hbm_to_vmem [thread:$0]  (!%p27312_p6), %s24256_s26, 24576, %s24260_s25, %s24077_s22, %s23838_s16, %s23838_s16, %s23839_s24  }
 0x105   : > { %s17710_s23 = sshll.u32 %s24059_s3, 2  ;;  %s19624_s15 = sshll.u32 %s23824_s30, 6 }
 0x106   : > { %s24289_s7 = scalar_lea.hbm %s27208_s11, %s19624_s15  ;;  %s821_s27 = scalar_lea.vmem [#allocation16], %s17710_s23 }
 0x107   : > { %s829_s20 = sshll.u32 %s821_s27, 4  ;;  %s24296_s8 = scalar_lea.hbm %s27209_s12, %s20133_s19  ;;  %s830_s20 = int_to_ptr.vmem [resolvable:$true] %s829_s20 }
 0x108   : > { %s23450_s26 = scalar_lea.hbm %s24289_s7, 64  ;;  %s23455_s24 = scalar_lea.hbm %s27208_s11, 128 }
 0x109   : > { %p23451_p9 = scmp.ne.s32.totalorder %s24289_s7, %s23450_s26  ;;  %p23456_p0 = scmp.lt.u32.totalorder %s24289_s7, %s27208_s11 }
 0x10a   : > { %p23457_p1 = scmp.lt.u32.totalorder %s23455_s24, %s23450_s26  ;;  %p23459_p8 = scmp.lt.u32.totalorder %s23450_s26, %s24289_s7 }
 0x10b   : > { %p23453_p3 = pnand %p23451_p9, %p24083_p13 }
 0x10c   : > { %p23458_p7 = por %p23457_p1, %p23456_p0 }
 0x10d   : > { %p23454_p4 = pneg %p23453_p3 }
 0x10e   : > { %p23460_p2 = por %p23459_p8, %p23458_p7 }
 0x110   : > { %p23461_p12 = pnand %p23460_p2, %p23454_p4 }
 0x112   : > { %23464 = shalt.err (!%p23461_p12)
}
 0x113   : > { %s23465_s30 = scalar_lea.vmem %s830_s20, 64  ;;  %s23840_s5 = smov [#allocation16]  }
 0x114   : > { %p23466_p10 = scmp.ne.s32.totalorder %s830_s20, %s23465_s30  ;;  %s23470_s19 = sshll.u32 %s23840_s5, 4  ;;  %s23471_s19 = int_to_ptr.vmem [resolvable:$false] %s23470_s19 }
 0x115   : > { %s23472_s23 = scalar_lea.vmem %s23471_s19, 128  ;;  %p23473_p9 = scmp.lt.s32.totalorder %s830_s20, %s23471_s19 }
 0x116   : > { %p23468_p5 = pnand %p23466_p10, %p24083_p13  ;;  %p23474_p3 = scmp.lt.s32.totalorder %s23472_s23, %s23465_s30 }
 0x118   : > { %p23469_p11 = pneg %p23468_p5  ;;  %p23475_p6 = por %p23474_p3, %p23473_p9 }
 0x11a   : > { %p23476_p0 = pnand %p23475_p6, %p23469_p11 }
 0x11c   : > { %23479 = shalt.err (!%p23476_p0)
}
 0x11d   : > { %p27313_p1 = scmp.ne.s32.totalorder %s27301_s18, 0  ;;  %s27314_s2 = smul.u32 1536, %s24059_s3 }
 0x11e   : > { %s24324_s16 = scalar_lea.hbm %s27210_s13, %s24147_s4  ;;  %s23480_s24 = scalar_lea.hbm %s24296_s8, 24576 }
 0x11f   : > { %20242 = dma.hbm_to_vmem [thread:$0]  (!%p27313_p1), %s24289_s7, 64, %s830_s20, %s24077_s22  }
 0x120   : > { %s840_s27 = scalar_lea.vmem [#allocation17], %s27314_s2  ;;  %p23481_p6 = scmp.ne.s32.totalorder %s24296_s8, %s23480_s24 }
 0x121   : > { %s847_s1 = sshll.u32 %s840_s27, 4  ;;  %s23485_s30 = scalar_lea.hbm %s27209_s12, 49152  ;;  %s24318_s1 = int_to_ptr.vmem [resolvable:$true] %s847_s1 }
 0x122   : > { %p23483_p4 = pnand %p23481_p6, %p24083_p13  ;;  %p23486_p8 = scmp.lt.u32.totalorder %s24296_s8, %s27209_s12 }
 0x123   : > { %p23487_p2 = scmp.lt.u32.totalorder %s23485_s30, %s23480_s24  ;;  %p23489_p10 = scmp.lt.u32.totalorder %s23480_s24, %s24296_s8 }
 0x124   : > { %p23484_p7 = pneg %p23483_p4 }
 0x125   : > { %p23488_p12 = por %p23487_p2, %p23486_p8 }
 0x127   : > { %p23490_p5 = por %p23489_p10, %p23488_p12 }
 0x129   : > { %p23491_p11 = pnand %p23490_p5, %p23484_p7 }
 0x12b   : > { %23494 = shalt.err (!%p23491_p11)
}
 0x12c   : > { %s23495_s20 = scalar_lea.vmem %s24318_s1, 24576  ;;  %s23841_s5 = smov [#allocation17]  }
 0x12d   : > { %p23496_p9 = scmp.ne.s32.totalorder %s24318_s1, %s23495_s20  ;;  %s23500_s19 = sshll.u32 %s23841_s5, 4  ;;  %s23501_s19 = int_to_ptr.vmem [resolvable:$false] %s23500_s19 }
 0x12e   : > { %s23502_s23 = scalar_lea.vmem %s23501_s19, 49152  ;;  %p23503_p6 = scmp.lt.s32.totalorder %s24318_s1, %s23501_s19 }
 0x12f   : > { %p23498_p3 = pnand %p23496_p9, %p24083_p13  ;;  %p23504_p4 = scmp.lt.s32.totalorder %s23502_s23, %s23495_s20 }
 0x131   : > { %p23499_p0 = pneg %p23498_p3  ;;  %p23505_p8 = por %p23504_p4, %p23503_p6 }
 0x133   : > { %p23506_p2 = pnand %p23505_p8, %p23499_p0 }
 0x135   : > { %23509 = shalt.err (!%p23506_p2)
}
 0x136   : > { %s27315_s2 = smov 24   ;;  %s27316_s27 = smov 384  }
 0x137   : > { %20245 = dma.hbm_to_vmem [thread:$0]  (!%p27313_p1), %s24296_s8, 24576, %s24318_s1, %s24077_s22, %s27316_s27, %s27316_s27, %s27315_s2  }
 0x138   : > { %s861_s26 = scalar_lea.vmem [#allocation18], %s24139_s29  ;;  %s23842_s24 = smov [#allocation7]  }
 0x139   : > { %s869_s25 = sshll.u32 %s861_s26, 4  ;;  %s615_s15 = sshll.u32 %s23842_s24, 4  ;;  %s24352_s25 = int_to_ptr.vmem [resolvable:$true] %s869_s25  ;;  %s616_s15 = int_to_ptr.vmem [resolvable:$true] %s615_s15 }
 0x13a   : > { %s23510_s21 = scalar_lea.hbm %s24324_s16, 96  ;;  %s23515_s3 = scalar_lea.hbm %s27210_s13, 192 }
 0x13b   : > { %p23511_p7 = scmp.ne.s32.totalorder %s24324_s16, %s23510_s21  ;;  %p23516_p5 = scmp.lt.u32.totalorder %s24324_s16, %s27210_s13 }
 0x13c   : > { %p23517_p11 = scmp.lt.u32.totalorder %s23515_s3, %s23510_s21  ;;  %p23519_p3 = scmp.lt.u32.totalorder %s23510_s21, %s24324_s16 }
 0x13d   : > { %p23513_p12 = pnand %p23511_p7, %p24083_p13 }
 0x13e   : > { %p23518_p9 = por %p23517_p11, %p23516_p5 }
 0x13f   : > { %p23514_p10 = pneg %p23513_p12 }
 0x140   : > { %p23520_p0 = por %p23519_p3, %p23518_p9 }
 0x142   : > { %p23521_p6 = pnand %p23520_p0, %p23514_p10 }
 0x144   : > { %23524 = shalt.err (!%p23521_p6)
}
 0x145   : > { %s23525_s8 = scalar_lea.vmem %s24352_s25, 96  ;;  %s23843_s1 = smov [#allocation18]  }
 0x146   : > { %p23526_p4 = scmp.ne.s32.totalorder %s24352_s25, %s23525_s8  ;;  %s23530_s19 = sshll.u32 %s23843_s1, 4  ;;  %s23531_s19 = int_to_ptr.vmem [resolvable:$false] %s23530_s19 }
 0x147   : > { %s23532_s23 = scalar_lea.vmem %s23531_s19, 192  ;;  %p23533_p7 = scmp.lt.s32.totalorder %s24352_s25, %s23531_s19 }
 0x148   : > { %p23528_p8 = pnand %p23526_p4, %p24083_p13  ;;  %p23534_p12 = scmp.lt.s32.totalorder %s23532_s23, %s23525_s8 }
 0x14a   : > { %p23529_p2 = pneg %p23528_p8  ;;  %p23535_p5 = por %p23534_p12, %p23533_p7 }
 0x14c   : > { %p23536_p11 = pnand %p23535_p5, %p23529_p2 }
 0x14e   : > { %23539 = shalt.err (!%p23536_p11)
}
 0x14f   : > { %20248 = dma.hbm_to_vmem [thread:$0]  (!%p27313_p1), %s24324_s16, 96, %s24352_s25, %s24077_s22  }
 0x150   : > { %s27317_s21 = sld [smem:[#allocation45_spill]]  ;;  %p27318_p9 = scmp.ne.s32.totalorder %s27297_s0, 0 }
 0x156   : > { %s23540_s30 = scalar_lea.hbm %s27317_s21, 96 }
 0x157   : > { %p23541_p10 = scmp.ne.s32.totalorder %s27317_s21, %s23540_s30  ;;  %p23547_p6 = scmp.lt.u32.totalorder %s23540_s30, %s27317_s21 }
 0x159   : > { %p23543_p3 = pnand %p23541_p10, %p27318_p9 }
 0x15b   : > { %p23544_p0 = pneg %p23543_p3 }
 0x15d   : > { %p23549_p4 = pnand %p23547_p6, %p23544_p0 }
 0x15f   : > { %23552 = shalt.err (!%p23549_p4)
}
 0x160   : > { %s23553_s8 = scalar_lea.vmem %s616_s15, 96  ;;  %p23561_p12 = scmp.lt.s32.totalorder %s616_s15, %s616_s15 }
 0x161   : > { %p23554_p8 = scmp.ne.s32.totalorder %s616_s15, %s23553_s8  ;;  %p23562_p5 = scmp.lt.s32.totalorder %s23553_s8, %s23553_s8 }
 0x163   : > { %p23556_p2 = pnand %p23554_p8, %p27318_p9  ;;  %p23563_p11 = por %p23562_p5, %p23561_p12 }
 0x165   : > { %p23557_p7 = pneg %p23556_p2 }
 0x167   : > { %p23564_p1 = pnand %p23563_p11, %p23557_p7 }
 0x169   : > { %23567 = shalt.err (!%p23564_p1)
}
 0x16a   : > { %p27319_p10 = scmp.ne.s32.totalorder %s27294_s6, 0  ;;  %s23844_s1 = smov [#allocation22]  }
 0x16b   : > { %s639_s19 = sshll.u32 %s23844_s1, 4  ;;  %s24398_s24 = scalar_lea.hbm %s27211_s14, %s24147_s4  ;;  %s640_s19 = int_to_ptr.vmem [resolvable:$true] %s639_s19 }
 0x16c   : > { %20205 = dma.hbm_to_vmem [thread:$0]  (!%p27319_p10), %s27317_s21, 96, %s616_s15, [#allocation8]  }
 0x16d   : > { %s23568_s3 = scalar_lea.hbm %s27214_s17, 96 }
 0x16e   : > { %p23569_p1 = scmp.ne.s32.totalorder %s27214_s17, %s23568_s3  ;;  %p23575_p6 = scmp.lt.u32.totalorder %s23568_s3, %s27214_s17 }
 0x170   : > { %p23571_p3 = pnand %p23569_p1, %p27318_p9 }
 0x172   : > { %p23572_p0 = pneg %p23571_p3 }
 0x174   : > { %p23577_p4 = pnand %p23575_p6, %p23572_p0 }
 0x176   : > { %23580 = shalt.err (!%p23577_p4)
}
 0x177   : > { %s23581_s16 = scalar_lea.vmem %s640_s19, 96  ;;  %p23589_p12 = scmp.lt.s32.totalorder %s640_s19, %s640_s19 }
 0x178   : > { %p23582_p8 = scmp.ne.s32.totalorder %s640_s19, %s23581_s16  ;;  %p23590_p5 = scmp.lt.s32.totalorder %s23581_s16, %s23581_s16 }
 0x17a   : > { %p23584_p2 = pnand %p23582_p8, %p27318_p9  ;;  %p23591_p11 = por %p23590_p5, %p23589_p12 }
 0x17c   : > { %p23585_p7 = pneg %p23584_p2 }
 0x17e   : > { %p23592_p13 = pnand %p23591_p11, %p23585_p7 }
 0x180   : > { %23595 = shalt.err (!%p23592_p13)
}
 0x181   : > { %20211 = dma.hbm_to_vmem [thread:$0]  (!%p27319_p10), %s27214_s17, 96, %s640_s19, [#allocation23]  }
 0x182   : > { %s880_s23 = scalar_lea.vmem [#allocation19], %s24139_s29  ;;  %s23845_s30 = smov [#allocation21]  }
 0x183   : > { %s888_s26 = sshll.u32 %s880_s23, 4  ;;  %s625_s7 = sshll.u32 %s23845_s30, 4  ;;  %s24419_s26 = int_to_ptr.vmem [resolvable:$true] %s888_s26  ;;  %s626_s7 = int_to_ptr.vmem [resolvable:$true] %s625_s7 }
 0x184   : > { %s23596_s3 = scalar_lea.hbm %s24398_s24, 96  ;;  %p27320_p1 = scmp.ne.s32.totalorder %s27303_s28, 0 }
 0x185   : > { %p23597_p13 = scmp.ne.s32.totalorder %s24398_s24, %s23596_s3  ;;  %s23601_s15 = scalar_lea.hbm %s27211_s14, 192 }
 0x186   : > { %p23602_p6 = scmp.lt.u32.totalorder %s24398_s24, %s27211_s14  ;;  %p23603_p4 = scmp.lt.u32.totalorder %s23601_s15, %s23596_s3 }
 0x187   : > { %p23599_p3 = pnand %p23597_p13, %p27320_p1  ;;  %p23605_p2 = scmp.lt.u32.totalorder %s23596_s3, %s24398_s24 }
 0x188   : > { %p23604_p8 = por %p23603_p4, %p23602_p6 }
 0x189   : > { %p23600_p0 = pneg %p23599_p3 }
 0x18a   : > { %p23606_p7 = por %p23605_p2, %p23604_p8 }
 0x18c   : > { %p23607_p12 = pnand %p23606_p7, %p23600_p0 }
 0x18e   : > { %23610 = shalt.err (!%p23607_p12)
}
 0x18f   : > { %s23611_s19 = scalar_lea.vmem %s24419_s26, 96  ;;  %s23846_s25 = smov [#allocation19]  }
 0x190   : > { %p23612_p5 = scmp.ne.s32.totalorder %s24419_s26, %s23611_s19  ;;  %s23616_s1 = sshll.u32 %s23846_s25, 4  ;;  %s23617_s1 = int_to_ptr.vmem [resolvable:$false] %s23616_s1 }
 0x191   : > { %s23618_s23 = scalar_lea.vmem %s23617_s1, 192  ;;  %p23619_p3 = scmp.lt.s32.totalorder %s24419_s26, %s23617_s1 }
 0x192   : > { %p23614_p11 = pnand %p23612_p5, %p27320_p1  ;;  %p23620_p10 = scmp.lt.s32.totalorder %s23618_s23, %s23611_s19 }
 0x194   : > { %p23615_p13 = pneg %p23614_p11  ;;  %p23621_p6 = por %p23620_p10, %p23619_p3 }
 0x196   : > { %p23622_p4 = pnand %p23621_p6, %p23615_p13 }
 0x198   : > { %23625 = shalt.err (!%p23622_p4)
}
 0x199   : > { %p27321_p0 = scmp.ne.s32.totalorder %s27301_s18, 0  ;;  %s27322_s20 = sld [smem:[#allocation53_spill]] }
 0x19b   : > { %20251 = dma.hbm_to_vmem [thread:$0]  (!%p27321_p0), %s24398_s24, 96, %s24419_s26, %s24077_s22  }
 0x19f   : > { %s23626_s5 = scalar_lea.hbm %s27322_s20, 36864 }
 0x1a0   : > { %p23627_p8 = scmp.ne.s32.totalorder %s27322_s20, %s23626_s5  ;;  %p23633_p7 = scmp.lt.u32.totalorder %s23626_s5, %s27322_s20 }
 0x1a2   : > { %p23629_p10 = pnand %p23627_p8, %p27318_p9 }
 0x1a4   : > { %p23630_p2 = pneg %p23629_p10 }
 0x1a6   : > { %p23635_p12 = pnand %p23633_p7, %p23630_p2 }
 0x1a8   : > { %23638 = shalt.err (!%p23635_p12)
}
 0x1a9   : > { %s23639_s25 = scalar_lea.vmem %s626_s7, 36864  ;;  %p23647_p3 = scmp.lt.s32.totalorder %s626_s7, %s626_s7 }
 0x1aa   : > { %p23640_p5 = scmp.ne.s32.totalorder %s626_s7, %s23639_s25  ;;  %p23648_p6 = scmp.lt.s32.totalorder %s23639_s25, %s23639_s25 }
 0x1ac   : > { %p23642_p11 = pnand %p23640_p5, %p27318_p9  ;;  %p23649_p4 = por %p23648_p6, %p23647_p3 }
 0x1ae   : > { %p23643_p13 = pneg %p23642_p11 }
 0x1b0   : > { %p23650_p0 = pnand %p23649_p4, %p23643_p13 }
 0x1b2   : > { %23653 = shalt.err (!%p23650_p0)
}
 0x1b3   : > { %p27323_p8 = scmp.ne.s32.totalorder %s27294_s6, 0  ;;  %s23847_s1 = smov [#allocation24]  }
 0x1b4   : > { %s653_s23 = sshll.u32 %s23847_s1, 4  ;;  %s23848_s30 = smov [#allocation25]   ;;  %s654_s23 = int_to_ptr.vmem [resolvable:$true] %s653_s23 }
 0x1b5   : > { %20208 = dma.hbm_to_vmem [thread:$0]  (!%p27323_p8), %s27322_s20, 36864, %s626_s7, [#allocation8], %s27316_s27, %s27316_s27, %s27315_s2  }
 0x1b6   : > { %s667_s3 = sshll.u32 %s23848_s30, 4  ;;  %s27324_s8 = sld [smem:[#allocation55_spill]]  ;;  %s668_s3 = int_to_ptr.vmem [resolvable:$true] %s667_s3 }
 0x1bc   : > { %s23654_s16 = scalar_lea.hbm %s27324_s8, 16 }
 0x1bd   : > { %p23655_p0 = scmp.ne.s32.totalorder %s27324_s8, %s23654_s16  ;;  %p23661_p7 = scmp.lt.u32.totalorder %s23654_s16, %s27324_s8 }
 0x1bf   : > { %p23657_p10 = pnand %p23655_p0, %p27318_p9 }
 0x1c1   : > { %p23658_p2 = pneg %p23657_p10 }
 0x1c3   : > { %p23663_p12 = pnand %p23661_p7, %p23658_p2 }
 0x1c5   : > { %23666 = shalt.err (!%p23663_p12)
}
 0x1c6   : > { %s23667_s2 = scalar_lea.vmem %s654_s23, 16  ;;  %s23674_s27 = scalar_lea.vmem %s654_s23, 32 }
 0x1c7   : > { %p23668_p5 = scmp.ne.s32.totalorder %s654_s23, %s23667_s2  ;;  %p23675_p3 = scmp.lt.s32.totalorder %s654_s23, %s654_s23 }
 0x1c8   : > { %p23676_p6 = scmp.lt.s32.totalorder %s23674_s27, %s23667_s2 }
 0x1c9   : > { %p23670_p11 = pnand %p23668_p5, %p27318_p9 }
 0x1ca   : > { %p23677_p4 = por %p23676_p6, %p23675_p3 }
 0x1cb   : > { %p23671_p13 = pneg %p23670_p11 }
 0x1cd   : > { %p23678_p1 = pnand %p23677_p4, %p23671_p13 }
 0x1cf   : > { %23681 = shalt.err (!%p23678_p1)
}
 0x1d0   : > { %20214 = dma.hbm_to_vmem [thread:$0]  (!%p27323_p8), %s27324_s8, 16, %s654_s23, [#allocation23]  }
 0x1d1   : > { %s27325_s30 = sld [smem:[#allocation57_spill]] }
 0x1d7   : > { %s27326_s5 = smov %s27325_s30  ;;  %s23682_s15 = scalar_lea.hbm %s27325_s30, 16 }
 0x1d8   : > { %p23683_p0 = scmp.ne.s32.totalorder %s27326_s5, %s23682_s15  ;;  %p23689_p1 = scmp.lt.u32.totalorder %s23682_s15, %s27326_s5 }
 0x1da   : > { %p23685_p10 = pnand %p23683_p0, %p27318_p9 }
 0x1dc   : > { %p23686_p2 = pneg %p23685_p10 }
 0x1de   : > { %p23691_p7 = pnand %p23689_p1, %p23686_p2 }
 0x1e0   : > { %23694 = shalt.err (!%p23691_p7)
}
 0x1e1   : > { %s23695_s2 = scalar_lea.vmem %s668_s3, 16  ;;  %s23702_s23 = scalar_lea.vmem %s668_s3, 32 }
 0x1e2   : > { %p23696_p12 = scmp.ne.s32.totalorder %s668_s3, %s23695_s2  ;;  %p23703_p13 = scmp.lt.s32.totalorder %s668_s3, %s668_s3 }
 0x1e3   : > { %p23704_p3 = scmp.lt.s32.totalorder %s23702_s23, %s23695_s2 }
 0x1e4   : > { %p23698_p5 = pnand %p23696_p12, %p27318_p9 }
 0x1e5   : > { %p23705_p6 = por %p23704_p3, %p23703_p13 }
 0x1e6   : > { %p23699_p11 = pneg %p23698_p5 }
 0x1e8   : > { %p23706_p4 = pnand %p23705_p6, %p23699_p11 }
 0x1ea   : > { %23709 = shalt.err (!%p23706_p4)
}
 0x1eb   : > { %20217 = dma.hbm_to_vmem [thread:$0]  (!%p27323_p8), %s27326_s5, 16, %s668_s3, [#allocation26]  }
 0x1ec   : > { %s27327_s0 = sld [smem:[#allocation52_spill]]  ;;  %s899_s30 = scalar_lea.vmem [#allocation20], %s24139_s29 }
 0x1ed   : > { %s907_s15 = sshll.u32 %s899_s30, 4  ;;  %p27328_p0 = scmp.ne.s32.totalorder %s27303_s28, 0  ;;  %s908_s15 = int_to_ptr.vmem [resolvable:$true] %s907_s15 }
 0x1f2   : > { %s24504_s1 = scalar_lea.hbm %s27327_s0, %s24147_s4  ;;  %s23715_s3 = scalar_lea.hbm %s27327_s0, 192 }
 0x1f3   : > { %s23710_s6 = scalar_lea.hbm %s24504_s1, 96  ;;  %p23716_p8 = scmp.lt.u32.totalorder %s24504_s1, %s27327_s0 }
 0x1f4   : > { %p23711_p9 = scmp.ne.s32.totalorder %s24504_s1, %s23710_s6  ;;  %p23717_p1 = scmp.lt.u32.totalorder %s23715_s3, %s23710_s6 }
 0x1f5   : > { %p23719_p12 = scmp.lt.u32.totalorder %s23710_s6, %s24504_s1 }
 0x1f6   : > { %p23713_p10 = pnand %p23711_p9, %p27328_p0  ;;  %p23718_p7 = por %p23717_p1, %p23716_p8 }
 0x1f8   : > { %p23714_p2 = pneg %p23713_p10  ;;  %p23720_p5 = por %p23719_p12, %p23718_p7 }
 0x1fa   : > { %p23721_p11 = pnand %p23720_p5, %p23714_p2 }
 0x1fc   : > { %23724 = shalt.err (!%p23721_p11)
}
 0x1fd   : > { %s23725_s29 = scalar_lea.vmem %s908_s15, 96  ;;  %s23849_s4 = smov [#allocation20]  }
 0x1fe   : > { %p23726_p13 = scmp.ne.s32.totalorder %s908_s15, %s23725_s29  ;;  %s23730_s2 = sshll.u32 %s23849_s4, 4  ;;  %s23731_s2 = int_to_ptr.vmem [resolvable:$false] %s23730_s2 }
 0x1ff   : > { %s23732_s23 = scalar_lea.vmem %s23731_s2, 192  ;;  %p23733_p4 = scmp.lt.s32.totalorder %s908_s15, %s23731_s2 }
 0x200   : > { %p23728_p3 = pnand %p23726_p13, %p27328_p0  ;;  %p23734_p9 = scmp.lt.s32.totalorder %s23732_s23, %s23725_s29 }
 0x202   : > { %p23729_p6 = pneg %p23728_p3  ;;  %p23735_p10 = por %p23734_p9, %p23733_p4 }
 0x204   : > { %p23736_p1 = pnand %p23735_p10, %p23729_p6 }
 0x206   : > { %23739 = shalt.err (!%p23736_p1)
}
 0x207   : > { %p27329_p8 = scmp.ne.s32.totalorder %s27301_s18, 0  ;;  %s27330_s27 = sld [smem:[#allocation39_spill]] }
 0x209   : > { %20254 = dma.hbm_to_vmem [thread:$0]  (!%p27329_p8), %s24504_s1, 96, %s908_s15, %s24077_s22  }
 0x20d   : > { %p27331_p2 = scmp.ne.s32.totalorder %s27330_s27, 0 }
 0x20e   : > { %s27332_s28 = sld [smem:[#allocation37_spill]] (!%p27331_p2) }
 0x20f   : > { %916 = sbr.rel (%p27331_p2) target bundleno = 11564 (0x2d2c), region = 108 }
 0x214   : > { %p27333_p0 = scmp.eq.s32.totalorder (!%p27331_p2), %s27332_s28, 0 }
 0x216   : > { %23783 = dma.done.wait (%p27333_p0), [#allocation5], 96   ;;  %p27334_p7 = pmov %p27333_p0 }
 0x217   : > { %p27335_p12 = pmov %p27333_p0 }
 0x218   : > { %23785 = vsyncadd (%p27334_p7), [#allocation5], 4294967200 }
 0x219   : > { %23787 = dma.done.wait (%p27335_p12), [#allocation8], 96   ;;  %p27336_p5 = pmov %p27333_p0 }
 0x21a   : > { %s27337_s18 = sld [smem:[#allocation35_spill]]  ;;  %s27338_s7 = sld [smem:[#allocation38_spill]] }
 0x21b   : > { %23789 = vsyncadd (%p27336_p5), [#allocation8], 4294967200  ;;  %s926_s26 = sand.u32 1, %s27332_s28  }
 0x21c   : > { %s927_s1 = scalar_lea.sflag [#allocation5], %s926_s26 }
 0x220   : > { %s928_s22 = sand.u32 1, %s27337_s18   ;;  %p27339_p11 = scmp.ne.s32.totalorder %s27338_s7, 0 }
 0x221   : > { %s20142_s9 = smul.u32 6912, %s928_s22 }
 0x223   : > { %s24537_s30 = scalar_lea.vmem [#allocation9], %s20142_s9 }
 0x224   : > { %23791 = dma.done.wait (%p27339_p11), %s927_s1, 197536  }
 0x225   : > { %23793 = vsyncadd (%p27339_p11), %s927_s1, 4294769760  ;;  %s20143_s15 = smul.u32 18, %s928_s22  ;;  %s17720_s6 = sshll.u32 %s928_s22, 2 }
 0x226   : > { %s20144_s16 = smul.u32 2304, %s928_s22  ;;  %s24554_s27 = scalar_lea.vmem [#allocation16], %s17720_s6 }
 0x227   : > { %s24543_s19 = smul.u32 6, %s928_s22  ;;  %s24545_s25 = scalar_lea.vmem [#allocation10], %s20143_s15 }
 0x228   : > { %s20146_s3 = smul.u32 1536, %s928_s22  ;;  %s24547_s24 = scalar_lea.vmem [#allocation11], %s20144_s16 }
 0x229   : > { %s957_s29 = scalar_lea.vmem [#allocation12], %s24543_s19  ;;  %p27340_p13 = pmov %p27333_p0 }
 0x22a   : > { %s24552_s23 = scalar_lea.vmem [#allocation15], %s20146_s3  ;;  %s24556_s18 = scalar_lea.vmem [#allocation17], %s20146_s3 }
 0x22b   : > { %23795 = dma.done.wait (%p27340_p13), [#allocation8], 36864   ;;  %p27341_p3 = pmov %p27333_p0 }
 0x22c   : > { %p27342_p6 = pmov %p27333_p0 }
 0x22d   : > { %23797 = vsyncadd (%p27341_p3), [#allocation8], 4294930432 }
 0x22e   : > { %23799 = dma.done.wait (%p27342_p6), [#allocation23], 112   ;;  %p27343_p4 = pmov %p27333_p0 }
 0x22f   : > { %p27344_p9 = pmov %p27333_p0 }
 0x230   : > { %23801 = vsyncadd (%p27343_p4), [#allocation23], 4294967184 }
 0x231   : > { %23803 = dma.done.wait (%p27344_p9), [#allocation26], 16   ;;  %p27345_p10 = pmov %p27333_p0 }
 0x232   : > { %p27346_p1 = scmp.ne.s32.totalorder %s27332_s28, 0 }
 0x233   : > { %23805 = vsyncadd (%p27345_p10), [#allocation26], 4294967280  ;;  %s27347_s15 = sld [smem:[#allocation42_spill]] (!%p27346_p1)  ;;  %v1249_v61 = vlaneseq (!%p27346_p1) }
 0x234   : > { %1160 = sbr.rel (%p27346_p1) target bundleno = 909 (0x38d), region = 184 }
 0x239   : > { %v1161_v0 = vld [vmem:[%s27347_s15] sm:$0xff] (!%p27346_p1)  ;;  %v1162_v1 = vld [vmem:[%s27347_s15 + $0x8] sm:$0xff] (!%p27346_p1)  ;;  %v1163_v2 = vld [vmem:[%s27347_s15 + $0x10] sm:$0xff] (!%p27346_p1) }
 0x23a   : > { %v1164_v3 = vld [vmem:[%s27347_s15 + $0x18] sm:$0xff] (!%p27346_p1)  ;;  %v1175_v4 = vadd.f32 (!%p27346_p1), %v1162_v1, %v1161_v0  ;;  %v1167_v5 = vld [vmem:[%s27347_s15 + $0x30] sm:$0xff] (!%p27346_p1)  ;;  %v1169_v7 = vld [vmem:[%s27347_s15 + $0x40] sm:$0xff] (!%p27346_p1) }
 0x23b   : > { %v1168_v6 = vld [vmem:[%s27347_s15 + $0x38] sm:$0xff]  ;;  %v1165_v10 = vld [vmem:[%s27347_s15 + $0x20] sm:$0xff]  ;;  %v1170_v11 = vld [vmem:[%s27347_s15 + $0x48] sm:$0xff] }
 0x23c   : > { %v1176_v8 = vadd.f32 %v1175_v4, %v1163_v2  ;;  %v1182_v9 = vadd.f32 %v1168_v6, %v1167_v5  ;;  %v1166_v14 = vld [vmem:[%s27347_s15 + $0x28] sm:$0xff]  ;;  %v1171_v15 = vld [vmem:[%s27347_s15 + $0x50] sm:$0xff]  ;;  %v1172_v18 = vld [vmem:[%s27347_s15 + $0x58] sm:$0xff] }
 0x23e   : > { %v1177_v12 = vadd.f32 %v1176_v8, %v1164_v3  ;;  %v1183_v13 = vadd.f32 %v1182_v9, %v1169_v7 }
 0x240   : > { %v1178_v16 = vadd.f32 %v1177_v12, %v1165_v10  ;;  %v1184_v17 = vadd.f32 %v1183_v13, %v1170_v11 }
 0x242   : > { %v1179_v19 = vadd.f32 %v1178_v16, %v1166_v14  ;;  %v1185_v20 = vadd.f32 %v1184_v17, %v1171_v15 }
 0x244   : > { %1180 = vadd.xlane.f32.xlu0 %v1179_v19  ;;  %v1186_v21 = vadd.f32 %v1185_v20, %v1172_v18 }
 0x248   : > { %1187 = vadd.xlane.f32.xlu0 %v1186_v21 }
 0x2d1   : > { %v1181_v22 = vpop.xlane.xlu0 %1180 }
 0x2d2   : > { %v1190_v23 = vmul.f32 0.0013020834, %v1181_v22 }
 0x2d4   : > { %v24611_v24 = vsub.f32 %v1161_v0, %v1190_v23  ;;  %v24613_v25 = vsub.f32 %v1162_v1, %v1190_v23  ;;  %v24615_v26 = vsub.f32 %v1163_v2, %v1190_v23  ;;  %v24617_v28 = vsub.f32 %v1164_v3, %v1190_v23 }
 0x2d5   : > { %v1188_v27 = vpop.xlane.xlu0 %1187  ;;  %v24623_v32 = vsub.f32 %v1165_v10, %v1190_v23  ;;  %v1197_v38 = vsub.f32 %v1166_v14, %v1190_v23  ;;  %v1250_v1 = vshrl.u32 %v1249_v61, 7 }
 0x2d6   : > { %v1191_v29 = vmul.f32 0.0013020834, %v1188_v27  ;;  %v1204_v30 = vmul.f32 %v24611_v24, %v24611_v24  ;;  %v1205_v31 = vmul.f32 %v24613_v25, %v24613_v25  ;;  %v1206_v33 = vmul.f32 %v24615_v26, %v24615_v26 }
 0x2d7   : > { %v1207_v39 = vmul.f32 %v24617_v28, %v24617_v28  ;;  %v1208_v44 = vmul.f32 %v24623_v32, %v24623_v32  ;;  %v1209_v49 = vmul.f32 %v1197_v38, %v1197_v38  ;;  %v1251_v4 = vsub.s32 0, %v1250_v1 }
 0x2d8   : > { %v1216_v34 = vadd.f32 %v1205_v31, %v1204_v30  ;;  %v24627_v35 = vsub.f32 %v1167_v5, %v1191_v29  ;;  %v24629_v36 = vsub.f32 %v1168_v6, %v1191_v29  ;;  %v24631_v37 = vsub.f32 %v1169_v7, %v1191_v29  ;;  %v1173_v6 = vld [vmem:[#allocation4] sm:$0x3f] }
 0x2d9   : > { %v24635_v41 = vsub.f32 %v1170_v11, %v1191_v29  ;;  %v24643_v46 = vsub.f32 %v1171_v15, %v1191_v29  ;;  %v24647_v51 = vsub.f32 %v1172_v18, %v1191_v29  ;;  %v1255_v5 = vsub.s32 1, %v1250_v1  ;;  %v1174_v11 = vld [vmem:[#allocation7] sm:$0x3f] }
 0x2da   : > { %v1217_v40 = vadd.f32 %v1216_v34, %v1206_v33  ;;  %v1210_v42 = vmul.f32 %v24627_v35, %v24627_v35  ;;  %v1211_v43 = vmul.f32 %v24629_v36, %v24629_v36  ;;  %v1212_v47 = vmul.f32 %v24631_v37, %v24631_v37 }
 0x2db   : > { %v1213_v52 = vmul.f32 %v24635_v41, %v24635_v41  ;;  %v1214_v55 = vmul.f32 %v24643_v46, %v24643_v46  ;;  %v1215_v57 = vmul.f32 %v24647_v51, %v24647_v51  ;;  %v1259_v7 = vsub.s32 2, %v1250_v1 }
 0x2dc   : > { %v1218_v45 = vadd.f32 %v1217_v40, %v1207_v39  ;;  %v1223_v48 = vadd.f32 %v1211_v43, %v1210_v42  ;;  %v1263_v8 = vsub.s32 3, %v1250_v1  ;;  %v1267_v9 = vsub.s32 4, %v1250_v1 }
 0x2dd   : > { %v1271_v10 = vsub.s32 5, %v1250_v1  ;;  %v1252_v12 = vrot.slane %v1173_v6, %v1251_v4  ;;  %v1256_v13 = vrot.slane %v1173_v6, %v1255_v5  ;;  %v1260_v14 = vrot.slane %v1173_v6, %v1259_v7 }
 0x2de   : > { %v1219_v50 = vadd.f32 %v1218_v45, %v1208_v44  ;;  %v1224_v53 = vadd.f32 %v1223_v48, %v1212_v47  ;;  %v1264_v15 = vrot.slane %v1173_v6, %v1263_v8  ;;  %v1268_v16 = vrot.slane %v1173_v6, %v1267_v9 }
 0x2df   : > { %v1272_v17 = vrot.slane %v1173_v6, %v1271_v10  ;;  %v1295_v19 = vrot.slane %v1174_v11, %v1251_v4  ;;  %v1299_v20 = vrot.slane %v1174_v11, %v1255_v5  ;;  %v1303_v21 = vrot.slane %v1174_v11, %v1259_v7 }
 0x2e0   : > { %v1220_v54 = vadd.f32 %v1219_v50, %v1209_v49  ;;  %v1225_v56 = vadd.f32 %v1224_v53, %v1213_v52  ;;  %v1307_v22 = vrot.slane %v1174_v11, %v1263_v8  ;;  %v1311_v31 = vrot.slane %v1174_v11, %v1267_v9 }
 0x2e1   : > { %v1315_v33 = vrot.slane %v1174_v11, %v1271_v10 }
 0x2e2   : > { %1221 = vadd.xlane.f32.xlu1 %v1220_v54  ;;  %v1226_v58 = vadd.f32 %v1225_v56, %v1214_v55 }
 0x2e4   : > { %v1227_v59 = vadd.f32 %v1226_v58, %v1215_v57 }
 0x2e6   : > { %1228 = vadd.xlane.f32.xlu1 %v1227_v59 }
 0x36f   : > { %v1222_v60 = vpop.xlane.xlu1 %1221 }
 0x370   : > { %v1230_v62 = vmul.f32 0.0013020834, %v1222_v60 }
 0x372   : > { %v1232_v63 = vadd.f32 1e-12, %v1230_v62 }
 0x373   : > { %v1229_v0 = vpop.xlane.xlu1 %1228 }
 0x374   : > { %20319 = vrsqrt.f32 %v1232_v63  ;;  %v1231_v2 = vmul.f32 0.0013020834, %v1229_v0 }
 0x376   : > { %v1233_v3 = vadd.f32 1e-12, %v1231_v2 }
 0x378   : > { %20321 = vrsqrt.f32 %v1233_v3 }
 0x37e   : > { %v20320_v18 = vpop.eup %20319 }
 0x37f   : > { %v1236_v23 = vmul.f32 %v20320_v18, %v24611_v24  ;;  %v1237_v27 = vmul.f32 %v20320_v18, %v24613_v25  ;;  %v1238_v29 = vmul.f32 %v20320_v18, %v24615_v26  ;;  %v1239_v30 = vmul.f32 %v20320_v18, %v24617_v28 }
 0x380   : > { %v1240_v34 = vmul.f32 %v20320_v18, %v24623_v32  ;;  %v1241_v39 = vmul.f32 %v20320_v18, %v1197_v38 }
 0x381   : > { %v1279_v40 = vmul.f32 %v1252_v12, %v1236_v23  ;;  %v1280_v42 = vmul.f32 %v1256_v13, %v1237_v27  ;;  %v1281_v43 = vmul.f32 %v1260_v14, %v1238_v29  ;;  %v1282_v44 = vmul.f32 %v1264_v15, %v1239_v30 }
 0x382   : > { %v20322_v45 = vpop.eup %20321  ;;  %v1283_v47 = vmul.f32 %v1268_v16, %v1240_v34  ;;  %v1284_v48 = vmul.f32 %v1272_v17, %v1241_v39 }
 0x383   : > { %v1322_v49 = vadd.f32 %v1295_v19, %v1279_v40  ;;  %v1323_v24 = vadd.f32 %v1299_v20, %v1280_v42  ;;  %v1324_v50 = vadd.f32 %v1303_v21, %v1281_v43  ;;  %v1325_v25 = vadd.f32 %v1307_v22, %v1282_v44 }
 0x384   : > { %v1326_v52 = vadd.f32 %v1311_v31, %v1283_v47  ;;  %v1327_v26 = vadd.f32 %v1315_v33, %v1284_v48  ;;  %v1242_v28 = vmul.f32 %v20322_v45, %v24627_v35  ;;  %v1243_v53 = vmul.f32 %v20322_v45, %v24629_v36 }
 0x385   : > { %1334 = vst [vmem:[#allocation2] sm:$0xff] %v1322_v49  ;;  %1335 = vst [vmem:[#allocation2 + $0x8] sm:$0xff] %v1323_v24  ;;  %v1244_v32 = vmul.f32 %v20322_v45, %v24631_v37  ;;  %v1245_v38 = vmul.f32 %v20322_v45, %v24635_v41  ;;  %v1246_v54 = vmul.f32 %v20322_v45, %v24643_v46 }
 0x386   : > { %1336 = vst [vmem:[#allocation2 + $0x10] sm:$0xff] %v1324_v50  ;;  %1337 = vst [vmem:[#allocation2 + $0x18] sm:$0xff] %v1325_v25  ;;  %v1247_v55 = vmul.f32 %v20322_v45, %v24647_v51  ;;  %v1285_v56 = vmul.f32 %v1252_v12, %v1242_v28  ;;  %v1286_v57 = vmul.f32 %v1256_v13, %v1243_v53 }
 0x387   : > { %1338 = vst [vmem:[#allocation2 + $0x20] sm:$0xff] %v1326_v52  ;;  %1339 = vst [vmem:[#allocation2 + $0x28] sm:$0xff] %v1327_v26  ;;  %v1287_v58 = vmul.f32 %v1260_v14, %v1244_v32  ;;  %v1288_v35 = vmul.f32 %v1264_v15, %v1245_v38  ;;  %v1289_v59 = vmul.f32 %v1268_v16, %v1246_v54 }
 0x388   : > { %v1290_v36 = vmul.f32 %v1272_v17, %v1247_v55  ;;  %v1328_v60 = vadd.f32 %v1295_v19, %v1285_v56  ;;  %v1329_v61 = vadd.f32 %v1299_v20, %v1286_v57 }
 0x389   : > { %v1330_v62 = vadd.f32 %v1303_v21, %v1287_v58  ;;  %v1331_v63 = vadd.f32 %v1307_v22, %v1288_v35  ;;  %v1332_v0 = vadd.f32 %v1311_v31, %v1289_v59 }
 0x38a   : > { %v1333_v37 = vadd.f32 %v1315_v33, %v1290_v36  ;;  %1340 = vst [vmem:[#allocation2 + $0x30] sm:$0xff] %v1328_v60  ;;  %1341 = vst [vmem:[#allocation2 + $0x38] sm:$0xff] %v1329_v61 }
 0x38b   : > { %1342 = vst [vmem:[#allocation2 + $0x40] sm:$0xff] %v1330_v62  ;;  %1343 = vst [vmem:[#allocation2 + $0x48] sm:$0xff] %v1331_v63 }
 0x38c   : > { %1344 = vst [vmem:[#allocation2 + $0x50] sm:$0xff] %v1332_v0  ;;  %1345 = vst [vmem:[#allocation2 + $0x58] sm:$0xff] %v1333_v37 }
 0x38d PF: > { %v20323_v41 = vld [vmem:[%s24537_s30 + $0xc] ss:$72 sps:$4 sm:$0xff]   ;;  %v20325_v46 = vld [vmem:[%s24537_s30 + $0x8] ss:$72 sps:$4 sm:$0xff]   ;;  %v20326_v51 = vld [vmem:[%s24537_s30 + $0x9c] ss:$72 sps:$4 sm:$0xff]  }
 0x38e   : > { %6773 = vmatprep.subr.bf16.mxu1 %v20323_v41  ;;  %v20328_v1 = vld [vmem:[%s24537_s30 + $0x98] ss:$72 sps:$4 sm:$0xff]   ;;  %v20329_v2 = vld [vmem:[%s24537_s30 + $0x12c] ss:$72 sps:$4 sm:$0xff]   ;;  %v20331_v3 = vld [vmem:[%s24537_s30 + $0x128] ss:$72 sps:$4 sm:$0xff]  }
 0x38f   : > { %6774 = vmatpush1.bf16.msra.mxu1 %v20325_v46  ;;  %v20332_v4 = vld [vmem:[%s24537_s30 + $0x1bc] ss:$72 sps:$4 sm:$0xff]   ;;  %v20334_v5 = vld [vmem:[%s24537_s30 + $0x1b8] ss:$72 sps:$4 sm:$0xff]   ;;  %v20335_v6 = vld [vmem:[%s24537_s30 + $0x24c] ss:$72 sps:$4 sm:$0xff]  }
 0x390   : > { %6775 = vmatprep.subr.bf16.mxu1 %v20326_v51  ;;  %v20337_v7 = vld [vmem:[%s24537_s30 + $0x248] ss:$72 sps:$4 sm:$0xff]   ;;  %v20338_v8 = vld [vmem:[%s24537_s30 + $0x2dc] ss:$72 sps:$4 sm:$0xff]   ;;  %v20340_v9 = vld [vmem:[%s24537_s30 + $0x2d8] ss:$72 sps:$4 sm:$0xff]  }
 0x391   : > { %v20341_v10 = vld [vmem:[%s24537_s30 + $0x36c] ss:$72 sps:$4 sm:$0xff]   ;;  %v1347_v11 = vld [vmem:[#allocation2 + $0x8] sm:$0xff]  ;;  %v20343_v14 = vld [vmem:[%s24537_s30 + $0x368] ss:$72 sps:$4 sm:$0xff]   ;;  %vm23851_vm0 = vmmov 0  }
 0x392   : > { %v1353_v12 = vld [vmem:[#allocation2 + $0x38] sm:$0xff]  ;;  %v20344_v15 = vld [vmem:[%s24537_s30 + $0x3fc] ss:$72 sps:$4 sm:$0xff]   ;;  %v20346_v16 = vld [vmem:[%s24537_s30 + $0x3f8] ss:$72 sps:$4 sm:$0xff]   ;;  %s27348_s16 = sld [smem:[#allocation43_spill]] }
 0x393   : > { %6776 = vmatpush1.bf16.msra.mxu1 %v20328_v1  ;;  %v24679_v13 = vpack.c.bf16 %v1353_v12, %v1347_v11  ;;  %v20347_v17 = vld [vmem:[%s24537_s30 + $0x48c] ss:$72 sps:$4 sm:$0xff]   ;;  %v20349_v18 = vld [vmem:[%s24537_s30 + $0x488] ss:$72 sps:$4 sm:$0xff]   ;;  %v20350_v19 = vld [vmem:[%s24537_s30 + $0x51c] ss:$72 sps:$4 sm:$0xff]  }
 0x394   : > { %6777 = vmatprep.subr.bf16.mxu1 %v20329_v2  ;;  %v20352_v20 = vld [vmem:[%s24537_s30 + $0x518] ss:$72 sps:$4 sm:$0xff]   ;;  %v20353_v21 = vld [vmem:[%s24537_s30 + $0x5ac] ss:$72 sps:$4 sm:$0xff]   ;;  %v20355_v22 = vld [vmem:[%s24537_s30 + $0x5a8] ss:$72 sps:$4 sm:$0xff]  }
 0x395   : > { %6805 = vmatprep.mubr.bf16.mxu1 %v24679_v13  ;;  %6676 = vmatprep.mubr.bf16.mxu0 %v24679_v13  ;;  %v20356_v23 = vld [vmem:[%s24537_s30 + $0x63c] ss:$72 sps:$4 sm:$0xff]   ;;  %v20358_v27 = vld [vmem:[%s24537_s30 + $0x638] ss:$72 sps:$4 sm:$0xff]   ;;  %v20359_v29 = vld [vmem:[%s24537_s30 + $0x6cc] ss:$72 sps:$4 sm:$0xff]  }
 0x396   : > { %v20361_v30 = vld [vmem:[%s24537_s30 + $0x6c8] ss:$72 sps:$4 sm:$0xff]   ;;  %v20362_v31 = vld [vmem:[%s24537_s30 + $0x75c] ss:$72 sps:$4 sm:$0xff]   ;;  %v20364_v33 = vld [vmem:[%s24537_s30 + $0x758] ss:$72 sps:$4 sm:$0xff]  }
 0x397   : > { %6778 = vmatpush1.bf16.msra.mxu1 %v20331_v3  ;;  %v20365_v34 = vld [vmem:[%s24537_s30 + $0x7ec] ss:$72 sps:$4 sm:$0xff]   ;;  %v20367_v39 = vld [vmem:[%s24537_s30 + $0x7e8] ss:$72 sps:$4 sm:$0xff]   ;;  %v20368_v40 = vld [vmem:[%s24537_s30 + $0x87c] ss:$72 sps:$4 sm:$0xff]  }
 0x398   : > { %6779 = vmatprep.subr.bf16.mxu1 %v20332_v4  ;;  %v20370_v42 = vld [vmem:[%s24537_s30 + $0x878] ss:$72 sps:$4 sm:$0xff]   ;;  %v20373_v43 = vld [vmem:[%s24537_s30 + $0x90c] ss:$72 sps:$4 sm:$0xff]   ;;  %v1352_v45 = vld [vmem:[#allocation2 + $0x30] sm:$0xff]  ;;  %vm7870_vm1 = vcmask 64512  }
 0x399   : > { %v1346_v44 = vld [vmem:[#allocation2] sm:$0xff]  ;;  %v1349_v47 = vld [vmem:[#allocation2 + $0x18] sm:$0xff]  ;;  %v1355_v48 = vld [vmem:[#allocation2 + $0x48] sm:$0xff]  ;;  %vm7886_vm2 = vcmask 1043456  }
 0x39a   : > { %v24703_v49 = vpack.c.bf16 %v1352_v45, %v1346_v44  ;;  %v20371_v24 = vld [vmem:[%s24537_s30 + $0x908] ss:$72 sps:$4 sm:$0xff]   ;;  %v24706_v50 = vpack.c.bf16 %v1355_v48, %v1349_v47  ;;  %v20376_v25 = vld [vmem:[%s24537_s30 + $0x99c] ss:$72 sps:$4 sm:$0xff]   ;;  %v20374_v26 = vld [vmem:[%s24537_s30 + $0x998] ss:$72 sps:$4 sm:$0xff]  }
 0x39b   : > { %6780 = vmatpush1.bf16.msra.mxu1 %v20334_v5  ;;  %v20464_v52 = vld [vmem:[%s24537_s30 + $0x4] ss:$72 sps:$4 sm:$0xff]   ;;  %v20469_v28 = vld [vmem:[%s24537_s30] ss:$72 sps:$4 sm:$0xff]   ;;  %v20470_v32 = vld [vmem:[%s24537_s30 + $0x94] ss:$72 sps:$4 sm:$0xff]  }
 0x39c   : > { %6781 = vmatprep.subr.bf16.mxu1 %v20335_v6  ;;  %v20379_v53 = vld [vmem:[%s24537_s30 + $0xa2c] ss:$72 sps:$4 sm:$0xff]   ;;  %6644 = vmatprep.subr.bf16.mxu0 %v20464_v52  ;;  %v20377_v38 = vld [vmem:[%s24537_s30 + $0xa28] ss:$72 sps:$4 sm:$0xff]   ;;  %v20382_v54 = vld [vmem:[%s24537_s30 + $0xabc] ss:$72 sps:$4 sm:$0xff]  }
 0x39d   : > { %6645 = vmatpush1.bf16.msra.mxu0 %v20469_v28  ;;  %v20475_v55 = vld [vmem:[%s24537_s30 + $0x90] ss:$72 sps:$4 sm:$0xff]   ;;  %v20476_v56 = vld [vmem:[%s24537_s30 + $0x124] ss:$72 sps:$4 sm:$0xff]   ;;  %v20481_v58 = vld [vmem:[%s24537_s30 + $0x120] ss:$72 sps:$4 sm:$0xff]  }
 0x39e   : > { %6646 = vmatprep.subr.bf16.mxu0 %v20470_v32  ;;  %v20380_v57 = vld [vmem:[%s24537_s30 + $0xab8] ss:$72 sps:$4 sm:$0xff]   ;;  %v20482_v35 = vld [vmem:[%s24537_s30 + $0x1b4] ss:$72 sps:$4 sm:$0xff]   ;;  %v20488_v60 = vld [vmem:[%s24537_s30 + $0x244] ss:$72 sps:$4 sm:$0xff]  }
 0x39f   : > { %6782 = vmatpush1.bf16.msra.mxu1 %v20337_v7  ;;  %v20385_v59 = vld [vmem:[%s24537_s30 + $0xb4c] ss:$72 sps:$4 sm:$0xff]   ;;  %v20487_v36 = vld [vmem:[%s24537_s30 + $0x1b0] ss:$72 sps:$4 sm:$0xff]   ;;  %v20388_v62 = vld [vmem:[%s24537_s30 + $0xbdc] ss:$72 sps:$4 sm:$0xff]  }
 0x3a0   : > { %6783 = vmatprep.subr.bf16.mxu1 %v20338_v8  ;;  %v20383_v61 = vld [vmem:[%s24537_s30 + $0xb48] ss:$72 sps:$4 sm:$0xff]   ;;  %v20494_v0 = vld [vmem:[%s24537_s30 + $0x2d4] ss:$72 sps:$4 sm:$0xff]   ;;  %v20386_v37 = vld [vmem:[%s24537_s30 + $0xbd8] ss:$72 sps:$4 sm:$0xff]  }
 0x3a1   : > { %6647 = vmatpush1.bf16.msra.mxu0 %v20475_v55  ;;  %v20493_v63 = vld [vmem:[%s24537_s30 + $0x240] ss:$72 sps:$4 sm:$0xff]   ;;  %v20391_v41 = vld [vmem:[%s24537_s30 + $0xc6c] ss:$72 sps:$4 sm:$0xff]   ;;  %v20499_v46 = vld [vmem:[%s24537_s30 + $0x2d0] ss:$72 sps:$4 sm:$0xff]  }
 0x3a2   : > { %6648 = vmatprep.subr.bf16.mxu0 %v20476_v56  ;;  %v20500_v51 = vld [vmem:[%s24537_s30 + $0x364] ss:$72 sps:$4 sm:$0xff]   ;;  %v20389_v1 = vld [vmem:[%s24537_s30 + $0xc68] ss:$72 sps:$4 sm:$0xff]   ;;  %v20506_v4 = vld [vmem:[%s24537_s30 + $0x3f4] ss:$72 sps:$4 sm:$0xff]  }
 0x3a3   : > { %6784 = vmatpush1.bf16.msra.mxu1 %v20340_v9  ;;  %v20394_v2 = vld [vmem:[%s24537_s30 + $0xcfc] ss:$72 sps:$4 sm:$0xff]   ;;  %v20505_v3 = vld [vmem:[%s24537_s30 + $0x360] ss:$72 sps:$4 sm:$0xff]   ;;  %v20397_v6 = vld [vmem:[%s24537_s30 + $0xd8c] ss:$72 sps:$4 sm:$0xff]  }
 0x3a4   : > { %6785 = vmatprep.subr.bf16.mxu1 %v20341_v10  ;;  %v20392_v5 = vld [vmem:[%s24537_s30 + $0xcf8] ss:$72 sps:$4 sm:$0xff]   ;;  %v20512_v8 = vld [vmem:[%s24537_s30 + $0x484] ss:$72 sps:$4 sm:$0xff]   ;;  %v20395_v9 = vld [vmem:[%s24537_s30 + $0xd88] ss:$72 sps:$4 sm:$0xff]  }
 0x3a5   : > { %6649 = vmatpush1.bf16.msra.mxu0 %v20481_v58  ;;  %v20511_v7 = vld [vmem:[%s24537_s30 + $0x3f0] ss:$72 sps:$4 sm:$0xff]   ;;  %v20400_v10 = vld [vmem:[%s24537_s30 + $0xe1c] ss:$72 sps:$4 sm:$0xff]   ;;  %v20517_v11 = vld [vmem:[%s24537_s30 + $0x480] ss:$72 sps:$4 sm:$0xff]  }
 0x3a6   : > { %6650 = vmatprep.subr.bf16.mxu0 %v20482_v35  ;;  %v20518_v12 = vld [vmem:[%s24537_s30 + $0x514] ss:$72 sps:$4 sm:$0xff]   ;;  %v20413_v44 = vld [vmem:[%s24537_s30 + $0x10e8] ss:$72 sps:$4 sm:$0xff]  }
 0x3a7   : > { %6786 = vmatpush1.bf16.msra.mxu1 %v20343_v14  ;;  %v20398_v14 = vld [vmem:[%s24537_s30 + $0xe18] ss:$72 sps:$4 sm:$0xff]   ;;  %v20418_v45 = vld [vmem:[%s24537_s30 + $0x117c] ss:$72 sps:$4 sm:$0xff]   ;;  %v20419_v55 = vld [vmem:[%s24537_s30 + $0x1208] ss:$72 sps:$4 sm:$0xff]  }
 0x3a8   : > { %6787 = vmatprep.subr.bf16.mxu1 %v20344_v15  ;;  %v20403_v15 = vld [vmem:[%s24537_s30 + $0xeac] ss:$72 sps:$4 sm:$0xff]   ;;  %v20553_v47 = vld [vmem:[%s24537_s30 + $0x7e0] ss:$72 sps:$4 sm:$0xff]   ;;  %v20559_v32 = vld [vmem:[%s24537_s30 + $0x870] ss:$72 sps:$4 sm:$0xff]  }
 0x3a9   : > { %6651 = vmatpush1.bf16.msra.mxu0 %v20487_v36  ;;  %v20554_v48 = vld [vmem:[%s24537_s30 + $0x874] ss:$72 sps:$4 sm:$0xff]   ;;  %v20560_v58 = vld [vmem:[%s24537_s30 + $0x900] ss:$72 sps:$4 sm:$0xff]  }
 0x3aa   : > { %6652 = vmatprep.subr.bf16.mxu0 %v20488_v60  ;;  %v1354_v52 = vld [vmem:[#allocation2 + $0x40] sm:$0xff]  ;;  %v1351_v28 = vld [vmem:[#allocation2 + $0x28] sm:$0xff] }
 0x3ab   : > { %6788 = vmatpush1.bf16.msra.mxu1 %v20346_v16  ;;  %v20523_v16 = vld [vmem:[%s24537_s30 + $0x510] ss:$72 sps:$4 sm:$0xff]   ;;  %v20424_v56 = vld [vmem:[%s24537_s30 + $0x129c] ss:$72 sps:$4 sm:$0xff]   ;;  %v20427_v36 = vld [vmem:[%s24537_s30 + $0x132c] ss:$72 sps:$4 sm:$0xff]  }
 0x3ac   : > { %6789 = vmatprep.subr.bf16.mxu1 %v20347_v17  ;;  %v20524_v17 = vld [vmem:[%s24537_s30 + $0x5a4] ss:$72 sps:$4 sm:$0xff]   ;;  %v20568_v35 = vld [vmem:[%s24537_s30 + $0x994] ss:$72 sps:$4 sm:$0xff]   ;;  %v20566_v60 = vld [vmem:[%s24537_s30 + $0x990] ss:$72 sps:$4 sm:$0xff]  }
 0x3ad   : > { %6653 = vmatpush1.bf16.msra.mxu0 %v20493_v63  ;;  %v20430_v63 = vld [vmem:[%s24537_s30 + $0x13bc] ss:$72 sps:$4 sm:$0xff]  }
 0x3ae   : > { %6654 = vmatprep.subr.bf16.mxu0 %v20494_v0  ;;  %v20572_v0 = vld [vmem:[%s24537_s30 + $0xa20] ss:$72 sps:$4 sm:$0xff]  }
 0x3af   : > { %6790 = vmatpush1.bf16.msra.mxu1 %v20349_v18  ;;  %v20401_v18 = vld [vmem:[%s24537_s30 + $0xea8] ss:$72 sps:$4 sm:$0xff]  }
 0x3b0   : > { %6791 = vmatprep.subr.bf16.mxu1 %v20350_v19  ;;  %v20406_v19 = vld [vmem:[%s24537_s30 + $0xf3c] ss:$72 sps:$4 sm:$0xff]  }
 0x3b1   : > { %6655 = vmatpush1.bf16.msra.mxu0 %v20499_v46  ;;  %v20433_v46 = vld [vmem:[%s24537_s30 + $0x144c] ss:$72 sps:$4 sm:$0xff]  }
 0x3b2   : > { %6656 = vmatprep.subr.bf16.mxu0 %v20500_v51  ;;  %v20578_v51 = vld [vmem:[%s24537_s30 + $0xab0] ss:$72 sps:$4 sm:$0xff]  }
 0x3b3   : > { %6792 = vmatpush1.bf16.msra.mxu1 %v20352_v20  ;;  %v20529_v20 = vld [vmem:[%s24537_s30 + $0x5a0] ss:$72 sps:$4 sm:$0xff]  }
 0x3b4   : > { %6793 = vmatprep.subr.bf16.mxu1 %v20353_v21  ;;  %v20530_v21 = vld [vmem:[%s24537_s30 + $0x634] ss:$72 sps:$4 sm:$0xff]  }
 0x3b5   : > { %6657 = vmatpush1.bf16.msra.mxu0 %v20505_v3  ;;  %v20436_v3 = vld [vmem:[%s24537_s30 + $0x14dc] ss:$72 sps:$4 sm:$0xff]  }
 0x3b6   : > { %6658 = vmatprep.subr.bf16.mxu0 %v20506_v4  ;;  %v20584_v4 = vld [vmem:[%s24537_s30 + $0xb40] ss:$72 sps:$4 sm:$0xff]  }
 0x3b7   : > { %6794 = vmatpush1.bf16.msra.mxu1 %v20355_v22  ;;  %v20404_v22 = vld [vmem:[%s24537_s30 + $0xf38] ss:$72 sps:$4 sm:$0xff]  }
 0x3b8   : > { %6795 = vmatprep.subr.bf16.mxu1 %v20356_v23  ;;  %v20409_v23 = vld [vmem:[%s24537_s30 + $0xfcc] ss:$72 sps:$4 sm:$0xff]  }
 0x3b9   : > { %6659 = vmatpush1.bf16.msra.mxu0 %v20511_v7  ;;  %v20439_v7 = vld [vmem:[%s24537_s30 + $0x156c] ss:$72 sps:$4 sm:$0xff]  }
 0x3ba   : > { %6660 = vmatprep.subr.bf16.mxu0 %v20512_v8  ;;  %v20590_v8 = vld [vmem:[%s24537_s30 + $0xbd0] ss:$72 sps:$4 sm:$0xff]  }
 0x3bb   : > { %6796 = vmatpush1.bf16.msra.mxu1 %v20358_v27  ;;  %v20535_v27 = vld [vmem:[%s24537_s30 + $0x630] ss:$72 sps:$4 sm:$0xff]  }
 0x3bc   : > { %6797 = vmatprep.subr.bf16.mxu1 %v20359_v29  ;;  %v20536_v29 = vld [vmem:[%s24537_s30 + $0x6c4] ss:$72 sps:$4 sm:$0xff]  }
 0x3bd   : > { %6661 = vmatpush1.bf16.msra.mxu0 %v20517_v11  ;;  %v20442_v11 = vld [vmem:[%s24537_s30 + $0x15fc] ss:$72 sps:$4 sm:$0xff]  }
 0x3be   : > { %6662 = vmatprep.subr.bf16.mxu0 %v20518_v12  ;;  %v20596_v12 = vld [vmem:[%s24537_s30 + $0xc60] ss:$72 sps:$4 sm:$0xff]  }
 0x3bf   : > { %6798 = vmatpush1.bf16.msra.mxu1 %v20361_v30  ;;  %v20407_v30 = vld [vmem:[%s24537_s30 + $0xfc8] ss:$72 sps:$4 sm:$0xff]  }
 0x3c0   : > { %6799 = vmatprep.subr.bf16.mxu1 %v20362_v31  ;;  %v20412_v31 = vld [vmem:[%s24537_s30 + $0x105c] ss:$72 sps:$4 sm:$0xff]  }
 0x3c1   : > { %6663 = vmatpush1.bf16.msra.mxu0 %v20523_v16  ;;  %v20445_v16 = vld [vmem:[%s24537_s30 + $0x168c] ss:$72 sps:$4 sm:$0xff]  }
 0x3c2   : > { %6664 = vmatprep.subr.bf16.mxu0 %v20524_v17  ;;  %v20602_v17 = vld [vmem:[%s24537_s30 + $0xcf0] ss:$72 sps:$4 sm:$0xff]  }
 0x3c3   : > { %6800 = vmatpush1.bf16.msra.mxu1 %v20364_v33  ;;  %v20541_v33 = vld [vmem:[%s24537_s30 + $0x6c0] ss:$72 sps:$4 sm:$0xff]  }
 0x3c4   : > { %6801 = vmatprep.subr.bf16.mxu1 %v20365_v34  ;;  %v20542_v34 = vld [vmem:[%s24537_s30 + $0x754] ss:$72 sps:$4 sm:$0xff]  }
 0x3c5   : > { %6665 = vmatpush1.bf16.msra.mxu0 %v20529_v20  ;;  %v20448_v20 = vld [vmem:[%s24537_s30 + $0x171c] ss:$72 sps:$4 sm:$0xff]  }
 0x3c6   : > { %6666 = vmatprep.subr.bf16.mxu0 %v20530_v21  ;;  %v20608_v21 = vld [vmem:[%s24537_s30 + $0xd80] ss:$72 sps:$4 sm:$0xff]  }
 0x3c7   : > { %6802 = vmatpush1.bf16.msra.mxu1 %v20367_v39  ;;  %v20410_v39 = vld [vmem:[%s24537_s30 + $0x1058] ss:$72 sps:$4 sm:$0xff]  }
 0x3c8   : > { %6803 = vmatprep.subr.bf16.mxu1 %v20368_v40  ;;  %v20415_v40 = vld [vmem:[%s24537_s30 + $0x10ec] ss:$72 sps:$4 sm:$0xff]  }
 0x3c9   : > { %6667 = vmatpush1.bf16.msra.mxu0 %v20535_v27  ;;  %v20451_v27 = vld [vmem:[%s24537_s30 + $0x17ac] ss:$72 sps:$4 sm:$0xff]  }
 0x3ca   : > { %6668 = vmatprep.subr.bf16.mxu0 %v20536_v29  ;;  %v20614_v29 = vld [vmem:[%s24537_s30 + $0xe10] ss:$72 sps:$4 sm:$0xff]  }
 0x3cb   : > { %6804 = vmatpush1.bf16.msra.mxu1 %v20370_v42  ;;  %v20547_v42 = vld [vmem:[%s24537_s30 + $0x750] ss:$72 sps:$4 sm:$0xff]  }
 0x3cc   : > { %6816 = vmatprep.subr.bf16.mxu1 %v20373_v43  ;;  %v20548_v43 = vld [vmem:[%s24537_s30 + $0x7e4] ss:$72 sps:$4 sm:$0xff]  }
 0x3cd   : > { %6669 = vmatpush1.bf16.msra.mxu0 %v20541_v33  ;;  %v20454_v33 = vld [vmem:[%s24537_s30 + $0x183c] ss:$72 sps:$4 sm:$0xff]  }
 0x3ce   : > { %6806 = vmatmul.mubr.bf16.vlgmr.msra.gmra.mrb[0].mxu1 %v24703_v49  ;;  %6670 = vmatprep.subr.bf16.mxu0 %v20542_v34  ;;  %v20620_v34 = vld [vmem:[%s24537_s30 + $0xea0] ss:$72 sps:$4 sm:$0xff]  }
 0x3cf   : > { %6817 = vmatpush1.bf16.msra.mxu1 %v20371_v24  ;;  %6848 = vmatprep.mubr.bf16.mxu1 %v24706_v50  ;;  %v20416_v24 = vld [vmem:[%s24537_s30 + $0x1178] ss:$72 sps:$4 sm:$0xff]  }
 0x3d0   : > { %6818 = vmatprep.subr.bf16.mxu1 %v20376_v25  ;;  %v1348_v25 = vld [vmem:[#allocation2 + $0x10] sm:$0xff] }
 0x3d1   : > { %6671 = vmatpush1.bf16.msra.mxu0 %v20547_v42  ;;  %v20457_v42 = vld [vmem:[%s24537_s30 + $0x18cc] ss:$72 sps:$4 sm:$0xff]  }
 0x3d2   : > { %6672 = vmatprep.subr.bf16.mxu0 %v20548_v43  ;;  %v20626_v43 = vld [vmem:[%s24537_s30 + $0xf30] ss:$72 sps:$4 sm:$0xff]  }
 0x3d3   : > { %6819 = vmatpush1.bf16.msra.mxu1 %v20374_v26  ;;  %v20421_v26 = vld [vmem:[%s24537_s30 + $0x120c] ss:$72 sps:$4 sm:$0xff]  }
 0x3d4   : > { %6820 = vmatprep.subr.bf16.mxu1 %v20379_v53  ;;  %v1357_v53 = vld [vmem:[#allocation2 + $0x58] sm:$0xff] }
 0x3d5   : > { %6673 = vmatpush1.bf16.msra.mxu0 %v20553_v47  ;;  %v20460_v47 = vld [vmem:[%s24537_s30 + $0x195c] ss:$72 sps:$4 sm:$0xff]  }
 0x3d6   : > { %6674 = vmatprep.subr.bf16.mxu0 %v20554_v48  ;;  %v20632_v48 = vld [vmem:[%s24537_s30 + $0xfc0] ss:$72 sps:$4 sm:$0xff]  }
 0x3d7   : > { %6821 = vmatpush1.bf16.msra.mxu1 %v20377_v38  ;;  %v20562_v38 = vld [vmem:[%s24537_s30 + $0x904] ss:$72 sps:$4 sm:$0xff]  }
 0x3d8   : > { %6822 = vmatprep.subr.bf16.mxu1 %v20382_v54  ;;  %v24774_v54 = vpack.c.bf16 %v1354_v52, %v1348_v25  ;;  %v20458_v25 = vld [vmem:[%s24537_s30 + $0x1958] ss:$72 sps:$4 sm:$0xff]   ;;  %v20463_v52 = vld [vmem:[%s24537_s30 + $0x19ec] ss:$72 sps:$4 sm:$0xff]  }
 0x3d9   : > { %6675 = vmatpush1.bf16.msra.mxu0 %v20559_v32  ;;  %v20468_v32 = vld [vmem:[%s24537_s30 + $0x1a7c] ss:$72 sps:$4 sm:$0xff]  }
 0x3da   : > { %6687 = vmatprep.subr.bf16.mxu0 %v20562_v38  ;;  %v20644_v38 = vld [vmem:[%s24537_s30 + $0x10e0] ss:$72 sps:$4 sm:$0xff]  }
 0x3db   : > { %6823 = vmatpush1.bf16.msra.mxu1 %v20380_v57  ;;  %v24778_v57 = vpack.c.bf16 %v1357_v53, %v1351_v28  ;;  %v20646_v28 = vld [vmem:[%s24537_s30 + $0x10e4] ss:$72 sps:$4 sm:$0xff]   ;;  %v20461_v53 = vld [vmem:[%s24537_s30 + $0x19e8] ss:$72 sps:$4 sm:$0xff]  }
 0x3dc   : > { %6824 = vmatprep.subr.bf16.mxu1 %v20385_v59  ;;  %v20422_v59 = vld [vmem:[%s24537_s30 + $0x1298] ss:$72 sps:$4 sm:$0xff]   ;;  %6677 = vmatmul.mubr.bf16.vlgmr.msra.gmra.mrb[0].mxu0 %v24703_v49 }
 0x3dd   : > { %6688 = vmatpush1.bf16.msra.mxu0 %v20560_v58  ;;  %6719 = vmatprep.mubr.bf16.mxu0 %v24706_v50  ;;  %v1350_v58 = vld [vmem:[#allocation2 + $0x20] sm:$0xff] }
 0x3de   : > { %6689 = vmatprep.subr.bf16.mxu0 %v20568_v35  ;;  %v1356_v35 = vld [vmem:[#allocation2 + $0x50] sm:$0xff] }
 0x3df   : > { %6825 = vmatpush1.bf16.msra.mxu1 %v20383_v61  ;;  %v20574_v61 = vld [vmem:[%s24537_s30 + $0xa24] ss:$72 sps:$4 sm:$0xff]  }
 0x3e0   : > { %6826 = vmatprep.subr.bf16.mxu1 %v20388_v62  ;;  %v20425_v62 = vld [vmem:[%s24537_s30 + $0x1328] ss:$72 sps:$4 sm:$0xff]  }
 0x3e1   : > { %6690 = vmatpush1.bf16.msra.mxu0 %v20566_v60  ;;  %v20658_v60 = vld [vmem:[%s24537_s30 + $0x1204] ss:$72 sps:$4 sm:$0xff]  }
 0x3e2   : > { %6691 = vmatprep.subr.bf16.mxu0 %v20574_v61  ;;  %v24846_v61 = vpack.c.bf16 %v1356_v35, %v1350_v58  ;;  %v20558_v58 = vld [vmem:[%s24537_s30 + $0x7fc] ss:$72 sps:$4 sm:$0xff]   ;;  %v20734_v35 = vld [vmem:[%s24537_s30 + $0x1950] ss:$72 sps:$4 sm:$0xff]  }
 0x3e3   : > { %6827 = vmatpush1.bf16.msra.mxu1 %v20386_v37  ;;  %v20580_v37 = vld [vmem:[%s24537_s30 + $0xab4] ss:$72 sps:$4 sm:$0xff]  }
 0x3e4   : > { %6828 = vmatprep.subr.bf16.mxu1 %v20391_v41  ;;  %v20428_v41 = vld [vmem:[%s24537_s30 + $0x13b8] ss:$72 sps:$4 sm:$0xff]  }
 0x3e5   : > { %6692 = vmatpush1.bf16.msra.mxu0 %v20572_v0  ;;  %v20656_v0 = vld [vmem:[%s24537_s30 + $0x1200] ss:$72 sps:$4 sm:$0xff]  }
 0x3e6   : > { %6693 = vmatprep.subr.bf16.mxu0 %v20580_v37  ;;  %v20664_v37 = vld [vmem:[%s24537_s30 + $0x1294] ss:$72 sps:$4 sm:$0xff]  }
 0x3e7   : > { %6829 = vmatpush1.bf16.msra.mxu1 %v20389_v1  ;;  %v20586_v1 = vld [vmem:[%s24537_s30 + $0xb44] ss:$72 sps:$4 sm:$0xff]  }
 0x3e8   : > { %6830 = vmatprep.subr.bf16.mxu1 %v20394_v2  ;;  %v20431_v2 = vld [vmem:[%s24537_s30 + $0x1448] ss:$72 sps:$4 sm:$0xff]  }
 0x3e9   : > { %6694 = vmatpush1.bf16.msra.mxu0 %v20578_v51  ;;  %v20662_v51 = vld [vmem:[%s24537_s30 + $0x1290] ss:$72 sps:$4 sm:$0xff]  }
 0x3ea   : > { %6695 = vmatprep.subr.bf16.mxu0 %v20586_v1  ;;  %v20670_v1 = vld [vmem:[%s24537_s30 + $0x1324] ss:$72 sps:$4 sm:$0xff]  }
 0x3eb   : > { %6831 = vmatpush1.bf16.msra.mxu1 %v20392_v5  ;;  %v20592_v5 = vld [vmem:[%s24537_s30 + $0xbd4] ss:$72 sps:$4 sm:$0xff]  }
 0x3ec   : > { %6832 = vmatprep.subr.bf16.mxu1 %v20397_v6  ;;  %v20434_v6 = vld [vmem:[%s24537_s30 + $0x14d8] ss:$72 sps:$4 sm:$0xff]  }
 0x3ed   : > { %6696 = vmatpush1.bf16.msra.mxu0 %v20584_v4  ;;  %v20668_v4 = vld [vmem:[%s24537_s30 + $0x1320] ss:$72 sps:$4 sm:$0xff]  }
 0x3ee   : > { %6697 = vmatprep.subr.bf16.mxu0 %v20592_v5  ;;  %v20676_v5 = vld [vmem:[%s24537_s30 + $0x13b4] ss:$72 sps:$4 sm:$0xff]  }
 0x3ef   : > { %6833 = vmatpush1.bf16.msra.mxu1 %v20395_v9  ;;  %v20598_v9 = vld [vmem:[%s24537_s30 + $0xc64] ss:$72 sps:$4 sm:$0xff]  }
 0x3f0   : > { %6834 = vmatprep.subr.bf16.mxu1 %v20400_v10  ;;  %v20437_v10 = vld [vmem:[%s24537_s30 + $0x1568] ss:$72 sps:$4 sm:$0xff]  }
 0x3f1   : > { %6698 = vmatpush1.bf16.msra.mxu0 %v20590_v8  ;;  %v20674_v8 = vld [vmem:[%s24537_s30 + $0x13b0] ss:$72 sps:$4 sm:$0xff]  }
 0x3f2   : > { %6699 = vmatprep.subr.bf16.mxu0 %v20598_v9  ;;  %v20682_v9 = vld [vmem:[%s24537_s30 + $0x1444] ss:$72 sps:$4 sm:$0xff]  }
 0x3f3   : > { %6835 = vmatpush1.bf16.msra.mxu1 %v20398_v14  ;;  %v20604_v14 = vld [vmem:[%s24537_s30 + $0xcf4] ss:$72 sps:$4 sm:$0xff]  }
 0x3f4   : > { %6836 = vmatprep.subr.bf16.mxu1 %v20403_v15  ;;  %v20440_v15 = vld [vmem:[%s24537_s30 + $0x15f8] ss:$72 sps:$4 sm:$0xff]  }
 0x3f5   : > { %6700 = vmatpush1.bf16.msra.mxu0 %v20596_v12  ;;  %v20680_v12 = vld [vmem:[%s24537_s30 + $0x1440] ss:$72 sps:$4 sm:$0xff]  }
 0x3f6   : > { %6701 = vmatprep.subr.bf16.mxu0 %v20604_v14  ;;  %v20688_v14 = vld [vmem:[%s24537_s30 + $0x14d4] ss:$72 sps:$4 sm:$0xff]  }
 0x3f7   : > { %6837 = vmatpush1.bf16.msra.mxu1 %v20401_v18  ;;  %v20610_v18 = vld [vmem:[%s24537_s30 + $0xd84] ss:$72 sps:$4 sm:$0xff]  }
 0x3f8   : > { %6838 = vmatprep.subr.bf16.mxu1 %v20406_v19  ;;  %v20443_v19 = vld [vmem:[%s24537_s30 + $0x1688] ss:$72 sps:$4 sm:$0xff]  }
 0x3f9   : > { %6702 = vmatpush1.bf16.msra.mxu0 %v20602_v17  ;;  %v20686_v17 = vld [vmem:[%s24537_s30 + $0x14d0] ss:$72 sps:$4 sm:$0xff]  }
 0x3fa   : > { %6703 = vmatprep.subr.bf16.mxu0 %v20610_v18  ;;  %v20694_v18 = vld [vmem:[%s24537_s30 + $0x1564] ss:$72 sps:$4 sm:$0xff]  }
 0x3fb   : > { %6839 = vmatpush1.bf16.msra.mxu1 %v20404_v22  ;;  %v20616_v22 = vld [vmem:[%s24537_s30 + $0xe14] ss:$72 sps:$4 sm:$0xff]  }
 0x3fc   : > { %6840 = vmatprep.subr.bf16.mxu1 %v20409_v23  ;;  %v20446_v23 = vld [vmem:[%s24537_s30 + $0x1718] ss:$72 sps:$4 sm:$0xff]  }
 0x3fd   : > { %6704 = vmatpush1.bf16.msra.mxu0 %v20608_v21  ;;  %v20692_v21 = vld [vmem:[%s24537_s30 + $0x1560] ss:$72 sps:$4 sm:$0xff]  }
 0x3fe   : > { %6705 = vmatprep.subr.bf16.mxu0 %v20616_v22  ;;  %v20700_v22 = vld [vmem:[%s24537_s30 + $0x15f4] ss:$72 sps:$4 sm:$0xff]  }
 0x3ff   : > { %6841 = vmatpush1.bf16.msra.mxu1 %v20407_v30  ;;  %v20622_v30 = vld [vmem:[%s24537_s30 + $0xea4] ss:$72 sps:$4 sm:$0xff]  }
 0x400   : > { %6842 = vmatprep.subr.bf16.mxu1 %v20412_v31  ;;  %v20449_v31 = vld [vmem:[%s24537_s30 + $0x17a8] ss:$72 sps:$4 sm:$0xff]  }
 0x401   : > { %6706 = vmatpush1.bf16.msra.mxu0 %v20614_v29  ;;  %v20698_v29 = vld [vmem:[%s24537_s30 + $0x15f0] ss:$72 sps:$4 sm:$0xff]  }
 0x402   : > { %6707 = vmatprep.subr.bf16.mxu0 %v20622_v30  ;;  %v20706_v30 = vld [vmem:[%s24537_s30 + $0x1684] ss:$72 sps:$4 sm:$0xff]  }
 0x403   : > { %6843 = vmatpush1.bf16.msra.mxu1 %v20410_v39  ;;  %v20628_v39 = vld [vmem:[%s24537_s30 + $0xf34] ss:$72 sps:$4 sm:$0xff]  }
 0x404   : > { %6844 = vmatprep.subr.bf16.mxu1 %v20415_v40  ;;  %v20452_v40 = vld [vmem:[%s24537_s30 + $0x1838] ss:$72 sps:$4 sm:$0xff]  }
 0x405   : > { %6708 = vmatpush1.bf16.msra.mxu0 %v20620_v34  ;;  %v20704_v34 = vld [vmem:[%s24537_s30 + $0x1680] ss:$72 sps:$4 sm:$0xff]  }
 0x406   : > { %6709 = vmatprep.subr.bf16.mxu0 %v20628_v39  ;;  %v20712_v39 = vld [vmem:[%s24537_s30 + $0x1714] ss:$72 sps:$4 sm:$0xff]  }
 0x407   : > { %6845 = vmatpush1.bf16.msra.mxu1 %v20413_v44  ;;  %v20634_v44 = vld [vmem:[%s24537_s30 + $0xfc4] ss:$72 sps:$4 sm:$0xff]  }
 0x408   : > { %6846 = vmatprep.subr.bf16.mxu1 %v20418_v45  ;;  %v20455_v45 = vld [vmem:[%s24537_s30 + $0x18c8] ss:$72 sps:$4 sm:$0xff]  }
 0x409   : > { %6710 = vmatpush1.bf16.msra.mxu0 %v20626_v43  ;;  %v20710_v43 = vld [vmem:[%s24537_s30 + $0x1710] ss:$72 sps:$4 sm:$0xff]  }
 0x40a   : > { %6711 = vmatprep.subr.bf16.mxu0 %v20634_v44  ;;  %v20718_v44 = vld [vmem:[%s24537_s30 + $0x17a4] ss:$72 sps:$4 sm:$0xff]  }
 0x40b   : > { %6847 = vmatpush1.bf16.msra.mxu1 %v20416_v24  ;;  %v20640_v24 = vld [vmem:[%s24537_s30 + $0x1054] ss:$72 sps:$4 sm:$0xff]  }
 0x40c   : > { %6859 = vmatprep.subr.bf16.mxu1 %v20421_v26  ;;  %v20638_v26 = vld [vmem:[%s24537_s30 + $0x1050] ss:$72 sps:$4 sm:$0xff]  }
 0x40d   : > { %6712 = vmatpush1.bf16.msra.mxu0 %v20632_v48  ;;  %v20716_v48 = vld [vmem:[%s24537_s30 + $0x17a0] ss:$72 sps:$4 sm:$0xff]  }
 0x40e   : > { %6849 = vmatmul.mubr.bf16.vlgmr.msra.gmra.mrb[0].mxu1 %v24774_v54  ;;  %6713 = vmatprep.subr.bf16.mxu0 %v20640_v24  ;;  %v20724_v24 = vld [vmem:[%s24537_s30 + $0x1834] ss:$72 sps:$4 sm:$0xff]  }
 0x40f   : > { %6860 = vmatpush1.bf16.msra.mxu1 %v20419_v55  ;;  %6891 = vmatprep.mubr.bf16.mxu1 %v24778_v57  ;;  %v20652_v55 = vld [vmem:[%s24537_s30 + $0x1174] ss:$72 sps:$4 sm:$0xff]  }
 0x410   : > { %6861 = vmatprep.subr.bf16.mxu1 %v20424_v56  ;;  %v20466_v56 = vld [vmem:[%s24537_s30 + $0x1a78] ss:$72 sps:$4 sm:$0xff]  }
 0x411   : > { %6714 = vmatpush1.bf16.msra.mxu0 %v20638_v26  ;;  %v20722_v26 = vld [vmem:[%s24537_s30 + $0x1830] ss:$72 sps:$4 sm:$0xff]  }
 0x412   : > { %6715 = vmatprep.subr.bf16.mxu0 %v20646_v28  ;;  %v20730_v28 = vld [vmem:[%s24537_s30 + $0x18c4] ss:$72 sps:$4 sm:$0xff]  }
 0x413   : > { %6862 = vmatpush1.bf16.msra.mxu1 %v20422_v59  ;;  %v20474_v59 = vld [vmem:[%s24537_s30 + $0x1c] ss:$72 sps:$4 sm:$0xff]  }
 0x414   : > { %6863 = vmatprep.subr.bf16.mxu1 %v20427_v36  ;;  %v20650_v36 = vld [vmem:[%s24537_s30 + $0x1170] ss:$72 sps:$4 sm:$0xff]  }
 0x415   : > { %6716 = vmatpush1.bf16.msra.mxu0 %v20644_v38  ;;  %v20728_v38 = vld [vmem:[%s24537_s30 + $0x18c0] ss:$72 sps:$4 sm:$0xff]  }
 0x416   : > { %6717 = vmatprep.subr.bf16.mxu0 %v20652_v55  ;;  %v20736_v55 = vld [vmem:[%s24537_s30 + $0x1954] ss:$72 sps:$4 sm:$0xff]  }
 0x417   : > { %6864 = vmatpush1.bf16.msra.mxu1 %v20425_v62  ;;  %v20472_v62 = vld [vmem:[%s24537_s30 + $0x18] ss:$72 sps:$4 sm:$0xff]  }
 0x418   : > { %6865 = vmatprep.subr.bf16.mxu1 %v20430_v63  ;;  %v20480_v63 = vld [vmem:[%s24537_s30 + $0xac] ss:$72 sps:$4 sm:$0xff]  }
 0x419   : > { %6718 = vmatpush1.bf16.msra.mxu0 %v20650_v36  ;;  %v20556_v36 = vld [vmem:[%s24537_s30 + $0x7f8] ss:$72 sps:$4 sm:$0xff]  }
 0x41a   : > { %6730 = vmatprep.subr.bf16.mxu0 %v20658_v60  ;;  %v20565_v60 = vld [vmem:[%s24537_s30 + $0x88c] ss:$72 sps:$4 sm:$0xff]  }
 0x41b   : > { %6866 = vmatpush1.bf16.msra.mxu1 %v20428_v41  ;;  %v20478_v41 = vld [vmem:[%s24537_s30 + $0xa8] ss:$72 sps:$4 sm:$0xff]  }
 0x41c   : > { %6867 = vmatprep.subr.bf16.mxu1 %v20433_v46  ;;  %v20486_v46 = vld [vmem:[%s24537_s30 + $0x13c] ss:$72 sps:$4 sm:$0xff]   ;;  %6720 = vmatmul.mubr.bf16.vlgmr.msra.gmra.mrb[0].mxu0 %v24774_v54 }
 0x41d   : > { %6731 = vmatpush1.bf16.msra.mxu0 %v20656_v0  ;;  %6762 = vmatprep.mubr.bf16.mxu0 %v24778_v57  ;;  %v20563_v0 = vld [vmem:[%s24537_s30 + $0x888] ss:$72 sps:$4 sm:$0xff]  }
 0x41e   : > { %6732 = vmatprep.subr.bf16.mxu0 %v20664_v37  ;;  %v20571_v37 = vld [vmem:[%s24537_s30 + $0x91c] ss:$72 sps:$4 sm:$0xff]  }
 0x41f   : > { %6868 = vmatpush1.bf16.msra.mxu1 %v20431_v2  ;;  %v20484_v2 = vld [vmem:[%s24537_s30 + $0x138] ss:$72 sps:$4 sm:$0xff]  }
 0x420   : > { %6869 = vmatprep.subr.bf16.mxu1 %v20436_v3  ;;  %v20492_v3 = vld [vmem:[%s24537_s30 + $0x1cc] ss:$72 sps:$4 sm:$0xff]  }
 0x421   : > { %6733 = vmatpush1.bf16.msra.mxu0 %v20662_v51  ;;  %v20569_v51 = vld [vmem:[%s24537_s30 + $0x918] ss:$72 sps:$4 sm:$0xff]  }
 0x422   : > { %6734 = vmatprep.subr.bf16.mxu0 %v20670_v1  ;;  %v20577_v1 = vld [vmem:[%s24537_s30 + $0x9ac] ss:$72 sps:$4 sm:$0xff]  }
 0x423   : > { %6870 = vmatpush1.bf16.msra.mxu1 %v20434_v6  ;;  %v20490_v6 = vld [vmem:[%s24537_s30 + $0x1c8] ss:$72 sps:$4 sm:$0xff]  }
 0x424   : > { %6871 = vmatprep.subr.bf16.mxu1 %v20439_v7  ;;  %v20498_v7 = vld [vmem:[%s24537_s30 + $0x25c] ss:$72 sps:$4 sm:$0xff]  }
 0x425   : > { %6735 = vmatpush1.bf16.msra.mxu0 %v20668_v4  ;;  %v20575_v4 = vld [vmem:[%s24537_s30 + $0x9a8] ss:$72 sps:$4 sm:$0xff]  }
 0x426   : > { %6736 = vmatprep.subr.bf16.mxu0 %v20676_v5  ;;  %v20583_v5 = vld [vmem:[%s24537_s30 + $0xa3c] ss:$72 sps:$4 sm:$0xff]  }
 0x427   : > { %6872 = vmatpush1.bf16.msra.mxu1 %v20437_v10  ;;  %v20496_v10 = vld [vmem:[%s24537_s30 + $0x258] ss:$72 sps:$4 sm:$0xff]  }
 0x428   : > { %6873 = vmatprep.subr.bf16.mxu1 %v20442_v11  ;;  %v20504_v11 = vld [vmem:[%s24537_s30 + $0x2ec] ss:$72 sps:$4 sm:$0xff]  }
 0x429   : > { %6737 = vmatpush1.bf16.msra.mxu0 %v20674_v8  ;;  %v20581_v8 = vld [vmem:[%s24537_s30 + $0xa38] ss:$72 sps:$4 sm:$0xff]  }
 0x42a   : > { %6738 = vmatprep.subr.bf16.mxu0 %v20682_v9  ;;  %v20589_v9 = vld [vmem:[%s24537_s30 + $0xacc] ss:$72 sps:$4 sm:$0xff]  }
 0x42b   : > { %6874 = vmatpush1.bf16.msra.mxu1 %v20440_v15  ;;  %v20502_v15 = vld [vmem:[%s24537_s30 + $0x2e8] ss:$72 sps:$4 sm:$0xff]  }
 0x42c   : > { %6875 = vmatprep.subr.bf16.mxu1 %v20445_v16  ;;  %v20510_v16 = vld [vmem:[%s24537_s30 + $0x37c] ss:$72 sps:$4 sm:$0xff]  }
 0x42d   : > { %6739 = vmatpush1.bf16.msra.mxu0 %v20680_v12  ;;  %v20587_v12 = vld [vmem:[%s24537_s30 + $0xac8] ss:$72 sps:$4 sm:$0xff]  }
 0x42e   : > { %6740 = vmatprep.subr.bf16.mxu0 %v20688_v14  ;;  %v20595_v14 = vld [vmem:[%s24537_s30 + $0xb5c] ss:$72 sps:$4 sm:$0xff]  }
 0x42f   : > { %6876 = vmatpush1.bf16.msra.mxu1 %v20443_v19  ;;  %v20508_v19 = vld [vmem:[%s24537_s30 + $0x378] ss:$72 sps:$4 sm:$0xff]  }
 0x430   : > { %6877 = vmatprep.subr.bf16.mxu1 %v20448_v20  ;;  %v20516_v20 = vld [vmem:[%s24537_s30 + $0x40c] ss:$72 sps:$4 sm:$0xff]  }
 0x431   : > { %6741 = vmatpush1.bf16.msra.mxu0 %v20686_v17  ;;  %v20593_v17 = vld [vmem:[%s24537_s30 + $0xb58] ss:$72 sps:$4 sm:$0xff]  }
 0x432   : > { %6742 = vmatprep.subr.bf16.mxu0 %v20694_v18  ;;  %v20601_v18 = vld [vmem:[%s24537_s30 + $0xbec] ss:$72 sps:$4 sm:$0xff]  }
 0x433   : > { %6878 = vmatpush1.bf16.msra.mxu1 %v20446_v23  ;;  %v20514_v23 = vld [vmem:[%s24537_s30 + $0x408] ss:$72 sps:$4 sm:$0xff]  }
 0x434   : > { %6879 = vmatprep.subr.bf16.mxu1 %v20451_v27  ;;  %v20522_v27 = vld [vmem:[%s24537_s30 + $0x49c] ss:$72 sps:$4 sm:$0xff]  }
 0x435   : > { %6743 = vmatpush1.bf16.msra.mxu0 %v20692_v21  ;;  %v20599_v21 = vld [vmem:[%s24537_s30 + $0xbe8] ss:$72 sps:$4 sm:$0xff]  }
 0x436   : > { %6744 = vmatprep.subr.bf16.mxu0 %v20700_v22  ;;  %v20607_v22 = vld [vmem:[%s24537_s30 + $0xc7c] ss:$72 sps:$4 sm:$0xff]  }
 0x437   : > { %6880 = vmatpush1.bf16.msra.mxu1 %v20449_v31  ;;  %v20520_v31 = vld [vmem:[%s24537_s30 + $0x498] ss:$72 sps:$4 sm:$0xff]  }
 0x438   : > { %6881 = vmatprep.subr.bf16.mxu1 %v20454_v33  ;;  %v20528_v33 = vld [vmem:[%s24537_s30 + $0x52c] ss:$72 sps:$4 sm:$0xff]  }
 0x439   : > { %6745 = vmatpush1.bf16.msra.mxu0 %v20698_v29  ;;  %v20790_v29 = vld [vmem:[%s24537_s30 + $0x374] ss:$72 sps:$4 sm:$0xff]  }
 0x43a   : > { %6746 = vmatprep.subr.bf16.mxu0 %v20706_v30  ;;  %v20613_v30 = vld [vmem:[%s24537_s30 + $0xd0c] ss:$72 sps:$4 sm:$0xff]  }
 0x43b   : > { %6882 = vmatpush1.bf16.msra.mxu1 %v20452_v40  ;;  %v20526_v40 = vld [vmem:[%s24537_s30 + $0x528] ss:$72 sps:$4 sm:$0xff]  }
 0x43c   : > { %6883 = vmatprep.subr.bf16.mxu1 %v20457_v42  ;;  %v20534_v42 = vld [vmem:[%s24537_s30 + $0x5bc] ss:$72 sps:$4 sm:$0xff]  }
 0x43d   : > { %6747 = vmatpush1.bf16.msra.mxu0 %v20704_v34  ;;  %v20796_v34 = vld [vmem:[%s24537_s30 + $0x404] ss:$72 sps:$4 sm:$0xff]  }
 0x43e   : > { %6748 = vmatprep.subr.bf16.mxu0 %v20712_v39  ;;  %v20619_v39 = vld [vmem:[%s24537_s30 + $0xd9c] ss:$72 sps:$4 sm:$0xff]  }
 0x43f   : > { %6884 = vmatpush1.bf16.msra.mxu1 %v20455_v45  ;;  %v20532_v45 = vld [vmem:[%s24537_s30 + $0x5b8] ss:$72 sps:$4 sm:$0xff]  }
 0x440   : > { %6885 = vmatprep.subr.bf16.mxu1 %v20460_v47  ;;  %v20540_v47 = vld [vmem:[%s24537_s30 + $0x64c] ss:$72 sps:$4 sm:$0xff]  }
 0x441   : > { %6749 = vmatpush1.bf16.msra.mxu0 %v20710_v43  ;;  %v20617_v43 = vld [vmem:[%s24537_s30 + $0xd98] ss:$72 sps:$4 sm:$0xff]  }
 0x442   : > { %6750 = vmatprep.subr.bf16.mxu0 %v20718_v44  ;;  %v20625_v44 = vld [vmem:[%s24537_s30 + $0xe2c] ss:$72 sps:$4 sm:$0xff]  }
 0x443   : > { %6886 = vmatpush1.bf16.msra.mxu1 %v20458_v25  ;;  %v20538_v25 = vld [vmem:[%s24537_s30 + $0x648] ss:$72 sps:$4 sm:$0xff]  }
 0x444   : > { %6887 = vmatprep.subr.bf16.mxu1 %v20463_v52  ;;  %v20546_v52 = vld [vmem:[%s24537_s30 + $0x6dc] ss:$72 sps:$4 sm:$0xff]  }
 0x445   : > { %6751 = vmatpush1.bf16.msra.mxu0 %v20716_v48  ;;  %v20623_v48 = vld [vmem:[%s24537_s30 + $0xe28] ss:$72 sps:$4 sm:$0xff]  }
 0x446   : > { %6752 = vmatprep.subr.bf16.mxu0 %v20724_v24  ;;  %v20631_v24 = vld [vmem:[%s24537_s30 + $0xebc] ss:$72 sps:$4 sm:$0xff]  }
 0x447   : > { %6888 = vmatpush1.bf16.msra.mxu1 %v20461_v53  ;;  %v20544_v53 = vld [vmem:[%s24537_s30 + $0x6d8] ss:$72 sps:$4 sm:$0xff]  }
 0x448   : > { %6889 = vmatprep.subr.bf16.mxu1 %v20468_v32  ;;  %v20552_v32 = vld [vmem:[%s24537_s30 + $0x76c] ss:$72 sps:$4 sm:$0xff]  }
 0x449   : > { %6753 = vmatpush1.bf16.msra.mxu0 %v20722_v26  ;;  %v20629_v26 = vld [vmem:[%s24537_s30 + $0xeb8] ss:$72 sps:$4 sm:$0xff]  }
 0x44a   : > { %6754 = vmatprep.subr.bf16.mxu0 %v20730_v28  ;;  %v20637_v28 = vld [vmem:[%s24537_s30 + $0xf4c] ss:$72 sps:$4 sm:$0xff]  }
 0x44b   : > { %6890 = vmatpush1.bf16.msra.mxu1 %v20466_v56  ;;  %v20550_v56 = vld [vmem:[%s24537_s30 + $0x768] ss:$72 sps:$4 sm:$0xff]  }
 0x44c   : > { %7031 = vmatprep.subr.bf16.mxu1 %v20474_v59  ;;  %v20742_v59 = vld [vmem:[%s24537_s30 + $0x19e4] ss:$72 sps:$4 sm:$0xff]  }
 0x44d   : > { %6755 = vmatpush1.bf16.msra.mxu0 %v20728_v38  ;;  %v20635_v38 = vld [vmem:[%s24537_s30 + $0xf48] ss:$72 sps:$4 sm:$0xff]  }
 0x44e   : > { %6892 = vmatmul.mubr.bf16.vlgmr.msra.gmra.mrb[0].mxu1 %v24846_v61  ;;  %6756 = vmatprep.subr.bf16.mxu0 %v20736_v55  ;;  %v20643_v55 = vld [vmem:[%s24537_s30 + $0xfdc] ss:$72 sps:$4 sm:$0xff]  }
 0x44f   : > { %7032 = vmatpush1.bf16.msra.mxu1 %v20472_v62  ;;  %7063 = vmatprep.mubr.bf16.mxu1 %v24679_v13  ;;  %v20740_v62 = vld [vmem:[%s24537_s30 + $0x19e0] ss:$72 sps:$4 sm:$0xff]  }
 0x450   : > { %7033 = vmatprep.subr.bf16.mxu1 %v20480_v63  ;;  %v20748_v63 = vld [vmem:[%s24537_s30 + $0x1a74] ss:$72 sps:$4 sm:$0xff]  }
 0x451   : > { %6757 = vmatpush1.bf16.msra.mxu0 %v20734_v35  ;;  %v20641_v35 = vld [vmem:[%s24537_s30 + $0xfd8] ss:$72 sps:$4 sm:$0xff]  }
 0x452   : > { %6758 = vmatprep.subr.bf16.mxu0 %v20742_v59  ;;  %v20649_v59 = vld [vmem:[%s24537_s30 + $0x106c] ss:$72 sps:$4 sm:$0xff]  }
 0x453   : > { %7034 = vmatpush1.bf16.msra.mxu1 %v20478_v41  ;;  %v20746_v41 = vld [vmem:[%s24537_s30 + $0x1a70] ss:$72 sps:$4 sm:$0xff]  }
 0x454   : > { %7035 = vmatprep.subr.bf16.mxu1 %v20486_v46  ;;  %v20754_v46 = vld [vmem:[%s24537_s30 + $0x14] ss:$72 sps:$4 sm:$0xff]  }
 0x455   : > { %6759 = vmatpush1.bf16.msra.mxu0 %v20740_v62  ;;  %v20647_v62 = vld [vmem:[%s24537_s30 + $0x1068] ss:$72 sps:$4 sm:$0xff]  }
 0x456   : > { %6760 = vmatprep.subr.bf16.mxu0 %v20748_v63  ;;  %v20655_v63 = vld [vmem:[%s24537_s30 + $0x10fc] ss:$72 sps:$4 sm:$0xff]  }
 0x457   : > { %7036 = vmatpush1.bf16.msra.mxu1 %v20484_v2  ;;  %v20752_v2 = vld [vmem:[%s24537_s30 + $0x10] ss:$72 sps:$4 sm:$0xff]  }
 0x458   : > { %7037 = vmatprep.subr.bf16.mxu1 %v20492_v3  ;;  %v20760_v3 = vld [vmem:[%s24537_s30 + $0xa4] ss:$72 sps:$4 sm:$0xff]  }
 0x459   : > { %6761 = vmatpush1.bf16.msra.mxu0 %v20746_v41  ;;  %v20653_v41 = vld [vmem:[%s24537_s30 + $0x10f8] ss:$72 sps:$4 sm:$0xff]  }
 0x45a   : > { %6902 = vmatprep.subr.bf16.mxu0 %v20754_v46  ;;  %v20661_v46 = vld [vmem:[%s24537_s30 + $0x118c] ss:$72 sps:$4 sm:$0xff]  }
 0x45b   : > { %7038 = vmatpush1.bf16.msra.mxu1 %v20490_v6  ;;  %v20758_v6 = vld [vmem:[%s24537_s30 + $0xa0] ss:$72 sps:$4 sm:$0xff]  }
 0x45c   : > { %7039 = vmatprep.subr.bf16.mxu1 %v20498_v7  ;;  %6763 = vmatmul.mubr.bf16.vlgmr.msra.gmra.mrb[0].mxu0 %v24846_v61  ;;  %v20766_v7 = vld [vmem:[%s24537_s30 + $0x134] ss:$72 sps:$4 sm:$0xff]  }
 0x45d   : > { %6903 = vmatpush1.bf16.msra.mxu0 %v20752_v2  ;;  %6934 = vmatprep.mubr.bf16.mxu0 %v24679_v13  ;;  %v20659_v2 = vld [vmem:[%s24537_s30 + $0x1188] ss:$72 sps:$4 sm:$0xff]  }
 0x45e   : > { %6904 = vmatprep.subr.bf16.mxu0 %v20760_v3  ;;  %v20667_v3 = vld [vmem:[%s24537_s30 + $0x121c] ss:$72 sps:$4 sm:$0xff]  }
 0x45f   : > { %7040 = vmatpush1.bf16.msra.mxu1 %v20496_v10  ;;  %v20764_v10 = vld [vmem:[%s24537_s30 + $0x130] ss:$72 sps:$4 sm:$0xff]  }
 0x460   : > { %7041 = vmatprep.subr.bf16.mxu1 %v20504_v11  ;;  %v20772_v11 = vld [vmem:[%s24537_s30 + $0x1c4] ss:$72 sps:$4 sm:$0xff]  }
 0x461   : > { %6905 = vmatpush1.bf16.msra.mxu0 %v20758_v6  ;;  %v20665_v6 = vld [vmem:[%s24537_s30 + $0x1218] ss:$72 sps:$4 sm:$0xff]  }
 0x462   : > { %6906 = vmatprep.subr.bf16.mxu0 %v20766_v7  ;;  %v20673_v7 = vld [vmem:[%s24537_s30 + $0x12ac] ss:$72 sps:$4 sm:$0xff]  }
 0x463   : > { %7042 = vmatpush1.bf16.msra.mxu1 %v20502_v15  ;;  %v20770_v15 = vld [vmem:[%s24537_s30 + $0x1c0] ss:$72 sps:$4 sm:$0xff]  }
 0x464   : > { %7043 = vmatprep.subr.bf16.mxu1 %v20510_v16  ;;  %v20778_v16 = vld [vmem:[%s24537_s30 + $0x254] ss:$72 sps:$4 sm:$0xff]  }
 0x465   : > { %6907 = vmatpush1.bf16.msra.mxu0 %v20764_v10  ;;  %v20671_v10 = vld [vmem:[%s24537_s30 + $0x12a8] ss:$72 sps:$4 sm:$0xff]  }
 0x466   : > { %6908 = vmatprep.subr.bf16.mxu0 %v20772_v11  ;;  %v20679_v11 = vld [vmem:[%s24537_s30 + $0x133c] ss:$72 sps:$4 sm:$0xff]  }
 0x467   : > { %7044 = vmatpush1.bf16.msra.mxu1 %v20508_v19  ;;  %v20776_v19 = vld [vmem:[%s24537_s30 + $0x250] ss:$72 sps:$4 sm:$0xff]  }
 0x468   : > { %7045 = vmatprep.subr.bf16.mxu1 %v20516_v20  ;;  %v20784_v20 = vld [vmem:[%s24537_s30 + $0x2e4] ss:$72 sps:$4 sm:$0xff]  }
 0x469   : > { %6909 = vmatpush1.bf16.msra.mxu0 %v20770_v15  ;;  %v20677_v15 = vld [vmem:[%s24537_s30 + $0x1338] ss:$72 sps:$4 sm:$0xff]  }
 0x46a   : > { %6910 = vmatprep.subr.bf16.mxu0 %v20778_v16  ;;  %v20685_v16 = vld [vmem:[%s24537_s30 + $0x13cc] ss:$72 sps:$4 sm:$0xff]  }
 0x46b   : > { %7046 = vmatpush1.bf16.msra.mxu1 %v20514_v23  ;;  %v20605_v23 = vld [vmem:[%s24537_s30 + $0xc78] ss:$72 sps:$4 sm:$0xff]  }
 0x46c   : > { %7047 = vmatprep.subr.bf16.mxu1 %v20522_v27  ;;  %v20782_v27 = vld [vmem:[%s24537_s30 + $0x2e0] ss:$72 sps:$4 sm:$0xff]  }
 0x46d   : > { %6911 = vmatpush1.bf16.msra.mxu0 %v20776_v19  ;;  %v20683_v19 = vld [vmem:[%s24537_s30 + $0x13c8] ss:$72 sps:$4 sm:$0xff]  }
 0x46e   : > { %6912 = vmatprep.subr.bf16.mxu0 %v20784_v20  ;;  %v20691_v20 = vld [vmem:[%s24537_s30 + $0x145c] ss:$72 sps:$4 sm:$0xff]  }
 0x46f   : > { %7048 = vmatpush1.bf16.msra.mxu1 %v20520_v31  ;;  %v20611_v31 = vld [vmem:[%s24537_s30 + $0xd08] ss:$72 sps:$4 sm:$0xff]  }
 0x470   : > { %7049 = vmatprep.subr.bf16.mxu1 %v20528_v33  ;;  %v20788_v33 = vld [vmem:[%s24537_s30 + $0x370] ss:$72 sps:$4 sm:$0xff]  }
 0x471   : > { %6913 = vmatpush1.bf16.msra.mxu0 %v20782_v27  ;;  %v20697_v27 = vld [vmem:[%s24537_s30 + $0x14ec] ss:$72 sps:$4 sm:$0xff]  }
 0x472   : > { %6914 = vmatprep.subr.bf16.mxu0 %v20790_v29  ;;  %v20872_v29 = vld [vmem:[%s24537_s30 + $0xb50] ss:$72 sps:$4 sm:$0xff]  }
 0x473   : > { %7050 = vmatpush1.bf16.msra.mxu1 %v20526_v40  ;;  %v20794_v40 = vld [vmem:[%s24537_s30 + $0x400] ss:$72 sps:$4 sm:$0xff]  }
 0x474   : > { %7051 = vmatprep.subr.bf16.mxu1 %v20534_v42  ;;  %v20802_v42 = vld [vmem:[%s24537_s30 + $0x494] ss:$72 sps:$4 sm:$0xff]  }
 0x475   : > { %6915 = vmatpush1.bf16.msra.mxu0 %v20788_v33  ;;  %v20703_v33 = vld [vmem:[%s24537_s30 + $0x157c] ss:$72 sps:$4 sm:$0xff]  }
 0x476   : > { %6916 = vmatprep.subr.bf16.mxu0 %v20796_v34  ;;  %v20878_v34 = vld [vmem:[%s24537_s30 + $0xbe0] ss:$72 sps:$4 sm:$0xff]  }
 0x477   : > { %7052 = vmatpush1.bf16.msra.mxu1 %v20532_v45  ;;  %v20800_v45 = vld [vmem:[%s24537_s30 + $0x490] ss:$72 sps:$4 sm:$0xff]  }
 0x478   : > { %7053 = vmatprep.subr.bf16.mxu1 %v20540_v47  ;;  %v20808_v47 = vld [vmem:[%s24537_s30 + $0x524] ss:$72 sps:$4 sm:$0xff]  }
 0x479   : > { %6917 = vmatpush1.bf16.msra.mxu0 %v20794_v40  ;;  %v20701_v40 = vld [vmem:[%s24537_s30 + $0x1578] ss:$72 sps:$4 sm:$0xff]  }
 0x47a   : > { %6918 = vmatprep.subr.bf16.mxu0 %v20802_v42  ;;  %v20709_v42 = vld [vmem:[%s24537_s30 + $0x160c] ss:$72 sps:$4 sm:$0xff]  }
 0x47b   : > { %7054 = vmatpush1.bf16.msra.mxu1 %v20538_v25  ;;  %v20806_v25 = vld [vmem:[%s24537_s30 + $0x520] ss:$72 sps:$4 sm:$0xff]  }
 0x47c   : > { %7055 = vmatprep.subr.bf16.mxu1 %v20546_v52  ;;  %v20814_v52 = vld [vmem:[%s24537_s30 + $0x5b4] ss:$72 sps:$4 sm:$0xff]  }
 0x47d   : > { %6919 = vmatpush1.bf16.msra.mxu0 %v20800_v45  ;;  %v20707_v45 = vld [vmem:[%s24537_s30 + $0x1608] ss:$72 sps:$4 sm:$0xff]  }
 0x47e   : > { %6920 = vmatprep.subr.bf16.mxu0 %v20808_v47  ;;  %v20715_v47 = vld [vmem:[%s24537_s30 + $0x169c] ss:$72 sps:$4 sm:$0xff]  }
 0x47f   : > { %7056 = vmatpush1.bf16.msra.mxu1 %v20544_v53  ;;  %v20812_v53 = vld [vmem:[%s24537_s30 + $0x5b0] ss:$72 sps:$4 sm:$0xff]  }
 0x480   : > { %7057 = vmatprep.subr.bf16.mxu1 %v20552_v32  ;;  %v20820_v32 = vld [vmem:[%s24537_s30 + $0x644] ss:$72 sps:$4 sm:$0xff]  }
 0x481   : > { %6921 = vmatpush1.bf16.msra.mxu0 %v20806_v25  ;;  %v20713_v25 = vld [vmem:[%s24537_s30 + $0x1698] ss:$72 sps:$4 sm:$0xff]  }
 0x482   : > { %6922 = vmatprep.subr.bf16.mxu0 %v20814_v52  ;;  %v20721_v52 = vld [vmem:[%s24537_s30 + $0x172c] ss:$72 sps:$4 sm:$0xff]  }
 0x483   : > { %7058 = vmatpush1.bf16.msra.mxu1 %v20550_v56  ;;  %v20818_v56 = vld [vmem:[%s24537_s30 + $0x640] ss:$72 sps:$4 sm:$0xff]  }
 0x484   : > { %7059 = vmatprep.subr.bf16.mxu1 %v20558_v58  ;;  %v20826_v58 = vld [vmem:[%s24537_s30 + $0x6d4] ss:$72 sps:$4 sm:$0xff]  }
 0x485   : > { %6923 = vmatpush1.bf16.msra.mxu0 %v20812_v53  ;;  %v20719_v53 = vld [vmem:[%s24537_s30 + $0x1728] ss:$72 sps:$4 sm:$0xff]  }
 0x486   : > { %6924 = vmatprep.subr.bf16.mxu0 %v20820_v32  ;;  %v20727_v32 = vld [vmem:[%s24537_s30 + $0x17bc] ss:$72 sps:$4 sm:$0xff]  }
 0x487   : > { %7060 = vmatpush1.bf16.msra.mxu1 %v20556_v36  ;;  %v20824_v36 = vld [vmem:[%s24537_s30 + $0x6d0] ss:$72 sps:$4 sm:$0xff]  }
 0x488   : > { %7061 = vmatprep.subr.bf16.mxu1 %v20565_v60  ;;  %v20832_v60 = vld [vmem:[%s24537_s30 + $0x764] ss:$72 sps:$4 sm:$0xff]  }
 0x489   : > { %6925 = vmatpush1.bf16.msra.mxu0 %v20818_v56  ;;  %v20725_v56 = vld [vmem:[%s24537_s30 + $0x17b8] ss:$72 sps:$4 sm:$0xff]  }
 0x48a   : > { %6926 = vmatprep.subr.bf16.mxu0 %v20826_v58  ;;  %v20733_v58 = vld [vmem:[%s24537_s30 + $0x184c] ss:$72 sps:$4 sm:$0xff]  }
 0x48b   : > { %7062 = vmatpush1.bf16.msra.mxu1 %v20563_v0  ;;  %v20830_v0 = vld [vmem:[%s24537_s30 + $0x760] ss:$72 sps:$4 sm:$0xff]  }
 0x48c   : > { %7074 = vmatprep.subr.bf16.mxu1 %v20571_v37  ;;  %v20838_v37 = vld [vmem:[%s24537_s30 + $0x7f4] ss:$72 sps:$4 sm:$0xff]  }
 0x48d   : > { %6927 = vmatpush1.bf16.msra.mxu0 %v20824_v36  ;;  %v20731_v36 = vld [vmem:[%s24537_s30 + $0x1848] ss:$72 sps:$4 sm:$0xff]  }
 0x48e   : > { %7064 = vmatmul.mubr.bf16.vlgmr.msra.gmra.mrb[4].mxu1 %v24703_v49  ;;  %6928 = vmatprep.subr.bf16.mxu0 %v20832_v60  ;;  %v20739_v60 = vld [vmem:[%s24537_s30 + $0x18dc] ss:$72 sps:$4 sm:$0xff]  }
 0x48f   : > { %7075 = vmatpush1.bf16.msra.mxu1 %v20569_v51  ;;  %7106 = vmatprep.mubr.bf16.mxu1 %v24706_v50  ;;  %v20836_v51 = vld [vmem:[%s24537_s30 + $0x7f0] ss:$72 sps:$4 sm:$0xff]  }
 0x490   : > { %7076 = vmatprep.subr.bf16.mxu1 %v20577_v1  ;;  %v20844_v1 = vld [vmem:[%s24537_s30 + $0x884] ss:$72 sps:$4 sm:$0xff]  }
 0x491   : > { %6929 = vmatpush1.bf16.msra.mxu0 %v20830_v0  ;;  %v20737_v0 = vld [vmem:[%s24537_s30 + $0x18d8] ss:$72 sps:$4 sm:$0xff]  }
 0x492   : > { %6930 = vmatprep.subr.bf16.mxu0 %v20838_v37  ;;  %v20745_v37 = vld [vmem:[%s24537_s30 + $0x196c] ss:$72 sps:$4 sm:$0xff]  }
 0x493   : > { %7077 = vmatpush1.bf16.msra.mxu1 %v20575_v4  ;;  %v20842_v4 = vld [vmem:[%s24537_s30 + $0x880] ss:$72 sps:$4 sm:$0xff]  }
 0x494   : > { %7078 = vmatprep.subr.bf16.mxu1 %v20583_v5  ;;  %v20850_v5 = vld [vmem:[%s24537_s30 + $0x914] ss:$72 sps:$4 sm:$0xff]  }
 0x495   : > { %6931 = vmatpush1.bf16.msra.mxu0 %v20836_v51  ;;  %v20743_v51 = vld [vmem:[%s24537_s30 + $0x1968] ss:$72 sps:$4 sm:$0xff]  }
 0x496   : > { %6932 = vmatprep.subr.bf16.mxu0 %v20844_v1  ;;  %v20751_v1 = vld [vmem:[%s24537_s30 + $0x19fc] ss:$72 sps:$4 sm:$0xff]  }
 0x497   : > { %7079 = vmatpush1.bf16.msra.mxu1 %v20581_v8  ;;  %v20848_v8 = vld [vmem:[%s24537_s30 + $0x910] ss:$72 sps:$4 sm:$0xff]  }
 0x498   : > { %7080 = vmatprep.subr.bf16.mxu1 %v20589_v9  ;;  %v20856_v9 = vld [vmem:[%s24537_s30 + $0x9a4] ss:$72 sps:$4 sm:$0xff]  }
 0x499   : > { %6933 = vmatpush1.bf16.msra.mxu0 %v20842_v4  ;;  %v20749_v4 = vld [vmem:[%s24537_s30 + $0x19f8] ss:$72 sps:$4 sm:$0xff]  }
 0x49a   : > { %6945 = vmatprep.subr.bf16.mxu0 %v20850_v5  ;;  %v20757_v5 = vld [vmem:[%s24537_s30 + $0x1a8c] ss:$72 sps:$4 sm:$0xff]  }
 0x49b   : > { %7081 = vmatpush1.bf16.msra.mxu1 %v20587_v12  ;;  %v20854_v12 = vld [vmem:[%s24537_s30 + $0x9a0] ss:$72 sps:$4 sm:$0xff]  }
 0x49c   : > { %7082 = vmatprep.subr.bf16.mxu1 %v20595_v14  ;;  %6935 = vmatmul.mubr.bf16.vlgmr.msra.gmra.mrb[4].mxu0 %v24703_v49  ;;  %v20862_v14 = vld [vmem:[%s24537_s30 + $0xa34] ss:$72 sps:$4 sm:$0xff]  }
 0x49d   : > { %6946 = vmatpush1.bf16.msra.mxu0 %v20848_v8  ;;  %6977 = vmatprep.mubr.bf16.mxu0 %v24706_v50  ;;  %v20755_v8 = vld [vmem:[%s24537_s30 + $0x1a88] ss:$72 sps:$4 sm:$0xff]  }
 0x49e   : > { %6947 = vmatprep.subr.bf16.mxu0 %v20856_v9  ;;  %v20763_v9 = vld [vmem:[%s24537_s30 + $0x2c] ss:$72 sps:$4 sm:$0xff]  }
 0x49f   : > { %7083 = vmatpush1.bf16.msra.mxu1 %v20593_v17  ;;  %v20860_v17 = vld [vmem:[%s24537_s30 + $0xa30] ss:$72 sps:$4 sm:$0xff]  }
 0x4a0   : > { %7084 = vmatprep.subr.bf16.mxu1 %v20601_v18  ;;  %v20868_v18 = vld [vmem:[%s24537_s30 + $0xac4] ss:$72 sps:$4 sm:$0xff]  }
 0x4a1   : > { %6948 = vmatpush1.bf16.msra.mxu0 %v20854_v12  ;;  %v20761_v12 = vld [vmem:[%s24537_s30 + $0x28] ss:$72 sps:$4 sm:$0xff]  }
 0x4a2   : > { %6949 = vmatprep.subr.bf16.mxu0 %v20862_v14  ;;  %v20769_v14 = vld [vmem:[%s24537_s30 + $0xbc] ss:$72 sps:$4 sm:$0xff]  }
 0x4a3   : > { %7085 = vmatpush1.bf16.msra.mxu1 %v20599_v21  ;;  %v20866_v21 = vld [vmem:[%s24537_s30 + $0xac0] ss:$72 sps:$4 sm:$0xff]  }
 0x4a4   : > { %7086 = vmatprep.subr.bf16.mxu1 %v20607_v22  ;;  %v20874_v22 = vld [vmem:[%s24537_s30 + $0xb54] ss:$72 sps:$4 sm:$0xff]  }
 0x4a5   : > { %6950 = vmatpush1.bf16.msra.mxu0 %v20860_v17  ;;  %v20767_v17 = vld [vmem:[%s24537_s30 + $0xb8] ss:$72 sps:$4 sm:$0xff]  }
 0x4a6   : > { %6951 = vmatprep.subr.bf16.mxu0 %v20868_v18  ;;  %v20775_v18 = vld [vmem:[%s24537_s30 + $0x14c] ss:$72 sps:$4 sm:$0xff]  }
 0x4a7   : > { %7087 = vmatpush1.bf16.msra.mxu1 %v20605_v23  ;;  %v20689_v23 = vld [vmem:[%s24537_s30 + $0x1458] ss:$72 sps:$4 sm:$0xff]  }
 0x4a8   : > { %7088 = vmatprep.subr.bf16.mxu1 %v20613_v30  ;;  %v20880_v30 = vld [vmem:[%s24537_s30 + $0xbe4] ss:$72 sps:$4 sm:$0xff]  }
 0x4a9   : > { %6952 = vmatpush1.bf16.msra.mxu0 %v20866_v21  ;;  %v20773_v21 = vld [vmem:[%s24537_s30 + $0x148] ss:$72 sps:$4 sm:$0xff]  }
 0x4aa   : > { %6953 = vmatprep.subr.bf16.mxu0 %v20874_v22  ;;  %v20781_v22 = vld [vmem:[%s24537_s30 + $0x1dc] ss:$72 sps:$4 sm:$0xff]  }
 0x4ab   : > { %7089 = vmatpush1.bf16.msra.mxu1 %v20611_v31  ;;  %v20695_v31 = vld [vmem:[%s24537_s30 + $0x14e8] ss:$72 sps:$4 sm:$0xff]  }
 0x4ac   : > { %7090 = vmatprep.subr.bf16.mxu1 %v20619_v39  ;;  %v20886_v39 = vld [vmem:[%s24537_s30 + $0xc74] ss:$72 sps:$4 sm:$0xff]  }
 0x4ad   : > { %6954 = vmatpush1.bf16.msra.mxu0 %v20872_v29  ;;  %v20964_v29 = vld [vmem:[%s24537_s30 + $0x13c4] ss:$72 sps:$4 sm:$0xff]  }
 0x4ae   : > { %6955 = vmatprep.subr.bf16.mxu0 %v20880_v30  ;;  %v20779_v30 = vld [vmem:[%s24537_s30 + $0x1d8] ss:$72 sps:$4 sm:$0xff]  }
 0x4af   : > { %7091 = vmatpush1.bf16.msra.mxu1 %v20617_v43  ;;  %v20884_v43 = vld [vmem:[%s24537_s30 + $0xc70] ss:$72 sps:$4 sm:$0xff]  }
 0x4b0   : > { %7092 = vmatprep.subr.bf16.mxu1 %v20625_v44  ;;  %v20892_v44 = vld [vmem:[%s24537_s30 + $0xd04] ss:$72 sps:$4 sm:$0xff]  }
 0x4b1   : > { %6956 = vmatpush1.bf16.msra.mxu0 %v20878_v34 }
 0x4b2   : > { %6957 = vmatprep.subr.bf16.mxu0 %v20886_v39  ;;  %v20970_v39 = vld [vmem:[%s24537_s30 + $0x1454] ss:$72 sps:$4 sm:$0xff]  }
 0x4b3   : > { %7093 = vmatpush1.bf16.msra.mxu1 %v20623_v48  ;;  %v20890_v48 = vld [vmem:[%s24537_s30 + $0xd00] ss:$72 sps:$4 sm:$0xff]  }
 0x4b4   : > { %7094 = vmatprep.subr.bf16.mxu1 %v20631_v24  ;;  %v20898_v24 = vld [vmem:[%s24537_s30 + $0xd94] ss:$72 sps:$4 sm:$0xff]  }
 0x4b5   : > { %6958 = vmatpush1.bf16.msra.mxu0 %v20884_v43  ;;  %v20793_v43 = vld [vmem:[%s24537_s30 + $0x2fc] ss:$72 sps:$4 sm:$0xff]  }
 0x4b6   : > { %6959 = vmatprep.subr.bf16.mxu0 %v20892_v44  ;;  %v20968_v44 = vld [vmem:[%s24537_s30 + $0x1450] ss:$72 sps:$4 sm:$0xff]  }
 0x4b7   : > { %7095 = vmatpush1.bf16.msra.mxu1 %v20629_v26  ;;  %v20896_v26 = vld [vmem:[%s24537_s30 + $0xd90] ss:$72 sps:$4 sm:$0xff]  }
 0x4b8   : > { %7096 = vmatprep.subr.bf16.mxu1 %v20637_v28  ;;  %v20904_v28 = vld [vmem:[%s24537_s30 + $0xe24] ss:$72 sps:$4 sm:$0xff]  }
 0x4b9   : > { %6960 = vmatpush1.bf16.msra.mxu0 %v20890_v48 }
 0x4ba   : > { %6961 = vmatprep.subr.bf16.mxu0 %v20898_v24  ;;  %v20791_v24 = vld [vmem:[%s24537_s30 + $0x2f8] ss:$72 sps:$4 sm:$0xff]  }
 0x4bb   : > { %7097 = vmatpush1.bf16.msra.mxu1 %v20635_v38  ;;  %v20902_v38 = vld [vmem:[%s24537_s30 + $0xe20] ss:$72 sps:$4 sm:$0xff]  }
 0x4bc   : > { %7098 = vmatprep.subr.bf16.mxu1 %v20643_v55  ;;  %v20910_v55 = vld [vmem:[%s24537_s30 + $0xeb4] ss:$72 sps:$4 sm:$0xff]  }
 0x4bd   : > { %6962 = vmatpush1.bf16.msra.mxu0 %v20896_v26 }
 0x4be   : > { %6963 = vmatprep.subr.bf16.mxu0 %v20904_v28  ;;  %v20982_v28 = vld [vmem:[%s24537_s30 + $0x1574] ss:$72 sps:$4 sm:$0xff]  }
 0x4bf   : > { %7099 = vmatpush1.bf16.msra.mxu1 %v20641_v35  ;;  %v20908_v35 = vld [vmem:[%s24537_s30 + $0xeb0] ss:$72 sps:$4 sm:$0xff]  }
 0x4c0   : > { %7100 = vmatprep.subr.bf16.mxu1 %v20649_v59  ;;  %v20916_v59 = vld [vmem:[%s24537_s30 + $0xf44] ss:$72 sps:$4 sm:$0xff]  }
 0x4c1   : > { %6964 = vmatpush1.bf16.msra.mxu0 %v20902_v38 }
 0x4c2   : > { %6965 = vmatprep.subr.bf16.mxu0 %v20910_v55 }
 0x4c3   : > { %7101 = vmatpush1.bf16.msra.mxu1 %v20647_v62  ;;  %v20914_v62 = vld [vmem:[%s24537_s30 + $0xf40] ss:$72 sps:$4 sm:$0xff]  }
 0x4c4   : > { %7102 = vmatprep.subr.bf16.mxu1 %v20655_v63  ;;  %v20922_v63 = vld [vmem:[%s24537_s30 + $0xfd4] ss:$72 sps:$4 sm:$0xff]  }
 0x4c5   : > { %6966 = vmatpush1.bf16.msra.mxu0 %v20908_v35 }
 0x4c6   : > { %6967 = vmatprep.subr.bf16.mxu0 %v20916_v59 }
 0x4c7   : > { %7103 = vmatpush1.bf16.msra.mxu1 %v20653_v41  ;;  %v20920_v41 = vld [vmem:[%s24537_s30 + $0xfd0] ss:$72 sps:$4 sm:$0xff]  }
 0x4c8   : > { %7104 = vmatprep.subr.bf16.mxu1 %v20661_v46  ;;  %v20928_v46 = vld [vmem:[%s24537_s30 + $0x1064] ss:$72 sps:$4 sm:$0xff]  }
 0x4c9   : > { %6968 = vmatpush1.bf16.msra.mxu0 %v20914_v62  ;;  %v20988_v62 = vld [vmem:[%s24537_s30 + $0x1604] ss:$72 sps:$4 sm:$0xff]  }
 0x4ca   : > { %6969 = vmatprep.subr.bf16.mxu0 %v20922_v63 }
 0x4cb   : > { %7105 = vmatpush1.bf16.msra.mxu1 %v20659_v2  ;;  %v20926_v2 = vld [vmem:[%s24537_s30 + $0x1060] ss:$72 sps:$4 sm:$0xff]  }
 0x4cc   : > { %7117 = vmatprep.subr.bf16.mxu1 %v20667_v3  ;;  %v20934_v3 = vld [vmem:[%s24537_s30 + $0x10f4] ss:$72 sps:$4 sm:$0xff]  }
 0x4cd   : > { %6970 = vmatpush1.bf16.msra.mxu0 %v20920_v41 }
 0x4ce   : > { %7107 = vmatmul.mubr.bf16.vlgmr.msra.gmra.mrb[4].mxu1 %v24774_v54  ;;  %6971 = vmatprep.subr.bf16.mxu0 %v20928_v46  ;;  %v20803_v46 = vld [vmem:[%s24537_s30 + $0x418] ss:$72 sps:$4 sm:$0xff]  }
 0x4cf   : > { %7118 = vmatpush1.bf16.msra.mxu1 %v20665_v6  ;;  %7149 = vmatprep.mubr.bf16.mxu1 %v24778_v57  ;;  %v20932_v6 = vld [vmem:[%s24537_s30 + $0x10f0] ss:$72 sps:$4 sm:$0xff]  }
 0x4d0   : > { %7119 = vmatprep.subr.bf16.mxu1 %v20673_v7  ;;  %v20940_v7 = vld [vmem:[%s24537_s30 + $0x1184] ss:$72 sps:$4 sm:$0xff]  }
 0x4d1   : > { %6972 = vmatpush1.bf16.msra.mxu0 %v20926_v2  ;;  %v20994_v2 = vld [vmem:[%s24537_s30 + $0x1694] ss:$72 sps:$4 sm:$0xff]  }
 0x4d2   : > { %6973 = vmatprep.subr.bf16.mxu0 %v20934_v3  ;;  %v20809_v3 = vld [vmem:[%s24537_s30 + $0x4a8] ss:$72 sps:$4 sm:$0xff]  }
 0x4d3   : > { %7120 = vmatpush1.bf16.msra.mxu1 %v20671_v10  ;;  %v20938_v10 = vld [vmem:[%s24537_s30 + $0x1180] ss:$72 sps:$4 sm:$0xff]  }
 0x4d4   : > { %7121 = vmatprep.subr.bf16.mxu1 %v20679_v11  ;;  %v20946_v11 = vld [vmem:[%s24537_s30 + $0x1214] ss:$72 sps:$4 sm:$0xff]  }
 0x4d5   : > { %6974 = vmatpush1.bf16.msra.mxu0 %v20932_v6  ;;  %v21000_v6 = vld [vmem:[%s24537_s30 + $0x1724] ss:$72 sps:$4 sm:$0xff]  }
 0x4d6   : > { %6975 = vmatprep.subr.bf16.mxu0 %v20940_v7  ;;  %v20815_v7 = vld [vmem:[%s24537_s30 + $0x538] ss:$72 sps:$4 sm:$0xff]  }
 0x4d7   : > { %7122 = vmatpush1.bf16.msra.mxu1 %v20677_v15  ;;  %v20944_v15 = vld [vmem:[%s24537_s30 + $0x1210] ss:$72 sps:$4 sm:$0xff]  }
 0x4d8   : > { %7123 = vmatprep.subr.bf16.mxu1 %v20685_v16  ;;  %v20952_v16 = vld [vmem:[%s24537_s30 + $0x12a4] ss:$72 sps:$4 sm:$0xff]  }
 0x4d9   : > { %6976 = vmatpush1.bf16.msra.mxu0 %v20938_v10  ;;  %v21006_v10 = vld [vmem:[%s24537_s30 + $0x17b4] ss:$72 sps:$4 sm:$0xff]  }
 0x4da   : > { %6988 = vmatprep.subr.bf16.mxu0 %v20946_v11  ;;  %v20821_v11 = vld [vmem:[%s24537_s30 + $0x5c8] ss:$72 sps:$4 sm:$0xff]  }
 0x4db   : > { %7124 = vmatpush1.bf16.msra.mxu1 %v20683_v19  ;;  %v20950_v19 = vld [vmem:[%s24537_s30 + $0x12a0] ss:$72 sps:$4 sm:$0xff]  }
 0x4dc   : > { %7125 = vmatprep.subr.bf16.mxu1 %v20691_v20  ;;  %6978 = vmatmul.mubr.bf16.vlgmr.msra.gmra.mrb[4].mxu0 %v24774_v54  ;;  %v20958_v20 = vld [vmem:[%s24537_s30 + $0x1334] ss:$72 sps:$4 sm:$0xff]  }
 0x4dd   : > { %6989 = vmatpush1.bf16.msra.mxu0 %v20944_v15  ;;  %7020 = vmatprep.mubr.bf16.mxu0 %v24778_v57  ;;  %v21012_v15 = vld [vmem:[%s24537_s30 + $0x1844] ss:$72 sps:$4 sm:$0xff]  }
 0x4de   : > { %6990 = vmatprep.subr.bf16.mxu0 %v20952_v16  ;;  %v20827_v16 = vld [vmem:[%s24537_s30 + $0x658] ss:$72 sps:$4 sm:$0xff]  }
 0x4df   : > { %7126 = vmatpush1.bf16.msra.mxu1 %v20689_v23  ;;  %v20956_v23 = vld [vmem:[%s24537_s30 + $0x1330] ss:$72 sps:$4 sm:$0xff]  }
 0x4e0   : > { %7127 = vmatprep.subr.bf16.mxu1 %v20697_v27  ;;  %v2234_v27 = vlaneseq }
 0x4e1   : > { %6991 = vmatpush1.bf16.msra.mxu0 %v20950_v19  ;;  %v21018_v19 = vld [vmem:[%s24537_s30 + $0x18d4] ss:$72 sps:$4 sm:$0xff]  }
 0x4e2   : > { %6992 = vmatprep.subr.bf16.mxu0 %v20958_v20  ;;  %v25071_v34 = vshrl.u32 %v2234_v27, 7  ;;  %v20833_v20 = vld [vmem:[%s24537_s30 + $0x6e8] ss:$72 sps:$4 sm:$0xff]   ;;  %v20839_v27 = vld [vmem:[%s24537_s30 + $0x778] ss:$72 sps:$4 sm:$0xff]  }
 0x4e3   : > { %7128 = vmatpush1.bf16.msra.mxu1 %v20695_v31  ;;  %v20787_v31 = vld [vmem:[%s24537_s30 + $0x26c] ss:$72 sps:$4 sm:$0xff]  }
 0x4e4   : > { %7129 = vmatprep.subr.bf16.mxu1 %v20703_v33  ;;  %v20962_v33 = vld [vmem:[%s24537_s30 + $0x13c0] ss:$72 sps:$4 sm:$0xff]   ;;  %v25085_v48 = vsub.s32 3, %v25071_v34 }
 0x4e5   : > { %6993 = vmatpush1.bf16.msra.mxu0 %v20956_v23  ;;  %v21024_v23 = vld [vmem:[%s24537_s30 + $0x1964] ss:$72 sps:$4 sm:$0xff]  }
 0x4e6   : > { %6994 = vmatprep.subr.bf16.mxu0 %v20964_v29  ;;  %v20847_v29 = vld [vmem:[%s24537_s30 + $0x80c] ss:$72 sps:$4 sm:$0xff]  }
 0x4e7   : > { %7130 = vmatpush1.bf16.msra.mxu1 %v20701_v40  ;;  %v20785_v40 = vld [vmem:[%s24537_s30 + $0x268] ss:$72 sps:$4 sm:$0xff]  }
 0x4e8   : > { %7131 = vmatprep.subr.bf16.mxu1 %v20709_v42  ;;  %v25076_v42 = vld [vmem:[%s24545_s25] sm:$0xff] }
 0x4e9   : > { %6995 = vmatpush1.bf16.msra.mxu0 %v20962_v33  ;;  %v20845_v33 = vld [vmem:[%s24537_s30 + $0x808] ss:$72 sps:$4 sm:$0xff]  }
 0x4ea   : > { %6996 = vmatprep.subr.bf16.mxu0 %v20970_v39  ;;  %v20853_v39 = vld [vmem:[%s24537_s30 + $0x89c] ss:$72 sps:$4 sm:$0xff]  }
 0x4eb   : > { %7132 = vmatpush1.bf16.msra.mxu1 %v20707_v45  ;;  %v25081_v45 = vsub.s32 2, %v25071_v34 }
 0x4ec   : > { %7133 = vmatprep.subr.bf16.mxu1 %v20715_v47  ;;  %v20976_v47 = vld [vmem:[%s24537_s30 + $0x14e4] ss:$72 sps:$4 sm:$0xff]  }
 0x4ed   : > { %v2245_v26 = vrot.slane %v25076_v42, %v25081_v45  ;;  %6997 = vmatpush1.bf16.msra.mxu0 %v20968_v44  ;;  %v20851_v44 = vld [vmem:[%s24537_s30 + $0x898] ss:$72 sps:$4 sm:$0xff]  }
 0x4ee   : > { %6998 = vmatprep.subr.bf16.mxu0 %v20976_v47  ;;  %v20859_v47 = vld [vmem:[%s24537_s30 + $0x92c] ss:$72 sps:$4 sm:$0xff]  }
 0x4ef   : > { %7134 = vmatpush1.bf16.msra.mxu1 %v20713_v25  ;;  %v20799_v25 = vld [vmem:[%s24537_s30 + $0x38c] ss:$72 sps:$4 sm:$0xff]  }
 0x4f0   : > { %7135 = vmatprep.subr.bf16.mxu1 %v20721_v52  ;;  %v20974_v52 = vld [vmem:[%s24537_s30 + $0x14e0] ss:$72 sps:$4 sm:$0xff]  }
 0x4f1   : > { %6999 = vmatpush1.bf16.msra.mxu0 %v20974_v52  ;;  %v20857_v52 = vld [vmem:[%s24537_s30 + $0x928] ss:$72 sps:$4 sm:$0xff]  }
 0x4f2   : > { %7000 = vmatprep.subr.bf16.mxu0 %v20982_v28  ;;  %v21040_v28 = vld [vmem:[%s24537_s30 + $0x20] ss:$72 sps:$4 sm:$0xff]  }
 0x4f3   : > { %7136 = vmatpush1.bf16.msra.mxu1 %v20719_v53 }
 0x4f4   : > { %7137 = vmatprep.subr.bf16.mxu1 %v20727_v32  ;;  %v2249_v32 = vrot.slane %v25076_v42, %v25085_v48 }
 0x4f7   : > { %7138 = vmatpush1.bf16.msra.mxu1 %v20725_v56  ;;  %v20797_v56 = vld [vmem:[%s24537_s30 + $0x388] ss:$72 sps:$4 sm:$0xff]  }
 0x4f8   : > { %7139 = vmatprep.subr.bf16.mxu1 %v20733_v58  ;;  %v20805_v58 = vld [vmem:[%s24537_s30 + $0x41c] ss:$72 sps:$4 sm:$0xff]  }
 0x4fb   : > { %7140 = vmatpush1.bf16.msra.mxu1 %v20731_v36 }
 0x4fc   : > { %7141 = vmatprep.subr.bf16.mxu1 %v20739_v60  ;;  %v20980_v60 = vld [vmem:[%s24537_s30 + $0x1570] ss:$72 sps:$4 sm:$0xff]  }
 0x4fd   : > { %7001 = vmatpush1.bf16.msra.mxu0 %v20980_v60  ;;  %v20875_v60 = vld [vmem:[%s24537_s30 + $0xad8] ss:$72 sps:$4 sm:$0xff]  }
 0x4fe   : > { %7002 = vmatprep.subr.bf16.mxu0 %v20988_v62  ;;  %v20883_v62 = vld [vmem:[%s24537_s30 + $0xb6c] ss:$72 sps:$4 sm:$0xff]  }
 0x4ff   : > { %7142 = vmatpush1.bf16.msra.mxu1 %v20737_v0 }
 0x500   : > { %7143 = vmatprep.subr.bf16.mxu1 %v20745_v37 }
 0x503   : > { %7144 = vmatpush1.bf16.msra.mxu1 %v20743_v51  ;;  %v20811_v51 = vld [vmem:[%s24537_s30 + $0x4ac] ss:$72 sps:$4 sm:$0xff]  }
 0x504   : > { %7145 = vmatprep.subr.bf16.mxu1 %v20751_v1  ;;  %v20986_v1 = vld [vmem:[%s24537_s30 + $0x1600] ss:$72 sps:$4 sm:$0xff]  }
 0x505   : > { %7003 = vmatpush1.bf16.msra.mxu0 %v20986_v1  ;;  %v21064_v1 = vld [vmem:[%s24537_s30 + $0x260] ss:$72 sps:$4 sm:$0xff]  }
 0x506   : > { %7004 = vmatprep.subr.bf16.mxu0 %v20994_v2  ;;  %v25163_v2 = vsub.s32 0, %v25071_v34 }
 0x507   : > { %7146 = vmatpush1.bf16.msra.mxu1 %v20749_v4  ;;  %v20817_v4 = vld [vmem:[%s24537_s30 + $0x53c] ss:$72 sps:$4 sm:$0xff]  }
 0x508   : > { %7147 = vmatprep.subr.bf16.mxu1 %v20757_v5  ;;  %v20992_v5 = vld [vmem:[%s24537_s30 + $0x1690] ss:$72 sps:$4 sm:$0xff]  }
 0x509   : > { %7005 = vmatpush1.bf16.msra.mxu0 %v20992_v5  ;;  %v25168_v5 = vsub.s32 1, %v25071_v34 }
 0x50a   : > { %7006 = vmatprep.subr.bf16.mxu0 %v21000_v6  ;;  %v20895_v6 = vld [vmem:[%s24537_s30 + $0xc8c] ss:$72 sps:$4 sm:$0xff]  }
 0x50b   : > { %7148 = vmatpush1.bf16.msra.mxu1 %v20755_v8  ;;  %v20823_v8 = vld [vmem:[%s24537_s30 + $0x5cc] ss:$72 sps:$4 sm:$0xff]  }
 0x50c   : > { %7289 = vmatprep.subr.bf16.mxu1 %v20763_v9  ;;  %v20998_v9 = vld [vmem:[%s24537_s30 + $0x1720] ss:$72 sps:$4 sm:$0xff]  }
 0x50d   : > { %7007 = vmatpush1.bf16.msra.mxu0 %v20998_v9  ;;  %v2241_v9 = vrot.slane %v25076_v42, %v25168_v5 }
 0x50e   : > { %7150 = vmatmul.mubr.bf16.vlgmr.msra.gmra.mrb[4].mxu1 %v24846_v61  ;;  %7008 = vmatprep.subr.bf16.mxu0 %v21006_v10  ;;  %v21070_v10 = vld [vmem:[%s24537_s30 + $0x2f0] ss:$72 sps:$4 sm:$0xff]  }
 0x50f   : > { %7290 = vmatpush1.bf16.msra.mxu1 %v20761_v12  ;;  %7321 = vmatprep.mubr.bf16.mxu1 %v24679_v13  ;;  %v20829_v12 = vld [vmem:[%s24537_s30 + $0x65c] ss:$72 sps:$4 sm:$0xff]  }
 0x510   : > { %7291 = vmatprep.subr.bf16.mxu1 %v20769_v14  ;;  %v21004_v14 = vld [vmem:[%s24537_s30 + $0x17b0] ss:$72 sps:$4 sm:$0xff]  }
 0x511   : > { %7009 = vmatpush1.bf16.msra.mxu0 %v21004_v14  ;;  %v20901_v14 = vld [vmem:[%s24537_s30 + $0xd1c] ss:$72 sps:$4 sm:$0xff]  }
 0x512   : > { %7010 = vmatprep.subr.bf16.mxu0 %v21012_v15 }
 0x513   : > { %7292 = vmatpush1.bf16.msra.mxu1 %v20767_v17  ;;  %v20835_v17 = vld [vmem:[%s24537_s30 + $0x6ec] ss:$72 sps:$4 sm:$0xff]  }
 0x514   : > { %7293 = vmatprep.subr.bf16.mxu1 %v20775_v18  ;;  %v21010_v18 = vld [vmem:[%s24537_s30 + $0x1840] ss:$72 sps:$4 sm:$0xff]  }
 0x515   : > { %7011 = vmatpush1.bf16.msra.mxu0 %v21010_v18 }
 0x516   : > { %7012 = vmatprep.subr.bf16.mxu0 %v21018_v19 }
 0x517   : > { %7294 = vmatpush1.bf16.msra.mxu1 %v20773_v21  ;;  %v20841_v21 = vld [vmem:[%s24537_s30 + $0x77c] ss:$72 sps:$4 sm:$0xff]  }
 0x518   : > { %7295 = vmatprep.subr.bf16.mxu1 %v20781_v22  ;;  %v21016_v22 = vld [vmem:[%s24537_s30 + $0x18d0] ss:$72 sps:$4 sm:$0xff]  }
 0x519   : > { %7013 = vmatpush1.bf16.msra.mxu0 %v21016_v22 }
 0x51a   : > { %7014 = vmatprep.subr.bf16.mxu0 %v21024_v23 }
 0x51b   : > { %7296 = vmatpush1.bf16.msra.mxu1 %v20779_v30  ;;  %v21022_v30 = vld [vmem:[%s24537_s30 + $0x1960] ss:$72 sps:$4 sm:$0xff]  }
 0x51c   : > { %7297 = vmatprep.subr.bf16.mxu1 %v20787_v31  ;;  %v21030_v31 = vld [vmem:[%s24537_s30 + $0x19f4] ss:$72 sps:$4 sm:$0xff]  }
 0x51d   : > { %7015 = vmatpush1.bf16.msra.mxu0 %v21022_v30 }
 0x51e   : > { %7016 = vmatprep.subr.bf16.mxu0 %v21030_v31  ;;  %v21082_v31 = vld [vmem:[%s24537_s30 + $0x410] ss:$72 sps:$4 sm:$0xff]  }
 0x51f   : > { %7298 = vmatpush1.bf16.msra.mxu1 %v20785_v40  ;;  %v21028_v40 = vld [vmem:[%s24537_s30 + $0x19f0] ss:$72 sps:$4 sm:$0xff]  }
 0x520   : > { %7299 = vmatprep.subr.bf16.mxu1 %v20793_v43  ;;  %v21036_v43 = vld [vmem:[%s24537_s30 + $0x1a84] ss:$72 sps:$4 sm:$0xff]  }
 0x521   : > { %v6893_v53 = vpop.f32.mrb[0].mxu1  ;;  %7017 = vmatpush1.bf16.msra.mxu0 %v21028_v40  ;;  %v20913_v40 = vld [vmem:[%s24537_s30 + $0xe3c] ss:$72 sps:$4 sm:$0xff]  }
 0x522   : > { %v6895_v38 = vpop.f32.mrb[1].mxu1  ;;  %v19904_v35 = vadd.f32 %v6893_v53, %v2245_v26  ;;  %7018 = vmatprep.subr.bf16.mxu0 %v21036_v43  ;;  %v21048_v53 = vld [vmem:[%s24537_s30 + $0xb4] ss:$72 sps:$4 sm:$0xff]   ;;  %v21088_v43 = vld [vmem:[%s24537_s30 + $0x4a0] ss:$72 sps:$4 sm:$0xff]  }
 0x523   : > { %v6897_v55 = vpop.f32.mrb[2].mxu1  ;;  %7300 = vmatpush1.bf16.msra.mxu1 %v20791_v24  ;;  %v19905_v63 = vadd.f32 %v6895_v38, %v2249_v32  ;;  %v21034_v24 = vld [vmem:[%s24537_s30 + $0x1a80] ss:$72 sps:$4 sm:$0xff]   ;;  %v20871_v38 = vld [vmem:[%s24537_s30 + $0xa4c] ss:$72 sps:$4 sm:$0xff]  }
 0x524   : > { %v19906_v59 = vadd.f32 %v6897_v55, %v2245_v26  ;;  %v6899_v36 = vpop.f32.mrb[3].mxu1  ;;  %7301 = vmatprep.subr.bf16.mxu1 %v20799_v25  ;;  %v21042_v25 = vld [vmem:[%s24537_s30 + $0x24] ss:$72 sps:$4 sm:$0xff]   ;;  %v21046_v55 = vld [vmem:[%s24537_s30 + $0xb0] ss:$72 sps:$4 sm:$0xff]  }
 0x525   : > { %v19907_v0 = vadd.f32 %v6899_v36, %v2249_v32  ;;  %v20865_v26 = vld [vmem:[%s24537_s30 + $0x9bc] ss:$72 sps:$4 sm:$0xff]   ;;  %7019 = vmatpush1.bf16.msra.mxu0 %v21034_v24  ;;  %v20863_v32 = vld [vmem:[%s24537_s30 + $0x9b8] ss:$72 sps:$4 sm:$0xff]   ;;  %v20919_v24 = vld [vmem:[%s24537_s30 + $0xecc] ss:$72 sps:$4 sm:$0xff]  }
 0x526   : > { %v25099_v37 = vpack.c.bf16 %v19906_v59, %v19904_v35  ;;  %7160 = vmatprep.subr.bf16.mxu0 %v21042_v25  ;;  %v20877_v35 = vld [vmem:[%s24537_s30 + $0xadc] ss:$72 sps:$4 sm:$0xff]   ;;  %v21052_v59 = vld [vmem:[%s24537_s30 + $0x140] ss:$72 sps:$4 sm:$0xff]   ;;  %v21094_v25 = vld [vmem:[%s24537_s30 + $0x530] ss:$72 sps:$4 sm:$0xff]  }
 0x527   : > { %v25101_v41 = vpack.c.bf16 %v19907_v0, %v19905_v63  ;;  %7302 = vmatpush1.bf16.msra.mxu1 %v20797_v56  ;;  %v21054_v56 = vld [vmem:[%s24537_s30 + $0x144] ss:$72 sps:$4 sm:$0xff]   ;;  %v21060_v36 = vld [vmem:[%s24537_s30 + $0x1d4] ss:$72 sps:$4 sm:$0xff]   ;;  %v21058_v63 = vld [vmem:[%s24537_s30 + $0x1d0] ss:$72 sps:$4 sm:$0xff]  }
 0x528   : > { %7303 = vmatprep.subr.bf16.mxu1 %v20805_v58  ;;  %7021 = vmatmul.mubr.bf16.vlgmr.msra.gmra.mrb[4].mxu0 %v24846_v61  ;;  %v20869_v58 = vld [vmem:[%s24537_s30 + $0xa48] ss:$72 sps:$4 sm:$0xff]   ;;  %v21066_v0 = vld [vmem:[%s24537_s30 + $0x264] ss:$72 sps:$4 sm:$0xff]  }
 0x529   : > { %7161 = vmatpush1.bf16.msra.mxu0 %v21040_v28  ;;  %7192 = vmatprep.mubr.bf16.mxu0 %v24679_v13  ;;  %v20925_v28 = vld [vmem:[%s24537_s30 + $0xf5c] ss:$72 sps:$4 sm:$0xff]  }
 0x52a   : > { %7162 = vmatprep.subr.bf16.mxu0 %v21048_v53  ;;  %v21100_v53 = vld [vmem:[%s24537_s30 + $0x5c0] ss:$72 sps:$4 sm:$0xff]  }
 0x52b   : > { %7304 = vmatpush1.bf16.msra.mxu1 %v20803_v46  ;;  %v20881_v46 = vld [vmem:[%s24537_s30 + $0xb68] ss:$72 sps:$4 sm:$0xff]  }
 0x52c   : > { %7305 = vmatprep.subr.bf16.mxu1 %v20811_v51  ;;  %v20889_v51 = vld [vmem:[%s24537_s30 + $0xbfc] ss:$72 sps:$4 sm:$0xff]  }
 0x52d   : > { %7163 = vmatpush1.bf16.msra.mxu0 %v21046_v55  ;;  %v20931_v55 = vld [vmem:[%s24537_s30 + $0xfec] ss:$72 sps:$4 sm:$0xff]  }
 0x52e   : > { %7164 = vmatprep.subr.bf16.mxu0 %v21054_v56  ;;  %v21106_v56 = vld [vmem:[%s24537_s30 + $0x650] ss:$72 sps:$4 sm:$0xff]  }
 0x52f   : > { %7306 = vmatpush1.bf16.msra.mxu1 %v20809_v3  ;;  %v21072_v3 = vld [vmem:[%s24537_s30 + $0x2f4] ss:$72 sps:$4 sm:$0xff]  }
 0x530   : > { %7307 = vmatprep.subr.bf16.mxu1 %v20817_v4  ;;  %v20887_v4 = vld [vmem:[%s24537_s30 + $0xbf8] ss:$72 sps:$4 sm:$0xff]  }
 0x531   : > { %7165 = vmatpush1.bf16.msra.mxu0 %v21052_v59  ;;  %v20937_v59 = vld [vmem:[%s24537_s30 + $0x107c] ss:$72 sps:$4 sm:$0xff]  }
 0x532   : > { %7166 = vmatprep.subr.bf16.mxu0 %v21060_v36  ;;  %v21112_v36 = vld [vmem:[%s24537_s30 + $0x6e0] ss:$72 sps:$4 sm:$0xff]  }
 0x533   : > { %7308 = vmatpush1.bf16.msra.mxu1 %v20815_v7  ;;  %v2237_v7 = vrot.slane %v25076_v42, %v25163_v2 }
 0x534   : > { %7309 = vmatprep.subr.bf16.mxu1 %v20823_v8  ;;  %v20893_v8 = vld [vmem:[%s24537_s30 + $0xc88] ss:$72 sps:$4 sm:$0xff]  }
 0x535   : > { %7167 = vmatpush1.bf16.msra.mxu0 %v21058_v63  ;;  %v20943_v63 = vld [vmem:[%s24537_s30 + $0x110c] ss:$72 sps:$4 sm:$0xff]  }
 0x536   : > { %7168 = vmatprep.subr.bf16.mxu0 %v21066_v0  ;;  %v21118_v0 = vld [vmem:[%s24537_s30 + $0x770] ss:$72 sps:$4 sm:$0xff]  }
 0x537   : > { %7310 = vmatpush1.bf16.msra.mxu1 %v20821_v11  ;;  %v21078_v11 = vld [vmem:[%s24537_s30 + $0x384] ss:$72 sps:$4 sm:$0xff]  }
 0x538   : > { %7311 = vmatprep.subr.bf16.mxu1 %v20829_v12  ;;  %v6764_v12 = vpop.f32.mrb[0].mxu0 }
 0x539   : > { %7169 = vmatpush1.bf16.msra.mxu0 %v21064_v1  ;;  %v19900_v15 = vadd.f32 %v6764_v12, %v2237_v7  ;;  %v20949_v1 = vld [vmem:[%s24537_s30 + $0x119c] ss:$72 sps:$4 sm:$0xff]   ;;  %v21136_v12 = vld [vmem:[%s24537_s30 + $0x920] ss:$72 sps:$4 sm:$0xff]  }
 0x53a   : > { %7170 = vmatprep.subr.bf16.mxu0 %v21072_v3  ;;  %v21124_v3 = vld [vmem:[%s24537_s30 + $0x800] ss:$72 sps:$4 sm:$0xff]  }
 0x53b   : > { %7312 = vmatpush1.bf16.msra.mxu1 %v20827_v16  ;;  %v6766_v16 = vpop.f32.mrb[1].mxu0 }
 0x53c   : > { %7313 = vmatprep.subr.bf16.mxu1 %v20835_v17  ;;  %v20899_v17 = vld [vmem:[%s24537_s30 + $0xd18] ss:$72 sps:$4 sm:$0xff]   ;;  %v19901_v18 = vadd.f32 %v6766_v16, %v2241_v9  ;;  %v6768_v19 = vpop.f32.mrb[2].mxu0  ;;  %v20967_v16 = vld [vmem:[%s24537_s30 + $0x134c] ss:$72 sps:$4 sm:$0xff]  }
 0x53d   : > { %7171 = vmatpush1.bf16.msra.mxu0 %v21070_v10  ;;  %v19902_v42 = vadd.f32 %v6768_v19, %v2237_v7  ;;  %v6770_v22 = vpop.f32.mrb[3].mxu0  ;;  %v20955_v7 = vld [vmem:[%s24537_s30 + $0x122c] ss:$72 sps:$4 sm:$0xff]   ;;  %v20953_v10 = vld [vmem:[%s24537_s30 + $0x1228] ss:$72 sps:$4 sm:$0xff]  }
 0x53e   : > { %7172 = vmatprep.subr.bf16.mxu0 %v21078_v11  ;;  %v19903_v23 = vadd.f32 %v6770_v22, %v2241_v9  ;;  %v21138_v9 = vld [vmem:[%s24537_s30 + $0x924] ss:$72 sps:$4 sm:$0xff]   ;;  %v20965_v19 = vld [vmem:[%s24537_s30 + $0x1348] ss:$72 sps:$4 sm:$0xff]   ;;  %v20971_v22 = vld [vmem:[%s24537_s30 + $0x13d8] ss:$72 sps:$4 sm:$0xff]  }
 0x53f   : > { %7314 = vmatpush1.bf16.msra.mxu1 %v20833_v20  ;;  %v21076_v20 = vld [vmem:[%s24537_s30 + $0x380] ss:$72 sps:$4 sm:$0xff]   ;;  %v20961_v11 = vld [vmem:[%s24537_s30 + $0x12bc] ss:$72 sps:$4 sm:$0xff]  }
 0x540   : > { %7315 = vmatprep.subr.bf16.mxu1 %v20841_v21  ;;  %v21084_v21 = vld [vmem:[%s24537_s30 + $0x414] ss:$72 sps:$4 sm:$0xff]   ;;  %v25185_v30 = vpack.c.bf16 %v19903_v23, %v19901_v18  ;;  %v21150_v18 = vld [vmem:[%s24537_s30 + $0xa44] ss:$72 sps:$4 sm:$0xff]  }
 0x541   : > { %7173 = vmatpush1.bf16.msra.mxu0 %v21076_v20  ;;  %v20973_v20 = vld [vmem:[%s24537_s30 + $0x13dc] ss:$72 sps:$4 sm:$0xff]   ;;  %v20979_v23 = vld [vmem:[%s24537_s30 + $0x146c] ss:$72 sps:$4 sm:$0xff]  }
 0x542   : > { %7174 = vmatprep.subr.bf16.mxu0 %v21084_v21  ;;  %v21148_v21 = vld [vmem:[%s24537_s30 + $0xa40] ss:$72 sps:$4 sm:$0xff]  }
 0x543   : > { %7316 = vmatpush1.bf16.msra.mxu1 %v20839_v27  ;;  %v20907_v27 = vld [vmem:[%s24537_s30 + $0xdac] ss:$72 sps:$4 sm:$0xff]  }
 0x544   : > { %7317 = vmatprep.subr.bf16.mxu1 %v20847_v29  ;;  %v25183_v29 = vpack.c.bf16 %v19902_v42, %v19900_v15  ;;  %v20959_v15 = vld [vmem:[%s24537_s30 + $0x12b8] ss:$72 sps:$4 sm:$0xff]   ;;  %v21156_v42 = vld [vmem:[%s24537_s30 + $0xad4] ss:$72 sps:$4 sm:$0xff]  }
 0x545   : > { %7175 = vmatpush1.bf16.msra.mxu0 %v21082_v31  ;;  %v21162_v31 = vld [vmem:[%s24537_s30 + $0xb64] ss:$72 sps:$4 sm:$0xff]  }
 0x547   : > { %7318 = vmatpush1.bf16.msra.mxu1 %v20845_v33  ;;  %v21090_v33 = vld [vmem:[%s24537_s30 + $0x4a4] ss:$72 sps:$4 sm:$0xff]  }
 0x548   : > { %7319 = vmatprep.subr.bf16.mxu1 %v20853_v39  ;;  %v20905_v39 = vld [vmem:[%s24537_s30 + $0xda8] ss:$72 sps:$4 sm:$0xff]   ;;  %7176 = vmatprep.subr.bf16.mxu0 %v21090_v33 }
 0x549   : > { %7177 = vmatpush1.bf16.msra.mxu0 %v21088_v43  ;;  %v20977_v33 = vld [vmem:[%s24537_s30 + $0x1468] ss:$72 sps:$4 sm:$0xff]   ;;  %v21168_v43 = vld [vmem:[%s24537_s30 + $0xbf4] ss:$72 sps:$4 sm:$0xff]  }
 0x54b   : > { %7320 = vmatpush1.bf16.msra.mxu1 %v20851_v44  ;;  %v21096_v44 = vld [vmem:[%s24537_s30 + $0x534] ss:$72 sps:$4 sm:$0xff]  }
 0x54c   : > { %7332 = vmatprep.subr.bf16.mxu1 %v20859_v47  ;;  %v20911_v47 = vld [vmem:[%s24537_s30 + $0xe38] ss:$72 sps:$4 sm:$0xff]   ;;  %7178 = vmatprep.subr.bf16.mxu0 %v21096_v44 }
 0x54d   : > { %7179 = vmatpush1.bf16.msra.mxu0 %v21094_v25  ;;  %v20983_v44 = vld [vmem:[%s24537_s30 + $0x14f8] ss:$72 sps:$4 sm:$0xff]   ;;  %v21174_v25 = vld [vmem:[%s24537_s30 + $0xc84] ss:$72 sps:$4 sm:$0xff]  }
 0x54e   : > { %7322 = vmatmul.mubr.bf16.vlgmr.msra.gmra.mrb[8].mxu1 %v24703_v49 }
 0x54f   : > { %7333 = vmatpush1.bf16.msra.mxu1 %v20857_v52  ;;  %7364 = vmatprep.mubr.bf16.mxu1 %v24706_v50  ;;  %v21102_v52 = vld [vmem:[%s24537_s30 + $0x5c4] ss:$72 sps:$4 sm:$0xff]  }
 0x550   : > { %7334 = vmatprep.subr.bf16.mxu1 %v20865_v26  ;;  %v20917_v26 = vld [vmem:[%s24537_s30 + $0xec8] ss:$72 sps:$4 sm:$0xff]   ;;  %7180 = vmatprep.subr.bf16.mxu0 %v21102_v52 }
 0x551   : > { %7181 = vmatpush1.bf16.msra.mxu0 %v21100_v53  ;;  %v20989_v52 = vld [vmem:[%s24537_s30 + $0x1588] ss:$72 sps:$4 sm:$0xff]   ;;  %v21180_v53 = vld [vmem:[%s24537_s30 + $0xd14] ss:$72 sps:$4 sm:$0xff]  }
 0x553   : > { %7335 = vmatpush1.bf16.msra.mxu1 %v20863_v32  ;;  %v21108_v32 = vld [vmem:[%s24537_s30 + $0x654] ss:$72 sps:$4 sm:$0xff]  }
 0x554   : > { %7336 = vmatprep.subr.bf16.mxu1 %v20871_v38  ;;  %v20923_v38 = vld [vmem:[%s24537_s30 + $0xf58] ss:$72 sps:$4 sm:$0xff]   ;;  %7182 = vmatprep.subr.bf16.mxu0 %v21108_v32 }
 0x555   : > { %7183 = vmatpush1.bf16.msra.mxu0 %v21106_v56  ;;  %v20995_v32 = vld [vmem:[%s24537_s30 + $0x1618] ss:$72 sps:$4 sm:$0xff]   ;;  %v21186_v56 = vld [vmem:[%s24537_s30 + $0xda4] ss:$72 sps:$4 sm:$0xff]  }
 0x557   : > { %7337 = vmatpush1.bf16.msra.mxu1 %v20869_v58  ;;  %v21114_v58 = vld [vmem:[%s24537_s30 + $0x6e4] ss:$72 sps:$4 sm:$0xff]  }
 0x558   : > { %7338 = vmatprep.subr.bf16.mxu1 %v20877_v35  ;;  %v20929_v35 = vld [vmem:[%s24537_s30 + $0xfe8] ss:$72 sps:$4 sm:$0xff]   ;;  %7184 = vmatprep.subr.bf16.mxu0 %v21114_v58 }
 0x559   : > { %7185 = vmatpush1.bf16.msra.mxu0 %v21112_v36  ;;  %v21001_v58 = vld [vmem:[%s24537_s30 + $0x16a8] ss:$72 sps:$4 sm:$0xff]   ;;  %v21192_v36 = vld [vmem:[%s24537_s30 + $0xe34] ss:$72 sps:$4 sm:$0xff]  }
 0x55b   : > { %7339 = vmatpush1.bf16.msra.mxu1 %v20875_v60  ;;  %v21120_v60 = vld [vmem:[%s24537_s30 + $0x774] ss:$72 sps:$4 sm:$0xff]  }
 0x55c   : > { %7340 = vmatprep.subr.bf16.mxu1 %v20883_v62  ;;  %v20935_v62 = vld [vmem:[%s24537_s30 + $0x1078] ss:$72 sps:$4 sm:$0xff]   ;;  %7186 = vmatprep.subr.bf16.mxu0 %v21120_v60 }
 0x55d   : > { %7187 = vmatpush1.bf16.msra.mxu0 %v21118_v0  ;;  %v21007_v60 = vld [vmem:[%s24537_s30 + $0x1738] ss:$72 sps:$4 sm:$0xff]   ;;  %v21198_v0 = vld [vmem:[%s24537_s30 + $0xec4] ss:$72 sps:$4 sm:$0xff]  }
 0x55f   : > { %7341 = vmatpush1.bf16.msra.mxu1 %v20881_v46  ;;  %v21126_v46 = vld [vmem:[%s24537_s30 + $0x804] ss:$72 sps:$4 sm:$0xff]  }
 0x560   : > { %7342 = vmatprep.subr.bf16.mxu1 %v20889_v51  ;;  %v20941_v51 = vld [vmem:[%s24537_s30 + $0x1108] ss:$72 sps:$4 sm:$0xff]   ;;  %7188 = vmatprep.subr.bf16.mxu0 %v21126_v46 }
 0x561   : > { %7189 = vmatpush1.bf16.msra.mxu0 %v21124_v3  ;;  %v21013_v46 = vld [vmem:[%s24537_s30 + $0x17c8] ss:$72 sps:$4 sm:$0xff]   ;;  %v21204_v3 = vld [vmem:[%s24537_s30 + $0xf54] ss:$72 sps:$4 sm:$0xff]  }
 0x563   : > { %7343 = vmatpush1.bf16.msra.mxu1 %v20887_v4  ;;  %v21132_v4 = vld [vmem:[%s24537_s30 + $0x894] ss:$72 sps:$4 sm:$0xff]  }
 0x564   : > { %7344 = vmatprep.subr.bf16.mxu1 %v20895_v6  ;;  %v20947_v6 = vld [vmem:[%s24537_s30 + $0x1198] ss:$72 sps:$4 sm:$0xff]   ;;  %7190 = vmatprep.subr.bf16.mxu0 %v21132_v4 }
 0x565   : > { %v21019_v4 = vld [vmem:[%s24537_s30 + $0x1858] ss:$72 sps:$4 sm:$0xff]  }
 0x567   : > { %7345 = vmatpush1.bf16.msra.mxu1 %v20893_v8  ;;  %v21130_v8 = vld [vmem:[%s24537_s30 + $0x890] ss:$72 sps:$4 sm:$0xff]  }
 0x568   : > { %7346 = vmatprep.subr.bf16.mxu1 %v20901_v14  ;;  %v21144_v14 = vld [vmem:[%s24537_s30 + $0x9b4] ss:$72 sps:$4 sm:$0xff]   ;;  %7191 = vmatpush1.bf16.msra.mxu0 %v21130_v8  ;;  %v21210_v8 = vld [vmem:[%s24537_s30 + $0xfe4] ss:$72 sps:$4 sm:$0xff]  }
 0x569   : > { %7203 = vmatprep.subr.bf16.mxu0 %v21138_v9  ;;  %v21025_v9 = vld [vmem:[%s24537_s30 + $0x18e8] ss:$72 sps:$4 sm:$0xff]  }
 0x56b   : > { %7347 = vmatpush1.bf16.msra.mxu1 %v20899_v17  ;;  %v21142_v17 = vld [vmem:[%s24537_s30 + $0x9b0] ss:$72 sps:$4 sm:$0xff]   ;;  %7193 = vmatmul.mubr.bf16.vlgmr.msra.gmra.mrb[8].mxu0 %v24703_v49 }
 0x56c   : > { %7348 = vmatprep.subr.bf16.mxu1 %v20907_v27  ;;  %7204 = vmatpush1.bf16.msra.mxu0 %v21136_v12  ;;  %v21154_v27 = vld [vmem:[%s24537_s30 + $0xad0] ss:$72 sps:$4 sm:$0xff]   ;;  %v21216_v12 = vld [vmem:[%s24537_s30 + $0x1074] ss:$72 sps:$4 sm:$0xff]  }
 0x56d   : > { %7235 = vmatprep.mubr.bf16.mxu0 %v24706_v50  ;;  %7205 = vmatprep.subr.bf16.mxu0 %v21144_v14  ;;  %v21031_v14 = vld [vmem:[%s24537_s30 + $0x1978] ss:$72 sps:$4 sm:$0xff]  }
 0x56f   : > { %7349 = vmatpush1.bf16.msra.mxu1 %v20905_v39  ;;  %v20985_v39 = vld [vmem:[%s24537_s30 + $0x14fc] ss:$72 sps:$4 sm:$0xff]  }
 0x570   : > { %7350 = vmatprep.subr.bf16.mxu1 %v20913_v40  ;;  %7206 = vmatpush1.bf16.msra.mxu0 %v21142_v17  ;;  %v21160_v40 = vld [vmem:[%s24537_s30 + $0xb60] ss:$72 sps:$4 sm:$0xff]   ;;  %v21222_v17 = vld [vmem:[%s24537_s30 + $0x1104] ss:$72 sps:$4 sm:$0xff]  }
 0x571   : > { %7207 = vmatprep.subr.bf16.mxu0 %v21150_v18  ;;  %v21037_v18 = vld [vmem:[%s24537_s30 + $0x1a08] ss:$72 sps:$4 sm:$0xff]  }
 0x573   : > { %7351 = vmatpush1.bf16.msra.mxu1 %v20911_v47  ;;  %v20991_v47 = vld [vmem:[%s24537_s30 + $0x158c] ss:$72 sps:$4 sm:$0xff]  }
 0x574   : > { %7352 = vmatprep.subr.bf16.mxu1 %v20919_v24  ;;  %7208 = vmatpush1.bf16.msra.mxu0 %v21148_v21  ;;  %v21166_v24 = vld [vmem:[%s24537_s30 + $0xbf0] ss:$72 sps:$4 sm:$0xff]   ;;  %v21228_v21 = vld [vmem:[%s24537_s30 + $0x1194] ss:$72 sps:$4 sm:$0xff]  }
 0x575   : > { %7209 = vmatprep.subr.bf16.mxu0 %v21156_v42  ;;  %v21043_v42 = vld [vmem:[%s24537_s30 + $0x1a98] ss:$72 sps:$4 sm:$0xff]  }
 0x577   : > { %7353 = vmatpush1.bf16.msra.mxu1 %v20917_v26  ;;  %v20997_v26 = vld [vmem:[%s24537_s30 + $0x161c] ss:$72 sps:$4 sm:$0xff]  }
 0x578   : > { %7354 = vmatprep.subr.bf16.mxu1 %v20925_v28  ;;  %7210 = vmatpush1.bf16.msra.mxu0 %v21154_v27  ;;  %v21172_v28 = vld [vmem:[%s24537_s30 + $0xc80] ss:$72 sps:$4 sm:$0xff]   ;;  %v21234_v27 = vld [vmem:[%s24537_s30 + $0x1224] ss:$72 sps:$4 sm:$0xff]  }
 0x579   : > { %7211 = vmatprep.subr.bf16.mxu0 %v21162_v31  ;;  %v21049_v31 = vld [vmem:[%s24537_s30 + $0x38] ss:$72 sps:$4 sm:$0xff]  }
 0x57b   : > { %7355 = vmatpush1.bf16.msra.mxu1 %v20923_v38  ;;  %v21003_v38 = vld [vmem:[%s24537_s30 + $0x16ac] ss:$72 sps:$4 sm:$0xff]  }
 0x57c   : > { %7356 = vmatprep.subr.bf16.mxu1 %v20931_v55  ;;  %7212 = vmatpush1.bf16.msra.mxu0 %v21160_v40  ;;  %v21178_v55 = vld [vmem:[%s24537_s30 + $0xd10] ss:$72 sps:$4 sm:$0xff]   ;;  %v21240_v40 = vld [vmem:[%s24537_s30 + $0x12b4] ss:$72 sps:$4 sm:$0xff]  }
 0x57d   : > { %7213 = vmatprep.subr.bf16.mxu0 %v21168_v43  ;;  %v21055_v43 = vld [vmem:[%s24537_s30 + $0xc8] ss:$72 sps:$4 sm:$0xff]  }
 0x57f   : > { %7357 = vmatpush1.bf16.msra.mxu1 %v20929_v35  ;;  %v21009_v35 = vld [vmem:[%s24537_s30 + $0x173c] ss:$72 sps:$4 sm:$0xff]  }
 0x580   : > { %7358 = vmatprep.subr.bf16.mxu1 %v20937_v59  ;;  %7214 = vmatpush1.bf16.msra.mxu0 %v21166_v24  ;;  %v21184_v59 = vld [vmem:[%s24537_s30 + $0xda0] ss:$72 sps:$4 sm:$0xff]   ;;  %v21246_v24 = vld [vmem:[%s24537_s30 + $0x1344] ss:$72 sps:$4 sm:$0xff]  }
 0x581   : > { %7215 = vmatprep.subr.bf16.mxu0 %v21174_v25  ;;  %v21061_v25 = vld [vmem:[%s24537_s30 + $0x158] ss:$72 sps:$4 sm:$0xff]  }
 0x583   : > { %7359 = vmatpush1.bf16.msra.mxu1 %v20935_v62  ;;  %v21015_v62 = vld [vmem:[%s24537_s30 + $0x17cc] ss:$72 sps:$4 sm:$0xff]  }
 0x584   : > { %7360 = vmatprep.subr.bf16.mxu1 %v20943_v63  ;;  %7216 = vmatpush1.bf16.msra.mxu0 %v21172_v28  ;;  %v21190_v63 = vld [vmem:[%s24537_s30 + $0xe30] ss:$72 sps:$4 sm:$0xff]   ;;  %v21252_v28 = vld [vmem:[%s24537_s30 + $0x13d4] ss:$72 sps:$4 sm:$0xff]  }
 0x585   : > { %7217 = vmatprep.subr.bf16.mxu0 %v21180_v53  ;;  %v21067_v53 = vld [vmem:[%s24537_s30 + $0x1e8] ss:$72 sps:$4 sm:$0xff]  }
 0x587   : > { %7361 = vmatpush1.bf16.msra.mxu1 %v20941_v51  ;;  %v21021_v51 = vld [vmem:[%s24537_s30 + $0x185c] ss:$72 sps:$4 sm:$0xff]  }
 0x588   : > { %7362 = vmatprep.subr.bf16.mxu1 %v20949_v1  ;;  %7218 = vmatpush1.bf16.msra.mxu0 %v21178_v55  ;;  %v21196_v1 = vld [vmem:[%s24537_s30 + $0xec0] ss:$72 sps:$4 sm:$0xff]   ;;  %v21258_v55 = vld [vmem:[%s24537_s30 + $0x1464] ss:$72 sps:$4 sm:$0xff]  }
 0x589   : > { %7219 = vmatprep.subr.bf16.mxu0 %v21186_v56  ;;  %v21073_v56 = vld [vmem:[%s24537_s30 + $0x278] ss:$72 sps:$4 sm:$0xff]  }
 0x58b   : > { %7363 = vmatpush1.bf16.msra.mxu1 %v20947_v6  ;;  %v21027_v6 = vld [vmem:[%s24537_s30 + $0x18ec] ss:$72 sps:$4 sm:$0xff]  }
 0x58c   : > { %7375 = vmatprep.subr.bf16.mxu1 %v20955_v7  ;;  %7220 = vmatpush1.bf16.msra.mxu0 %v21184_v59  ;;  %v21202_v7 = vld [vmem:[%s24537_s30 + $0xf50] ss:$72 sps:$4 sm:$0xff]   ;;  %v2260_v59 = vsub.s32 6, %v25071_v34 }
 0x58d   : > { %7221 = vmatprep.subr.bf16.mxu0 %v21192_v36  ;;  %v21264_v36 = vld [vmem:[%s24537_s30 + $0x14f4] ss:$72 sps:$4 sm:$0xff]  }
 0x58e   : > { %7365 = vmatmul.mubr.bf16.vlgmr.msra.gmra.mrb[8].mxu1 %v24774_v54 }
 0x58f   : > { %7376 = vmatpush1.bf16.msra.mxu1 %v20953_v10  ;;  %7407 = vmatprep.mubr.bf16.mxu1 %v24778_v57  ;;  %v21033_v10 = vld [vmem:[%s24537_s30 + $0x197c] ss:$72 sps:$4 sm:$0xff]  }
 0x590   : > { %7377 = vmatprep.subr.bf16.mxu1 %v20961_v11  ;;  %7222 = vmatpush1.bf16.msra.mxu0 %v21190_v63  ;;  %v21208_v11 = vld [vmem:[%s24537_s30 + $0xfe0] ss:$72 sps:$4 sm:$0xff]   ;;  %v21087_v63 = vld [vmem:[%s24537_s30 + $0x39c] ss:$72 sps:$4 sm:$0xff]  }
 0x591   : > { %7223 = vmatprep.subr.bf16.mxu0 %v21198_v0  ;;  %v21262_v0 = vld [vmem:[%s24537_s30 + $0x14f0] ss:$72 sps:$4 sm:$0xff]  }
 0x593   : > { %7378 = vmatpush1.bf16.msra.mxu1 %v20959_v15  ;;  %v21039_v15 = vld [vmem:[%s24537_s30 + $0x1a0c] ss:$72 sps:$4 sm:$0xff]  }
 0x594   : > { %7379 = vmatprep.subr.bf16.mxu1 %v20967_v16  ;;  %7224 = vmatpush1.bf16.msra.mxu0 %v21196_v1  ;;  %v21214_v16 = vld [vmem:[%s24537_s30 + $0x1070] ss:$72 sps:$4 sm:$0xff]   ;;  %v21270_v1 = vld [vmem:[%s24537_s30 + $0x1584] ss:$72 sps:$4 sm:$0xff]  }
 0x595   : > { %7225 = vmatprep.subr.bf16.mxu0 %v21204_v3 }
 0x597   : > { %7380 = vmatpush1.bf16.msra.mxu1 %v20965_v19  ;;  %v21045_v19 = vld [vmem:[%s24537_s30 + $0x1a9c] ss:$72 sps:$4 sm:$0xff]  }
 0x598   : > { %7381 = vmatprep.subr.bf16.mxu1 %v20973_v20  ;;  %7226 = vmatpush1.bf16.msra.mxu0 %v21202_v7  ;;  %v21220_v20 = vld [vmem:[%s24537_s30 + $0x1100] ss:$72 sps:$4 sm:$0xff]  }
 0x599   : > { %7227 = vmatprep.subr.bf16.mxu0 %v21210_v8  ;;  %v21085_v8 = vld [vmem:[%s24537_s30 + $0x398] ss:$72 sps:$4 sm:$0xff]  }
 0x59b   : > { %7382 = vmatpush1.bf16.msra.mxu1 %v20971_v22  ;;  %v21051_v22 = vld [vmem:[%s24537_s30 + $0x3c] ss:$72 sps:$4 sm:$0xff]  }
 0x59c   : > { %7383 = vmatprep.subr.bf16.mxu1 %v20979_v23  ;;  %7228 = vmatpush1.bf16.msra.mxu0 %v21208_v11  ;;  %v21226_v23 = vld [vmem:[%s24537_s30 + $0x1190] ss:$72 sps:$4 sm:$0xff]  }
 0x59d   : > { %7229 = vmatprep.subr.bf16.mxu0 %v21216_v12 }
 0x59f   : > { %7384 = vmatpush1.bf16.msra.mxu1 %v20977_v33  ;;  %v21057_v33 = vld [vmem:[%s24537_s30 + $0xcc] ss:$72 sps:$4 sm:$0xff]  }
 0x5a0   : > { %7385 = vmatprep.subr.bf16.mxu1 %v20985_v39  ;;  %7230 = vmatpush1.bf16.msra.mxu0 %v21214_v16  ;;  %v21232_v39 = vld [vmem:[%s24537_s30 + $0x1220] ss:$72 sps:$4 sm:$0xff]  }
 0x5a1   : > { %7231 = vmatprep.subr.bf16.mxu0 %v21222_v17 }
 0x5a3   : > { %7386 = vmatpush1.bf16.msra.mxu1 %v20983_v44  ;;  %v21063_v44 = vld [vmem:[%s24537_s30 + $0x15c] ss:$72 sps:$4 sm:$0xff]  }
 0x5a4   : > { %7387 = vmatprep.subr.bf16.mxu1 %v20991_v47  ;;  %7232 = vmatpush1.bf16.msra.mxu0 %v21220_v20  ;;  %v21238_v47 = vld [vmem:[%s24537_s30 + $0x12b0] ss:$72 sps:$4 sm:$0xff]  }
 0x5a5   : > { %7233 = vmatprep.subr.bf16.mxu0 %v21228_v21  ;;  %v21091_v20 = vld [vmem:[%s24537_s30 + $0x428] ss:$72 sps:$4 sm:$0xff]   ;;  %v21099_v21 = vld [vmem:[%s24537_s30 + $0x4bc] ss:$72 sps:$4 sm:$0xff]  }
 0x5a7   : > { %7388 = vmatpush1.bf16.msra.mxu1 %v20989_v52  ;;  %v21069_v52 = vld [vmem:[%s24537_s30 + $0x1ec] ss:$72 sps:$4 sm:$0xff]  }
 0x5a8   : > { %7389 = vmatprep.subr.bf16.mxu1 %v20997_v26  ;;  %7234 = vmatpush1.bf16.msra.mxu0 %v21226_v23  ;;  %v21244_v26 = vld [vmem:[%s24537_s30 + $0x1340] ss:$72 sps:$4 sm:$0xff]  }
 0x5a9   : > { %7246 = vmatprep.subr.bf16.mxu0 %v21234_v27  ;;  %v21097_v23 = vld [vmem:[%s24537_s30 + $0x4b8] ss:$72 sps:$4 sm:$0xff]   ;;  %v21105_v27 = vld [vmem:[%s24537_s30 + $0x54c] ss:$72 sps:$4 sm:$0xff]  }
 0x5ab   : > { %7390 = vmatpush1.bf16.msra.mxu1 %v20995_v32  ;;  %7236 = vmatmul.mubr.bf16.vlgmr.msra.gmra.mrb[8].mxu0 %v24774_v54  ;;  %v21075_v32 = vld [vmem:[%s24537_s30 + $0x27c] ss:$72 sps:$4 sm:$0xff]  }
 0x5ac   : > { %7391 = vmatprep.subr.bf16.mxu1 %v21003_v38  ;;  %7247 = vmatpush1.bf16.msra.mxu0 %v21232_v39  ;;  %v21250_v38 = vld [vmem:[%s24537_s30 + $0x13d0] ss:$72 sps:$4 sm:$0xff]  }
 0x5ad   : > { %7278 = vmatprep.mubr.bf16.mxu0 %v24778_v57  ;;  %7248 = vmatprep.subr.bf16.mxu0 %v21240_v40  ;;  %v21103_v39 = vld [vmem:[%s24537_s30 + $0x548] ss:$72 sps:$4 sm:$0xff]   ;;  %v21111_v40 = vld [vmem:[%s24537_s30 + $0x5dc] ss:$72 sps:$4 sm:$0xff]  }
 0x5af   : > { %7392 = vmatpush1.bf16.msra.mxu1 %v21001_v58  ;;  %v21081_v58 = vld [vmem:[%s24537_s30 + $0x30c] ss:$72 sps:$4 sm:$0xff]  }
 0x5b0   : > { %7393 = vmatprep.subr.bf16.mxu1 %v21009_v35  ;;  %7249 = vmatpush1.bf16.msra.mxu0 %v21238_v47  ;;  %v21256_v35 = vld [vmem:[%s24537_s30 + $0x1460] ss:$72 sps:$4 sm:$0xff]  }
 0x5b1   : > { %7250 = vmatprep.subr.bf16.mxu0 %v21246_v24  ;;  %v21109_v47 = vld [vmem:[%s24537_s30 + $0x5d8] ss:$72 sps:$4 sm:$0xff]   ;;  %v21117_v24 = vld [vmem:[%s24537_s30 + $0x66c] ss:$72 sps:$4 sm:$0xff]  }
 0x5b3   : > { %7394 = vmatpush1.bf16.msra.mxu1 %v21007_v60  ;;  %v2264_v60 = vsub.s32 7, %v25071_v34 }
 0x5b4   : > { %7395 = vmatprep.subr.bf16.mxu1 %v21015_v62  ;;  %7251 = vmatpush1.bf16.msra.mxu0 %v21244_v26  ;;  %v21079_v62 = vld [vmem:[%s24537_s30 + $0x308] ss:$72 sps:$4 sm:$0xff]  }
 0x5b5   : > { %7252 = vmatprep.subr.bf16.mxu0 %v21252_v28  ;;  %v21115_v26 = vld [vmem:[%s24537_s30 + $0x668] ss:$72 sps:$4 sm:$0xff]   ;;  %v21123_v28 = vld [vmem:[%s24537_s30 + $0x6fc] ss:$72 sps:$4 sm:$0xff]  }
 0x5b7   : > { %7396 = vmatpush1.bf16.msra.mxu1 %v21013_v46  ;;  %v25319_v46 = vld [vmem:[%s24545_s25] sm:$0xff] }
 0x5b8   : > { %7397 = vmatprep.subr.bf16.mxu1 %v21021_v51  ;;  %7253 = vmatpush1.bf16.msra.mxu0 %v21250_v38  ;;  %v2261_v51 = vrot.slane %v25319_v46, %v2260_v59  ;;  %v21121_v38 = vld [vmem:[%s24537_s30 + $0x6f8] ss:$72 sps:$4 sm:$0xff]  }
 0x5b9   : > { %7254 = vmatprep.subr.bf16.mxu0 %v21258_v55  ;;  %v21129_v55 = vld [vmem:[%s24537_s30 + $0x78c] ss:$72 sps:$4 sm:$0xff]  }
 0x5bb   : > { %7398 = vmatpush1.bf16.msra.mxu1 %v21019_v4  ;;  %v2265_v4 = vrot.slane %v25319_v46, %v2264_v60 }
 0x5bc   : > { %7399 = vmatprep.subr.bf16.mxu1 %v21027_v6  ;;  %7255 = vmatpush1.bf16.msra.mxu0 %v21256_v35  ;;  %v21127_v35 = vld [vmem:[%s24537_s30 + $0x788] ss:$72 sps:$4 sm:$0xff]  }
 0x5bd   : > { %7256 = vmatprep.subr.bf16.mxu0 %v21264_v36  ;;  %v21135_v36 = vld [vmem:[%s24537_s30 + $0x81c] ss:$72 sps:$4 sm:$0xff]  }
 0x5bf   : > { %7400 = vmatpush1.bf16.msra.mxu1 %v21025_v9  ;;  %v21093_v9 = vld [vmem:[%s24537_s30 + $0x42c] ss:$72 sps:$4 sm:$0xff]  }
 0x5c0   : > { %7401 = vmatprep.subr.bf16.mxu1 %v21033_v10  ;;  %7257 = vmatpush1.bf16.msra.mxu0 %v21262_v0  ;;  %v21133_v0 = vld [vmem:[%s24537_s30 + $0x818] ss:$72 sps:$4 sm:$0xff]  }
 0x5c1   : > { %7258 = vmatprep.subr.bf16.mxu0 %v21270_v1  ;;  %v21316_v1 = vld [vmem:[%s24537_s30 + $0x1a00] ss:$72 sps:$4 sm:$0xff]  }
 0x5c3   : > { %7402 = vmatpush1.bf16.msra.mxu1 %v21031_v14  ;;  %v21268_v14 = vld [vmem:[%s24537_s30 + $0x1580] ss:$72 sps:$4 sm:$0xff]  }
 0x5c4   : > { %7403 = vmatprep.subr.bf16.mxu1 %v21039_v15  ;;  %v21276_v15 = vld [vmem:[%s24537_s30 + $0x1614] ss:$72 sps:$4 sm:$0xff]   ;;  %7259 = vmatpush1.bf16.msra.mxu0 %v21268_v14 }
 0x5c5   : > { %7260 = vmatprep.subr.bf16.mxu0 %v21276_v15  ;;  %v21159_v14 = vld [vmem:[%s24537_s30 + $0xa5c] ss:$72 sps:$4 sm:$0xff]  }
 0x5c6   : > { %v21336_v15 = vld [vmem:[%s24537_s30 + $0xc4] ss:$72 sps:$4 sm:$0xff]  }
 0x5c7   : > { %7404 = vmatpush1.bf16.msra.mxu1 %v21037_v18 }
 0x5c8   : > { %7405 = vmatprep.subr.bf16.mxu1 %v21045_v19 }
 0x5cb   : > { %7406 = vmatpush1.bf16.msra.mxu1 %v21043_v42  ;;  %v21274_v42 = vld [vmem:[%s24537_s30 + $0x1610] ss:$72 sps:$4 sm:$0xff]  }
 0x5cc   : > { %7547 = vmatprep.subr.bf16.mxu1 %v21051_v22  ;;  %v21282_v22 = vld [vmem:[%s24537_s30 + $0x16a4] ss:$72 sps:$4 sm:$0xff]   ;;  %7261 = vmatpush1.bf16.msra.mxu0 %v21274_v42  ;;  %v21337_v42 = vld [vmem:[%s24537_s30 + $0x150] ss:$72 sps:$4 sm:$0xff]  }
 0x5cd   : > { %7262 = vmatprep.subr.bf16.mxu0 %v21282_v22  ;;  %v21163_v22 = vld [vmem:[%s24537_s30 + $0xae8] ss:$72 sps:$4 sm:$0xff]  }
 0x5ce   : > { %7408 = vmatmul.mubr.bf16.vlgmr.msra.gmra.mrb[8].mxu1 %v24846_v61 }
 0x5cf   : > { %7548 = vmatpush1.bf16.msra.mxu1 %v21049_v31  ;;  %7579 = vmatprep.mubr.bf16.mxu1 %v24679_v13  ;;  %v21280_v31 = vld [vmem:[%s24537_s30 + $0x16a0] ss:$72 sps:$4 sm:$0xff]  }
 0x5d0   : > { %7549 = vmatprep.subr.bf16.mxu1 %v21057_v33  ;;  %v21288_v33 = vld [vmem:[%s24537_s30 + $0x1734] ss:$72 sps:$4 sm:$0xff]   ;;  %7263 = vmatpush1.bf16.msra.mxu0 %v21280_v31  ;;  %v21340_v31 = vld [vmem:[%s24537_s30 + $0x1e0] ss:$72 sps:$4 sm:$0xff]  }
 0x5d1   : > { %7264 = vmatprep.subr.bf16.mxu0 %v21288_v33  ;;  %v21345_v33 = vld [vmem:[%s24537_s30 + $0x274] ss:$72 sps:$4 sm:$0xff]  }
 0x5d3   : > { %7550 = vmatpush1.bf16.msra.mxu1 %v21055_v43  ;;  %v21286_v43 = vld [vmem:[%s24537_s30 + $0x1730] ss:$72 sps:$4 sm:$0xff]  }
 0x5d4   : > { %7551 = vmatprep.subr.bf16.mxu1 %v21063_v44  ;;  %v21294_v44 = vld [vmem:[%s24537_s30 + $0x17c4] ss:$72 sps:$4 sm:$0xff]   ;;  %7265 = vmatpush1.bf16.msra.mxu0 %v21286_v43  ;;  %v21343_v43 = vld [vmem:[%s24537_s30 + $0x270] ss:$72 sps:$4 sm:$0xff]  }
 0x5d5   : > { %7266 = vmatprep.subr.bf16.mxu0 %v21294_v44  ;;  %v25396_v44 = vsub.s32 4, %v25071_v34 }
 0x5d7   : > { %7552 = vmatpush1.bf16.msra.mxu1 %v21061_v25  ;;  %v21292_v25 = vld [vmem:[%s24537_s30 + $0x17c0] ss:$72 sps:$4 sm:$0xff]  }
 0x5d8   : > { %7553 = vmatprep.subr.bf16.mxu1 %v21069_v52  ;;  %v21300_v52 = vld [vmem:[%s24537_s30 + $0x1854] ss:$72 sps:$4 sm:$0xff]   ;;  %7267 = vmatpush1.bf16.msra.mxu0 %v21292_v25  ;;  %v25401_v25 = vsub.s32 5, %v25071_v34 }
 0x5d9   : > { %7268 = vmatprep.subr.bf16.mxu0 %v21300_v52  ;;  %v21183_v52 = vld [vmem:[%s24537_s30 + $0xc9c] ss:$72 sps:$4 sm:$0xff]  }
 0x5db   : > { %7554 = vmatpush1.bf16.msra.mxu1 %v21067_v53  ;;  %v21298_v53 = vld [vmem:[%s24537_s30 + $0x1850] ss:$72 sps:$4 sm:$0xff]  }
 0x5dc   : > { %7555 = vmatprep.subr.bf16.mxu1 %v21075_v32  ;;  %v21306_v32 = vld [vmem:[%s24537_s30 + $0x18e4] ss:$72 sps:$4 sm:$0xff]   ;;  %7269 = vmatpush1.bf16.msra.mxu0 %v21298_v53  ;;  %v21181_v53 = vld [vmem:[%s24537_s30 + $0xc98] ss:$72 sps:$4 sm:$0xff]  }
 0x5dd   : > { %7270 = vmatprep.subr.bf16.mxu0 %v21306_v32  ;;  %v2257_v32 = vrot.slane %v25319_v46, %v25401_v25 }
 0x5df   : > { %7556 = vmatpush1.bf16.msra.mxu1 %v21073_v56  ;;  %v21304_v56 = vld [vmem:[%s24537_s30 + $0x18e0] ss:$72 sps:$4 sm:$0xff]  }
 0x5e0   : > { %7557 = vmatprep.subr.bf16.mxu1 %v21081_v58  ;;  %v21312_v58 = vld [vmem:[%s24537_s30 + $0x1974] ss:$72 sps:$4 sm:$0xff]   ;;  %7271 = vmatpush1.bf16.msra.mxu0 %v21304_v56 }
 0x5e1   : > { %v7151_v3 = vpop.f32.mrb[4].mxu1  ;;  %7272 = vmatprep.subr.bf16.mxu0 %v21312_v58 }
 0x5e2   : > { %v7153_v6 = vpop.f32.mrb[5].mxu1  ;;  %v19912_v10 = vadd.f32 %v7151_v3, %v2261_v51  ;;  %v21324_v3 = vld [vmem:[%s24537_s30 + $0x1a94] ss:$72 sps:$4 sm:$0xff]  }
 0x5e3   : > { %v7155_v7 = vpop.f32.mrb[6].mxu1  ;;  %7558 = vmatpush1.bf16.msra.mxu1 %v21079_v62  ;;  %v19913_v16 = vadd.f32 %v7153_v6, %v2265_v4  ;;  %v21310_v62 = vld [vmem:[%s24537_s30 + $0x1970] ss:$72 sps:$4 sm:$0xff]   ;;  %v21147_v6 = vld [vmem:[%s24537_s30 + $0x93c] ss:$72 sps:$4 sm:$0xff]  }
 0x5e4   : > { %v19914_v11 = vadd.f32 %v7155_v7, %v2261_v51  ;;  %v7157_v12 = vpop.f32.mrb[7].mxu1  ;;  %7559 = vmatprep.subr.bf16.mxu1 %v21087_v63  ;;  %v21318_v63 = vld [vmem:[%s24537_s30 + $0x1a04] ss:$72 sps:$4 sm:$0xff]   ;;  %7273 = vmatpush1.bf16.msra.mxu0 %v21310_v62  ;;  %v21322_v7 = vld [vmem:[%s24537_s30 + $0x1a90] ss:$72 sps:$4 sm:$0xff]  }
 0x5e5   : > { %v19915_v17 = vadd.f32 %v7157_v12, %v2265_v4  ;;  %v21141_v51 = vld [vmem:[%s24537_s30 + $0x8ac] ss:$72 sps:$4 sm:$0xff]   ;;  %7274 = vmatprep.subr.bf16.mxu0 %v21318_v63  ;;  %v21139_v4 = vld [vmem:[%s24537_s30 + $0x8a8] ss:$72 sps:$4 sm:$0xff]  }
 0x5e6   : > { %v25332_v18 = vpack.c.bf16 %v19914_v11, %v19912_v10  ;;  %v21153_v10 = vld [vmem:[%s24537_s30 + $0x9cc] ss:$72 sps:$4 sm:$0xff]   ;;  %v21328_v11 = vld [vmem:[%s24537_s30 + $0x30] ss:$72 sps:$4 sm:$0xff]  }
 0x5e7   : > { %v25334_v19 = vpack.c.bf16 %v19915_v17, %v19913_v16  ;;  %7560 = vmatpush1.bf16.msra.mxu1 %v21085_v8  ;;  %v21330_v8 = vld [vmem:[%s24537_s30 + $0x34] ss:$72 sps:$4 sm:$0xff]   ;;  %v21151_v12 = vld [vmem:[%s24537_s30 + $0x9c8] ss:$72 sps:$4 sm:$0xff]  }
 0x5e8   : > { %7561 = vmatprep.subr.bf16.mxu1 %v21093_v9  ;;  %v21145_v9 = vld [vmem:[%s24537_s30 + $0x938] ss:$72 sps:$4 sm:$0xff]   ;;  %7275 = vmatpush1.bf16.msra.mxu0 %v21316_v1  ;;  %v21339_v17 = vld [vmem:[%s24537_s30 + $0x154] ss:$72 sps:$4 sm:$0xff]   ;;  %v21187_v62 = vld [vmem:[%s24537_s30 + $0xd28] ss:$72 sps:$4 sm:$0xff]  }
 0x5e9   : > { %7276 = vmatprep.subr.bf16.mxu0 %v21324_v3  ;;  %v21334_v16 = vld [vmem:[%s24537_s30 + $0xc0] ss:$72 sps:$4 sm:$0xff]  }
 0x5eb   : > { %7562 = vmatpush1.bf16.msra.mxu1 %v21091_v20  ;;  %v21157_v20 = vld [vmem:[%s24537_s30 + $0xa58] ss:$72 sps:$4 sm:$0xff]  }
 0x5ec   : > { %7563 = vmatprep.subr.bf16.mxu1 %v21099_v21  ;;  %7277 = vmatpush1.bf16.msra.mxu0 %v21322_v7  ;;  %v21165_v21 = vld [vmem:[%s24537_s30 + $0xaec] ss:$72 sps:$4 sm:$0xff]  }
 0x5ed   : > { %7418 = vmatprep.subr.bf16.mxu0 %v21330_v8  ;;  %v21352_v8 = vld [vmem:[%s24537_s30 + $0x420] ss:$72 sps:$4 sm:$0xff]  }
 0x5ef   : > { %7564 = vmatpush1.bf16.msra.mxu1 %v21097_v23  ;;  %7279 = vmatmul.mubr.bf16.vlgmr.msra.gmra.mrb[8].mxu0 %v24846_v61  ;;  %v21342_v23 = vld [vmem:[%s24537_s30 + $0x1e4] ss:$72 sps:$4 sm:$0xff]  }
 0x5f0   : > { %7565 = vmatprep.subr.bf16.mxu1 %v21105_v27  ;;  %7419 = vmatpush1.bf16.msra.mxu0 %v21328_v11  ;;  %v21171_v27 = vld [vmem:[%s24537_s30 + $0xb7c] ss:$72 sps:$4 sm:$0xff]   ;;  %v21201_v11 = vld [vmem:[%s24537_s30 + $0xe4c] ss:$72 sps:$4 sm:$0xff]  }
 0x5f1   : > { %7450 = vmatprep.mubr.bf16.mxu0 %v24679_v13  ;;  %7420 = vmatprep.subr.bf16.mxu0 %v21336_v15  ;;  %v21199_v15 = vld [vmem:[%s24537_s30 + $0xe48] ss:$72 sps:$4 sm:$0xff]  }
 0x5f3   : > { %7566 = vmatpush1.bf16.msra.mxu1 %v21103_v39  ;;  %v21169_v39 = vld [vmem:[%s24537_s30 + $0xb78] ss:$72 sps:$4 sm:$0xff]  }
 0x5f4   : > { %7567 = vmatprep.subr.bf16.mxu1 %v21111_v40  ;;  %7421 = vmatpush1.bf16.msra.mxu0 %v21334_v16  ;;  %v21177_v40 = vld [vmem:[%s24537_s30 + $0xc0c] ss:$72 sps:$4 sm:$0xff]   ;;  %v21207_v16 = vld [vmem:[%s24537_s30 + $0xedc] ss:$72 sps:$4 sm:$0xff]  }
 0x5f5   : > { %7422 = vmatprep.subr.bf16.mxu0 %v21339_v17  ;;  %v21358_v17 = vld [vmem:[%s24537_s30 + $0x540] ss:$72 sps:$4 sm:$0xff]  }
 0x5f7   : > { %7568 = vmatpush1.bf16.msra.mxu1 %v21109_v47  ;;  %v21348_v47 = vld [vmem:[%s24537_s30 + $0x304] ss:$72 sps:$4 sm:$0xff]  }
 0x5f8   : > { %7569 = vmatprep.subr.bf16.mxu1 %v21117_v24  ;;  %7423 = vmatpush1.bf16.msra.mxu0 %v21337_v42  ;;  %v21175_v24 = vld [vmem:[%s24537_s30 + $0xc08] ss:$72 sps:$4 sm:$0xff]   ;;  %v21213_v42 = vld [vmem:[%s24537_s30 + $0xf6c] ss:$72 sps:$4 sm:$0xff]  }
 0x5f9   : > { %7424 = vmatprep.subr.bf16.mxu0 %v21342_v23  ;;  %v21366_v23 = vld [vmem:[%s24537_s30 + $0x664] ss:$72 sps:$4 sm:$0xff]  }
 0x5fb   : > { %7570 = vmatpush1.bf16.msra.mxu1 %v21115_v26  ;;  %v2253_v26 = vrot.slane %v25319_v46, %v25396_v44  ;;  %v7022_v56 = vpop.f32.mrb[4].mxu0 }
 0x5fc   : > { %7571 = vmatprep.subr.bf16.mxu1 %v21123_v28  ;;  %7425 = vmatpush1.bf16.msra.mxu0 %v21340_v31  ;;  %v21346_v28 = vld [vmem:[%s24537_s30 + $0x300] ss:$72 sps:$4 sm:$0xff]   ;;  %v21219_v31 = vld [vmem:[%s24537_s30 + $0xffc] ss:$72 sps:$4 sm:$0xff]  }
 0x5fd   : > { %7426 = vmatprep.subr.bf16.mxu0 %v21345_v33  ;;  %v19908_v58 = vadd.f32 %v7022_v56, %v2253_v26  ;;  %v21364_v33 = vld [vmem:[%s24537_s30 + $0x660] ss:$72 sps:$4 sm:$0xff]   ;;  %v21373_v56 = vld [vmem:[%s24537_s30 + $0x810] ss:$72 sps:$4 sm:$0xff]  }
 0x5ff   : > { %7572 = vmatpush1.bf16.msra.mxu1 %v21121_v38  ;;  %v21351_v38 = vld [vmem:[%s24537_s30 + $0x394] ss:$72 sps:$4 sm:$0xff]  }
 0x600   : > { %7573 = vmatprep.subr.bf16.mxu1 %v21129_v55  ;;  %7427 = vmatpush1.bf16.msra.mxu0 %v21343_v43  ;;  %v21189_v55 = vld [vmem:[%s24537_s30 + $0xd2c] ss:$72 sps:$4 sm:$0xff]  }
 0x601   : > { %7428 = vmatprep.subr.bf16.mxu0 %v21348_v47  ;;  %v21225_v43 = vld [vmem:[%s24537_s30 + $0x108c] ss:$72 sps:$4 sm:$0xff]   ;;  %v21367_v47 = vld [vmem:[%s24537_s30 + $0x6f0] ss:$72 sps:$4 sm:$0xff]  }
 0x603   : > { %7574 = vmatpush1.bf16.msra.mxu1 %v21127_v35  ;;  %v7024_v35 = vpop.f32.mrb[5].mxu0 }
 0x604   : > { %7575 = vmatprep.subr.bf16.mxu1 %v21135_v36  ;;  %v21349_v36 = vld [vmem:[%s24537_s30 + $0x390] ss:$72 sps:$4 sm:$0xff]   ;;  %v19909_v63 = vadd.f32 %v7024_v35, %v2257_v32  ;;  %7429 = vmatpush1.bf16.msra.mxu0 %v21346_v28  ;;  %v21243_v35 = vld [vmem:[%s24537_s30 + $0x123c] ss:$72 sps:$4 sm:$0xff]  }
 0x605   : > { %7430 = vmatprep.subr.bf16.mxu0 %v21351_v38  ;;  %v21229_v28 = vld [vmem:[%s24537_s30 + $0x1118] ss:$72 sps:$4 sm:$0xff]   ;;  %v21375_v38 = vld [vmem:[%s24537_s30 + $0x814] ss:$72 sps:$4 sm:$0xff]  }
 0x607   : > { %7576 = vmatpush1.bf16.msra.mxu1 %v21133_v0  ;;  %v7026_v0 = vpop.f32.mrb[6].mxu0 }
 0x608   : > { %7577 = vmatprep.subr.bf16.mxu1 %v21141_v51  ;;  %v21354_v51 = vld [vmem:[%s24537_s30 + $0x424] ss:$72 sps:$4 sm:$0xff]   ;;  %v19910_v1 = vadd.f32 %v7026_v0, %v2253_v26  ;;  %v7028_v46 = vpop.f32.mrb[7].mxu0  ;;  %7431 = vmatpush1.bf16.msra.mxu0 %v21349_v36  ;;  %v21241_v36 = vld [vmem:[%s24537_s30 + $0x1238] ss:$72 sps:$4 sm:$0xff]  }
 0x609   : > { %v19911_v3 = vadd.f32 %v7028_v46, %v2257_v32  ;;  %7432 = vmatprep.subr.bf16.mxu0 %v21354_v51  ;;  %v21231_v26 = vld [vmem:[%s24537_s30 + $0x111c] ss:$72 sps:$4 sm:$0xff]   ;;  %v21237_v32 = vld [vmem:[%s24537_s30 + $0x11ac] ss:$72 sps:$4 sm:$0xff]   ;;  %v21379_v51 = vld [vmem:[%s24537_s30 + $0x930] ss:$72 sps:$4 sm:$0xff]  }
 0x60a   : > { %v21249_v0 = vld [vmem:[%s24537_s30 + $0x12cc] ss:$72 sps:$4 sm:$0xff]   ;;  %v21247_v46 = vld [vmem:[%s24537_s30 + $0x12c8] ss:$72 sps:$4 sm:$0xff]  }
 0x60b   : > { %7578 = vmatpush1.bf16.msra.mxu1 %v21139_v4  ;;  %v21195_v4 = vld [vmem:[%s24537_s30 + $0xdbc] ss:$72 sps:$4 sm:$0xff]   ;;  %v25418_v7 = vpack.c.bf16 %v19911_v3, %v19909_v63 }
 0x60c   : > { %7590 = vmatprep.subr.bf16.mxu1 %v21147_v6  ;;  %v25416_v6 = vpack.c.bf16 %v19910_v1, %v19908_v58  ;;  %7433 = vmatpush1.bf16.msra.mxu0 %v21352_v8  ;;  %v21378_v58 = vld [vmem:[%s24537_s30 + $0x8a4] ss:$72 sps:$4 sm:$0xff]   ;;  %v21381_v63 = vld [vmem:[%s24537_s30 + $0x934] ss:$72 sps:$4 sm:$0xff]  }
 0x60d   : > { %v21384_v1 = vld [vmem:[%s24537_s30 + $0x9c4] ss:$72 sps:$4 sm:$0xff]   ;;  %v21387_v8 = vld [vmem:[%s24537_s30 + $0xa54] ss:$72 sps:$4 sm:$0xff]  }
 0x60e   : > { %7580 = vmatmul.mubr.bf16.vlgmr.msra.gmra.mrb[12].mxu1 %v24703_v49  ;;  %v21255_v3 = vld [vmem:[%s24537_s30 + $0x135c] ss:$72 sps:$4 sm:$0xff]  }
 0x60f   : > { %7591 = vmatpush1.bf16.msra.mxu1 %v21145_v9  ;;  %7622 = vmatprep.mubr.bf16.mxu1 %v24706_v50  ;;  %v21357_v9 = vld [vmem:[%s24537_s30 + $0x4b4] ss:$72 sps:$4 sm:$0xff]  }
 0x610   : > { %7592 = vmatprep.subr.bf16.mxu1 %v21153_v10  ;;  %v21193_v10 = vld [vmem:[%s24537_s30 + $0xdb8] ss:$72 sps:$4 sm:$0xff]   ;;  %7434 = vmatprep.subr.bf16.mxu0 %v21357_v9 }
 0x611   : > { %v21253_v9 = vld [vmem:[%s24537_s30 + $0x1358] ss:$72 sps:$4 sm:$0xff]  }
 0x613   : > { %7593 = vmatpush1.bf16.msra.mxu1 %v21151_v12  ;;  %v21355_v12 = vld [vmem:[%s24537_s30 + $0x4b0] ss:$72 sps:$4 sm:$0xff]  }
 0x614   : > { %7594 = vmatprep.subr.bf16.mxu1 %v21159_v14  ;;  %v21360_v14 = vld [vmem:[%s24537_s30 + $0x544] ss:$72 sps:$4 sm:$0xff]   ;;  %7435 = vmatpush1.bf16.msra.mxu0 %v21355_v12 }
 0x615   : > { %7436 = vmatprep.subr.bf16.mxu0 %v21360_v14  ;;  %v21390_v12 = vld [vmem:[%s24537_s30 + $0xae4] ss:$72 sps:$4 sm:$0xff]   ;;  %v21259_v14 = vld [vmem:[%s24537_s30 + $0x13e8] ss:$72 sps:$4 sm:$0xff]  }
 0x617   : > { %7595 = vmatpush1.bf16.msra.mxu1 %v21157_v20  ;;  %v21363_v20 = vld [vmem:[%s24537_s30 + $0x5d4] ss:$72 sps:$4 sm:$0xff]  }
 0x618   : > { %7596 = vmatprep.subr.bf16.mxu1 %v21165_v21  ;;  %v21205_v21 = vld [vmem:[%s24537_s30 + $0xed8] ss:$72 sps:$4 sm:$0xff]   ;;  %7437 = vmatpush1.bf16.msra.mxu0 %v21358_v17  ;;  %v21393_v17 = vld [vmem:[%s24537_s30 + $0xb74] ss:$72 sps:$4 sm:$0xff]  }
 0x619   : > { %7438 = vmatprep.subr.bf16.mxu0 %v21363_v20  ;;  %v21265_v20 = vld [vmem:[%s24537_s30 + $0x1478] ss:$72 sps:$4 sm:$0xff]  }
 0x61b   : > { %7597 = vmatpush1.bf16.msra.mxu1 %v21163_v22  ;;  %v21361_v22 = vld [vmem:[%s24537_s30 + $0x5d0] ss:$72 sps:$4 sm:$0xff]  }
 0x61c   : > { %7598 = vmatprep.subr.bf16.mxu1 %v21171_v27  ;;  %v21211_v27 = vld [vmem:[%s24537_s30 + $0xf68] ss:$72 sps:$4 sm:$0xff]   ;;  %7439 = vmatpush1.bf16.msra.mxu0 %v21361_v22  ;;  %v21396_v22 = vld [vmem:[%s24537_s30 + $0xc04] ss:$72 sps:$4 sm:$0xff]  }
 0x61d   : > { %7440 = vmatprep.subr.bf16.mxu0 %v21366_v23  ;;  %v21271_v23 = vld [vmem:[%s24537_s30 + $0x1508] ss:$72 sps:$4 sm:$0xff]  }
 0x61f   : > { %7599 = vmatpush1.bf16.msra.mxu1 %v21169_v39  ;;  %v21369_v39 = vld [vmem:[%s24537_s30 + $0x6f4] ss:$72 sps:$4 sm:$0xff]  }
 0x620   : > { %7600 = vmatprep.subr.bf16.mxu1 %v21177_v40  ;;  %v21217_v40 = vld [vmem:[%s24537_s30 + $0xff8] ss:$72 sps:$4 sm:$0xff]   ;;  %7441 = vmatpush1.bf16.msra.mxu0 %v21364_v33  ;;  %v21399_v33 = vld [vmem:[%s24537_s30 + $0xc94] ss:$72 sps:$4 sm:$0xff]  }
 0x621   : > { %7442 = vmatprep.subr.bf16.mxu0 %v21369_v39  ;;  %v21277_v39 = vld [vmem:[%s24537_s30 + $0x1598] ss:$72 sps:$4 sm:$0xff]  }
 0x623   : > { %7601 = vmatpush1.bf16.msra.mxu1 %v21175_v24  ;;  %v21372_v24 = vld [vmem:[%s24537_s30 + $0x784] ss:$72 sps:$4 sm:$0xff]  }
 0x624   : > { %7602 = vmatprep.subr.bf16.mxu1 %v21183_v52  ;;  %v21223_v52 = vld [vmem:[%s24537_s30 + $0x1088] ss:$72 sps:$4 sm:$0xff]   ;;  %7443 = vmatpush1.bf16.msra.mxu0 %v21367_v47  ;;  %v21402_v47 = vld [vmem:[%s24537_s30 + $0xd24] ss:$72 sps:$4 sm:$0xff]  }
 0x625   : > { %7444 = vmatprep.subr.bf16.mxu0 %v21372_v24  ;;  %v21283_v24 = vld [vmem:[%s24537_s30 + $0x1628] ss:$72 sps:$4 sm:$0xff]  }
 0x627   : > { %7603 = vmatpush1.bf16.msra.mxu1 %v21181_v53  ;;  %v21370_v53 = vld [vmem:[%s24537_s30 + $0x780] ss:$72 sps:$4 sm:$0xff]  }
 0x628   : > { %7604 = vmatprep.subr.bf16.mxu1 %v21189_v55  ;;  %v21235_v55 = vld [vmem:[%s24537_s30 + $0x11a8] ss:$72 sps:$4 sm:$0xff]   ;;  %7445 = vmatpush1.bf16.msra.mxu0 %v21370_v53  ;;  %v21289_v53 = vld [vmem:[%s24537_s30 + $0x16b8] ss:$72 sps:$4 sm:$0xff]  }
 0x629   : > { %7446 = vmatprep.subr.bf16.mxu0 %v21375_v38  ;;  %v21403_v38 = vld [vmem:[%s24537_s30 + $0xdb0] ss:$72 sps:$4 sm:$0xff]  }
 0x62b   : > { %7605 = vmatpush1.bf16.msra.mxu1 %v21187_v62  ;;  %v21376_v62 = vld [vmem:[%s24537_s30 + $0x8a0] ss:$72 sps:$4 sm:$0xff]  }
 0x62c   : > { %7606 = vmatprep.subr.bf16.mxu1 %v21195_v4  ;;  %7447 = vmatpush1.bf16.msra.mxu0 %v21373_v56  ;;  %v21382_v4 = vld [vmem:[%s24537_s30 + $0x9c0] ss:$72 sps:$4 sm:$0xff]  }
 0x62d   : > { %7448 = vmatprep.subr.bf16.mxu0 %v21378_v58  ;;  %v21295_v56 = vld [vmem:[%s24537_s30 + $0x1748] ss:$72 sps:$4 sm:$0xff]   ;;  %v21303_v58 = vld [vmem:[%s24537_s30 + $0x17dc] ss:$72 sps:$4 sm:$0xff]  }
 0x62f   : > { %7607 = vmatpush1.bf16.msra.mxu1 %v21193_v10  ;;  %v21261_v10 = vld [vmem:[%s24537_s30 + $0x13ec] ss:$72 sps:$4 sm:$0xff]  }
 0x630   : > { %7608 = vmatprep.subr.bf16.mxu1 %v21201_v11  ;;  %7449 = vmatpush1.bf16.msra.mxu0 %v21376_v62  ;;  %v21385_v11 = vld [vmem:[%s24537_s30 + $0xa50] ss:$72 sps:$4 sm:$0xff]  }
 0x631   : > { %7461 = vmatprep.subr.bf16.mxu0 %v21381_v63  ;;  %v21301_v62 = vld [vmem:[%s24537_s30 + $0x17d8] ss:$72 sps:$4 sm:$0xff]   ;;  %v21309_v63 = vld [vmem:[%s24537_s30 + $0x186c] ss:$72 sps:$4 sm:$0xff]  }
 0x633   : > { %7609 = vmatpush1.bf16.msra.mxu1 %v21199_v15  ;;  %7451 = vmatmul.mubr.bf16.vlgmr.msra.gmra.mrb[12].mxu0 %v24703_v49  ;;  %v21267_v15 = vld [vmem:[%s24537_s30 + $0x147c] ss:$72 sps:$4 sm:$0xff]  }
 0x634   : > { %7610 = vmatprep.subr.bf16.mxu1 %v21207_v16  ;;  %7462 = vmatpush1.bf16.msra.mxu0 %v21379_v51  ;;  %v21388_v16 = vld [vmem:[%s24537_s30 + $0xae0] ss:$72 sps:$4 sm:$0xff]   ;;  %v21414_v51 = vld [vmem:[%s24537_s30 + $0xf64] ss:$72 sps:$4 sm:$0xff]  }
 0x635   : > { %7493 = vmatprep.mubr.bf16.mxu0 %v24706_v50  ;;  %7463 = vmatprep.subr.bf16.mxu0 %v21384_v1  ;;  %v21307_v1 = vld [vmem:[%s24537_s30 + $0x1868] ss:$72 sps:$4 sm:$0xff]  }
 0x637   : > { %7611 = vmatpush1.bf16.msra.mxu1 %v21205_v21  ;;  %v21273_v21 = vld [vmem:[%s24537_s30 + $0x150c] ss:$72 sps:$4 sm:$0xff]  }
 0x638   : > { %7612 = vmatprep.subr.bf16.mxu1 %v21213_v42  ;;  %7464 = vmatpush1.bf16.msra.mxu0 %v21382_v4  ;;  %v21391_v42 = vld [vmem:[%s24537_s30 + $0xb70] ss:$72 sps:$4 sm:$0xff]   ;;  %v21417_v4 = vld [vmem:[%s24537_s30 + $0xff4] ss:$72 sps:$4 sm:$0xff]  }
 0x639   : > { %7465 = vmatprep.subr.bf16.mxu0 %v21387_v8  ;;  %v21313_v8 = vld [vmem:[%s24537_s30 + $0x18f8] ss:$72 sps:$4 sm:$0xff]  }
 0x63b   : > { %7613 = vmatpush1.bf16.msra.mxu1 %v21211_v27  ;;  %v21279_v27 = vld [vmem:[%s24537_s30 + $0x159c] ss:$72 sps:$4 sm:$0xff]  }
 0x63c   : > { %7614 = vmatprep.subr.bf16.mxu1 %v21219_v31  ;;  %7466 = vmatpush1.bf16.msra.mxu0 %v21385_v11  ;;  %v21394_v31 = vld [vmem:[%s24537_s30 + $0xc00] ss:$72 sps:$4 sm:$0xff]   ;;  %v21420_v11 = vld [vmem:[%s24537_s30 + $0x1084] ss:$72 sps:$4 sm:$0xff]  }
 0x63d   : > { %7467 = vmatprep.subr.bf16.mxu0 %v21390_v12  ;;  %v21319_v12 = vld [vmem:[%s24537_s30 + $0x1988] ss:$72 sps:$4 sm:$0xff]  }
 0x63f   : > { %7615 = vmatpush1.bf16.msra.mxu1 %v21217_v40  ;;  %v21285_v40 = vld [vmem:[%s24537_s30 + $0x162c] ss:$72 sps:$4 sm:$0xff]  }
 0x640   : > { %7616 = vmatprep.subr.bf16.mxu1 %v21225_v43  ;;  %7468 = vmatpush1.bf16.msra.mxu0 %v21388_v16  ;;  %v21397_v43 = vld [vmem:[%s24537_s30 + $0xc90] ss:$72 sps:$4 sm:$0xff]   ;;  %v21423_v16 = vld [vmem:[%s24537_s30 + $0x1114] ss:$72 sps:$4 sm:$0xff]  }
 0x641   : > { %7469 = vmatprep.subr.bf16.mxu0 %v21393_v17  ;;  %v21325_v17 = vld [vmem:[%s24537_s30 + $0x1a18] ss:$72 sps:$4 sm:$0xff]  }
 0x643   : > { %7617 = vmatpush1.bf16.msra.mxu1 %v21223_v52  ;;  %v21291_v52 = vld [vmem:[%s24537_s30 + $0x16bc] ss:$72 sps:$4 sm:$0xff]  }
 0x644   : > { %7618 = vmatprep.subr.bf16.mxu1 %v21231_v26  ;;  %7470 = vmatpush1.bf16.msra.mxu0 %v21391_v42  ;;  %v21400_v26 = vld [vmem:[%s24537_s30 + $0xd20] ss:$72 sps:$4 sm:$0xff]   ;;  %v21426_v42 = vld [vmem:[%s24537_s30 + $0x11a4] ss:$72 sps:$4 sm:$0xff]  }
 0x645   : > { %7471 = vmatprep.subr.bf16.mxu0 %v21396_v22  ;;  %v21331_v22 = vld [vmem:[%s24537_s30 + $0x1aa8] ss:$72 sps:$4 sm:$0xff]  }
 0x647   : > { %7619 = vmatpush1.bf16.msra.mxu1 %v21229_v28  ;;  %v21405_v28 = vld [vmem:[%s24537_s30 + $0xdb4] ss:$72 sps:$4 sm:$0xff]  }
 0x648   : > { %7620 = vmatprep.subr.bf16.mxu1 %v21237_v32  ;;  %7472 = vmatpush1.bf16.msra.mxu0 %v21394_v31  ;;  %v21297_v32 = vld [vmem:[%s24537_s30 + $0x174c] ss:$72 sps:$4 sm:$0xff]   ;;  %v21427_v31 = vld [vmem:[%s24537_s30 + $0x1230] ss:$72 sps:$4 sm:$0xff]  }
 0x649   : > { %7473 = vmatprep.subr.bf16.mxu0 %v21399_v33  ;;  %v23850_v33 = vmov 0.0  }
 0x64b   : > { %7621 = vmatpush1.bf16.msra.mxu1 %v21235_v55  ;;  %v21408_v55 = vld [vmem:[%s24537_s30 + $0xe44] ss:$72 sps:$4 sm:$0xff]  }
 0x64c   : > { %7633 = vmatprep.subr.bf16.mxu1 %v21243_v35  ;;  %7474 = vmatpush1.bf16.msra.mxu0 %v21397_v43  ;;  %v21406_v35 = vld [vmem:[%s24537_s30 + $0xe40] ss:$72 sps:$4 sm:$0xff]   ;;  %v21435_v43 = vld [vmem:[%s24537_s30 + $0x1354] ss:$72 sps:$4 sm:$0xff]  }
 0x64d   : > { %7475 = vmatprep.subr.bf16.mxu0 %v21402_v47  ;;  %v21433_v47 = vld [vmem:[%s24537_s30 + $0x1350] ss:$72 sps:$4 sm:$0xff]  }
 0x64e   : > { %7623 = vmatmul.mubr.bf16.vlgmr.msra.gmra.mrb[12].mxu1 %v24774_v54 }
 0x64f   : > { %7634 = vmatpush1.bf16.msra.mxu1 %v21241_v36  ;;  %7665 = vmatprep.mubr.bf16.mxu1 %v24778_v57  ;;  %v21411_v36 = vld [vmem:[%s24537_s30 + $0xed4] ss:$72 sps:$4 sm:$0xff]  }
 0x650   : > { %7635 = vmatprep.subr.bf16.mxu1 %v21249_v0  ;;  %7476 = vmatpush1.bf16.msra.mxu0 %v21400_v26  ;;  %v21409_v0 = vld [vmem:[%s24537_s30 + $0xed0] ss:$72 sps:$4 sm:$0xff]   ;;  %v21441_v26 = vld [vmem:[%s24537_s30 + $0x1474] ss:$72 sps:$4 sm:$0xff]  }
 0x651   : > { %7477 = vmatprep.subr.bf16.mxu0 %v21405_v28  ;;  %v25541_v28 = vld [vmem:[%s24545_s25 + $0x8] sm:$0xff] }
 0x653   : > { %7636 = vmatpush1.bf16.msra.mxu1 %v21247_v46  ;;  %v21315_v46 = vld [vmem:[%s24537_s30 + $0x18fc] ss:$72 sps:$4 sm:$0xff]  }
 0x654   : > { %7637 = vmatprep.subr.bf16.mxu1 %v21255_v3  ;;  %7478 = vmatpush1.bf16.msra.mxu0 %v21403_v38  ;;  %v21412_v3 = vld [vmem:[%s24537_s30 + $0xf60] ss:$72 sps:$4 sm:$0xff]   ;;  %v2277_v38 = vrot.slane %v25541_v28, %v25081_v45 }
 0x655   : > { %7479 = vmatprep.subr.bf16.mxu0 %v21408_v55 }
 0x657   : > { %7638 = vmatpush1.bf16.msra.mxu1 %v21253_v9  ;;  %v21321_v9 = vld [vmem:[%s24537_s30 + $0x198c] ss:$72 sps:$4 sm:$0xff]  }
 0x658   : > { %7639 = vmatprep.subr.bf16.mxu1 %v21261_v10  ;;  %7480 = vmatpush1.bf16.msra.mxu0 %v21406_v35  ;;  %v21415_v10 = vld [vmem:[%s24537_s30 + $0xff0] ss:$72 sps:$4 sm:$0xff]  }
 0x659   : > { %7481 = vmatprep.subr.bf16.mxu0 %v21411_v36  ;;  %v21447_v36 = vld [vmem:[%s24537_s30 + $0x1594] ss:$72 sps:$4 sm:$0xff]  }
 0x65b   : > { %7640 = vmatpush1.bf16.msra.mxu1 %v21259_v14  ;;  %v21327_v14 = vld [vmem:[%s24537_s30 + $0x1a1c] ss:$72 sps:$4 sm:$0xff]  }
 0x65c   : > { %7641 = vmatprep.subr.bf16.mxu1 %v21267_v15  ;;  %7482 = vmatpush1.bf16.msra.mxu0 %v21409_v0  ;;  %v21418_v15 = vld [vmem:[%s24537_s30 + $0x1080] ss:$72 sps:$4 sm:$0xff]  }
 0x65d   : > { %7483 = vmatprep.subr.bf16.mxu0 %v21414_v51 }
 0x65f   : > { %7642 = vmatpush1.bf16.msra.mxu1 %v21265_v20  ;;  %v21333_v20 = vld [vmem:[%s24537_s30 + $0x1aac] ss:$72 sps:$4 sm:$0xff]  }
 0x660   : > { %7643 = vmatprep.subr.bf16.mxu1 %v21273_v21  ;;  %7484 = vmatpush1.bf16.msra.mxu0 %v21412_v3  ;;  %v21421_v21 = vld [vmem:[%s24537_s30 + $0x1110] ss:$72 sps:$4 sm:$0xff]  }
 0x661   : > { %7485 = vmatprep.subr.bf16.mxu0 %v21417_v4  ;;  %v21445_v3 = vld [vmem:[%s24537_s30 + $0x1590] ss:$72 sps:$4 sm:$0xff]  }
 0x663   : > { %7644 = vmatpush1.bf16.msra.mxu1 %v21271_v23  ;;  %v21424_v23 = vld [vmem:[%s24537_s30 + $0x11a0] ss:$72 sps:$4 sm:$0xff]  }
 0x664   : > { %7645 = vmatprep.subr.bf16.mxu1 %v21279_v27  ;;  %7486 = vmatpush1.bf16.msra.mxu0 %v21415_v10  ;;  %v21429_v27 = vld [vmem:[%s24537_s30 + $0x1234] ss:$72 sps:$4 sm:$0xff]   ;;  %v21448_v10 = vld [vmem:[%s24537_s30 + $0x1620] ss:$72 sps:$4 sm:$0xff]  }
 0x665   : > { %7487 = vmatprep.subr.bf16.mxu0 %v21420_v11  ;;  %v21453_v11 = vld [vmem:[%s24537_s30 + $0x16b4] ss:$72 sps:$4 sm:$0xff]  }
 0x667   : > { %7646 = vmatpush1.bf16.msra.mxu1 %v21277_v39  ;;  %v21432_v39 = vld [vmem:[%s24537_s30 + $0x12c4] ss:$72 sps:$4 sm:$0xff]  }
 0x668   : > { %7647 = vmatprep.subr.bf16.mxu1 %v21285_v40  ;;  %7488 = vmatpush1.bf16.msra.mxu0 %v21418_v15  ;;  %v21430_v40 = vld [vmem:[%s24537_s30 + $0x12c0] ss:$72 sps:$4 sm:$0xff]  }
 0x669   : > { %7489 = vmatprep.subr.bf16.mxu0 %v21423_v16  ;;  %v21454_v15 = vld [vmem:[%s24537_s30 + $0x1740] ss:$72 sps:$4 sm:$0xff]   ;;  %v21459_v16 = vld [vmem:[%s24537_s30 + $0x17d4] ss:$72 sps:$4 sm:$0xff]  }
 0x66b   : > { %7648 = vmatpush1.bf16.msra.mxu1 %v21283_v24  ;;  %v21438_v24 = vld [vmem:[%s24537_s30 + $0x13e4] ss:$72 sps:$4 sm:$0xff]  }
 0x66c   : > { %7649 = vmatprep.subr.bf16.mxu1 %v21291_v52  ;;  %7490 = vmatpush1.bf16.msra.mxu0 %v21421_v21  ;;  %v21436_v52 = vld [vmem:[%s24537_s30 + $0x13e0] ss:$72 sps:$4 sm:$0xff]  }
 0x66d   : > { %7491 = vmatprep.subr.bf16.mxu0 %v21426_v42  ;;  %v21460_v21 = vld [vmem:[%s24537_s30 + $0x1860] ss:$72 sps:$4 sm:$0xff]   ;;  %v21465_v42 = vld [vmem:[%s24537_s30 + $0x18f4] ss:$72 sps:$4 sm:$0xff]  }
 0x66f   : > { %7650 = vmatpush1.bf16.msra.mxu1 %v21289_v53  ;;  %v21439_v53 = vld [vmem:[%s24537_s30 + $0x1470] ss:$72 sps:$4 sm:$0xff]  }
 0x670   : > { %7651 = vmatprep.subr.bf16.mxu1 %v21297_v32  ;;  %7492 = vmatpush1.bf16.msra.mxu0 %v21424_v23  ;;  %v21444_v32 = vld [vmem:[%s24537_s30 + $0x1504] ss:$72 sps:$4 sm:$0xff]  }
 0x671   : > { %7504 = vmatprep.subr.bf16.mxu0 %v21429_v27  ;;  %v21468_v23 = vld [vmem:[%s24537_s30 + $0x1984] ss:$72 sps:$4 sm:$0xff]   ;;  %v21466_v27 = vld [vmem:[%s24537_s30 + $0x1980] ss:$72 sps:$4 sm:$0xff]  }
 0x673   : > { %7652 = vmatpush1.bf16.msra.mxu1 %v21295_v56  ;;  %7494 = vmatmul.mubr.bf16.vlgmr.msra.gmra.mrb[12].mxu0 %v24774_v54  ;;  %v2281_v56 = vrot.slane %v25541_v28, %v25085_v48 }
 0x674   : > { %7653 = vmatprep.subr.bf16.mxu1 %v21303_v58  ;;  %7505 = vmatpush1.bf16.msra.mxu0 %v21427_v31  ;;  %v21442_v58 = vld [vmem:[%s24537_s30 + $0x1500] ss:$72 sps:$4 sm:$0xff]   ;;  %v21471_v31 = vld [vmem:[%s24537_s30 + $0x1a14] ss:$72 sps:$4 sm:$0xff]  }
 0x675   : > { %7536 = vmatprep.mubr.bf16.mxu0 %v24778_v57  ;;  %7506 = vmatprep.subr.bf16.mxu0 %v21432_v39  ;;  %v21469_v39 = vld [vmem:[%s24537_s30 + $0x1a10] ss:$72 sps:$4 sm:$0xff]  }
 0x677   : > { %7654 = vmatpush1.bf16.msra.mxu1 %v21301_v62 }
 0x678   : > { %7655 = vmatprep.subr.bf16.mxu1 %v21309_v63  ;;  %7507 = vmatpush1.bf16.msra.mxu0 %v21430_v40  ;;  %v21474_v40 = vld [vmem:[%s24537_s30 + $0x1aa4] ss:$72 sps:$4 sm:$0xff]  }
 0x679   : > { %7508 = vmatprep.subr.bf16.mxu0 %v21435_v43  ;;  %v21472_v43 = vld [vmem:[%s24537_s30 + $0x1aa0] ss:$72 sps:$4 sm:$0xff]  }
 0x67b   : > { %7656 = vmatpush1.bf16.msra.mxu1 %v21307_v1 }
 0x67c   : > { %7657 = vmatprep.subr.bf16.mxu1 %v21315_v46  ;;  %7509 = vmatpush1.bf16.msra.mxu0 %v21433_v47  ;;  %v2269_v47 = vrot.slane %v25541_v28, %v25163_v2 }
 0x67d   : > { %7510 = vmatprep.subr.bf16.mxu0 %v21438_v24  ;;  %v2273_v24 = vrot.slane %v25541_v28, %v25168_v5 }
 0x67f   : > { %7658 = vmatpush1.bf16.msra.mxu1 %v21313_v8  ;;  %v21450_v8 = vld [vmem:[%s24537_s30 + $0x1624] ss:$72 sps:$4 sm:$0xff]  }
 0x680   : > { %7659 = vmatprep.subr.bf16.mxu1 %v21321_v9  ;;  %7511 = vmatpush1.bf16.msra.mxu0 %v21436_v52 }
 0x681   : > { %7512 = vmatprep.subr.bf16.mxu0 %v21441_v26 }
 0x683   : > { %7660 = vmatpush1.bf16.msra.mxu1 %v21319_v12  ;;  %v21451_v12 = vld [vmem:[%s24537_s30 + $0x16b0] ss:$72 sps:$4 sm:$0xff]  }
 0x684   : > { %7661 = vmatprep.subr.bf16.mxu1 %v21327_v14  ;;  %7513 = vmatpush1.bf16.msra.mxu0 %v21439_v53  ;;  %v21456_v14 = vld [vmem:[%s24537_s30 + $0x1744] ss:$72 sps:$4 sm:$0xff]  }
 0x685   : > { %7514 = vmatprep.subr.bf16.mxu0 %v21444_v32 }
 0x687   : > { %7662 = vmatpush1.bf16.msra.mxu1 %v21325_v17  ;;  %v21457_v17 = vld [vmem:[%s24537_s30 + $0x17d0] ss:$72 sps:$4 sm:$0xff]  }
 0x688   : > { %7663 = vmatprep.subr.bf16.mxu1 %v21333_v20  ;;  %7515 = vmatpush1.bf16.msra.mxu0 %v21442_v58  ;;  %v21462_v20 = vld [vmem:[%s24537_s30 + $0x1864] ss:$72 sps:$4 sm:$0xff]  }
 0x689   : > { %7516 = vmatprep.subr.bf16.mxu0 %v21447_v36 }
 0x68b   : > { %7664 = vmatpush1.bf16.msra.mxu1 %v21331_v22  ;;  %v21463_v22 = vld [vmem:[%s24537_s30 + $0x18f0] ss:$72 sps:$4 sm:$0xff]  }
 0x68c   : > { %19744 = vmatprep.subr.bf16.mxu1 %v23850_v33  ;;  %7517 = vmatpush1.bf16.msra.mxu0 %v21445_v3 }
 0x68d   : > { %7518 = vmatprep.subr.bf16.mxu0 %v21450_v8 }
 0x68e   : > { %7666 = vmatmul.mubr.bf16.vlgmr.msra.gmra.mrb[12].mxu1 %v24846_v61 }
 0x68f   : > { %19746 = vmatprep.mubr.msk.bf16.mxu1 %vm23851_vm0, %v23850_v33 }
 0x690   : > { %7519 = vmatpush1.bf16.msra.mxu0 %v21448_v10 }
 0x691   : > { %7520 = vmatprep.subr.bf16.mxu0 %v21453_v11 }
 0x694   : > { %19745 = vmatpush3.bf16.xpose.msra.mxu1 %v25332_v18  ;;  %7521 = vmatpush1.bf16.msra.mxu0 %v21451_v12 }
 0x695   : > { %19750 = vmatprep.subr.bf16.mxu1 %v23850_v33  ;;  %7522 = vmatprep.subr.bf16.mxu0 %v21456_v14 }
 0x698   : > { %7523 = vmatpush1.bf16.msra.mxu0 %v21454_v15 }
 0x699   : > { %7524 = vmatprep.subr.bf16.mxu0 %v21459_v16 }
 0x69b   : > { %19747 = vmatmul.mubr.bf16.vlgmr.msra.gmra.mrb[16].mxu1 %v25183_v29 }
 0x69c   : > { %19752 = vmatprep.mubr.msk.bf16.mxu1 %vm23851_vm0, %v23850_v33  ;;  %7525 = vmatpush1.bf16.msra.mxu0 %v21457_v17 }
 0x69d   : > { %7526 = vmatprep.subr.bf16.mxu0 %v21462_v20 }
 0x6a0   : > { %7527 = vmatpush1.bf16.msra.mxu0 %v21460_v21  ;;  %v2285_v21 = vrot.slane %v25541_v28, %v25396_v44 }
 0x6a1   : > { %v7409_v55 = vpop.f32.mrb[8].mxu1  ;;  %7528 = vmatprep.subr.bf16.mxu0 %v21465_v42  ;;  %v2289_v42 = vrot.slane %v25541_v28, %v25401_v25 }
 0x6a2   : > { %v7411_v35 = vpop.f32.mrb[9].mxu1  ;;  %v19920_v63 = vadd.f32 %v7409_v55, %v2277_v38 }
 0x6a3   : > { %v7413_v62 = vpop.f32.mrb[10].mxu1  ;;  %v19921_v1 = vadd.f32 %v7411_v35, %v2281_v56 }
 0x6a4   : > { %v19922_v0 = vadd.f32 %v7413_v62, %v2277_v38  ;;  %v7415_v51 = vpop.f32.mrb[11].mxu1  ;;  %7529 = vmatpush1.bf16.msra.mxu0 %v21463_v22 }
 0x6a5   : > { %v19923_v46 = vadd.f32 %v7415_v51, %v2281_v56  ;;  %7530 = vmatprep.subr.bf16.mxu0 %v21468_v23 }
 0x6a6   : > { %v25552_v4 = vpack.c.bf16 %v19922_v0, %v19920_v63  ;;  %v2297_v63 = vrot.slane %v25541_v28, %v2264_v60 }
 0x6a7   : > { %v25555_v9 = vpack.c.bf16 %v19923_v46, %v19921_v1 }
 0x6a8   : > { %7531 = vmatpush1.bf16.msra.mxu0 %v21466_v27 }
 0x6a9   : > { %7532 = vmatprep.subr.bf16.mxu0 %v21471_v31 }
 0x6ac   : > { %7533 = vmatpush1.bf16.msra.mxu0 %v21469_v39 }
 0x6ad   : > { %7534 = vmatprep.subr.bf16.mxu0 %v21474_v40 }
 0x6b0   : > { %7535 = vmatpush1.bf16.msra.mxu0 %v21472_v43 }
 0x6b3   : > { %7537 = vmatmul.mubr.bf16.vlgmr.msra.gmra.mrb[12].mxu0 %v24846_v61 }
 0x6b4   : > { %7708 = vmatprep.mubr.bf16.mxu0 %v24679_v13  ;;  %v2293_v13 = vrot.slane %v25541_v28, %v2260_v59  ;;  %v25597_v59 = vld [vmem:[%s27348_s16] ss:$0 sm:$0xff] }
 0x6c2   : > { %v7280_v52 = vpop.f32.mrb[8].mxu0 }
 0x6c3   : > { %v19916_v26 = vadd.f32 %v7280_v52, %v2269_v47  ;;  %v7282_v53 = vpop.f32.mrb[9].mxu0 }
 0x6c4   : > { %v19917_v32 = vadd.f32 %v7282_v53, %v2273_v24  ;;  %v7284_v38 = vpop.f32.mrb[10].mxu0 }
 0x6c5   : > { %v19918_v55 = vadd.f32 %v7284_v38, %v2269_v47  ;;  %v7286_v56 = vpop.f32.mrb[11].mxu0 }
 0x6c6   : > { %v19919_v58 = vadd.f32 %v7286_v56, %v2273_v24 }
 0x6c7   : > { %v25580_v35 = vpack.c.bf16 %v19918_v55, %v19916_v26 }
 0x6c8   : > { %v25582_v36 = vpack.c.bf16 %v19919_v58, %v19917_v32 }
 0x761   : > { %v7667_v62 = vpop.f32.mrb[12].mxu1 }
 0x762   : > { %v7669_v0 = vpop.f32.mrb[13].mxu1  ;;  %v19928_v1 = vadd.f32 %v7667_v62, %v2293_v13 }
 0x763   : > { %v7671_v51 = vpop.f32.mrb[14].mxu1  ;;  %v19929_v8 = vadd.f32 %v7669_v0, %v2297_v63 }
 0x764   : > { %v19930_v46 = vadd.f32 %v7671_v51, %v2293_v13  ;;  %v7673_v3 = vpop.f32.mrb[15].mxu1 }
 0x765   : > { %v19931_v10 = vadd.f32 %v7673_v3, %v2297_v63 }
 0x766   : > { %v25590_v11 = vpack.c.bf16 %v19930_v46, %v19928_v1 }
 0x767   : > { %v25592_v12 = vpack.c.bf16 %v19931_v10, %v19929_v8 }
 0x76e   : > { %v7862_v14 = vpop.f32.mrb[16].mxu1 }
 0x76f   : > { %v7868_v34 = vmul.f32 0.088388346, %v7862_v14  ;;  %v19748_v15 = vpop.f32.mrb[17].mxu1 }
 0x770   : > { %v7865_v60 = vpop.f32.mrb[18].mxu1 }
 0x771   : > { %v19749_v16 = vpop.f32.mrb[19].mxu1  ;;  %v7869_v17 = vadd.f32 %v25597_v59, %v7868_v34 }
 0x773   : > { %v7871_v20 = vsel %vm7870_vm1, %v7869_v17, -inf }
 0x774   : > { %7872 = vmax.xlane.f32.xlu0 %v7871_v20 }
 0x786   : > { %v7538_v22 = vpop.f32.mrb[12].mxu0 }
 0x787   : > { %v19924_v23 = vadd.f32 %v7538_v22, %v2285_v21  ;;  %v7540_v27 = vpop.f32.mrb[13].mxu0 }
 0x788   : > { %v19925_v31 = vadd.f32 %v7540_v27, %v2289_v42  ;;  %v7542_v39 = vpop.f32.mrb[14].mxu0 }
 0x789   : > { %v19926_v40 = vadd.f32 %v7542_v39, %v2285_v21  ;;  %v7544_v43 = vpop.f32.mrb[15].mxu0  ;;  %v8090_v39 = vsel %vm7886_vm2, %v25590_v11, 0 }
 0x78a   : > { %v19927_v47 = vadd.f32 %v7544_v43, %v2289_v42 }
 0x78b   : > { %v25605_v24 = vpack.c.bf16 %v19926_v40, %v19924_v23 }
 0x78c   : > { %v25607_v52 = vpack.c.bf16 %v19927_v47, %v19925_v31 }
 0x78d   : > { %v7888_v26 = vsel %vm7886_vm2, %v25605_v24, 0 }
 0x78e   : > { %19751 = vmatpush3.bf16.msra.mxu1 %v7888_v26  ;;  %v7989_v63 = vsel %vm7886_vm2, %v25607_v52, 0 }
 0x78f   : > { %19756 = vmatprep.subr.bf16.mxu1 %v23850_v33 }
 0x801   : > { %v7873_v28 = vpop.xlane.xlu0 %7872 }
 0x802   : > { %v7874_v53 = vsub.f32 %v7869_v17, %v7873_v28 }
 0x804   : > { %v7875_v32 = vmul.f32 1.442695, %v7874_v53 }
 0x806   : > { %22627 = vpow2.f32 %v7875_v32 }
 0x810   : > { %v22628_v38 = vpop.eup %22627 }
 0x811   : > { %v7877_v55 = vsel %vm7870_vm1, %v22628_v38, 0.0 }
 0x812   : > { %7878 = vadd.xlane.f32.xlu0 %v7877_v55 }
 0x89f   : > { %v7879_v56 = vpop.xlane.xlu0 %7878 }
 0x8a0   : > { %22629 = vrcp.f32 %v7879_v56 }
 0x8aa   : > { %v22630_v58 = vpop.eup %22629 }
 0x8ab   : > { %v7881_v13 = vmul.f32 %v22630_v58, %v22628_v38 }
 0x8ad   : > { %v7882_v62 = vpack.c.bf16 %v7881_v13, %v7881_v13 }
 0x8af   : > { %19753 = vmatmul.mubr.msk.bf16.vlgmr.msra.gmra.mrb[20].mxu1 %vm7870_vm1, %v7882_v62 }
 0x8b0   : > { %19757 = vmatpush3.bf16.xpose.msra.mxu1 %v25334_v19  ;;  %19758 = vmatprep.mubr.msk.bf16.mxu1 %vm23851_vm0, %v23850_v33 }
 0x8b1   : > { %19762 = vmatprep.subr.bf16.mxu1 %v23850_v33 }
 0x8b7   : > { %19759 = vmatmul.mubr.bf16.vlgmr.msra.gmra.mrb[24].mxu1 %v25185_v30 }
 0x8b8   : > { %19763 = vmatpush3.bf16.msra.mxu1 %v7989_v63  ;;  %19764 = vmatprep.mubr.msk.bf16.mxu1 %vm23851_vm0, %v23850_v33 }
 0x8b9   : > { %19768 = vmatprep.subr.bf16.mxu1 %v23850_v33 }
 0x982   : > { %v25624_v0 = vpop.f32.mrb[20].mxu1 }
 0x983   : > { %v19754_v51 = vpop.f32.mrb[21].mxu1 }
 0x984   : > { %v7927_v1 = vpop.f32.mrb[22].mxu1 }
 0x985   : > { %v19755_v46 = vpop.f32.mrb[23].mxu1 }
 0x98a   : > { %v7965_v3 = vpop.f32.mrb[24].mxu1 }
 0x98b   : > { %v7971_v8 = vmul.f32 0.088388346, %v7965_v3  ;;  %v19760_v10 = vpop.f32.mrb[25].mxu1 }
 0x98c   : > { %v7968_v14 = vpop.f32.mrb[26].mxu1 }
 0x98d   : > { %v19761_v34 = vpop.f32.mrb[27].mxu1  ;;  %v7972_v15 = vadd.f32 %v25597_v59, %v7971_v8  ;;  %v8191_v14 = vsel %vm7886_vm2, %v25592_v12, 0 }
 0x98f   : > { %v7973_v60 = vsel %vm7870_vm1, %v7972_v15, -inf }
 0x990   : > { %7974 = vmax.xlane.f32.xlu1 %v7973_v60 }
 0xa1d   : > { %v7975_v16 = vpop.xlane.xlu1 %7974 }
 0xa1e   : > { %v7976_v17 = vsub.f32 %v7972_v15, %v7975_v16 }
 0xa20   : > { %v7977_v20 = vmul.f32 1.442695, %v7976_v17 }
 0xa22   : > { %22631 = vpow2.f32 %v7977_v20 }
 0xa2c   : > { %v22632_v21 = vpop.eup %22631 }
 0xa2d   : > { %v7979_v42 = vsel %vm7870_vm1, %v22632_v21, 0.0 }
 0xa2e   : > { %7980 = vadd.xlane.f32.xlu1 %v7979_v42 }
 0xabb   : > { %v7981_v22 = vpop.xlane.xlu1 %7980 }
 0xabc   : > { %22633 = vrcp.f32 %v7981_v22 }
 0xac6   : > { %v22634_v23 = vpop.eup %22633 }
 0xac7   : > { %v7983_v27 = vmul.f32 %v22634_v23, %v22632_v21 }
 0xac9   : > { %v7984_v31 = vpack.c.bf16 %v7983_v27, %v7983_v27 }
 0xacb   : > { %19765 = vmatmul.mubr.msk.bf16.vlgmr.msra.gmra.mrb[28].mxu1 %vm7870_vm1, %v7984_v31 }
 0xacc   : > { %19769 = vmatpush3.bf16.xpose.msra.mxu1 %v25580_v35  ;;  %19770 = vmatprep.mubr.msk.bf16.mxu1 %vm23851_vm0, %v23850_v33 }
 0xacd   : > { %19774 = vmatprep.subr.bf16.mxu1 %v23850_v33 }
 0xad3   : > { %19771 = vmatmul.mubr.bf16.vlgmr.msra.gmra.mrb[32].mxu1 %v25099_v37 }
 0xad4   : > { %19775 = vmatpush3.bf16.msra.mxu1 %v8090_v39  ;;  %19776 = vmatprep.mubr.msk.bf16.mxu1 %vm23851_vm0, %v23850_v33 }
 0xad5   : > { %19780 = vmatprep.subr.bf16.mxu1 %v23850_v33 }
 0xb9e   : > { %v25640_v40 = vpop.f32.mrb[28].mxu1 }
 0xb9f   : > { %v19766_v43 = vpop.f32.mrb[29].mxu1 }
 0xba0   : > { %v8028_v47 = vpop.f32.mrb[30].mxu1 }
 0xba1   : > { %v19767_v26 = vpop.f32.mrb[31].mxu1 }
 0xba6   : > { %v8066_v28 = vpop.f32.mrb[32].mxu1 }
 0xba7   : > { %v8072_v53 = vmul.f32 0.088388346, %v8066_v28  ;;  %v19772_v32 = vpop.f32.mrb[33].mxu1  ;;  %v21477_v28 = vld [vmem:[%s24537_s30 + $0x44] ss:$72 sps:$4 sm:$0xff]  }
 0xba8   : > { %v8069_v38 = vpop.f32.mrb[34].mxu1  ;;  %7676 = vmatprep.subr.bf16.mxu0 %v21477_v28  ;;  %v21480_v32 = vld [vmem:[%s24537_s30 + $0xd4] ss:$72 sps:$4 sm:$0xff]   ;;  %v21520_v28 = vld [vmem:[%s24537_s30 + $0x8b0] ss:$72 sps:$4 sm:$0xff]  }
 0xba9   : > { %v19773_v55 = vpop.f32.mrb[35].mxu1  ;;  %v8073_v56 = vadd.f32 %v25597_v59, %v8072_v53  ;;  %v21475_v53 = vld [vmem:[%s24537_s30 + $0x40] ss:$72 sps:$4 sm:$0xff]   ;;  %v21478_v38 = vld [vmem:[%s24537_s30 + $0xd0] ss:$72 sps:$4 sm:$0xff]  }
 0xbaa   : > { %7677 = vmatpush1.bf16.msra.mxu0 %v21475_v53  ;;  %v21483_v55 = vld [vmem:[%s24537_s30 + $0x164] ss:$72 sps:$4 sm:$0xff]  }
 0xbab   : > { %v8074_v58 = vsel %vm7870_vm1, %v8073_v56, -inf  ;;  %7678 = vmatprep.subr.bf16.mxu0 %v21480_v32  ;;  %v21525_v53 = vld [vmem:[%s24537_s30 + $0x944] ss:$72 sps:$4 sm:$0xff]   ;;  %v21523_v32 = vld [vmem:[%s24537_s30 + $0x940] ss:$72 sps:$4 sm:$0xff]  }
 0xbac   : > { %8075 = vmax.xlane.f32.xlu0 %v8074_v58  ;;  %v21484_v58 = vld [vmem:[%s24537_s30 + $0x1f0] ss:$72 sps:$4 sm:$0xff]  }
 0xbae   : > { %7679 = vmatpush1.bf16.msra.mxu0 %v21478_v38  ;;  %v21528_v38 = vld [vmem:[%s24537_s30 + $0x9d4] ss:$72 sps:$4 sm:$0xff]  }
 0xbaf   : > { %7680 = vmatprep.subr.bf16.mxu0 %v21483_v55  ;;  %v21526_v55 = vld [vmem:[%s24537_s30 + $0x9d0] ss:$72 sps:$4 sm:$0xff]  }
 0xc39   : > { %v8076_v13 = vpop.xlane.xlu0 %8075 }
 0xc3a   : > { %v8077_v62 = vsub.f32 %v8073_v56, %v8076_v13  ;;  %v21481_v56 = vld [vmem:[%s24537_s30 + $0x160] ss:$72 sps:$4 sm:$0xff]   ;;  %v21486_v13 = vld [vmem:[%s24537_s30 + $0x1f4] ss:$72 sps:$4 sm:$0xff]  }
 0xc3b   : > { %7681 = vmatpush1.bf16.msra.mxu0 %v21481_v56  ;;  %v21531_v56 = vld [vmem:[%s24537_s30 + $0xa64] ss:$72 sps:$4 sm:$0xff]  }
 0xc3c   : > { %v8078_v63 = vmul.f32 1.442695, %v8077_v62  ;;  %v21489_v62 = vld [vmem:[%s24537_s30 + $0x284] ss:$72 sps:$4 sm:$0xff]   ;;  %7682 = vmatprep.subr.bf16.mxu0 %v21486_v13  ;;  %v21534_v13 = vld [vmem:[%s24537_s30 + $0xaf4] ss:$72 sps:$4 sm:$0xff]  }
 0xc3e   : > { %22635 = vpow2.f32 %v8078_v63  ;;  %v21487_v63 = vld [vmem:[%s24537_s30 + $0x280] ss:$72 sps:$4 sm:$0xff]  }
 0xc3f   : > { %7683 = vmatpush1.bf16.msra.mxu0 %v21484_v58  ;;  %v21529_v58 = vld [vmem:[%s24537_s30 + $0xa60] ss:$72 sps:$4 sm:$0xff]  }
 0xc40   : > { %7684 = vmatprep.subr.bf16.mxu0 %v21489_v62  ;;  %v21532_v62 = vld [vmem:[%s24537_s30 + $0xaf0] ss:$72 sps:$4 sm:$0xff]  }
 0xc43   : > { %7685 = vmatpush1.bf16.msra.mxu0 %v21487_v63  ;;  %v21535_v63 = vld [vmem:[%s24537_s30 + $0xb80] ss:$72 sps:$4 sm:$0xff]  }
 0xc48   : > { %v22636_v51 = vpop.eup %22635 }
 0xc49   : > { %v8080_v1 = vsel %vm7870_vm1, %v22636_v51, 0.0 }
 0xc4a   : > { %8081 = vadd.xlane.f32.xlu1 %v8080_v1  ;;  %v21490_v1 = vld [vmem:[%s24537_s30 + $0x310] ss:$72 sps:$4 sm:$0xff]  }
 0xcd7   : > { %v8082_v46 = vpop.xlane.xlu1 %8081 }
 0xcd8   : > { %22637 = vrcp.f32 %v8082_v46  ;;  %v21495_v46 = vld [vmem:[%s24537_s30 + $0x3a4] ss:$72 sps:$4 sm:$0xff]  }
 0xce2   : > { %v22638_v3 = vpop.eup %22637 }
 0xce3   : > { %v8084_v8 = vmul.f32 %v22638_v3, %v22636_v51  ;;  %v21492_v51 = vld [vmem:[%s24537_s30 + $0x314] ss:$72 sps:$4 sm:$0xff]   ;;  %v21493_v3 = vld [vmem:[%s24537_s30 + $0x3a0] ss:$72 sps:$4 sm:$0xff]  }
 0xce4   : > { %7686 = vmatprep.subr.bf16.mxu0 %v21492_v51  ;;  %v21538_v51 = vld [vmem:[%s24537_s30 + $0xc10] ss:$72 sps:$4 sm:$0xff]  }
 0xce5   : > { %v8085_v10 = vpack.c.bf16 %v8084_v8, %v8084_v8  ;;  %7687 = vmatpush1.bf16.msra.mxu0 %v21490_v1  ;;  %v21498_v8 = vld [vmem:[%s24537_s30 + $0x434] ss:$72 sps:$4 sm:$0xff]   ;;  %v21543_v1 = vld [vmem:[%s24537_s30 + $0xca4] ss:$72 sps:$4 sm:$0xff]  }
 0xce6   : > { %7688 = vmatprep.subr.bf16.mxu0 %v21495_v46  ;;  %v21541_v46 = vld [vmem:[%s24537_s30 + $0xca0] ss:$72 sps:$4 sm:$0xff]  }
 0xce7   : > { %19777 = vmatmul.mubr.msk.bf16.vlgmr.msra.gmra.mrb[36].mxu1 %vm7870_vm1, %v8085_v10  ;;  %v21496_v10 = vld [vmem:[%s24537_s30 + $0x430] ss:$72 sps:$4 sm:$0xff]  }
 0xce8   : > { %19781 = vmatpush3.bf16.xpose.msra.mxu1 %v25582_v36  ;;  %19782 = vmatprep.mubr.msk.bf16.mxu1 %vm23851_vm0, %v23850_v33 }
 0xce9   : > { %19786 = vmatprep.subr.bf16.mxu1 %v23850_v33  ;;  %7689 = vmatpush1.bf16.msra.mxu0 %v21493_v3  ;;  %v21546_v3 = vld [vmem:[%s24537_s30 + $0xd34] ss:$72 sps:$4 sm:$0xff]  }
 0xcea   : > { %7690 = vmatprep.subr.bf16.mxu0 %v21498_v8  ;;  %v21544_v8 = vld [vmem:[%s24537_s30 + $0xd30] ss:$72 sps:$4 sm:$0xff]  }
 0xced   : > { %7691 = vmatpush1.bf16.msra.mxu0 %v21496_v10  ;;  %v21549_v10 = vld [vmem:[%s24537_s30 + $0xdc4] ss:$72 sps:$4 sm:$0xff]  }
 0xcef   : > { %19783 = vmatmul.mubr.bf16.vlgmr.msra.gmra.mrb[40].mxu1 %v25101_v41 }
 0xcf0   : > { %19787 = vmatpush3.bf16.msra.mxu1 %v8191_v14  ;;  %19788 = vmatprep.mubr.msk.bf16.mxu1 %vm23851_vm0, %v23850_v33  ;;  %v21501_v14 = vld [vmem:[%s24537_s30 + $0x4c4] ss:$72 sps:$4 sm:$0xff]  }
 0xcf1   : > { %19792 = vmatprep.subr.bf16.mxu1 %v23850_v33  ;;  %7692 = vmatprep.subr.bf16.mxu0 %v21501_v14  ;;  %v21547_v14 = vld [vmem:[%s24537_s30 + $0xdc0] ss:$72 sps:$4 sm:$0xff]  }
 0xdba   : > { %v25656_v34 = vpop.f32.mrb[36].mxu1 }
 0xdbb   : > { %v19778_v15 = vpop.f32.mrb[37].mxu1 }
 0xdbc   : > { %v8129_v60 = vpop.f32.mrb[38].mxu1  ;;  %v21499_v15 = vld [vmem:[%s24537_s30 + $0x4c0] ss:$72 sps:$4 sm:$0xff]  }
 0xdbd   : > { %v19779_v16 = vpop.f32.mrb[39].mxu1  ;;  %v21504_v60 = vld [vmem:[%s24537_s30 + $0x554] ss:$72 sps:$4 sm:$0xff]   ;;  %7693 = vmatpush1.bf16.msra.mxu0 %v21499_v15 }
 0xdbe   : > { %v21502_v16 = vld [vmem:[%s24537_s30 + $0x550] ss:$72 sps:$4 sm:$0xff]   ;;  %7694 = vmatprep.subr.bf16.mxu0 %v21504_v60  ;;  %v21552_v15 = vld [vmem:[%s24537_s30 + $0xe54] ss:$72 sps:$4 sm:$0xff]  }
 0xdbf   : > { %v21550_v60 = vld [vmem:[%s24537_s30 + $0xe50] ss:$72 sps:$4 sm:$0xff]  }
 0xdc1   : > { %7695 = vmatpush1.bf16.msra.mxu0 %v21502_v16  ;;  %v21555_v16 = vld [vmem:[%s24537_s30 + $0xee4] ss:$72 sps:$4 sm:$0xff]  }
 0xdc2   : > { %v8167_v17 = vpop.f32.mrb[40].mxu1 }
 0xdc3   : > { %v8173_v20 = vmul.f32 0.088388346, %v8167_v17  ;;  %v19784_v21 = vpop.f32.mrb[41].mxu1  ;;  %v21507_v17 = vld [vmem:[%s24537_s30 + $0x5e4] ss:$72 sps:$4 sm:$0xff]  }
 0xdc4   : > { %v8170_v42 = vpop.f32.mrb[42].mxu1  ;;  %7696 = vmatprep.subr.bf16.mxu0 %v21507_v17  ;;  %v21510_v21 = vld [vmem:[%s24537_s30 + $0x674] ss:$72 sps:$4 sm:$0xff]   ;;  %v21553_v17 = vld [vmem:[%s24537_s30 + $0xee0] ss:$72 sps:$4 sm:$0xff]  }
 0xdc5   : > { %v19785_v22 = vpop.f32.mrb[43].mxu1  ;;  %v8174_v23 = vadd.f32 %v25597_v59, %v8173_v20  ;;  %v21505_v20 = vld [vmem:[%s24537_s30 + $0x5e0] ss:$72 sps:$4 sm:$0xff]   ;;  %v21508_v42 = vld [vmem:[%s24537_s30 + $0x670] ss:$72 sps:$4 sm:$0xff]  }
 0xdc6   : > { %7697 = vmatpush1.bf16.msra.mxu0 %v21505_v20  ;;  %v21513_v22 = vld [vmem:[%s24537_s30 + $0x704] ss:$72 sps:$4 sm:$0xff]   ;;  %v21558_v20 = vld [vmem:[%s24537_s30 + $0xf74] ss:$72 sps:$4 sm:$0xff]  }
 0xdc7   : > { %v8175_v27 = vsel %vm7870_vm1, %v8174_v23, -inf  ;;  %7698 = vmatprep.subr.bf16.mxu0 %v21510_v21  ;;  %v21556_v21 = vld [vmem:[%s24537_s30 + $0xf70] ss:$72 sps:$4 sm:$0xff]  }
 0xdc8   : > { %8176 = vmax.xlane.f32.xlu0 %v8175_v27  ;;  %v21516_v27 = vld [vmem:[%s24537_s30 + $0x794] ss:$72 sps:$4 sm:$0xff]  }
 0xdca   : > { %7699 = vmatpush1.bf16.msra.mxu0 %v21508_v42  ;;  %v21561_v42 = vld [vmem:[%s24537_s30 + $0x1004] ss:$72 sps:$4 sm:$0xff]  }
 0xdcb   : > { %7700 = vmatprep.subr.bf16.mxu0 %v21513_v22  ;;  %v21559_v22 = vld [vmem:[%s24537_s30 + $0x1000] ss:$72 sps:$4 sm:$0xff]  }
 0xe55   : > { %v8177_v31 = vpop.xlane.xlu0 %8176 }
 0xe56   : > { %v8178_v39 = vsub.f32 %v8174_v23, %v8177_v31  ;;  %v21511_v23 = vld [vmem:[%s24537_s30 + $0x700] ss:$72 sps:$4 sm:$0xff]   ;;  %v21514_v31 = vld [vmem:[%s24537_s30 + $0x790] ss:$72 sps:$4 sm:$0xff]  }
 0xe57   : > { %7701 = vmatpush1.bf16.msra.mxu0 %v21511_v23  ;;  %v21564_v23 = vld [vmem:[%s24537_s30 + $0x1094] ss:$72 sps:$4 sm:$0xff]  }
 0xe58   : > { %v8179_v43 = vmul.f32 1.442695, %v8178_v39  ;;  %7702 = vmatprep.subr.bf16.mxu0 %v21516_v27  ;;  %v21519_v39 = vld [vmem:[%s24537_s30 + $0x824] ss:$72 sps:$4 sm:$0xff]   ;;  %v21562_v27 = vld [vmem:[%s24537_s30 + $0x1090] ss:$72 sps:$4 sm:$0xff]  }
 0xe5a   : > { %22639 = vpow2.f32 %v8179_v43  ;;  %v21517_v43 = vld [vmem:[%s24537_s30 + $0x820] ss:$72 sps:$4 sm:$0xff]  }
 0xe5b   : > { %7703 = vmatpush1.bf16.msra.mxu0 %v21514_v31  ;;  %v21567_v31 = vld [vmem:[%s24537_s30 + $0x1124] ss:$72 sps:$4 sm:$0xff]  }
 0xe5c   : > { %7704 = vmatprep.subr.bf16.mxu0 %v21519_v39  ;;  %v21565_v39 = vld [vmem:[%s24537_s30 + $0x1120] ss:$72 sps:$4 sm:$0xff]  }
 0xe5f   : > { %7705 = vmatpush1.bf16.msra.mxu0 %v21517_v43  ;;  %v21570_v43 = vld [vmem:[%s24537_s30 + $0x11b4] ss:$72 sps:$4 sm:$0xff]  }
 0xe64   : > { %v25660_v47 = vpop.eup %22639 }
 0xe65   : > { %v8181_v26 = vsel %vm7870_vm1, %v25660_v47, 0.0 }
 0xe66   : > { %8182 = vadd.xlane.f32.xlu1 %v8181_v26  ;;  %v21522_v26 = vld [vmem:[%s24537_s30 + $0x8b4] ss:$72 sps:$4 sm:$0xff]  }
 0xe67   : > { %7706 = vmatprep.subr.bf16.mxu0 %v21522_v26 }
 0xe68   : > { %7707 = vmatpush1.bf16.msra.mxu0 %v21520_v28  ;;  %v21568_v28 = vld [vmem:[%s24537_s30 + $0x11b0] ss:$72 sps:$4 sm:$0xff]  }
 0xe69   : > { %7719 = vmatprep.subr.bf16.mxu0 %v21525_v53  ;;  %v21573_v53 = vld [vmem:[%s24537_s30 + $0x1244] ss:$72 sps:$4 sm:$0xff]  }
 0xe6b   : > { %7709 = vmatmul.mubr.bf16.vlgmr.msra.gmra.mrb[16].mxu0 %v24703_v49  ;;  %v21537_v49 = vld [vmem:[%s24537_s30 + $0xb84] ss:$72 sps:$4 sm:$0xff]  }
 0xe6c   : > { %7720 = vmatpush1.bf16.msra.mxu0 %v21523_v32  ;;  %7751 = vmatprep.mubr.bf16.mxu0 %v24706_v50  ;;  %v21540_v50 = vld [vmem:[%s24537_s30 + $0xc14] ss:$72 sps:$4 sm:$0xff]   ;;  %v21571_v32 = vld [vmem:[%s24537_s30 + $0x1240] ss:$72 sps:$4 sm:$0xff]  }
 0xe6d   : > { %7721 = vmatprep.subr.bf16.mxu0 %v21528_v38  ;;  %v21576_v38 = vld [vmem:[%s24537_s30 + $0x12d4] ss:$72 sps:$4 sm:$0xff]  }
 0xe70   : > { %7722 = vmatpush1.bf16.msra.mxu0 %v21526_v55  ;;  %v21574_v55 = vld [vmem:[%s24537_s30 + $0x12d0] ss:$72 sps:$4 sm:$0xff]  }
 0xe71   : > { %7723 = vmatprep.subr.bf16.mxu0 %v21531_v56  ;;  %v21579_v56 = vld [vmem:[%s24537_s30 + $0x1364] ss:$72 sps:$4 sm:$0xff]  }
 0xe74   : > { %7724 = vmatpush1.bf16.msra.mxu0 %v21529_v58 }
 0xe75   : > { %7725 = vmatprep.subr.bf16.mxu0 %v21534_v13 }
 0xe78   : > { %7726 = vmatpush1.bf16.msra.mxu0 %v21532_v62 }
 0xe79   : > { %7727 = vmatprep.subr.bf16.mxu0 %v21537_v49  ;;  %v21577_v49 = vld [vmem:[%s24537_s30 + $0x1360] ss:$72 sps:$4 sm:$0xff]  }
 0xe7c   : > { %7728 = vmatpush1.bf16.msra.mxu0 %v21535_v63  ;;  %v21582_v63 = vld [vmem:[%s24537_s30 + $0x13f4] ss:$72 sps:$4 sm:$0xff]  }
 0xe7d   : > { %7729 = vmatprep.subr.bf16.mxu0 %v21540_v50  ;;  %v21588_v50 = vld [vmem:[%s24537_s30 + $0x1514] ss:$72 sps:$4 sm:$0xff]  }
 0xe80   : > { %7730 = vmatpush1.bf16.msra.mxu0 %v21538_v51  ;;  %v21586_v51 = vld [vmem:[%s24537_s30 + $0x1510] ss:$72 sps:$4 sm:$0xff]  }
 0xe81   : > { %7731 = vmatprep.subr.bf16.mxu0 %v21543_v1  ;;  %v21591_v1 = vld [vmem:[%s24537_s30 + $0x15a4] ss:$72 sps:$4 sm:$0xff]  }
 0xe84   : > { %7732 = vmatpush1.bf16.msra.mxu0 %v21541_v46  ;;  %v21589_v46 = vld [vmem:[%s24537_s30 + $0x15a0] ss:$72 sps:$4 sm:$0xff]  }
 0xe85   : > { %7733 = vmatprep.subr.bf16.mxu0 %v21546_v3  ;;  %v21594_v3 = vld [vmem:[%s24537_s30 + $0x1634] ss:$72 sps:$4 sm:$0xff]  }
 0xe88   : > { %7734 = vmatpush1.bf16.msra.mxu0 %v21544_v8  ;;  %v21592_v8 = vld [vmem:[%s24537_s30 + $0x1630] ss:$72 sps:$4 sm:$0xff]  }
 0xe89   : > { %7735 = vmatprep.subr.bf16.mxu0 %v21549_v10  ;;  %v21597_v10 = vld [vmem:[%s24537_s30 + $0x16c4] ss:$72 sps:$4 sm:$0xff]  }
 0xe8c   : > { %7736 = vmatpush1.bf16.msra.mxu0 %v21547_v14  ;;  %v21595_v14 = vld [vmem:[%s24537_s30 + $0x16c0] ss:$72 sps:$4 sm:$0xff]  }
 0xe8d   : > { %7737 = vmatprep.subr.bf16.mxu0 %v21552_v15  ;;  %v21600_v15 = vld [vmem:[%s24537_s30 + $0x1754] ss:$72 sps:$4 sm:$0xff]  }
 0xe90   : > { %7738 = vmatpush1.bf16.msra.mxu0 %v21550_v60  ;;  %v21598_v60 = vld [vmem:[%s24537_s30 + $0x1750] ss:$72 sps:$4 sm:$0xff]  }
 0xe91   : > { %7739 = vmatprep.subr.bf16.mxu0 %v21555_v16  ;;  %v21603_v16 = vld [vmem:[%s24537_s30 + $0x17e4] ss:$72 sps:$4 sm:$0xff]  }
 0xe94   : > { %7740 = vmatpush1.bf16.msra.mxu0 %v21553_v17  ;;  %v21601_v17 = vld [vmem:[%s24537_s30 + $0x17e0] ss:$72 sps:$4 sm:$0xff]  }
 0xe95   : > { %7741 = vmatprep.subr.bf16.mxu0 %v21558_v20  ;;  %v21606_v20 = vld [vmem:[%s24537_s30 + $0x1874] ss:$72 sps:$4 sm:$0xff]  }
 0xe98   : > { %7742 = vmatpush1.bf16.msra.mxu0 %v21556_v21  ;;  %v21604_v21 = vld [vmem:[%s24537_s30 + $0x1870] ss:$72 sps:$4 sm:$0xff]  }
 0xe99   : > { %7743 = vmatprep.subr.bf16.mxu0 %v21561_v42  ;;  %v21609_v42 = vld [vmem:[%s24537_s30 + $0x1904] ss:$72 sps:$4 sm:$0xff]  }
 0xe9c   : > { %7744 = vmatpush1.bf16.msra.mxu0 %v21559_v22  ;;  %v21607_v22 = vld [vmem:[%s24537_s30 + $0x1900] ss:$72 sps:$4 sm:$0xff]  }
 0xe9d   : > { %7745 = vmatprep.subr.bf16.mxu0 %v21564_v23  ;;  %v21612_v23 = vld [vmem:[%s24537_s30 + $0x1994] ss:$72 sps:$4 sm:$0xff]  }
 0xea0   : > { %7746 = vmatpush1.bf16.msra.mxu0 %v21562_v27  ;;  %v21610_v27 = vld [vmem:[%s24537_s30 + $0x1990] ss:$72 sps:$4 sm:$0xff]  }
 0xea1   : > { %7747 = vmatprep.subr.bf16.mxu0 %v21567_v31  ;;  %v21615_v31 = vld [vmem:[%s24537_s30 + $0x1a24] ss:$72 sps:$4 sm:$0xff]  }
 0xea4   : > { %7748 = vmatpush1.bf16.msra.mxu0 %v21565_v39  ;;  %v21613_v39 = vld [vmem:[%s24537_s30 + $0x1a20] ss:$72 sps:$4 sm:$0xff]  }
 0xea5   : > { %7749 = vmatprep.subr.bf16.mxu0 %v21570_v43  ;;  %v21618_v43 = vld [vmem:[%s24537_s30 + $0x1ab4] ss:$72 sps:$4 sm:$0xff]  }
 0xea8   : > { %7750 = vmatpush1.bf16.msra.mxu0 %v21568_v28 }
 0xea9   : > { %7762 = vmatprep.subr.bf16.mxu0 %v21573_v53 }
 0xeab   : > { %7752 = vmatmul.mubr.bf16.vlgmr.msra.gmra.mrb[16].mxu0 %v24774_v54  ;;  %v21580_v54 = vld [vmem:[%s24537_s30 + $0x13f0] ss:$72 sps:$4 sm:$0xff]  }
 0xeac   : > { %7763 = vmatpush1.bf16.msra.mxu0 %v21571_v32  ;;  %7794 = vmatprep.mubr.bf16.mxu0 %v24778_v57  ;;  %v21585_v57 = vld [vmem:[%s24537_s30 + $0x1484] ss:$72 sps:$4 sm:$0xff]  }
 0xead   : > { %7764 = vmatprep.subr.bf16.mxu0 %v21576_v38 }
 0xeb0   : > { %7765 = vmatpush1.bf16.msra.mxu0 %v21574_v55 }
 0xeb1   : > { %7766 = vmatprep.subr.bf16.mxu0 %v21579_v56 }
 0xeb4   : > { %7767 = vmatpush1.bf16.msra.mxu0 %v21577_v49 }
 0xeb5   : > { %7768 = vmatprep.subr.bf16.mxu0 %v21582_v63 }
 0xeb8   : > { %7769 = vmatpush1.bf16.msra.mxu0 %v21580_v54  ;;  %v2224_v54 = vld [vmem:[%s24545_s25 + $0x10] sm:$0x3] }
 0xeb9   : > { %7770 = vmatprep.subr.bf16.mxu0 %v21585_v57  ;;  %v2301_v57 = vrot.slane %v2224_v54, %v25163_v2 }
 0xef3   : > { %v8183_v26 = vpop.xlane.xlu1 %8182 }
 0xef4   : > { %22641 = vrcp.f32 %v8183_v26  ;;  %v21616_v26 = vld [vmem:[%s24537_s30 + $0x1ab0] ss:$72 sps:$4 sm:$0xff]  }
 0xefe   : > { %v22642_v58 = vpop.eup %22641 }
 0xeff   : > { %v8185_v13 = vmul.f32 %v22642_v58, %v25660_v47  ;;  %v21583_v47 = vld [vmem:[%s24537_s30 + $0x1480] ss:$72 sps:$4 sm:$0xff]  }
 0xf00   : > { %7771 = vmatpush1.bf16.msra.mxu0 %v21583_v47 }
 0xf01   : > { %v8186_v62 = vpack.c.bf16 %v8185_v13, %v8185_v13  ;;  %7772 = vmatprep.subr.bf16.mxu0 %v21588_v50 }
 0xf03   : > { %19789 = vmatmul.mubr.msk.bf16.vlgmr.msra.gmra.mrb[44].mxu1 %vm7870_vm1, %v8186_v62 }
 0xf04   : > { %19793 = vmatpush3.bf16.xpose.msra.mxu1 %v25552_v4  ;;  %19794 = vmatprep.mubr.msk.bf16.mxu1 %vm23851_vm0, %v23850_v33 }
 0xf05   : > { %19798 = vmatprep.subr.bf16.mxu1 %v23850_v33  ;;  %7773 = vmatpush1.bf16.msra.mxu0 %v21586_v51 }
 0xf06   : > { %7774 = vmatprep.subr.bf16.mxu0 %v21591_v1 }
 0xf09   : > { %7775 = vmatpush1.bf16.msra.mxu0 %v21589_v46 }
 0xf0a   : > { %7776 = vmatprep.subr.bf16.mxu0 %v21594_v3 }
 0xf0b   : > { %19795 = vmatmul.mubr.bf16.vlgmr.msra.gmra.mrb[48].mxu1 %v25416_v6 }
 0xf0c   : > { %19800 = vmatprep.mubr.msk.bf16.mxu1 %vm23851_vm0, %v23850_v33 }
 0xf0d   : > { %7777 = vmatpush1.bf16.msra.mxu0 %v21592_v8 }
 0xf0e   : > { %7778 = vmatprep.subr.bf16.mxu0 %v21597_v10 }
 0xf11   : > { %7779 = vmatpush1.bf16.msra.mxu0 %v21595_v14 }
 0xf12   : > { %7780 = vmatprep.subr.bf16.mxu0 %v21600_v15 }
 0xf15   : > { %7781 = vmatpush1.bf16.msra.mxu0 %v21598_v60 }
 0xf16   : > { %7782 = vmatprep.subr.bf16.mxu0 %v21603_v16 }
 0xf19   : > { %7783 = vmatpush1.bf16.msra.mxu0 %v21601_v17 }
 0xf1a   : > { %7784 = vmatprep.subr.bf16.mxu0 %v21606_v20 }
 0xf1d   : > { %7785 = vmatpush1.bf16.msra.mxu0 %v21604_v21 }
 0xf1e   : > { %7786 = vmatprep.subr.bf16.mxu0 %v21609_v42 }
 0xf21   : > { %7787 = vmatpush1.bf16.msra.mxu0 %v21607_v22 }
 0xf22   : > { %7788 = vmatprep.subr.bf16.mxu0 %v21612_v23 }
 0xf25   : > { %7789 = vmatpush1.bf16.msra.mxu0 %v21610_v27 }
 0xf26   : > { %7790 = vmatprep.subr.bf16.mxu0 %v21615_v31 }
 0xf29   : > { %7791 = vmatpush1.bf16.msra.mxu0 %v21613_v39 }
 0xf2a   : > { %7792 = vmatprep.subr.bf16.mxu0 %v21618_v43 }
 0xf2d   : > { %7793 = vmatpush1.bf16.msra.mxu0 %v21616_v26 }
 0xf30   : > { %7795 = vmatmul.mubr.bf16.vlgmr.msra.gmra.mrb[16].mxu0 %v24846_v61  ;;  %v2305_v61 = vrot.slane %v2224_v54, %v25168_v5 }
 0xfd6   : > { %v25774_v28 = vpop.f32.mrb[44].mxu1 }
 0xfd7   : > { %v19790_v53 = vpop.f32.mrb[45].mxu1 }
 0xfd8   : > { %v8230_v32 = vpop.f32.mrb[46].mxu1 }
 0xfd9   : > { %v19791_v38 = vpop.f32.mrb[47].mxu1 }
 0xfde   : > { %v8268_v55 = vpop.f32.mrb[48].mxu1 }
 0xfdf   : > { %v8274_v56 = vmul.f32 0.088388346, %v8268_v55  ;;  %v19796_v58 = vpop.f32.mrb[49].mxu1 }
 0xfe0   : > { %v8271_v13 = vpop.f32.mrb[50].mxu1 }
 0xfe1   : > { %v19797_v62 = vpop.f32.mrb[51].mxu1  ;;  %v8275_v49 = vadd.f32 %v25597_v59, %v8274_v56 }
 0xfe3   : > { %v8276_v63 = vsel %vm7870_vm1, %v8275_v49, -inf }
 0xfe4   : > { %8277 = vmax.xlane.f32.xlu0 %v8276_v63 }
0x1003   : > { %v7796_v47 = vpop.f32.mrb[16].mxu0 }
0x1004   : > { %v19932_v50 = vadd.f32 %v7796_v47, %v2301_v57  ;;  %v7798_v51 = vpop.f32.mrb[17].mxu0 }
0x1005   : > { %v19933_v1 = vadd.f32 %v7798_v51, %v2305_v61  ;;  %v7800_v46 = vpop.f32.mrb[18].mxu0 }
0x1006   : > { %v19934_v3 = vadd.f32 %v7800_v46, %v2301_v57  ;;  %v7802_v8 = vpop.f32.mrb[19].mxu0 }
0x1007   : > { %v19935_v10 = vadd.f32 %v7802_v8, %v2305_v61  ;;  %v8442_v8 = vrot.slane %v25183_v29, 4 }
0x1008   : > { %v25781_v14 = vpack.c.bf16 %v19934_v3, %v19932_v50  ;;  %v8445_v3 = vrot.slane %v25332_v18, 4 }
0x1009   : > { %v25783_v15 = vpack.c.bf16 %v19935_v10, %v19933_v1 }
0x100a   : > { %v8292_v60 = vsel %vm7886_vm2, %v25781_v14, 0 }
0x100b   : > { %19799 = vmatpush3.bf16.msra.mxu1 %v8292_v60  ;;  %v8393_v39 = vsel %vm7886_vm2, %v25783_v15, 0 }
0x100c   : > { %19804 = vmatprep.subr.bf16.mxu1 %v23850_v33 }
0x1071   : > { %v8278_v16 = vpop.xlane.xlu0 %8277 }
0x1072   : > { %v8279_v17 = vsub.f32 %v8275_v49, %v8278_v16 }
0x1074   : > { %v8280_v20 = vmul.f32 1.442695, %v8279_v17 }
0x1076   : > { %22643 = vpow2.f32 %v8280_v20 }
0x1080   : > { %v22644_v21 = vpop.eup %22643 }
0x1081   : > { %v8282_v42 = vsel %vm7870_vm1, %v22644_v21, 0.0 }
0x1082   : > { %8283 = vadd.xlane.f32.xlu1 %v8282_v42 }
0x110f   : > { %v8284_v22 = vpop.xlane.xlu1 %8283 }
0x1110   : > { %22645 = vrcp.f32 %v8284_v22 }
0x111a   : > { %v22646_v23 = vpop.eup %22645 }
0x111b   : > { %v8286_v27 = vmul.f32 %v22646_v23, %v22644_v21 }
0x111d   : > { %v8287_v31 = vpack.c.bf16 %v8286_v27, %v8286_v27 }
0x111f   : > { %19801 = vmatmul.mubr.msk.bf16.vlgmr.msra.gmra.mrb[52].mxu1 %vm7870_vm1, %v8287_v31 }
0x1120   : > { %19805 = vmatpush3.bf16.xpose.msra.mxu1 %v25555_v9  ;;  %19806 = vmatprep.mubr.msk.bf16.mxu1 %vm23851_vm0, %v23850_v33 }
0x1121   : > { %19810 = vmatprep.subr.bf16.mxu1 %v23850_v33 }
0x1127   : > { %19807 = vmatmul.mubr.bf16.vlgmr.msra.gmra.mrb[56].mxu1 %v25418_v7 }
0x1128   : > { %19811 = vmatpush3.bf16.msra.mxu1 %v8393_v39  ;;  %19812 = vmatprep.mubr.msk.bf16.mxu1 %vm23851_vm0, %v23850_v33 }
0x1129   : > { %19816 = vmatprep.subr.bf16.mxu1 %v23850_v33 }
0x11f2   : > { %v25800_v43 = vpop.f32.mrb[52].mxu1 }
0x11f3   : > { %v19802_v26 = vpop.f32.mrb[53].mxu1 }
0x11f4   : > { %v8331_v53 = vpop.f32.mrb[54].mxu1 }
0x11f5   : > { %v19803_v32 = vpop.f32.mrb[55].mxu1 }
0x11fa   : > { %v8369_v38 = vpop.f32.mrb[56].mxu1 }
0x11fb   : > { %v8375_v55 = vmul.f32 0.088388346, %v8369_v38  ;;  %v19808_v56 = vpop.f32.mrb[57].mxu1 }
0x11fc   : > { %v8372_v58 = vpop.f32.mrb[58].mxu1 }
0x11fd   : > { %v19809_v13 = vpop.f32.mrb[59].mxu1  ;;  %v8376_v62 = vadd.f32 %v25597_v59, %v8375_v55  ;;  %v8502_v59 = vrot.slane %v25605_v24, 4  ;;  %v25821_v24 = vld [vmem:[%s27348_s16 + $0x1] ss:$0 sm:$0xff] }
0x11fe   : > { %v8554_v13 = vrot.slane %v25334_v19, 4 }
0x11ff   : > { %v8377_v49 = vsel %vm7870_vm1, %v8376_v62, -inf  ;;  %v8507_v10 = vsel %vm7886_vm2, %v8502_v59, 0 }
0x1200   : > { %8378 = vmax.xlane.f32.xlu0 %v8377_v49  ;;  %v8551_v49 = vrot.slane %v25185_v30, 4 }
0x128d   : > { %v8379_v63 = vpop.xlane.xlu0 %8378 }
0x128e   : > { %v8380_v54 = vsub.f32 %v8376_v62, %v8379_v63  ;;  %v8611_v62 = vrot.slane %v25607_v52, 4 }
0x1290   : > { %v8381_v57 = vmul.f32 1.442695, %v8380_v54  ;;  %v8616_v63 = vsel %vm7886_vm2, %v8611_v62, 0  ;;  %v21646_v62 = vld [vmem:[%s24547_s24 + $0x1b0] ss:$24 sps:$4 sm:$0xff]  }
0x1292   : > { %22647 = vpow2.f32 %v8381_v57 }
0x129c   : > { %v22648_v61 = vpop.eup %22647 }
0x129d   : > { %v8383_v47 = vsel %vm7870_vm1, %v22648_v61, 0.0 }
0x129e   : > { %8384 = vadd.xlane.f32.xlu1 %v8383_v47 }
0x132b   : > { %v8385_v50 = vpop.xlane.xlu1 %8384 }
0x132c   : > { %22649 = vrcp.f32 %v8385_v50 }
0x1336   : > { %v22650_v51 = vpop.eup %22649 }
0x1337   : > { %v8387_v1 = vmul.f32 %v22650_v51, %v22648_v61 }
0x1339   : > { %v8388_v46 = vpack.c.bf16 %v8387_v1, %v8387_v1 }
0x133b   : > { %19813 = vmatmul.mubr.msk.bf16.vlgmr.msra.gmra.mrb[60].mxu1 %vm7870_vm1, %v8388_v46 }
0x133c   : > { %19817 = vmatpush3.bf16.xpose.msra.mxu1 %v8445_v3  ;;  %19818 = vmatprep.mubr.msk.bf16.mxu1 %vm23851_vm0, %v23850_v33 }
0x133d   : > { %19822 = vmatprep.subr.bf16.mxu1 %v23850_v33 }
0x1343   : > { %19819 = vmatmul.mubr.bf16.vlgmr.msra.gmra.mrb[64].mxu1 %v8442_v8 }
0x1344   : > { %19823 = vmatpush3.bf16.msra.mxu1 %v8507_v10  ;;  %19824 = vmatprep.mubr.msk.bf16.mxu1 %vm23851_vm0, %v23850_v33 }
0x1345   : > { %19828 = vmatprep.subr.bf16.mxu1 %v23850_v33 }
0x140e   : > { %v25816_v18 = vpop.f32.mrb[60].mxu1 }
0x140f   : > { %v19814_v60 = vpop.f32.mrb[61].mxu1 }
0x1410   : > { %v8432_v16 = vpop.f32.mrb[62].mxu1 }
0x1411   : > { %v19815_v17 = vpop.f32.mrb[63].mxu1  ;;  %v21619_v16 = vld [vmem:[%s24547_s24] ss:$24 sps:$4 sm:$0xff]  }
0x1412   : > { %v21621_v17 = vld [vmem:[%s24547_s24 + $0x4] ss:$24 sps:$4 sm:$0xff]  }
0x1413   : > { %10873 = vmatprep.subr.bf16.mxu0 %v21621_v17 }
0x1414   : > { %10874 = vmatpush1.bf16.msra.mxu0 %v21619_v16 }
0x1416   : > { %v8481_v20 = vpop.f32.mrb[64].mxu1 }
0x1417   : > { %v8487_v29 = vmul.f32 0.088388346, %v8481_v20  ;;  %v19820_v21 = vpop.f32.mrb[65].mxu1  ;;  %v21624_v20 = vld [vmem:[%s24547_s24 + $0x34] ss:$24 sps:$4 sm:$0xff]  }
0x1418   : > { %v8484_v42 = vpop.f32.mrb[66].mxu1  ;;  %10875 = vmatprep.subr.bf16.mxu0 %v21624_v20  ;;  %v21627_v21 = vld [vmem:[%s24547_s24 + $0x64] ss:$24 sps:$4 sm:$0xff]  }
0x1419   : > { %v19821_v22 = vpop.f32.mrb[67].mxu1  ;;  %v8488_v23 = vadd.f32 %v25821_v24, %v8487_v29  ;;  %v21622_v29 = vld [vmem:[%s24547_s24 + $0x30] ss:$24 sps:$4 sm:$0xff]   ;;  %v21625_v42 = vld [vmem:[%s24547_s24 + $0x60] ss:$24 sps:$4 sm:$0xff]  }
0x141a   : > { %10876 = vmatpush1.bf16.msra.mxu0 %v21622_v29  ;;  %v21630_v22 = vld [vmem:[%s24547_s24 + $0x94] ss:$24 sps:$4 sm:$0xff]  }
0x141b   : > { %v8489_v27 = vsel %vm7870_vm1, %v8488_v23, -inf  ;;  %10877 = vmatprep.subr.bf16.mxu0 %v21627_v21 }
0x141c   : > { %8490 = vmax.xlane.f32.xlu0 %v8489_v27  ;;  %v21633_v27 = vld [vmem:[%s24547_s24 + $0xc4] ss:$24 sps:$4 sm:$0xff]  }
0x141e   : > { %10878 = vmatpush1.bf16.msra.mxu0 %v21625_v42 }
0x141f   : > { %10879 = vmatprep.subr.bf16.mxu0 %v21630_v22 }
0x14a9   : > { %v8491_v31 = vpop.xlane.xlu0 %8490 }
0x14aa   : > { %v8492_v39 = vsub.f32 %v8488_v23, %v8491_v31  ;;  %v21628_v23 = vld [vmem:[%s24547_s24 + $0x90] ss:$24 sps:$4 sm:$0xff]   ;;  %v21631_v31 = vld [vmem:[%s24547_s24 + $0xc0] ss:$24 sps:$4 sm:$0xff]  }
0x14ab   : > { %10880 = vmatpush1.bf16.msra.mxu0 %v21628_v23 }
0x14ac   : > { %v8493_v26 = vmul.f32 1.442695, %v8492_v39  ;;  %10881 = vmatprep.subr.bf16.mxu0 %v21633_v27  ;;  %v21636_v39 = vld [vmem:[%s24547_s24 + $0xf4] ss:$24 sps:$4 sm:$0xff]  }
0x14ae   : > { %22651 = vpow2.f32 %v8493_v26  ;;  %v21634_v26 = vld [vmem:[%s24547_s24 + $0xf0] ss:$24 sps:$4 sm:$0xff]  }
0x14af   : > { %10882 = vmatpush1.bf16.msra.mxu0 %v21631_v31 }
0x14b0   : > { %10883 = vmatprep.subr.bf16.mxu0 %v21636_v39 }
0x14b3   : > { %10884 = vmatpush1.bf16.msra.mxu0 %v21634_v26 }
0x14b8   : > { %v22652_v53 = vpop.eup %22651 }
0x14b9   : > { %v8495_v32 = vsel %vm7870_vm1, %v22652_v53, 0.0 }
0x14ba   : > { %8496 = vadd.xlane.f32.xlu1 %v8495_v32  ;;  %v21637_v32 = vld [vmem:[%s24547_s24 + $0x120] ss:$24 sps:$4 sm:$0xff]  }
0x1547   : > { %v8497_v38 = vpop.xlane.xlu1 %8496 }
0x1548   : > { %22653 = vrcp.f32 %v8497_v38  ;;  %v21642_v38 = vld [vmem:[%s24547_s24 + $0x154] ss:$24 sps:$4 sm:$0xff]  }
0x1552   : > { %v22654_v55 = vpop.eup %22653 }
0x1553   : > { %v8499_v56 = vmul.f32 %v22654_v55, %v22652_v53  ;;  %v21639_v53 = vld [vmem:[%s24547_s24 + $0x124] ss:$24 sps:$4 sm:$0xff]   ;;  %v21640_v55 = vld [vmem:[%s24547_s24 + $0x150] ss:$24 sps:$4 sm:$0xff]  }
0x1554   : > { %10885 = vmatprep.subr.bf16.mxu0 %v21639_v53 }
0x1555   : > { %v8500_v58 = vpack.c.bf16 %v8499_v56, %v8499_v56  ;;  %10886 = vmatpush1.bf16.msra.mxu0 %v21637_v32  ;;  %v21645_v56 = vld [vmem:[%s24547_s24 + $0x184] ss:$24 sps:$4 sm:$0xff]  }
0x1556   : > { %10887 = vmatprep.subr.bf16.mxu0 %v21642_v38 }
0x1557   : > { %19825 = vmatmul.mubr.msk.bf16.vlgmr.msra.gmra.mrb[68].mxu1 %vm7870_vm1, %v8500_v58  ;;  %v21643_v58 = vld [vmem:[%s24547_s24 + $0x180] ss:$24 sps:$4 sm:$0xff]  }
0x1558   : > { %19829 = vmatpush3.bf16.xpose.msra.mxu1 %v8554_v13  ;;  %19830 = vmatprep.mubr.msk.bf16.mxu1 %vm23851_vm0, %v23850_v33  ;;  %v21648_v13 = vld [vmem:[%s24547_s24 + $0x1b4] ss:$24 sps:$4 sm:$0xff]  }
0x1559   : > { %19834 = vmatprep.subr.bf16.mxu1 %v23850_v33  ;;  %10888 = vmatpush1.bf16.msra.mxu0 %v21640_v55 }
0x155a   : > { %10889 = vmatprep.subr.bf16.mxu0 %v21645_v56 }
0x155d   : > { %10890 = vmatpush1.bf16.msra.mxu0 %v21643_v58 }
0x155e   : > { %10891 = vmatprep.subr.bf16.mxu0 %v21648_v13 }
0x155f   : > { %19831 = vmatmul.mubr.bf16.vlgmr.msra.gmra.mrb[72].mxu1 %v8551_v49  ;;  %v21651_v49 = vld [vmem:[%s24547_s24 + $0x1e4] ss:$24 sps:$4 sm:$0xff]  }
0x1560   : > { %19835 = vmatpush3.bf16.msra.mxu1 %v8616_v63  ;;  %19836 = vmatprep.mubr.msk.bf16.mxu1 %vm23851_vm0, %v23850_v33  ;;  %v21649_v63 = vld [vmem:[%s24547_s24 + $0x1e0] ss:$24 sps:$4 sm:$0xff]  }
0x1561   : > { %19840 = vmatprep.subr.bf16.mxu1 %v23850_v33  ;;  %10892 = vmatpush1.bf16.msra.mxu0 %v21646_v62  ;;  %v8772_v62 = vrot.slane %v25582_v36, 4 }
0x1562   : > { %10893 = vmatprep.subr.bf16.mxu0 %v21651_v49  ;;  %v8829_v49 = vrot.slane %v25592_v12, 4 }
0x1565   : > { %10894 = vmatpush1.bf16.msra.mxu0 %v21649_v63  ;;  %v8769_v63 = vrot.slane %v25101_v41, 4 }
0x162a   : > { %v8543_v19 = vpop.f32.mrb[68].mxu1 }
0x162b   : > { %v25838_v54 = vpack.c.bf16 %v8543_v19, %v25624_v0  ;;  %v19826_v57 = vpop.f32.mrb[69].mxu1  ;;  %v21654_v19 = vld [vmem:[%s24547_s24 + $0x214] ss:$24 sps:$4 sm:$0xff]  }
0x162c   : > { %v8546_v61 = vpop.f32.mrb[70].mxu1  ;;  %v21652_v57 = vld [vmem:[%s24547_s24 + $0x210] ss:$24 sps:$4 sm:$0xff]   ;;  %10895 = vmatprep.subr.bf16.mxu0 %v21654_v19  ;;  %v8834_v19 = vsel %vm7886_vm2, %v8829_v49, 0  ;;  %v21703_v49 = vld [vmem:[%s24547_s24 + $0x540] ss:$24 sps:$4 sm:$0xff]  }
0x162d   : > { %v19827_v47 = vpop.f32.mrb[71].mxu1  ;;  %v21657_v61 = vld [vmem:[%s24547_s24 + $0x244] ss:$24 sps:$4 sm:$0xff]   ;;  %10896 = vmatpush1.bf16.msra.mxu0 %v21652_v57 }
0x162e   : > { %v21655_v47 = vld [vmem:[%s24547_s24 + $0x240] ss:$24 sps:$4 sm:$0xff]   ;;  %10897 = vmatprep.subr.bf16.mxu0 %v21657_v61 }
0x1631   : > { %10898 = vmatpush1.bf16.msra.mxu0 %v21655_v47 }
0x1632   : > { %v8590_v52 = vpop.f32.mrb[72].mxu1 }
0x1633   : > { %v8596_v30 = vmul.f32 0.088388346, %v8590_v52  ;;  %v19832_v50 = vpop.f32.mrb[73].mxu1  ;;  %v21660_v52 = vld [vmem:[%s24547_s24 + $0x274] ss:$24 sps:$4 sm:$0xff]  }
0x1634   : > { %v8593_v51 = vpop.f32.mrb[74].mxu1  ;;  %10899 = vmatprep.subr.bf16.mxu0 %v21660_v52  ;;  %v21663_v50 = vld [vmem:[%s24547_s24 + $0x2a4] ss:$24 sps:$4 sm:$0xff]  }
0x1635   : > { %v19833_v1 = vpop.f32.mrb[75].mxu1  ;;  %v8597_v46 = vadd.f32 %v25821_v24, %v8596_v30  ;;  %v21658_v30 = vld [vmem:[%s24547_s24 + $0x270] ss:$24 sps:$4 sm:$0xff]   ;;  %v21661_v51 = vld [vmem:[%s24547_s24 + $0x2a0] ss:$24 sps:$4 sm:$0xff]  }
0x1636   : > { %10900 = vmatpush1.bf16.msra.mxu0 %v21658_v30 }
0x1637   : > { %v8598_v3 = vsel %vm7870_vm1, %v8597_v46, -inf  ;;  %10901 = vmatprep.subr.bf16.mxu0 %v21663_v50 }
0x1638   : > { %8599 = vmax.xlane.f32.xlu0 %v8598_v3 }
0x163a   : > { %10902 = vmatpush1.bf16.msra.mxu0 %v21661_v51 }
0x16c5   : > { %v8600_v0 = vpop.xlane.xlu0 %8599 }
0x16c6   : > { %v8601_v59 = vsub.f32 %v8597_v46, %v8600_v0 }
0x16c8   : > { %v8602_v8 = vmul.f32 1.442695, %v8601_v59  ;;  %v8663_v59 = vrot.slane %v25580_v35, 4  ;;  %v21666_v35 = vld [vmem:[%s24547_s24 + $0x2d4] ss:$24 sps:$4 sm:$0xff]  }
0x16c9   : > { %10903 = vmatprep.subr.bf16.mxu0 %v21666_v35  ;;  %v21672_v35 = vld [vmem:[%s24547_s24 + $0x334] ss:$24 sps:$4 sm:$0xff]  }
0x16ca   : > { %22655 = vpow2.f32 %v8602_v8  ;;  %v8720_v8 = vrot.slane %v25590_v11, 4 }
0x16cc   : > { %v8725_v16 = vsel %vm7886_vm2, %v8720_v8, 0 }
0x16d4   : > { %v25842_v10 = vpop.eup %22655 }
0x16d5   : > { %v8604_v60 = vsel %vm7870_vm1, %v25842_v10, 0.0 }
0x16d6   : > { %8605 = vadd.xlane.f32.xlu1 %v8604_v60  ;;  %v8660_v60 = vrot.slane %v25099_v37, 4 }
0x1763   : > { %v8606_v1 = vpop.xlane.xlu1 %8605 }
0x1764   : > { %22657 = vrcp.f32 %v8606_v1 }
0x176e   : > { %v22658_v46 = vpop.eup %22657 }
0x176f   : > { %v8608_v3 = vmul.f32 %v22658_v46, %v25842_v10  ;;  %v21664_v10 = vld [vmem:[%s24547_s24 + $0x2d0] ss:$24 sps:$4 sm:$0xff]  }
0x1770   : > { %10904 = vmatpush1.bf16.msra.mxu0 %v21664_v10  ;;  %v21670_v10 = vld [vmem:[%s24547_s24 + $0x330] ss:$24 sps:$4 sm:$0xff]  }
0x1771   : > { %v8609_v0 = vpack.c.bf16 %v8608_v3, %v8608_v3 }
0x1773   : > { %19837 = vmatmul.mubr.msk.bf16.vlgmr.msra.gmra.mrb[76].mxu1 %vm7870_vm1, %v8609_v0 }
0x1774   : > { %19841 = vmatpush3.bf16.xpose.msra.mxu1 %v8663_v59  ;;  %19842 = vmatprep.mubr.msk.bf16.mxu1 %vm23851_vm0, %v23850_v33 }
0x1775   : > { %19846 = vmatprep.subr.bf16.mxu1 %v23850_v33 }
0x177b   : > { %19843 = vmatmul.mubr.bf16.vlgmr.msra.gmra.mrb[80].mxu1 %v8660_v60  ;;  %v21667_v60 = vld [vmem:[%s24547_s24 + $0x300] ss:$24 sps:$4 sm:$0xff]  }
0x177c   : > { %19847 = vmatpush3.bf16.msra.mxu1 %v8725_v16  ;;  %19848 = vmatprep.mubr.msk.bf16.mxu1 %vm23851_vm0, %v23850_v33  ;;  %v21669_v16 = vld [vmem:[%s24547_s24 + $0x304] ss:$24 sps:$4 sm:$0xff]  }
0x177d   : > { %19852 = vmatprep.subr.bf16.mxu1 %v23850_v33  ;;  %10916 = vmatprep.subr.bf16.mxu0 %v21669_v16 }
0x1846   : > { %v8652_v17 = vpop.f32.mrb[76].mxu1 }
0x1847   : > { %v25891_v20 = vpack.c.bf16 %v8652_v17, %v25640_v40  ;;  %v19838_v11 = vpop.f32.mrb[77].mxu1  ;;  %v21675_v17 = vld [vmem:[%s24547_s24 + $0x364] ss:$24 sps:$4 sm:$0xff]  }
0x1848   : > { %v8655_v29 = vpop.f32.mrb[78].mxu1  ;;  %v21673_v11 = vld [vmem:[%s24547_s24 + $0x360] ss:$24 sps:$4 sm:$0xff]  }
0x1849   : > { %v19839_v37 = vpop.f32.mrb[79].mxu1  ;;  %10905 = vmatprep.mubr.bf16.mxu0 %v25891_v20  ;;  %v21678_v29 = vld [vmem:[%s24547_s24 + $0x394] ss:$24 sps:$4 sm:$0xff]  }
0x184a   : > { %10906 = vmatmul.mubr.bf16.vlgmr.msra.gmra.mrb[20].mxu0 %v25838_v54  ;;  %v21676_v37 = vld [vmem:[%s24547_s24 + $0x390] ss:$24 sps:$4 sm:$0xff]  }
0x184b   : > { %10917 = vmatpush1.bf16.msra.mxu0 %v21667_v60 }
0x184c   : > { %10918 = vmatprep.subr.bf16.mxu0 %v21672_v35 }
0x184e   : > { %v8699_v21 = vpop.f32.mrb[80].mxu1 }
0x184f   : > { %v8705_v42 = vmul.f32 0.088388346, %v8699_v21  ;;  %v19844_v22 = vpop.f32.mrb[81].mxu1  ;;  %10919 = vmatpush1.bf16.msra.mxu0 %v21670_v10  ;;  %v21681_v21 = vld [vmem:[%s24547_s24 + $0x3c4] ss:$24 sps:$4 sm:$0xff]  }
0x1850   : > { %v8702_v23 = vpop.f32.mrb[82].mxu1  ;;  %10920 = vmatprep.subr.bf16.mxu0 %v21675_v17  ;;  %v21684_v22 = vld [vmem:[%s24547_s24 + $0x3f4] ss:$24 sps:$4 sm:$0xff]  }
0x1851   : > { %v19845_v27 = vpop.f32.mrb[83].mxu1  ;;  %v8706_v31 = vadd.f32 %v25821_v24, %v8705_v42  ;;  %v21679_v42 = vld [vmem:[%s24547_s24 + $0x3c0] ss:$24 sps:$4 sm:$0xff]   ;;  %v21682_v23 = vld [vmem:[%s24547_s24 + $0x3f0] ss:$24 sps:$4 sm:$0xff]  }
0x1852   : > { %v21687_v27 = vld [vmem:[%s24547_s24 + $0x424] ss:$24 sps:$4 sm:$0xff]  }
0x1853   : > { %v8707_v39 = vsel %vm7870_vm1, %v8706_v31, -inf  ;;  %10921 = vmatpush1.bf16.msra.mxu0 %v21673_v11 }
0x1854   : > { %8708 = vmax.xlane.f32.xlu0 %v8707_v39  ;;  %10922 = vmatprep.subr.bf16.mxu0 %v21678_v29  ;;  %v21690_v39 = vld [vmem:[%s24547_s24 + $0x454] ss:$24 sps:$4 sm:$0xff]  }
0x1857   : > { %10923 = vmatpush1.bf16.msra.mxu0 %v21676_v37 }
0x1858   : > { %10924 = vmatprep.subr.bf16.mxu0 %v21681_v21 }
0x185b   : > { %10925 = vmatpush1.bf16.msra.mxu0 %v21679_v42 }
0x185c   : > { %10926 = vmatprep.subr.bf16.mxu0 %v21684_v22 }
0x185f   : > { %10927 = vmatpush1.bf16.msra.mxu0 %v21682_v23 }
0x1860   : > { %10928 = vmatprep.subr.bf16.mxu0 %v21687_v27 }
0x18e1   : > { %v8709_v26 = vpop.xlane.xlu0 %8708 }
0x18e2   : > { %v8710_v40 = vsub.f32 %v8706_v31, %v8709_v26  ;;  %v21685_v31 = vld [vmem:[%s24547_s24 + $0x420] ss:$24 sps:$4 sm:$0xff]   ;;  %v21688_v26 = vld [vmem:[%s24547_s24 + $0x450] ss:$24 sps:$4 sm:$0xff]  }
0x18e3   : > { %10929 = vmatpush1.bf16.msra.mxu0 %v21685_v31  ;;  %v8990_v31 = vrot.slane %v25555_v9, 4 }
0x18e4   : > { %v8711_v53 = vmul.f32 1.442695, %v8710_v40  ;;  %10930 = vmatprep.subr.bf16.mxu0 %v21690_v39  ;;  %v21693_v40 = vld [vmem:[%s24547_s24 + $0x484] ss:$24 sps:$4 sm:$0xff]   ;;  %v9047_v39 = vrot.slane %v25783_v15, 4 }
0x18e6   : > { %22659 = vpow2.f32 %v8711_v53  ;;  %v21691_v53 = vld [vmem:[%s24547_s24 + $0x480] ss:$24 sps:$4 sm:$0xff]  }
0x18e7   : > { %10931 = vmatpush1.bf16.msra.mxu0 %v21688_v26  ;;  %v8987_v26 = vrot.slane %v25418_v7, 4 }
0x18e8   : > { %10932 = vmatprep.subr.bf16.mxu0 %v21693_v40  ;;  %v9052_v40 = vsel %vm7886_vm2, %v9047_v39, 0  ;;  %v21736_v39 = vld [vmem:[%s24547_s24 + $0x158] ss:$24 sps:$4 sm:$0xff]  }
0x18eb   : > { %10933 = vmatpush1.bf16.msra.mxu0 %v21691_v53 }
0x18f0   : > { %v22660_v32 = vpop.eup %22659 }
0x18f1   : > { %v8713_v38 = vsel %vm7870_vm1, %v22660_v32, 0.0 }
0x18f2   : > { %8714 = vadd.xlane.f32.xlu1 %v8713_v38  ;;  %v21694_v38 = vld [vmem:[%s24547_s24 + $0x4b0] ss:$24 sps:$4 sm:$0xff]  }
0x197f   : > { %v8715_v55 = vpop.xlane.xlu1 %8714 }
0x1980   : > { %22661 = vrcp.f32 %v8715_v55  ;;  %v21699_v55 = vld [vmem:[%s24547_s24 + $0x4e4] ss:$24 sps:$4 sm:$0xff]  }
0x198a   : > { %v22662_v56 = vpop.eup %22661 }
0x198b   : > { %v8717_v58 = vmul.f32 %v22662_v56, %v22660_v32  ;;  %v21696_v32 = vld [vmem:[%s24547_s24 + $0x4b4] ss:$24 sps:$4 sm:$0xff]   ;;  %v21697_v56 = vld [vmem:[%s24547_s24 + $0x4e0] ss:$24 sps:$4 sm:$0xff]  }
0x198c   : > { %10934 = vmatprep.subr.bf16.mxu0 %v21696_v32 }
0x198d   : > { %v8718_v13 = vpack.c.bf16 %v8717_v58, %v8717_v58  ;;  %10935 = vmatpush1.bf16.msra.mxu0 %v21694_v38  ;;  %v21702_v58 = vld [vmem:[%s24547_s24 + $0x514] ss:$24 sps:$4 sm:$0xff]  }
0x198e   : > { %10936 = vmatprep.subr.bf16.mxu0 %v21699_v55 }
0x198f   : > { %19849 = vmatmul.mubr.msk.bf16.vlgmr.msra.gmra.mrb[84].mxu1 %vm7870_vm1, %v8718_v13  ;;  %v21700_v13 = vld [vmem:[%s24547_s24 + $0x510] ss:$24 sps:$4 sm:$0xff]  }
0x1990   : > { %19853 = vmatpush3.bf16.xpose.msra.mxu1 %v8772_v62  ;;  %19854 = vmatprep.mubr.msk.bf16.mxu1 %vm23851_vm0, %v23850_v33  ;;  %v21705_v62 = vld [vmem:[%s24547_s24 + $0x544] ss:$24 sps:$4 sm:$0xff]  }
0x1991   : > { %19858 = vmatprep.subr.bf16.mxu1 %v23850_v33  ;;  %10937 = vmatpush1.bf16.msra.mxu0 %v21697_v56 }
0x1992   : > { %10938 = vmatprep.subr.bf16.mxu0 %v21702_v58 }
0x1995   : > { %10939 = vmatpush1.bf16.msra.mxu0 %v21700_v13 }
0x1996   : > { %10940 = vmatprep.subr.bf16.mxu0 %v21705_v62 }
0x1997   : > { %19855 = vmatmul.mubr.bf16.vlgmr.msra.gmra.mrb[88].mxu1 %v8769_v63  ;;  %v21708_v63 = vld [vmem:[%s24547_s24 + $0x574] ss:$24 sps:$4 sm:$0xff]  }
0x1998   : > { %19859 = vmatpush3.bf16.msra.mxu1 %v8834_v19  ;;  %19860 = vmatprep.mubr.msk.bf16.mxu1 %vm23851_vm0, %v23850_v33  ;;  %v21706_v19 = vld [vmem:[%s24547_s24 + $0x570] ss:$24 sps:$4 sm:$0xff]  }
0x1999   : > { %19864 = vmatprep.subr.bf16.mxu1 %v23850_v33  ;;  %10941 = vmatpush1.bf16.msra.mxu0 %v21703_v49 }
0x199a   : > { %10942 = vmatprep.subr.bf16.mxu0 %v21708_v63 }
0x199d   : > { %10943 = vmatpush1.bf16.msra.mxu0 %v21706_v19 }
0x1a62   : > { %v8761_v36 = vpop.f32.mrb[84].mxu1 }
0x1a63   : > { %v25910_v57 = vpack.c.bf16 %v8761_v36, %v25656_v34  ;;  %v19850_v61 = vpop.f32.mrb[85].mxu1  ;;  %v21711_v36 = vld [vmem:[%s24547_s24 + $0x5a4] ss:$24 sps:$4 sm:$0xff]  }
0x1a64   : > { %v8764_v47 = vpop.f32.mrb[86].mxu1  ;;  %v21709_v61 = vld [vmem:[%s24547_s24 + $0x5a0] ss:$24 sps:$4 sm:$0xff]   ;;  %10944 = vmatprep.subr.bf16.mxu0 %v21711_v36 }
0x1a65   : > { %v19851_v52 = vpop.f32.mrb[87].mxu1  ;;  %10945 = vmatpush1.bf16.msra.mxu0 %v21709_v61  ;;  %v21717_v61 = vld [vmem:[%s24547_s24 + $0xc] ss:$24 sps:$4 sm:$0xff]  }
0x1a6a   : > { %v8808_v12 = vpop.f32.mrb[88].mxu1 }
0x1a6b   : > { %v8814_v41 = vmul.f32 0.088388346, %v8808_v12  ;;  %v19856_v30 = vpop.f32.mrb[89].mxu1 }
0x1a6c   : > { %v8811_v50 = vpop.f32.mrb[90].mxu1  ;;  %v8881_v30 = vrot.slane %v25552_v4, 4  ;;  %v21714_v4 = vld [vmem:[%s24547_s24 + $0x5d4] ss:$24 sps:$4 sm:$0xff]  }
0x1a6d   : > { %v19857_v51 = vpop.f32.mrb[91].mxu1  ;;  %v8815_v1 = vadd.f32 %v25821_v24, %v8814_v41  ;;  %v8938_v50 = vrot.slane %v25781_v14, 4  ;;  %10946 = vmatprep.subr.bf16.mxu0 %v21714_v4  ;;  %v21819_v4 = vld [vmem:[%s24547_s24 + $0x634] ss:$24 sps:$4 sm:$0xff]  }
0x1a6e   : > { %v8878_v51 = vrot.slane %v25416_v6, 4 }
0x1a6f   : > { %v8816_v46 = vsel %vm7870_vm1, %v8815_v1, -inf }
0x1a70   : > { %8817 = vmax.xlane.f32.xlu0 %v8816_v46  ;;  %v21712_v46 = vld [vmem:[%s24547_s24 + $0x5d0] ss:$24 sps:$4 sm:$0xff]  }
0x1a71   : > { %10947 = vmatpush1.bf16.msra.mxu0 %v21712_v46  ;;  %v21723_v46 = vld [vmem:[%s24547_s24 + $0x6c] ss:$24 sps:$4 sm:$0xff]  }
0x1afd   : > { %v8818_v34 = vpop.xlane.xlu0 %8817 }
0x1afe   : > { %v8819_v3 = vsub.f32 %v8815_v1, %v8818_v34  ;;  %v8943_v1 = vsel %vm7886_vm2, %v8938_v50, 0  ;;  %v21811_v50 = vld [vmem:[%s24547_s24 + $0x600] ss:$24 sps:$4 sm:$0xff]  }
0x1b00   : > { %v8820_v0 = vmul.f32 1.442695, %v8819_v3 }
0x1b02   : > { %22663 = vpow2.f32 %v8820_v0 }
0x1b0c   : > { %v25914_v59 = vpop.eup %22663 }
0x1b0d   : > { %v8822_v8 = vsel %vm7870_vm1, %v25914_v59, 0.0 }
0x1b0e   : > { %8823 = vadd.xlane.f32.xlu1 %v8822_v8 }
0x1b9b   : > { %v8824_v47 = vpop.xlane.xlu1 %8823 }
0x1b9c   : > { %22665 = vrcp.f32 %v8824_v47 }
0x1ba6   : > { %v22666_v52 = vpop.eup %22665 }
0x1ba7   : > { %v8826_v12 = vmul.f32 %v22666_v52, %v25914_v59 }
0x1ba9   : > { %v8827_v41 = vpack.c.bf16 %v8826_v12, %v8826_v12  ;;  %v21715_v12 = vld [vmem:[%s24547_s24 + $0x8] ss:$24 sps:$4 sm:$0xff]  }
0x1bab   : > { %19861 = vmatmul.mubr.msk.bf16.vlgmr.msra.gmra.mrb[92].mxu1 %vm7870_vm1, %v8827_v41 }
0x1bac   : > { %19865 = vmatpush3.bf16.xpose.msra.mxu1 %v8881_v30  ;;  %19866 = vmatprep.mubr.msk.bf16.mxu1 %vm23851_vm0, %v23850_v33  ;;  %v21720_v30 = vld [vmem:[%s24547_s24 + $0x3c] ss:$24 sps:$4 sm:$0xff]  }
0x1bad   : > { %19870 = vmatprep.subr.bf16.mxu1 %v23850_v33 }
0x1bb3   : > { %19867 = vmatmul.mubr.bf16.vlgmr.msra.gmra.mrb[96].mxu1 %v8878_v51  ;;  %v21813_v51 = vld [vmem:[%s24547_s24 + $0x604] ss:$24 sps:$4 sm:$0xff]  }
0x1bb4   : > { %19871 = vmatpush3.bf16.msra.mxu1 %v8943_v1  ;;  %19872 = vmatprep.mubr.msk.bf16.mxu1 %vm23851_vm0, %v23850_v33  ;;  %v21718_v1 = vld [vmem:[%s24547_s24 + $0x38] ss:$24 sps:$4 sm:$0xff]  }
0x1bb5   : > { %19876 = vmatprep.subr.bf16.mxu1 %v23850_v33  ;;  %10959 = vmatprep.subr.bf16.mxu0 %v21813_v51  ;;  %v21889_v51 = vld [vmem:[%s24547_s24 + $0x870] ss:$24 sps:$4 sm:$0xff]  }
0x1c7e   : > { %v8870_v34 = vpop.f32.mrb[92].mxu1 }
0x1c7f   : > { %v25963_v3 = vpack.c.bf16 %v8870_v34, %v25774_v28  ;;  %v19862_v14 = vpop.f32.mrb[93].mxu1  ;;  %v21817_v34 = vld [vmem:[%s24547_s24 + $0x630] ss:$24 sps:$4 sm:$0xff]  }
0x1c80   : > { %v8873_v0 = vpop.f32.mrb[94].mxu1  ;;  %v21721_v14 = vld [vmem:[%s24547_s24 + $0x68] ss:$24 sps:$4 sm:$0xff]  }
0x1c81   : > { %v19863_v6 = vpop.f32.mrb[95].mxu1  ;;  %10948 = vmatprep.mubr.bf16.mxu0 %v25963_v3  ;;  %v21825_v0 = vld [vmem:[%s24547_s24 + $0x664] ss:$24 sps:$4 sm:$0xff]  }
0x1c82   : > { %10949 = vmatmul.mubr.bf16.vlgmr.msra.gmra.mrb[20].mxu0 %v25910_v57  ;;  %v21726_v6 = vld [vmem:[%s24547_s24 + $0x9c] ss:$24 sps:$4 sm:$0xff]  }
0x1c83   : > { %10960 = vmatpush1.bf16.msra.mxu0 %v21811_v50  ;;  %v21759_v50 = vld [vmem:[%s24547_s24 + $0x2ac] ss:$24 sps:$4 sm:$0xff]  }
0x1c84   : > { %10961 = vmatprep.subr.bf16.mxu0 %v21819_v4  ;;  %v21897_v4 = vld [vmem:[%s24547_s24 + $0x8a4] ss:$24 sps:$4 sm:$0xff]  }
0x1c86   : > { %v8917_v59 = vpop.f32.mrb[96].mxu1 }
0x1c87   : > { %v8923_v8 = vmul.f32 0.088388346, %v8917_v59  ;;  %v19868_v60 = vpop.f32.mrb[97].mxu1  ;;  %10962 = vmatpush1.bf16.msra.mxu0 %v21817_v34  ;;  %v21823_v59 = vld [vmem:[%s24547_s24 + $0x660] ss:$24 sps:$4 sm:$0xff]  }
0x1c88   : > { %v8920_v16 = vpop.f32.mrb[98].mxu1  ;;  %10963 = vmatprep.subr.bf16.mxu0 %v21825_v0  ;;  %v21831_v60 = vld [vmem:[%s24547_s24 + $0x694] ss:$24 sps:$4 sm:$0xff]   ;;  %v21895_v34 = vld [vmem:[%s24547_s24 + $0x8a0] ss:$24 sps:$4 sm:$0xff]  }
0x1c89   : > { %v19869_v35 = vpop.f32.mrb[99].mxu1  ;;  %v8924_v10 = vadd.f32 %v25821_v24, %v8923_v8  ;;  %v21724_v8 = vld [vmem:[%s24547_s24 + $0x98] ss:$24 sps:$4 sm:$0xff]   ;;  %v21729_v16 = vld [vmem:[%s24547_s24 + $0xcc] ss:$24 sps:$4 sm:$0xff]  }
0x1c8a   : > { %v21829_v35 = vld [vmem:[%s24547_s24 + $0x690] ss:$24 sps:$4 sm:$0xff]   ;;  %v21903_v0 = vld [vmem:[%s24547_s24 + $0x8d4] ss:$24 sps:$4 sm:$0xff]  }
0x1c8b   : > { %v8925_v17 = vsel %vm7870_vm1, %v8924_v10, -inf  ;;  %10964 = vmatpush1.bf16.msra.mxu0 %v21823_v59  ;;  %v21901_v59 = vld [vmem:[%s24547_s24 + $0x8d0] ss:$24 sps:$4 sm:$0xff]  }
0x1c8c   : > { %8926 = vmax.xlane.f32.xlu0 %v8925_v17  ;;  %10965 = vmatprep.subr.bf16.mxu0 %v21831_v60  ;;  %v21837_v17 = vld [vmem:[%s24547_s24 + $0x6c4] ss:$24 sps:$4 sm:$0xff]  }
0x1c8d   : > { %v21768_v60 = vld [vmem:[%s24547_s24 + $0x33c] ss:$24 sps:$4 sm:$0xff]  }
0x1c8f   : > { %10966 = vmatpush1.bf16.msra.mxu0 %v21829_v35  ;;  %v21771_v35 = vld [vmem:[%s24547_s24 + $0x36c] ss:$24 sps:$4 sm:$0xff]  }
0x1c90   : > { %10967 = vmatprep.subr.bf16.mxu0 %v21837_v17  ;;  %v21774_v17 = vld [vmem:[%s24547_s24 + $0x39c] ss:$24 sps:$4 sm:$0xff]  }
0x1d19   : > { %v8927_v11 = vpop.xlane.xlu0 %8926 }
0x1d1a   : > { %v8928_v28 = vsub.f32 %v8924_v10, %v8927_v11  ;;  %v21727_v10 = vld [vmem:[%s24547_s24 + $0xc8] ss:$24 sps:$4 sm:$0xff]   ;;  %v21732_v11 = vld [vmem:[%s24547_s24 + $0xfc] ss:$24 sps:$4 sm:$0xff]  }
0x1d1c   : > { %v8929_v29 = vmul.f32 1.442695, %v8928_v28  ;;  %v21835_v28 = vld [vmem:[%s24547_s24 + $0x6c0] ss:$24 sps:$4 sm:$0xff]  }
0x1d1d   : > { %10968 = vmatpush1.bf16.msra.mxu0 %v21835_v28  ;;  %v21777_v28 = vld [vmem:[%s24547_s24 + $0x3cc] ss:$24 sps:$4 sm:$0xff]  }
0x1d1e   : > { %22667 = vpow2.f32 %v8929_v29  ;;  %v21730_v29 = vld [vmem:[%s24547_s24 + $0xf8] ss:$24 sps:$4 sm:$0xff]  }
0x1d28   : > { %v22668_v37 = vpop.eup %22667 }
0x1d29   : > { %v8931_v21 = vsel %vm7870_vm1, %v22668_v37, 0.0 }
0x1d2a   : > { %8932 = vadd.xlane.f32.xlu1 %v8931_v21  ;;  %v21735_v21 = vld [vmem:[%s24547_s24 + $0x12c] ss:$24 sps:$4 sm:$0xff]  }
0x1db7   : > { %v8933_v42 = vpop.xlane.xlu1 %8932 }
0x1db8   : > { %22669 = vrcp.f32 %v8933_v42  ;;  %v21841_v42 = vld [vmem:[%s24547_s24 + $0x6f0] ss:$24 sps:$4 sm:$0xff]  }
0x1dc2   : > { %v22670_v22 = vpop.eup %22669 }
0x1dc3   : > { %v8935_v23 = vmul.f32 %v22670_v22, %v22668_v37  ;;  %v21843_v37 = vld [vmem:[%s24547_s24 + $0x6f4] ss:$24 sps:$4 sm:$0xff]   ;;  %v21733_v22 = vld [vmem:[%s24547_s24 + $0x128] ss:$24 sps:$4 sm:$0xff]  }
0x1dc4   : > { %10969 = vmatprep.subr.bf16.mxu0 %v21843_v37  ;;  %v21780_v37 = vld [vmem:[%s24547_s24 + $0x3fc] ss:$24 sps:$4 sm:$0xff]  }
0x1dc5   : > { %v8936_v27 = vpack.c.bf16 %v8935_v23, %v8935_v23  ;;  %v21849_v23 = vld [vmem:[%s24547_s24 + $0x724] ss:$24 sps:$4 sm:$0xff]   ;;  %10970 = vmatpush1.bf16.msra.mxu0 %v21841_v42 }
0x1dc6   : > { %10971 = vmatprep.subr.bf16.mxu0 %v21849_v23  ;;  %v21783_v42 = vld [vmem:[%s24547_s24 + $0x42c] ss:$24 sps:$4 sm:$0xff]  }
0x1dc7   : > { %19873 = vmatmul.mubr.msk.bf16.vlgmr.msra.gmra.mrb[100].mxu1 %vm7870_vm1, %v8936_v27  ;;  %v21738_v27 = vld [vmem:[%s24547_s24 + $0x15c] ss:$24 sps:$4 sm:$0xff]  }
0x1dc8   : > { %19877 = vmatpush3.bf16.xpose.msra.mxu1 %v8990_v31  ;;  %19878 = vmatprep.mubr.msk.bf16.mxu1 %vm23851_vm0, %v23850_v33  ;;  %v21847_v31 = vld [vmem:[%s24547_s24 + $0x720] ss:$24 sps:$4 sm:$0xff]   ;;  %v21909_v23 = vld [vmem:[%s24547_s24 + $0x14] ss:$24 sps:$4 sm:$0xff]  }
0x1dc9   : > { %19882 = vmatprep.subr.bf16.mxu1 %v23850_v33  ;;  %10972 = vmatpush1.bf16.msra.mxu0 %v21847_v31  ;;  %v21784_v31 = vld [vmem:[%s24547_s24 + $0x458] ss:$24 sps:$4 sm:$0xff]  }
0x1dcf   : > { %19879 = vmatmul.mubr.bf16.vlgmr.msra.gmra.mrb[104].mxu1 %v8987_v26  ;;  %v21855_v26 = vld [vmem:[%s24547_s24 + $0x754] ss:$24 sps:$4 sm:$0xff]  }
0x1dd0   : > { %19883 = vmatpush3.bf16.msra.mxu1 %v9052_v40  ;;  %19884 = vmatprep.mubr.msk.bf16.mxu1 %vm23851_vm0, %v23850_v33  ;;  %v21741_v40 = vld [vmem:[%s24547_s24 + $0x18c] ss:$24 sps:$4 sm:$0xff]  }
0x1dd1   : > { %11002 = vmatprep.subr.bf16.mxu1 %v21717_v61  ;;  %10973 = vmatprep.subr.bf16.mxu0 %v21855_v26  ;;  %v21877_v61 = vld [vmem:[%s24547_s24 + $0x810] ss:$24 sps:$4 sm:$0xff]  }
0x1dd2   : > { %v21787_v26 = vld [vmem:[%s24547_s24 + $0x488] ss:$24 sps:$4 sm:$0xff]  }
0x1e9a   : > { %v8979_v9 = vpop.f32.mrb[100].mxu1 }
0x1e9b   : > { %v25981_v53 = vpack.c.bf16 %v8979_v9, %v25800_v43  ;;  %v19874_v32 = vpop.f32.mrb[101].mxu1  ;;  %v21853_v9 = vld [vmem:[%s24547_s24 + $0x750] ss:$24 sps:$4 sm:$0xff]  }
0x1e9c   : > { %v8982_v38 = vpop.f32.mrb[102].mxu1  ;;  %v21739_v32 = vld [vmem:[%s24547_s24 + $0x188] ss:$24 sps:$4 sm:$0xff]   ;;  %10974 = vmatpush1.bf16.msra.mxu0 %v21853_v9  ;;  %v21790_v9 = vld [vmem:[%s24547_s24 + $0x4b8] ss:$24 sps:$4 sm:$0xff]  }
0x1e9d   : > { %v19875_v55 = vpop.f32.mrb[103].mxu1  ;;  %v21861_v38 = vld [vmem:[%s24547_s24 + $0x784] ss:$24 sps:$4 sm:$0xff]  }
0x1e9e   : > { %v21744_v55 = vld [vmem:[%s24547_s24 + $0x1bc] ss:$24 sps:$4 sm:$0xff]   ;;  %10975 = vmatprep.subr.bf16.mxu0 %v21861_v38  ;;  %v21793_v38 = vld [vmem:[%s24547_s24 + $0x4e8] ss:$24 sps:$4 sm:$0xff]  }
0x1ea2   : > { %v9026_v56 = vpop.f32.mrb[104].mxu1 }
0x1ea3   : > { %v9032_v58 = vmul.f32 0.088388346, %v9026_v56  ;;  %v19880_v15 = vpop.f32.mrb[105].mxu1  ;;  %v21859_v56 = vld [vmem:[%s24547_s24 + $0x780] ss:$24 sps:$4 sm:$0xff]  }
0x1ea4   : > { %v9029_v13 = vpop.f32.mrb[106].mxu1  ;;  %v21867_v15 = vld [vmem:[%s24547_s24 + $0x7b4] ss:$24 sps:$4 sm:$0xff]   ;;  %10976 = vmatpush1.bf16.msra.mxu0 %v21859_v56  ;;  %v21796_v56 = vld [vmem:[%s24547_s24 + $0x518] ss:$24 sps:$4 sm:$0xff]  }
0x1ea5   : > { %v19881_v7 = vpop.f32.mrb[107].mxu1  ;;  %v9033_v62 = vadd.f32 %v25821_v24, %v9032_v58  ;;  %v21742_v58 = vld [vmem:[%s24547_s24 + $0x1b8] ss:$24 sps:$4 sm:$0xff]   ;;  %v21747_v13 = vld [vmem:[%s24547_s24 + $0x1ec] ss:$24 sps:$4 sm:$0xff]   ;;  %10977 = vmatprep.subr.bf16.mxu0 %v21867_v15 }
0x1ea6   : > { %v21865_v7 = vld [vmem:[%s24547_s24 + $0x7b0] ss:$24 sps:$4 sm:$0xff]  }
0x1ea7   : > { %v9034_v49 = vsel %vm7870_vm1, %v9033_v62, -inf  ;;  %v21799_v15 = vld [vmem:[%s24547_s24 + $0x548] ss:$24 sps:$4 sm:$0xff]  }
0x1ea8   : > { %9035 = vmax.xlane.f32.xlu0 %v9034_v49  ;;  %v21873_v49 = vld [vmem:[%s24547_s24 + $0x7e4] ss:$24 sps:$4 sm:$0xff]   ;;  %10978 = vmatpush1.bf16.msra.mxu0 %v21865_v7  ;;  %v21802_v7 = vld [vmem:[%s24547_s24 + $0x578] ss:$24 sps:$4 sm:$0xff]  }
0x1ea9   : > { %10979 = vmatprep.subr.bf16.mxu0 %v21873_v49  ;;  %v21805_v49 = vld [vmem:[%s24547_s24 + $0x5a8] ss:$24 sps:$4 sm:$0xff]  }
0x1f35   : > { %v9036_v33 = vpop.xlane.xlu0 %9035 }
0x1f36   : > { %v9037_v63 = vsub.f32 %v9033_v62, %v9036_v33  ;;  %v21745_v62 = vld [vmem:[%s24547_s24 + $0x1e8] ss:$24 sps:$4 sm:$0xff]   ;;  %v21750_v33 = vld [vmem:[%s24547_s24 + $0x21c] ss:$24 sps:$4 sm:$0xff]  }
0x1f38   : > { %v9038_v43 = vmul.f32 1.442695, %v9037_v63  ;;  %v21871_v63 = vld [vmem:[%s24547_s24 + $0x7e0] ss:$24 sps:$4 sm:$0xff]  }
0x1f39   : > { %10980 = vmatpush1.bf16.msra.mxu0 %v21871_v63  ;;  %v21808_v63 = vld [vmem:[%s24547_s24 + $0x5d8] ss:$24 sps:$4 sm:$0xff]  }
0x1f3a   : > { %22671 = vpow2.f32 %v9038_v43  ;;  %v21748_v43 = vld [vmem:[%s24547_s24 + $0x218] ss:$24 sps:$4 sm:$0xff]  }
0x1f44   : > { %v22672_v19 = vpop.eup %22671 }
0x1f45   : > { %v9040_v36 = vsel %vm7870_vm1, %v22672_v19, 0.0 }
0x1f46   : > { %9041 = vadd.xlane.f32.xlu1 %v9040_v36  ;;  %v21753_v36 = vld [vmem:[%s24547_s24 + $0x24c] ss:$24 sps:$4 sm:$0xff]  }
0x1fd3   : > { %v9042_v24 = vpop.xlane.xlu1 %9041 }
0x1fd4   : > { %22673 = vrcp.f32 %v9042_v24  ;;  %v21751_v24 = vld [vmem:[%s24547_s24 + $0x248] ss:$24 sps:$4 sm:$0xff]  }
0x1fde   : > { %v22674_v47 = vpop.eup %22673 }
0x1fdf   : > { %v9044_v52 = vmul.f32 %v22674_v47, %v22672_v19  ;;  %v21879_v19 = vld [vmem:[%s24547_s24 + $0x814] ss:$24 sps:$4 sm:$0xff]   ;;  %v21885_v47 = vld [vmem:[%s24547_s24 + $0x844] ss:$24 sps:$4 sm:$0xff]  }
0x1fe0   : > { %10981 = vmatprep.subr.bf16.mxu0 %v21879_v19  ;;  %v21814_v19 = vld [vmem:[%s24547_s24 + $0x608] ss:$24 sps:$4 sm:$0xff]  }
0x1fe1   : > { %v9045_v41 = vpack.c.bf16 %v9044_v52, %v9044_v52  ;;  %v21756_v52 = vld [vmem:[%s24547_s24 + $0x27c] ss:$24 sps:$4 sm:$0xff]   ;;  %10982 = vmatpush1.bf16.msra.mxu0 %v21877_v61  ;;  %v21820_v61 = vld [vmem:[%s24547_s24 + $0x638] ss:$24 sps:$4 sm:$0xff]  }
0x1fe2   : > { %10983 = vmatprep.subr.bf16.mxu0 %v21885_v47  ;;  %v21826_v47 = vld [vmem:[%s24547_s24 + $0x668] ss:$24 sps:$4 sm:$0xff]  }
0x1fe3   : > { %19885 = vmatmul.mubr.msk.bf16.vlgmr.msra.gmra.mrb[108].mxu1 %vm7870_vm1, %v9045_v41  ;;  %v21754_v41 = vld [vmem:[%s24547_s24 + $0x278] ss:$24 sps:$4 sm:$0xff]  }
0x1fe4   : > { %11003 = vmatpush1.bf16.msra.mxu1 %v21715_v12  ;;  %11034 = vmatprep.mubr.bf16.mxu1 %v25891_v20  ;;  %v21883_v12 = vld [vmem:[%s24547_s24 + $0x840] ss:$24 sps:$4 sm:$0xff]  }
0x1fe5   : > { %11004 = vmatprep.subr.bf16.mxu1 %v21720_v30  ;;  %v21891_v30 = vld [vmem:[%s24547_s24 + $0x874] ss:$24 sps:$4 sm:$0xff]   ;;  %10984 = vmatpush1.bf16.msra.mxu0 %v21883_v12  ;;  %v21832_v12 = vld [vmem:[%s24547_s24 + $0x698] ss:$24 sps:$4 sm:$0xff]  }
0x1fe6   : > { %10985 = vmatprep.subr.bf16.mxu0 %v21891_v30  ;;  %v21838_v30 = vld [vmem:[%s24547_s24 + $0x6c8] ss:$24 sps:$4 sm:$0xff]  }
0x1fe8   : > { %11005 = vmatpush1.bf16.msra.mxu1 %v21718_v1  ;;  %v21757_v1 = vld [vmem:[%s24547_s24 + $0x2a8] ss:$24 sps:$4 sm:$0xff]  }
0x1fe9   : > { %11006 = vmatprep.subr.bf16.mxu1 %v21723_v46  ;;  %v21762_v46 = vld [vmem:[%s24547_s24 + $0x2dc] ss:$24 sps:$4 sm:$0xff]   ;;  %10986 = vmatpush1.bf16.msra.mxu0 %v21889_v51  ;;  %v21844_v51 = vld [vmem:[%s24547_s24 + $0x6f8] ss:$24 sps:$4 sm:$0xff]  }
0x1fea   : > { %10987 = vmatprep.subr.bf16.mxu0 %v21897_v4  ;;  %v21850_v4 = vld [vmem:[%s24547_s24 + $0x728] ss:$24 sps:$4 sm:$0xff]  }
0x1fec   : > { %11007 = vmatpush1.bf16.msra.mxu1 %v21721_v14  ;;  %v21760_v14 = vld [vmem:[%s24547_s24 + $0x2d8] ss:$24 sps:$4 sm:$0xff]  }
0x1fed   : > { %11008 = vmatprep.subr.bf16.mxu1 %v21726_v6  ;;  %v21765_v6 = vld [vmem:[%s24547_s24 + $0x30c] ss:$24 sps:$4 sm:$0xff]   ;;  %10988 = vmatpush1.bf16.msra.mxu0 %v21895_v34  ;;  %v21856_v34 = vld [vmem:[%s24547_s24 + $0x758] ss:$24 sps:$4 sm:$0xff]  }
0x1fee   : > { %10989 = vmatprep.subr.bf16.mxu0 %v21903_v0  ;;  %v21862_v0 = vld [vmem:[%s24547_s24 + $0x788] ss:$24 sps:$4 sm:$0xff]  }
0x1ff0   : > { %11009 = vmatpush1.bf16.msra.mxu1 %v21724_v8  ;;  %v21763_v8 = vld [vmem:[%s24547_s24 + $0x308] ss:$24 sps:$4 sm:$0xff]  }
0x1ff1   : > { %11010 = vmatprep.subr.bf16.mxu1 %v21729_v16  ;;  %10990 = vmatpush1.bf16.msra.mxu0 %v21901_v59  ;;  %v21766_v16 = vld [vmem:[%s24547_s24 + $0x338] ss:$24 sps:$4 sm:$0xff]  }
0x1ff2   : > { %11131 = vmatprep.subr.bf16.mxu0 %v21909_v23  ;;  %v21868_v59 = vld [vmem:[%s24547_s24 + $0x7b8] ss:$24 sps:$4 sm:$0xff]  }
0x1ff4   : > { %11011 = vmatpush1.bf16.msra.mxu1 %v21727_v10  ;;  %v21769_v10 = vld [vmem:[%s24547_s24 + $0x368] ss:$24 sps:$4 sm:$0xff]  }
0x1ff5   : > { %11012 = vmatprep.subr.bf16.mxu1 %v21732_v11  ;;  %v21772_v11 = vld [vmem:[%s24547_s24 + $0x398] ss:$24 sps:$4 sm:$0xff]  }
0x1ff8   : > { %11013 = vmatpush1.bf16.msra.mxu1 %v21730_v29  ;;  %v21775_v29 = vld [vmem:[%s24547_s24 + $0x3c8] ss:$24 sps:$4 sm:$0xff]  }
0x1ff9   : > { %11014 = vmatprep.subr.bf16.mxu1 %v21735_v21  ;;  %v21778_v21 = vld [vmem:[%s24547_s24 + $0x3f8] ss:$24 sps:$4 sm:$0xff]  }
0x1ffc   : > { %11015 = vmatpush1.bf16.msra.mxu1 %v21733_v22  ;;  %v21781_v22 = vld [vmem:[%s24547_s24 + $0x428] ss:$24 sps:$4 sm:$0xff]  }
0x1ffd   : > { %11016 = vmatprep.subr.bf16.mxu1 %v21738_v27  ;;  %v21786_v27 = vld [vmem:[%s24547_s24 + $0x45c] ss:$24 sps:$4 sm:$0xff]  }
0x2000   : > { %11017 = vmatpush1.bf16.msra.mxu1 %v21736_v39  ;;  %v21789_v39 = vld [vmem:[%s24547_s24 + $0x48c] ss:$24 sps:$4 sm:$0xff]  }
0x2001   : > { %11018 = vmatprep.subr.bf16.mxu1 %v21741_v40  ;;  %v21792_v40 = vld [vmem:[%s24547_s24 + $0x4bc] ss:$24 sps:$4 sm:$0xff]  }
0x2004   : > { %11019 = vmatpush1.bf16.msra.mxu1 %v21739_v32  ;;  %v21795_v32 = vld [vmem:[%s24547_s24 + $0x4ec] ss:$24 sps:$4 sm:$0xff]  }
0x2005   : > { %11020 = vmatprep.subr.bf16.mxu1 %v21744_v55  ;;  %v21798_v55 = vld [vmem:[%s24547_s24 + $0x51c] ss:$24 sps:$4 sm:$0xff]  }
0x2008   : > { %11021 = vmatpush1.bf16.msra.mxu1 %v21742_v58  ;;  %v21801_v58 = vld [vmem:[%s24547_s24 + $0x54c] ss:$24 sps:$4 sm:$0xff]  }
0x2009   : > { %11022 = vmatprep.subr.bf16.mxu1 %v21747_v13  ;;  %v21804_v13 = vld [vmem:[%s24547_s24 + $0x57c] ss:$24 sps:$4 sm:$0xff]  }
0x200c   : > { %11023 = vmatpush1.bf16.msra.mxu1 %v21745_v62  ;;  %v21807_v62 = vld [vmem:[%s24547_s24 + $0x5ac] ss:$24 sps:$4 sm:$0xff]  }
0x200d   : > { %11024 = vmatprep.subr.bf16.mxu1 %v21750_v33  ;;  %v21810_v33 = vld [vmem:[%s24547_s24 + $0x5dc] ss:$24 sps:$4 sm:$0xff]  }
0x2010   : > { %11025 = vmatpush1.bf16.msra.mxu1 %v21748_v43  ;;  %v21816_v43 = vld [vmem:[%s24547_s24 + $0x60c] ss:$24 sps:$4 sm:$0xff]  }
0x2011   : > { %11026 = vmatprep.subr.bf16.mxu1 %v21753_v36  ;;  %v21822_v36 = vld [vmem:[%s24547_s24 + $0x63c] ss:$24 sps:$4 sm:$0xff]  }
0x2014   : > { %11027 = vmatpush1.bf16.msra.mxu1 %v21751_v24  ;;  %v21828_v24 = vld [vmem:[%s24547_s24 + $0x66c] ss:$24 sps:$4 sm:$0xff]  }
0x2015   : > { %11028 = vmatprep.subr.bf16.mxu1 %v21756_v52  ;;  %v21834_v52 = vld [vmem:[%s24547_s24 + $0x69c] ss:$24 sps:$4 sm:$0xff]  }
0x2018   : > { %11029 = vmatpush1.bf16.msra.mxu1 %v21754_v41  ;;  %v21840_v41 = vld [vmem:[%s24547_s24 + $0x6cc] ss:$24 sps:$4 sm:$0xff]  }
0x2019   : > { %11030 = vmatprep.subr.bf16.mxu1 %v21759_v50  ;;  %v21846_v50 = vld [vmem:[%s24547_s24 + $0x6fc] ss:$24 sps:$4 sm:$0xff]  }
0x201c   : > { %11031 = vmatpush1.bf16.msra.mxu1 %v21757_v1  ;;  %v21852_v1 = vld [vmem:[%s24547_s24 + $0x72c] ss:$24 sps:$4 sm:$0xff]  }
0x201d   : > { %11032 = vmatprep.subr.bf16.mxu1 %v21762_v46  ;;  %v21858_v46 = vld [vmem:[%s24547_s24 + $0x75c] ss:$24 sps:$4 sm:$0xff]  }
0x2020   : > { %11033 = vmatpush1.bf16.msra.mxu1 %v21760_v14  ;;  %v21864_v14 = vld [vmem:[%s24547_s24 + $0x78c] ss:$24 sps:$4 sm:$0xff]  }
0x2021   : > { %11045 = vmatprep.subr.bf16.mxu1 %v21765_v6  ;;  %v21870_v6 = vld [vmem:[%s24547_s24 + $0x7bc] ss:$24 sps:$4 sm:$0xff]  }
0x2023   : > { %11035 = vmatmul.mubr.bf16.vlgmr.msra.gmra.mrb[112].mxu1 %v25838_v54 }
0x2024   : > { %11046 = vmatpush1.bf16.msra.mxu1 %v21763_v8  ;;  %11077 = vmatprep.mubr.bf16.mxu1 %v25963_v3  ;;  %v21876_v8 = vld [vmem:[%s24547_s24 + $0x7ec] ss:$24 sps:$4 sm:$0xff]  }
0x2025   : > { %11047 = vmatprep.subr.bf16.mxu1 %v21768_v60  ;;  %v21874_v60 = vld [vmem:[%s24547_s24 + $0x7e8] ss:$24 sps:$4 sm:$0xff]  }
0x2028   : > { %11048 = vmatpush1.bf16.msra.mxu1 %v21766_v16  ;;  %v21882_v16 = vld [vmem:[%s24547_s24 + $0x81c] ss:$24 sps:$4 sm:$0xff]  }
0x2029   : > { %11049 = vmatprep.subr.bf16.mxu1 %v21771_v35  ;;  %v21880_v35 = vld [vmem:[%s24547_s24 + $0x818] ss:$24 sps:$4 sm:$0xff]  }
0x202c   : > { %11050 = vmatpush1.bf16.msra.mxu1 %v21769_v10  ;;  %v21888_v10 = vld [vmem:[%s24547_s24 + $0x84c] ss:$24 sps:$4 sm:$0xff]  }
0x202d   : > { %11051 = vmatprep.subr.bf16.mxu1 %v21774_v17  ;;  %v21886_v17 = vld [vmem:[%s24547_s24 + $0x848] ss:$24 sps:$4 sm:$0xff]  }
0x2030   : > { %11052 = vmatpush1.bf16.msra.mxu1 %v21772_v11  ;;  %v21894_v11 = vld [vmem:[%s24547_s24 + $0x87c] ss:$24 sps:$4 sm:$0xff]  }
0x2031   : > { %11053 = vmatprep.subr.bf16.mxu1 %v21777_v28  ;;  %v21892_v28 = vld [vmem:[%s24547_s24 + $0x878] ss:$24 sps:$4 sm:$0xff]  }
0x2034   : > { %11054 = vmatpush1.bf16.msra.mxu1 %v21775_v29  ;;  %v21900_v29 = vld [vmem:[%s24547_s24 + $0x8ac] ss:$24 sps:$4 sm:$0xff]  }
0x2035   : > { %11055 = vmatprep.subr.bf16.mxu1 %v21780_v37  ;;  %v21898_v37 = vld [vmem:[%s24547_s24 + $0x8a8] ss:$24 sps:$4 sm:$0xff]  }
0x2038   : > { %11056 = vmatpush1.bf16.msra.mxu1 %v21778_v21  ;;  %v21906_v21 = vld [vmem:[%s24547_s24 + $0x8dc] ss:$24 sps:$4 sm:$0xff]  }
0x2039   : > { %11057 = vmatprep.subr.bf16.mxu1 %v21783_v42  ;;  %v21904_v42 = vld [vmem:[%s24547_s24 + $0x8d8] ss:$24 sps:$4 sm:$0xff]  }
0x203c   : > { %11058 = vmatpush1.bf16.msra.mxu1 %v21781_v22 }
0x203d   : > { %11059 = vmatprep.subr.bf16.mxu1 %v21786_v27 }
0x2040   : > { %11060 = vmatpush1.bf16.msra.mxu1 %v21784_v31  ;;  %v21907_v31 = vld [vmem:[%s24547_s24 + $0x10] ss:$24 sps:$4 sm:$0xff]  }
0x2041   : > { %11061 = vmatprep.subr.bf16.mxu1 %v21789_v39 }
0x2044   : > { %11062 = vmatpush1.bf16.msra.mxu1 %v21787_v26  ;;  %v21912_v26 = vld [vmem:[%s24547_s24 + $0x44] ss:$24 sps:$4 sm:$0xff]  }
0x2045   : > { %11063 = vmatprep.subr.bf16.mxu1 %v21792_v40 }
0x2048   : > { %11064 = vmatpush1.bf16.msra.mxu1 %v21790_v9  ;;  %v21915_v9 = vld [vmem:[%s24547_s24 + $0x74] ss:$24 sps:$4 sm:$0xff]  }
0x2049   : > { %11065 = vmatprep.subr.bf16.mxu1 %v21795_v32  ;;  %v21913_v32 = vld [vmem:[%s24547_s24 + $0x70] ss:$24 sps:$4 sm:$0xff]  }
0x204c   : > { %11066 = vmatpush1.bf16.msra.mxu1 %v21793_v38  ;;  %v21918_v38 = vld [vmem:[%s24547_s24 + $0xa4] ss:$24 sps:$4 sm:$0xff]  }
0x204d   : > { %11067 = vmatprep.subr.bf16.mxu1 %v21798_v55  ;;  %v21916_v55 = vld [vmem:[%s24547_s24 + $0xa0] ss:$24 sps:$4 sm:$0xff]  }
0x2050   : > { %11068 = vmatpush1.bf16.msra.mxu1 %v21796_v56  ;;  %v21921_v56 = vld [vmem:[%s24547_s24 + $0xd4] ss:$24 sps:$4 sm:$0xff]  }
0x2051   : > { %11069 = vmatprep.subr.bf16.mxu1 %v21801_v58  ;;  %v21919_v58 = vld [vmem:[%s24547_s24 + $0xd0] ss:$24 sps:$4 sm:$0xff]  }
0x2054   : > { %11070 = vmatpush1.bf16.msra.mxu1 %v21799_v15  ;;  %v21922_v15 = vld [vmem:[%s24547_s24 + $0x100] ss:$24 sps:$4 sm:$0xff]  }
0x2055   : > { %11071 = vmatprep.subr.bf16.mxu1 %v21804_v13  ;;  %v21927_v13 = vld [vmem:[%s24547_s24 + $0x134] ss:$24 sps:$4 sm:$0xff]  }
0x2058   : > { %11072 = vmatpush1.bf16.msra.mxu1 %v21802_v7  ;;  %v21925_v7 = vld [vmem:[%s24547_s24 + $0x130] ss:$24 sps:$4 sm:$0xff]  }
0x2059   : > { %11073 = vmatprep.subr.bf16.mxu1 %v21807_v62  ;;  %v21930_v62 = vld [vmem:[%s24547_s24 + $0x164] ss:$24 sps:$4 sm:$0xff]  }
0x205c   : > { %11074 = vmatpush1.bf16.msra.mxu1 %v21805_v49  ;;  %v21928_v49 = vld [vmem:[%s24547_s24 + $0x160] ss:$24 sps:$4 sm:$0xff]  }
0x205d   : > { %11075 = vmatprep.subr.bf16.mxu1 %v21810_v33  ;;  %v21933_v33 = vld [vmem:[%s24547_s24 + $0x194] ss:$24 sps:$4 sm:$0xff]  }
0x2060   : > { %11076 = vmatpush1.bf16.msra.mxu1 %v21808_v63  ;;  %v21931_v63 = vld [vmem:[%s24547_s24 + $0x190] ss:$24 sps:$4 sm:$0xff]  }
0x2061   : > { %11088 = vmatprep.subr.bf16.mxu1 %v21816_v43  ;;  %v21936_v43 = vld [vmem:[%s24547_s24 + $0x1c4] ss:$24 sps:$4 sm:$0xff]  }
0x2063   : > { %11078 = vmatmul.mubr.bf16.vlgmr.msra.gmra.mrb[112].mxu1 %v25910_v57 }
0x2064   : > { %11089 = vmatpush1.bf16.msra.mxu1 %v21814_v19  ;;  %v21934_v19 = vld [vmem:[%s24547_s24 + $0x1c0] ss:$24 sps:$4 sm:$0xff]  }
0x2065   : > { %11090 = vmatprep.subr.bf16.mxu1 %v21822_v36  ;;  %v21939_v36 = vld [vmem:[%s24547_s24 + $0x1f4] ss:$24 sps:$4 sm:$0xff]  }
0x2068   : > { %11091 = vmatpush1.bf16.msra.mxu1 %v21820_v61  ;;  %v21937_v61 = vld [vmem:[%s24547_s24 + $0x1f0] ss:$24 sps:$4 sm:$0xff]  }
0x2069   : > { %11092 = vmatprep.subr.bf16.mxu1 %v21828_v24  ;;  %v21942_v24 = vld [vmem:[%s24547_s24 + $0x224] ss:$24 sps:$4 sm:$0xff]  }
0x206c   : > { %11093 = vmatpush1.bf16.msra.mxu1 %v21826_v47  ;;  %v21940_v47 = vld [vmem:[%s24547_s24 + $0x220] ss:$24 sps:$4 sm:$0xff]  }
0x206d   : > { %11094 = vmatprep.subr.bf16.mxu1 %v21834_v52  ;;  %v21945_v52 = vld [vmem:[%s24547_s24 + $0x254] ss:$24 sps:$4 sm:$0xff]  }
0x2070   : > { %11095 = vmatpush1.bf16.msra.mxu1 %v21832_v12  ;;  %v21943_v12 = vld [vmem:[%s24547_s24 + $0x250] ss:$24 sps:$4 sm:$0xff]  }
0x2071   : > { %11096 = vmatprep.subr.bf16.mxu1 %v21840_v41  ;;  %v21948_v41 = vld [vmem:[%s24547_s24 + $0x284] ss:$24 sps:$4 sm:$0xff]  }
0x2074   : > { %11097 = vmatpush1.bf16.msra.mxu1 %v21838_v30  ;;  %v21946_v30 = vld [vmem:[%s24547_s24 + $0x280] ss:$24 sps:$4 sm:$0xff]  }
0x2075   : > { %11098 = vmatprep.subr.bf16.mxu1 %v21846_v50  ;;  %v21951_v50 = vld [vmem:[%s24547_s24 + $0x2b4] ss:$24 sps:$4 sm:$0xff]  }
0x2078   : > { %11099 = vmatpush1.bf16.msra.mxu1 %v21844_v51  ;;  %v21949_v51 = vld [vmem:[%s24547_s24 + $0x2b0] ss:$24 sps:$4 sm:$0xff]  }
0x2079   : > { %11100 = vmatprep.subr.bf16.mxu1 %v21852_v1  ;;  %v21954_v1 = vld [vmem:[%s24547_s24 + $0x2e4] ss:$24 sps:$4 sm:$0xff]  }
0x207c   : > { %11101 = vmatpush1.bf16.msra.mxu1 %v21850_v4  ;;  %v21952_v4 = vld [vmem:[%s24547_s24 + $0x2e0] ss:$24 sps:$4 sm:$0xff]  }
0x207d   : > { %11102 = vmatprep.subr.bf16.mxu1 %v21858_v46  ;;  %v21957_v46 = vld [vmem:[%s24547_s24 + $0x314] ss:$24 sps:$4 sm:$0xff]  }
0x2080   : > { %11103 = vmatpush1.bf16.msra.mxu1 %v21856_v34  ;;  %v21955_v34 = vld [vmem:[%s24547_s24 + $0x310] ss:$24 sps:$4 sm:$0xff]  }
0x2081   : > { %11104 = vmatprep.subr.bf16.mxu1 %v21864_v14  ;;  %v21960_v14 = vld [vmem:[%s24547_s24 + $0x344] ss:$24 sps:$4 sm:$0xff]  }
0x2084   : > { %11105 = vmatpush1.bf16.msra.mxu1 %v21862_v0  ;;  %v21958_v0 = vld [vmem:[%s24547_s24 + $0x340] ss:$24 sps:$4 sm:$0xff]  }
0x2085   : > { %11106 = vmatprep.subr.bf16.mxu1 %v21870_v6  ;;  %v21963_v6 = vld [vmem:[%s24547_s24 + $0x374] ss:$24 sps:$4 sm:$0xff]  }
0x2088   : > { %11107 = vmatpush1.bf16.msra.mxu1 %v21868_v59  ;;  %v21961_v59 = vld [vmem:[%s24547_s24 + $0x370] ss:$24 sps:$4 sm:$0xff]  }
0x2089   : > { %11108 = vmatprep.subr.bf16.mxu1 %v21876_v8  ;;  %v21966_v8 = vld [vmem:[%s24547_s24 + $0x3a4] ss:$24 sps:$4 sm:$0xff]  }
0x208c   : > { %11109 = vmatpush1.bf16.msra.mxu1 %v21874_v60  ;;  %v21964_v60 = vld [vmem:[%s24547_s24 + $0x3a0] ss:$24 sps:$4 sm:$0xff]  }
0x208d   : > { %11110 = vmatprep.subr.bf16.mxu1 %v21882_v16  ;;  %v21967_v16 = vld [vmem:[%s24547_s24 + $0x3d0] ss:$24 sps:$4 sm:$0xff]  }
0x2090   : > { %11111 = vmatpush1.bf16.msra.mxu1 %v21880_v35  ;;  %v21970_v35 = vld [vmem:[%s24547_s24 + $0x400] ss:$24 sps:$4 sm:$0xff]  }
0x2091   : > { %11112 = vmatprep.subr.bf16.mxu1 %v21888_v10  ;;  %v21975_v10 = vld [vmem:[%s24547_s24 + $0x434] ss:$24 sps:$4 sm:$0xff]  }
0x2094   : > { %11113 = vmatpush1.bf16.msra.mxu1 %v21886_v17  ;;  %v21973_v17 = vld [vmem:[%s24547_s24 + $0x430] ss:$24 sps:$4 sm:$0xff]  }
0x2095   : > { %11114 = vmatprep.subr.bf16.mxu1 %v21894_v11  ;;  %v21978_v11 = vld [vmem:[%s24547_s24 + $0x464] ss:$24 sps:$4 sm:$0xff]  }
0x2098   : > { %11115 = vmatpush1.bf16.msra.mxu1 %v21892_v28  ;;  %v21976_v28 = vld [vmem:[%s24547_s24 + $0x460] ss:$24 sps:$4 sm:$0xff]  }
0x2099   : > { %11116 = vmatprep.subr.bf16.mxu1 %v21900_v29  ;;  %v21981_v29 = vld [vmem:[%s24547_s24 + $0x494] ss:$24 sps:$4 sm:$0xff]  }
0x209c   : > { %11117 = vmatpush1.bf16.msra.mxu1 %v21898_v37  ;;  %v21979_v37 = vld [vmem:[%s24547_s24 + $0x490] ss:$24 sps:$4 sm:$0xff]  }
0x209d   : > { %11118 = vmatprep.subr.bf16.mxu1 %v21906_v21  ;;  %v21984_v21 = vld [vmem:[%s24547_s24 + $0x4c4] ss:$24 sps:$4 sm:$0xff]  }
0x20a0   : > { %11119 = vmatpush1.bf16.msra.mxu1 %v21904_v42  ;;  %v21982_v42 = vld [vmem:[%s24547_s24 + $0x4c0] ss:$24 sps:$4 sm:$0xff]  }
0x20b6   : > { %v9088_v22 = vpop.f32.mrb[108].mxu1 }
0x20b7   : > { %v26121_v23 = vpack.c.bf16 %v9088_v22, %v25816_v18  ;;  %v19886_v27 = vpop.f32.mrb[109].mxu1  ;;  %v21910_v18 = vld [vmem:[%s24547_s24 + $0x40] ss:$24 sps:$4 sm:$0xff]   ;;  %v21987_v22 = vld [vmem:[%s24547_s24 + $0x4f4] ss:$24 sps:$4 sm:$0xff]  }
0x20b8   : > { %v9091_v39 = vpop.f32.mrb[110].mxu1  ;;  %v21985_v27 = vld [vmem:[%s24547_s24 + $0x4f0] ss:$24 sps:$4 sm:$0xff]  }
0x20b9   : > { %v19887_v40 = vpop.f32.mrb[111].mxu1  ;;  %10991 = vmatprep.mubr.bf16.mxu0 %v26121_v23  ;;  %11120 = vmatprep.mubr.bf16.mxu1 %v26121_v23  ;;  %v21988_v39 = vld [vmem:[%s24547_s24 + $0x520] ss:$24 sps:$4 sm:$0xff]  }
0x20ba   : > { %10992 = vmatmul.mubr.bf16.vlgmr.msra.gmra.mrb[20].mxu0 %v25981_v53  ;;  %11121 = vmatmul.mubr.bf16.vlgmr.msra.gmra.mrb[112].mxu1 %v25981_v53  ;;  %v21991_v40 = vld [vmem:[%s24547_s24 + $0x550] ss:$24 sps:$4 sm:$0xff]  }
0x20bb   : > { %11132 = vmatpush1.bf16.msra.mxu0 %v21907_v31  ;;  %11163 = vmatprep.mubr.bf16.mxu0 %v25891_v20  ;;  %v21924_v20 = vld [vmem:[%s24547_s24 + $0x104] ss:$24 sps:$4 sm:$0xff]  }
0x20bc   : > { %11133 = vmatprep.subr.bf16.mxu0 %v21912_v26  ;;  %v21990_v31 = vld [vmem:[%s24547_s24 + $0x524] ss:$24 sps:$4 sm:$0xff]   ;;  %v21993_v26 = vld [vmem:[%s24547_s24 + $0x554] ss:$24 sps:$4 sm:$0xff]  }
0x20bf   : > { %11134 = vmatpush1.bf16.msra.mxu0 %v21910_v18  ;;  %v21996_v18 = vld [vmem:[%s24547_s24 + $0x584] ss:$24 sps:$4 sm:$0xff]  }
0x20c0   : > { %11135 = vmatprep.subr.bf16.mxu0 %v21915_v9  ;;  %v21994_v9 = vld [vmem:[%s24547_s24 + $0x580] ss:$24 sps:$4 sm:$0xff]  }
0x20c3   : > { %11136 = vmatpush1.bf16.msra.mxu0 %v21913_v32  ;;  %v21999_v32 = vld [vmem:[%s24547_s24 + $0x5b4] ss:$24 sps:$4 sm:$0xff]  }
0x20c4   : > { %11137 = vmatprep.subr.bf16.mxu0 %v21918_v38  ;;  %v21997_v38 = vld [vmem:[%s24547_s24 + $0x5b0] ss:$24 sps:$4 sm:$0xff]  }
0x20c7   : > { %11138 = vmatpush1.bf16.msra.mxu0 %v21916_v55  ;;  %v22002_v55 = vld [vmem:[%s24547_s24 + $0x5e4] ss:$24 sps:$4 sm:$0xff]  }
0x20c8   : > { %11139 = vmatprep.subr.bf16.mxu0 %v21921_v56  ;;  %v22000_v56 = vld [vmem:[%s24547_s24 + $0x5e0] ss:$24 sps:$4 sm:$0xff]  }
0x20cb   : > { %11140 = vmatpush1.bf16.msra.mxu0 %v21919_v58  ;;  %v22005_v58 = vld [vmem:[%s24547_s24 + $0x614] ss:$24 sps:$4 sm:$0xff]  }
0x20cc   : > { %11141 = vmatprep.subr.bf16.mxu0 %v21924_v20  ;;  %v22003_v20 = vld [vmem:[%s24547_s24 + $0x610] ss:$24 sps:$4 sm:$0xff]  }
0x20cf   : > { %11142 = vmatpush1.bf16.msra.mxu0 %v21922_v15  ;;  %v22008_v15 = vld [vmem:[%s24547_s24 + $0x644] ss:$24 sps:$4 sm:$0xff]  }
0x20d0   : > { %11143 = vmatprep.subr.bf16.mxu0 %v21927_v13  ;;  %v22006_v13 = vld [vmem:[%s24547_s24 + $0x640] ss:$24 sps:$4 sm:$0xff]  }
0x20d3   : > { %11144 = vmatpush1.bf16.msra.mxu0 %v21925_v7  ;;  %v22011_v7 = vld [vmem:[%s24547_s24 + $0x674] ss:$24 sps:$4 sm:$0xff]  }
0x20d4   : > { %11145 = vmatprep.subr.bf16.mxu0 %v21930_v62  ;;  %v22009_v62 = vld [vmem:[%s24547_s24 + $0x670] ss:$24 sps:$4 sm:$0xff]  }
0x20d7   : > { %11146 = vmatpush1.bf16.msra.mxu0 %v21928_v49  ;;  %v22014_v49 = vld [vmem:[%s24547_s24 + $0x6a4] ss:$24 sps:$4 sm:$0xff]  }
0x20d8   : > { %11147 = vmatprep.subr.bf16.mxu0 %v21933_v33  ;;  %v22012_v33 = vld [vmem:[%s24547_s24 + $0x6a0] ss:$24 sps:$4 sm:$0xff]  }
0x20db   : > { %11148 = vmatpush1.bf16.msra.mxu0 %v21931_v63  ;;  %v22015_v63 = vld [vmem:[%s24547_s24 + $0x6d0] ss:$24 sps:$4 sm:$0xff]  }
0x20dc   : > { %11149 = vmatprep.subr.bf16.mxu0 %v21936_v43  ;;  %v22018_v43 = vld [vmem:[%s24547_s24 + $0x700] ss:$24 sps:$4 sm:$0xff]  }
0x20df   : > { %11150 = vmatpush1.bf16.msra.mxu0 %v21934_v19  ;;  %v22023_v19 = vld [vmem:[%s24547_s24 + $0x734] ss:$24 sps:$4 sm:$0xff]  }
0x20e0   : > { %11151 = vmatprep.subr.bf16.mxu0 %v21939_v36  ;;  %v22021_v36 = vld [vmem:[%s24547_s24 + $0x730] ss:$24 sps:$4 sm:$0xff]  }
0x20e3   : > { %11152 = vmatpush1.bf16.msra.mxu0 %v21937_v61  ;;  %v22026_v61 = vld [vmem:[%s24547_s24 + $0x764] ss:$24 sps:$4 sm:$0xff]  }
0x20e4   : > { %11153 = vmatprep.subr.bf16.mxu0 %v21942_v24  ;;  %v22024_v24 = vld [vmem:[%s24547_s24 + $0x760] ss:$24 sps:$4 sm:$0xff]  }
0x20e7   : > { %11154 = vmatpush1.bf16.msra.mxu0 %v21940_v47  ;;  %v22029_v47 = vld [vmem:[%s24547_s24 + $0x794] ss:$24 sps:$4 sm:$0xff]  }
0x20e8   : > { %11155 = vmatprep.subr.bf16.mxu0 %v21945_v52  ;;  %v22027_v52 = vld [vmem:[%s24547_s24 + $0x790] ss:$24 sps:$4 sm:$0xff]  }
0x20eb   : > { %11156 = vmatpush1.bf16.msra.mxu0 %v21943_v12  ;;  %v22032_v12 = vld [vmem:[%s24547_s24 + $0x7c4] ss:$24 sps:$4 sm:$0xff]  }
0x20ec   : > { %11157 = vmatprep.subr.bf16.mxu0 %v21948_v41  ;;  %v22030_v41 = vld [vmem:[%s24547_s24 + $0x7c0] ss:$24 sps:$4 sm:$0xff]  }
0x20ef   : > { %11158 = vmatpush1.bf16.msra.mxu0 %v21946_v30  ;;  %v22035_v30 = vld [vmem:[%s24547_s24 + $0x7f4] ss:$24 sps:$4 sm:$0xff]  }
0x20f0   : > { %11159 = vmatprep.subr.bf16.mxu0 %v21951_v50  ;;  %v22033_v50 = vld [vmem:[%s24547_s24 + $0x7f0] ss:$24 sps:$4 sm:$0xff]  }
0x20f3   : > { %11160 = vmatpush1.bf16.msra.mxu0 %v21949_v51  ;;  %v22038_v51 = vld [vmem:[%s24547_s24 + $0x824] ss:$24 sps:$4 sm:$0xff]  }
0x20f4   : > { %11161 = vmatprep.subr.bf16.mxu0 %v21954_v1  ;;  %v22036_v1 = vld [vmem:[%s24547_s24 + $0x820] ss:$24 sps:$4 sm:$0xff]  }
0x20f7   : > { %11162 = vmatpush1.bf16.msra.mxu0 %v21952_v4  ;;  %v22041_v4 = vld [vmem:[%s24547_s24 + $0x854] ss:$24 sps:$4 sm:$0xff]  }
0x20f8   : > { %11174 = vmatprep.subr.bf16.mxu0 %v21957_v46  ;;  %v22039_v46 = vld [vmem:[%s24547_s24 + $0x850] ss:$24 sps:$4 sm:$0xff]  }
0x20fa   : > { %11164 = vmatmul.mubr.bf16.vlgmr.msra.gmra.mrb[24].mxu0 %v25838_v54  ;;  %v21969_v54 = vld [vmem:[%s24547_s24 + $0x3d4] ss:$24 sps:$4 sm:$0xff]  }
0x20fb   : > { %11175 = vmatpush1.bf16.msra.mxu0 %v21955_v34  ;;  %11206 = vmatprep.mubr.bf16.mxu0 %v25963_v3  ;;  %v21972_v3 = vld [vmem:[%s24547_s24 + $0x404] ss:$24 sps:$4 sm:$0xff]  }
0x20fc   : > { %11176 = vmatprep.subr.bf16.mxu0 %v21960_v14  ;;  %v22044_v34 = vld [vmem:[%s24547_s24 + $0x884] ss:$24 sps:$4 sm:$0xff]   ;;  %v22042_v14 = vld [vmem:[%s24547_s24 + $0x880] ss:$24 sps:$4 sm:$0xff]  }
0x20ff   : > { %11177 = vmatpush1.bf16.msra.mxu0 %v21958_v0  ;;  %v22047_v0 = vld [vmem:[%s24547_s24 + $0x8b4] ss:$24 sps:$4 sm:$0xff]  }
0x2100   : > { %11178 = vmatprep.subr.bf16.mxu0 %v21963_v6  ;;  %v22045_v6 = vld [vmem:[%s24547_s24 + $0x8b0] ss:$24 sps:$4 sm:$0xff]  }
0x2103   : > { %11179 = vmatpush1.bf16.msra.mxu0 %v21961_v59  ;;  %v22050_v59 = vld [vmem:[%s24547_s24 + $0x8e4] ss:$24 sps:$4 sm:$0xff]  }
0x2104   : > { %11180 = vmatprep.subr.bf16.mxu0 %v21966_v8  ;;  %v22048_v8 = vld [vmem:[%s24547_s24 + $0x8e0] ss:$24 sps:$4 sm:$0xff]  }
0x2107   : > { %11181 = vmatpush1.bf16.msra.mxu0 %v21964_v60 }
0x2108   : > { %11182 = vmatprep.subr.bf16.mxu0 %v21969_v54 }
0x210b   : > { %11183 = vmatpush1.bf16.msra.mxu0 %v21967_v16 }
0x210c   : > { %11184 = vmatprep.subr.bf16.mxu0 %v21972_v3 }
0x210f   : > { %11185 = vmatpush1.bf16.msra.mxu0 %v21970_v35 }
0x2110   : > { %11186 = vmatprep.subr.bf16.mxu0 %v21975_v10 }
0x2113   : > { %11187 = vmatpush1.bf16.msra.mxu0 %v21973_v17 }
0x2114   : > { %11188 = vmatprep.subr.bf16.mxu0 %v21978_v11 }
0x2117   : > { %11189 = vmatpush1.bf16.msra.mxu0 %v21976_v28  ;;  %v9395_v28 = vld [vmem:[%s957_s29] sm:$0x3f]  ;;  %s27350_s29 = scalar_lea.vmem [#allocation14], %s24543_s19 }
0x2118   : > { %11190 = vmatprep.subr.bf16.mxu0 %v21981_v29  ;;  %v9406_v29 = vrot.slane %v9395_v28, %v25163_v2 }
0x211b   : > { %11191 = vmatpush1.bf16.msra.mxu0 %v21979_v37  ;;  %v9410_v37 = vrot.slane %v9395_v28, %v25168_v5 }
0x211c   : > { %11192 = vmatprep.subr.bf16.mxu0 %v21984_v21 }
0x211f   : > { %11193 = vmatpush1.bf16.msra.mxu0 %v21982_v42 }
0x2120   : > { %11194 = vmatprep.subr.bf16.mxu0 %v21987_v22  ;;  %v9414_v22 = vrot.slane %v9395_v28, %v25081_v45 }
0x2123   : > { %11195 = vmatpush1.bf16.msra.mxu0 %v21985_v27 }
0x2124   : > { %11196 = vmatprep.subr.bf16.mxu0 %v21990_v31  ;;  %v22700_v31 = vld [vmem:[#allocation2] sm:$0xff] }
0x2127   : > { %11197 = vmatpush1.bf16.msra.mxu0 %v21988_v39 }
0x2128   : > { %11198 = vmatprep.subr.bf16.mxu0 %v21993_v26  ;;  %v22701_v26 = vld [vmem:[#allocation2 + $0x8] sm:$0xff] }
0x212b   : > { %11199 = vmatpush1.bf16.msra.mxu0 %v21991_v40 }
0x212c   : > { %11200 = vmatprep.subr.bf16.mxu0 %v21996_v18 }
0x212f   : > { %11201 = vmatpush1.bf16.msra.mxu0 %v21994_v9  ;;  %v9418_v9 = vrot.slane %v9395_v28, %v25085_v48 }
0x2130   : > { %11202 = vmatprep.subr.bf16.mxu0 %v21999_v32  ;;  %v22702_v32 = vld [vmem:[#allocation2 + $0x30] sm:$0xff] }
0x2133   : > { %11203 = vmatpush1.bf16.msra.mxu0 %v21997_v38 }
0x2134   : > { %11204 = vmatprep.subr.bf16.mxu0 %v22002_v55  ;;  %v22703_v55 = vld [vmem:[#allocation2 + $0x38] sm:$0xff] }
0x2137   : > { %11205 = vmatpush1.bf16.msra.mxu0 %v22000_v56 }
0x2138   : > { %11217 = vmatprep.subr.bf16.mxu0 %v22005_v58 }
0x213a   : > { %11207 = vmatmul.mubr.bf16.vlgmr.msra.gmra.mrb[24].mxu0 %v25910_v57  ;;  %v22017_v57 = vld [vmem:[%s24547_s24 + $0x6d4] ss:$24 sps:$4 sm:$0xff]  }
0x213b   : > { %11218 = vmatpush1.bf16.msra.mxu0 %v22003_v20  ;;  %11249 = vmatprep.mubr.bf16.mxu0 %v26121_v23  ;;  %v22020_v23 = vld [vmem:[%s24547_s24 + $0x704] ss:$24 sps:$4 sm:$0xff]   ;;  %s27349_s24 = scalar_lea.vmem [#allocation13], %s24543_s19 }
0x213c   : > { %11219 = vmatprep.subr.bf16.mxu0 %v22008_v15  ;;  %v22704_v15 = vld [vmem:[#allocation2 + $0x10] sm:$0xff] }
0x213f   : > { %11220 = vmatpush1.bf16.msra.mxu0 %v22006_v13 }
0x2140   : > { %11221 = vmatprep.subr.bf16.mxu0 %v22011_v7 }
0x2143   : > { %11222 = vmatpush1.bf16.msra.mxu0 %v22009_v62 }
0x2144   : > { %11223 = vmatprep.subr.bf16.mxu0 %v22014_v49  ;;  %v9422_v49 = vrot.slane %v9395_v28, %v25396_v44 }
0x2147   : > { %11224 = vmatpush1.bf16.msra.mxu0 %v22012_v33  ;;  %v9426_v33 = vrot.slane %v9395_v28, %v25401_v25  ;;  %v22053_v28 = vld [vmem:[%s24552_s23 + $0x4] ss:$16 sps:$4 sm:$0xff]  }
0x2148   : > { %11225 = vmatprep.subr.bf16.mxu0 %v22017_v57  ;;  %12613 = vmatprep.subr.bf16.mxu1 %v22053_v28 }
0x214b   : > { %11226 = vmatpush1.bf16.msra.mxu0 %v22015_v63  ;;  %v22705_v63 = vld [vmem:[#allocation2 + $0x40] sm:$0xff] }
0x214c   : > { %11227 = vmatprep.subr.bf16.mxu0 %v22020_v23 }
0x214f   : > { %11228 = vmatpush1.bf16.msra.mxu0 %v22018_v43 }
0x2150   : > { %11229 = vmatprep.subr.bf16.mxu0 %v22023_v19 }
0x2153   : > { %11230 = vmatpush1.bf16.msra.mxu0 %v22021_v36  ;;  %v22706_v36 = vld [vmem:[#allocation2 + $0x18] sm:$0xff] }
0x2154   : > { %11231 = vmatprep.subr.bf16.mxu0 %v22026_v61 }
0x2157   : > { %11232 = vmatpush1.bf16.msra.mxu0 %v22024_v24 }
0x2158   : > { %11233 = vmatprep.subr.bf16.mxu0 %v22029_v47 }
0x215b   : > { %11234 = vmatpush1.bf16.msra.mxu0 %v22027_v52 }
0x215c   : > { %11235 = vmatprep.subr.bf16.mxu0 %v22032_v12 }
0x215f   : > { %11236 = vmatpush1.bf16.msra.mxu0 %v22030_v41 }
0x2160   : > { %11237 = vmatprep.subr.bf16.mxu0 %v22035_v30 }
0x2163   : > { %11238 = vmatpush1.bf16.msra.mxu0 %v22033_v50  ;;  %v22707_v50 = vld [vmem:[#allocation2 + $0x48] sm:$0xff] }
0x2164   : > { %11239 = vmatprep.subr.bf16.mxu0 %v22038_v51 }
0x2167   : > { %11240 = vmatpush1.bf16.msra.mxu0 %v22036_v1  ;;  %v22708_v1 = vld [vmem:[#allocation2 + $0x20] sm:$0xff] }
0x2168   : > { %11241 = vmatprep.subr.bf16.mxu0 %v22041_v4 }
0x216b   : > { %11242 = vmatpush1.bf16.msra.mxu0 %v22039_v46 }
0x216c   : > { %11243 = vmatprep.subr.bf16.mxu0 %v22044_v34 }
0x216f   : > { %11244 = vmatpush1.bf16.msra.mxu0 %v22042_v14  ;;  %v22709_v14 = vld [vmem:[#allocation2 + $0x28] sm:$0xff] }
0x2170   : > { %11245 = vmatprep.subr.bf16.mxu0 %v22047_v0 }
0x2173   : > { %11246 = vmatpush1.bf16.msra.mxu0 %v22045_v6 }
0x2174   : > { %11247 = vmatprep.subr.bf16.mxu0 %v22050_v59 }
0x2177   : > { %11248 = vmatpush1.bf16.msra.mxu0 %v22048_v8  ;;  %v22710_v8 = vld [vmem:[#allocation2 + $0x50] sm:$0xff] }
0x217a   : > { %11250 = vmatmul.mubr.bf16.vlgmr.msra.gmra.mrb[24].mxu0 %v25981_v53 }
0x218d   : > { %v10993_v60 = vpop.f32.mrb[20].mxu0  ;;  %v11122_v54 = vpop.f32.mrb[112].mxu1 }
0x218e   : > { %v10995_v16 = vpop.f32.mrb[21].mxu0  ;;  %v11124_v3 = vpop.f32.mrb[113].mxu1  ;;  %v19936_v21 = vadd.f32 %v10993_v60, %v9406_v29  ;;  %v19940_v18 = vadd.f32 %v11122_v54, %v9414_v22 }
0x218f   : > { %v10997_v35 = vpop.f32.mrb[22].mxu0  ;;  %v11126_v10 = vpop.f32.mrb[114].mxu1  ;;  %v19937_v42 = vadd.f32 %v10995_v16, %v9410_v37  ;;  %v19941_v7 = vadd.f32 %v11124_v3, %v9418_v9  ;;  %v22711_v16 = vld [vmem:[#allocation2 + $0x58] sm:$0xff] }
0x2190   : > { %v10999_v17 = vpop.f32.mrb[23].mxu0  ;;  %v11128_v11 = vpop.f32.mrb[115].mxu1  ;;  %v19938_v27 = vadd.f32 %v10997_v35, %v9406_v29  ;;  %v26233_v39 = vadd.f32 %v22700_v31, %v19936_v21  ;;  %v19942_v20 = vadd.f32 %v11126_v10, %v9414_v22  ;;  %v26244_v13 = vadd.f32 %v22704_v15, %v19940_v18  ;;  %v22054_v29 = vld [vmem:[%s24552_s23 + $0x8] ss:$16 sps:$4 sm:$0xff]   ;;  %v22059_v21 = vld [vmem:[%s24552_s23 + $0x24] ss:$16 sps:$4 sm:$0xff]  }
0x2191   : > { %v19939_v53 = vadd.f32 %v10999_v17, %v9410_v37  ;;  %v26235_v40 = vadd.f32 %v22701_v26, %v19937_v42  ;;  %v19943_v43 = vadd.f32 %v11128_v11, %v9418_v9  ;;  %v26253_v61 = vadd.f32 %v22706_v36, %v19941_v7  ;;  %v22051_v11 = vld [vmem:[%s24552_s23] ss:$16 sps:$4 sm:$0xff]   ;;  %v22056_v37 = vld [vmem:[%s24552_s23 + $0xc] ss:$16 sps:$4 sm:$0xff]   ;;  %v22066_v18 = vld [vmem:[%s24552_s23 + $0x48] ss:$16 sps:$4 sm:$0xff]  }
0x2192   : > { %v26238_v38 = vadd.f32 %v22702_v32, %v19938_v27  ;;  %v26251_v23 = vadd.f32 %v22705_v63, %v19942_v20  ;;  %v22062_v42 = vld [vmem:[%s24552_s23 + $0x2c] ss:$16 sps:$4 sm:$0xff]   ;;  %12742 = vmatprep.subr.bf16.mxu0 %v22056_v37  ;;  %12614 = vmatpush1.bf16.msra.mxu1 %v22051_v11  ;;  %v22057_v22 = vld [vmem:[%s24552_s23 + $0x20] ss:$16 sps:$4 sm:$0xff]   ;;  %v22060_v27 = vld [vmem:[%s24552_s23 + $0x28] ss:$16 sps:$4 sm:$0xff]  }
0x2193   : > { %v26240_v56 = vadd.f32 %v22703_v55, %v19939_v53  ;;  %v11274_v58 = vadd.f32 %v26235_v40, %v26233_v39  ;;  %v26257_v51 = vadd.f32 %v22707_v50, %v19943_v43  ;;  %12743 = vmatpush1.bf16.msra.mxu0 %v22054_v29  ;;  %12615 = vmatprep.subr.bf16.mxu1 %v22059_v21  ;;  %v22065_v53 = vld [vmem:[%s24552_s23 + $0x44] ss:$16 sps:$4 sm:$0xff]   ;;  %v22068_v31 = vld [vmem:[%s24552_s23 + $0x4c] ss:$16 sps:$4 sm:$0xff]   ;;  %v22063_v26 = vld [vmem:[%s24552_s23 + $0x40] ss:$16 sps:$4 sm:$0xff]  }
0x2194   : > { %12744 = vmatprep.subr.bf16.mxu0 %v22062_v42  ;;  %v22071_v9 = vld [vmem:[%s24552_s23 + $0x64] ss:$16 sps:$4 sm:$0xff]   ;;  %v22074_v32 = vld [vmem:[%s24552_s23 + $0x6c] ss:$16 sps:$4 sm:$0xff]   ;;  %v22069_v55 = vld [vmem:[%s24552_s23 + $0x60] ss:$16 sps:$4 sm:$0xff]  }
0x2195   : > { %v11281_v62 = vadd.f32 %v26240_v56, %v26238_v38  ;;  %v11275_v57 = vadd.f32 %v11274_v58, %v26244_v13  ;;  %v22072_v58 = vld [vmem:[%s24552_s23 + $0x68] ss:$16 sps:$4 sm:$0xff]   ;;  %v22077_v20 = vld [vmem:[%s24552_s23 + $0x84] ss:$16 sps:$4 sm:$0xff]   ;;  %v22080_v15 = vld [vmem:[%s24552_s23 + $0x8c] ss:$16 sps:$4 sm:$0xff]  }
0x2196   : > { %12616 = vmatpush1.bf16.msra.mxu1 %v22057_v22  ;;  %v22075_v7 = vld [vmem:[%s24552_s23 + $0x80] ss:$16 sps:$4 sm:$0xff]   ;;  %v22084_v63 = vld [vmem:[%s24552_s23 + $0xa8] ss:$16 sps:$4 sm:$0xff]   ;;  %v22089_v43 = vld [vmem:[%s24552_s23 + $0xc4] ss:$16 sps:$4 sm:$0xff]  }
0x2197   : > { %v11282_v24 = vadd.f32 %v11281_v62, %v26251_v23  ;;  %v11276_v30 = vadd.f32 %v11275_v57, %v26253_v61  ;;  %12745 = vmatpush1.bf16.msra.mxu0 %v22060_v27  ;;  %12617 = vmatprep.subr.bf16.mxu1 %v22065_v53  ;;  %v22078_v62 = vld [vmem:[%s24552_s23 + $0x88] ss:$16 sps:$4 sm:$0xff]   ;;  %v22081_v57 = vld [vmem:[%s24552_s23 + $0xa0] ss:$16 sps:$4 sm:$0xff]   ;;  %v22104_v50 = vld [vmem:[%s24552_s23 + $0x10c] ss:$16 sps:$4 sm:$0xff]  }
0x2198   : > { %12746 = vmatprep.subr.bf16.mxu0 %v22068_v31  ;;  %v22087_v36 = vld [vmem:[%s24552_s23 + $0xc0] ss:$16 sps:$4 sm:$0xff]  }
0x2199   : > { %v11283_v59 = vadd.f32 %v11282_v24, %v26257_v51  ;;  %v22090_v24 = vld [vmem:[%s24552_s23 + $0xc8] ss:$16 sps:$4 sm:$0xff]  }
0x219a   : > { %12618 = vmatpush1.bf16.msra.mxu1 %v22063_v26 }
0x219b   : > { %12747 = vmatpush1.bf16.msra.mxu0 %v22066_v18  ;;  %12619 = vmatprep.subr.bf16.mxu1 %v22071_v9 }
0x219c   : > { %12748 = vmatprep.subr.bf16.mxu0 %v22074_v32 }
0x219e   : > { %12620 = vmatpush1.bf16.msra.mxu1 %v22069_v55 }
0x219f   : > { %12749 = vmatpush1.bf16.msra.mxu0 %v22072_v58  ;;  %12621 = vmatprep.subr.bf16.mxu1 %v22077_v20 }
0x21a0   : > { %12750 = vmatprep.subr.bf16.mxu0 %v22080_v15 }
0x21a2   : > { %12622 = vmatpush1.bf16.msra.mxu1 %v22075_v7 }
0x21a3   : > { %12751 = vmatpush1.bf16.msra.mxu0 %v22078_v62 }
0x224d   : > { %v11251_v19 = vpop.f32.mrb[24].mxu0 }
0x224e   : > { %v19944_v47 = vadd.f32 %v11251_v19, %v9422_v49  ;;  %v11253_v52 = vpop.f32.mrb[25].mxu0  ;;  %v22092_v19 = vld [vmem:[%s24552_s23 + $0xcc] ss:$16 sps:$4 sm:$0xff]  }
0x224f   : > { %v19945_v12 = vadd.f32 %v11253_v52, %v9426_v33  ;;  %v11255_v41 = vpop.f32.mrb[26].mxu0  ;;  %v22098_v52 = vld [vmem:[%s24552_s23 + $0xec] ss:$16 sps:$4 sm:$0xff]  }
0x2250   : > { %v26259_v4 = vadd.f32 %v22708_v1, %v19944_v47  ;;  %v19946_v46 = vadd.f32 %v11255_v41, %v9422_v49  ;;  %v11257_v34 = vpop.f32.mrb[27].mxu0  ;;  %v22083_v49 = vld [vmem:[%s24552_s23 + $0xa4] ss:$16 sps:$4 sm:$0xff]   ;;  %v22096_v41 = vld [vmem:[%s24552_s23 + $0xe8] ss:$16 sps:$4 sm:$0xff]  }
0x2251   : > { %v26261_v0 = vadd.f32 %v22709_v14, %v19945_v12  ;;  %v19947_v6 = vadd.f32 %v11257_v34, %v9426_v33  ;;  %v22086_v33 = vld [vmem:[%s24552_s23 + $0xac] ss:$16 sps:$4 sm:$0xff]   ;;  %12623 = vmatprep.subr.bf16.mxu1 %v22083_v49  ;;  %v22095_v47 = vld [vmem:[%s24552_s23 + $0xe4] ss:$16 sps:$4 sm:$0xff]   ;;  %v22093_v12 = vld [vmem:[%s24552_s23 + $0xe0] ss:$16 sps:$4 sm:$0xff]  }
0x2252   : > { %v26264_v60 = vadd.f32 %v22710_v8, %v19946_v46  ;;  %v11277_v54 = vadd.f32 %v11276_v30, %v26259_v4  ;;  %12752 = vmatprep.subr.bf16.mxu0 %v22086_v33  ;;  %12624 = vmatpush1.bf16.msra.mxu1 %v22081_v57  ;;  %v22101_v30 = vld [vmem:[%s24552_s23 + $0x104] ss:$16 sps:$4 sm:$0xff]   ;;  %v22099_v1 = vld [vmem:[%s24552_s23 + $0x100] ss:$16 sps:$4 sm:$0xff]   ;;  %v22102_v46 = vld [vmem:[%s24552_s23 + $0x108] ss:$16 sps:$4 sm:$0xff]  }
0x2253   : > { %v26267_v3 = vadd.f32 %v22711_v16, %v19947_v6  ;;  %12753 = vmatpush1.bf16.msra.mxu0 %v22084_v63  ;;  %12625 = vmatprep.subr.bf16.mxu1 %v22089_v43  ;;  %v22107_v34 = vld [vmem:[%s24552_s23 + $0x124] ss:$16 sps:$4 sm:$0xff]   ;;  %v22110_v14 = vld [vmem:[%s24552_s23 + $0x12c] ss:$16 sps:$4 sm:$0xff]   ;;  %v22105_v6 = vld [vmem:[%s24552_s23 + $0x120] ss:$16 sps:$4 sm:$0xff]  }
0x2254   : > { %v11278_v35 = vadd.f32 %v11277_v54, %v26261_v0  ;;  %v11284_v10 = vadd.f32 %v11283_v59, %v26264_v60  ;;  %12754 = vmatprep.subr.bf16.mxu0 %v22092_v19  ;;  %v22108_v59 = vld [vmem:[%s24552_s23 + $0x128] ss:$16 sps:$4 sm:$0xff]   ;;  %v22113_v49 = vld [vmem:[%s24552_s23 + $0x144] ss:$16 sps:$4 sm:$0xff]   ;;  %v22116_v33 = vld [vmem:[%s24552_s23 + $0x14c] ss:$16 sps:$4 sm:$0xff]  }
0x2255   : > { %v22111_v57 = vld [vmem:[%s24552_s23 + $0x140] ss:$16 sps:$4 sm:$0xff]   ;;  %v22114_v63 = vld [vmem:[%s24552_s23 + $0x148] ss:$16 sps:$4 sm:$0xff]   ;;  %v22119_v43 = vld [vmem:[%s24552_s23 + $0x164] ss:$16 sps:$4 sm:$0xff]  }
0x2256   : > { %11279 = vadd.xlane.f32.xlu0 %v11278_v35  ;;  %v11285_v17 = vadd.f32 %v11284_v10, %v26267_v3  ;;  %12626 = vmatpush1.bf16.msra.mxu1 %v22087_v36  ;;  %v22122_v19 = vld [vmem:[%s24552_s23 + $0x16c] ss:$16 sps:$4 sm:$0xff]   ;;  %v22117_v36 = vld [vmem:[%s24552_s23 + $0x160] ss:$16 sps:$4 sm:$0xff]  }
0x2257   : > { %12755 = vmatpush1.bf16.msra.mxu0 %v22090_v24  ;;  %12627 = vmatprep.subr.bf16.mxu1 %v22095_v47  ;;  %v22120_v24 = vld [vmem:[%s24552_s23 + $0x168] ss:$16 sps:$4 sm:$0xff]   ;;  %v22125_v47 = vld [vmem:[%s24552_s23 + $0x184] ss:$16 sps:$4 sm:$0xff]  }
0x2258   : > { %11286 = vadd.xlane.f32.xlu1 %v11285_v17  ;;  %12756 = vmatprep.subr.bf16.mxu0 %v22098_v52  ;;  %v22128_v52 = vld [vmem:[%s24552_s23 + $0x18c] ss:$16 sps:$4 sm:$0xff]  }
0x225a   : > { %12628 = vmatpush1.bf16.msra.mxu1 %v22093_v12  ;;  %v22123_v12 = vld [vmem:[%s24552_s23 + $0x180] ss:$16 sps:$4 sm:$0xff]  }
0x225b   : > { %12757 = vmatpush1.bf16.msra.mxu0 %v22096_v41  ;;  %12629 = vmatprep.subr.bf16.mxu1 %v22101_v30  ;;  %v22126_v41 = vld [vmem:[%s24552_s23 + $0x188] ss:$16 sps:$4 sm:$0xff]   ;;  %v22131_v30 = vld [vmem:[%s24552_s23 + $0x1a4] ss:$16 sps:$4 sm:$0xff]  }
0x225c   : > { %12758 = vmatprep.subr.bf16.mxu0 %v22104_v50  ;;  %v22134_v50 = vld [vmem:[%s24552_s23 + $0x1ac] ss:$16 sps:$4 sm:$0xff]  }
0x225e   : > { %12630 = vmatpush1.bf16.msra.mxu1 %v22099_v1  ;;  %v22129_v1 = vld [vmem:[%s24552_s23 + $0x1a0] ss:$16 sps:$4 sm:$0xff]  }
0x225f   : > { %12759 = vmatpush1.bf16.msra.mxu0 %v22102_v46  ;;  %12631 = vmatprep.subr.bf16.mxu1 %v22107_v34  ;;  %v22132_v46 = vld [vmem:[%s24552_s23 + $0x1a8] ss:$16 sps:$4 sm:$0xff]   ;;  %v22137_v34 = vld [vmem:[%s24552_s23 + $0x1c4] ss:$16 sps:$4 sm:$0xff]  }
0x2260   : > { %12760 = vmatprep.subr.bf16.mxu0 %v22110_v14  ;;  %v22140_v14 = vld [vmem:[%s24552_s23 + $0x1cc] ss:$16 sps:$4 sm:$0xff]  }
0x2262   : > { %12632 = vmatpush1.bf16.msra.mxu1 %v22105_v6  ;;  %v22135_v6 = vld [vmem:[%s24552_s23 + $0x1c0] ss:$16 sps:$4 sm:$0xff]  }
0x2263   : > { %12761 = vmatpush1.bf16.msra.mxu0 %v22108_v59  ;;  %12633 = vmatprep.subr.bf16.mxu1 %v22113_v49  ;;  %v22138_v59 = vld [vmem:[%s24552_s23 + $0x1c8] ss:$16 sps:$4 sm:$0xff]  }
0x2264   : > { %12762 = vmatprep.subr.bf16.mxu0 %v22116_v33 }
0x2266   : > { %12634 = vmatpush1.bf16.msra.mxu1 %v22111_v57 }
0x2267   : > { %12763 = vmatpush1.bf16.msra.mxu0 %v22114_v63  ;;  %12635 = vmatprep.subr.bf16.mxu1 %v22119_v43 }
0x2268   : > { %12764 = vmatprep.subr.bf16.mxu0 %v22122_v19 }
0x226a   : > { %12636 = vmatpush1.bf16.msra.mxu1 %v22117_v36 }
0x226b   : > { %12765 = vmatpush1.bf16.msra.mxu0 %v22120_v24  ;;  %12637 = vmatprep.subr.bf16.mxu1 %v22125_v47 }
0x226c   : > { %12766 = vmatprep.subr.bf16.mxu0 %v22128_v52 }
0x226e   : > { %12638 = vmatpush1.bf16.msra.mxu1 %v22123_v12 }
0x226f   : > { %12767 = vmatpush1.bf16.msra.mxu0 %v22126_v41  ;;  %12639 = vmatprep.subr.bf16.mxu1 %v22131_v30 }
0x2270   : > { %12768 = vmatprep.subr.bf16.mxu0 %v22134_v50 }
0x2272   : > { %12640 = vmatpush1.bf16.msra.mxu1 %v22129_v1 }
0x2273   : > { %12769 = vmatpush1.bf16.msra.mxu0 %v22132_v46  ;;  %12641 = vmatprep.subr.bf16.mxu1 %v22137_v34 }
0x2274   : > { %12770 = vmatprep.subr.bf16.mxu0 %v22140_v14 }
0x2276   : > { %12642 = vmatpush1.bf16.msra.mxu1 %v22135_v6 }
0x2277   : > { %12771 = vmatpush1.bf16.msra.mxu0 %v22138_v59 }
0x22e3   : > { %v11280_v8 = vpop.xlane.xlu0 %11279 }
0x22e4   : > { %v11289_v54 = vmul.f32 0.0013020834, %v11280_v8  ;;  %v22143_v8 = vld [vmem:[%s24552_s23 + $0x1e4] ss:$16 sps:$4 sm:$0xff]  }
0x22e5   : > { %v11287_v16 = vpop.xlane.xlu1 %11286  ;;  %12643 = vmatprep.subr.bf16.mxu1 %v22143_v8 }
0x22e6   : > { %v11290_v35 = vmul.f32 0.0013020834, %v11287_v16  ;;  %v26313_v10 = vsub.f32 %v26233_v39, %v11289_v54  ;;  %v26316_v17 = vsub.f32 %v26235_v40, %v11289_v54  ;;  %v26319_v11 = vsub.f32 %v26244_v13, %v11289_v54  ;;  %v22141_v16 = vld [vmem:[%s24552_s23 + $0x1e0] ss:$16 sps:$4 sm:$0xff]  }
0x22e7   : > { %v26322_v28 = vsub.f32 %v26253_v61, %v11289_v54  ;;  %v26335_v40 = vsub.f32 %v26259_v4, %v11289_v54  ;;  %v26350_v27 = vsub.f32 %v26261_v0, %v11289_v54  ;;  %v22146_v54 = vld [vmem:[%s24552_s23 + $0x1ec] ss:$16 sps:$4 sm:$0xff]   ;;  %12644 = vmatpush1.bf16.msra.mxu1 %v22141_v16 }
0x22e8   : > { %v11303_v29 = vmul.f32 %v26313_v10, %v26313_v10  ;;  %v11304_v37 = vmul.f32 %v26316_v17, %v26316_v17  ;;  %v26329_v21 = vsub.f32 %v26238_v38, %v11290_v35  ;;  %v26332_v39 = vsub.f32 %v26240_v56, %v11290_v35  ;;  %12772 = vmatprep.subr.bf16.mxu0 %v22146_v54 }
0x22e9   : > { %v11305_v13 = vmul.f32 %v26319_v11, %v26319_v11  ;;  %v26340_v42 = vsub.f32 %v26251_v23, %v11290_v35  ;;  %v26343_v22 = vsub.f32 %v26257_v51, %v11290_v35  ;;  %v11306_v4 = vmul.f32 %v26322_v28, %v26322_v28 }
0x22ea   : > { %v11315_v61 = vadd.f32 %v11304_v37, %v11303_v29  ;;  %v11309_v38 = vmul.f32 %v26329_v21, %v26329_v21  ;;  %v11310_v56 = vmul.f32 %v26332_v39, %v26332_v39  ;;  %v26355_v31 = vsub.f32 %v26264_v60, %v11290_v35  ;;  %v22149_v29 = vld [vmem:[%s24552_s23 + $0x204] ss:$16 sps:$4 sm:$0xff]   ;;  %v22152_v37 = vld [vmem:[%s24552_s23 + $0x20c] ss:$16 sps:$4 sm:$0xff]  }
0x22eb   : > { %v11311_v23 = vmul.f32 %v26340_v42, %v26340_v42  ;;  %v11307_v26 = vmul.f32 %v26335_v40, %v26335_v40  ;;  %v26362_v0 = vsub.f32 %v26267_v3, %v11290_v35  ;;  %v11312_v9 = vmul.f32 %v26343_v22, %v26343_v22  ;;  %v22144_v35 = vld [vmem:[%s24552_s23 + $0x1e8] ss:$16 sps:$4 sm:$0xff]   ;;  %12656 = vmatprep.subr.bf16.mxu1 %v22149_v29 }
0x22ec   : > { %v11316_v53 = vadd.f32 %v11315_v61, %v11305_v13  ;;  %v11322_v51 = vadd.f32 %v11310_v56, %v11309_v38  ;;  %v11308_v32 = vmul.f32 %v26350_v27, %v26350_v27  ;;  %v11313_v58 = vmul.f32 %v26355_v31, %v26355_v31  ;;  %12773 = vmatpush1.bf16.msra.mxu0 %v22144_v35 }
0x22ed   : > { %v11314_v3 = vmul.f32 %v26362_v0, %v26362_v0  ;;  %12785 = vmatprep.subr.bf16.mxu0 %v22152_v37  ;;  %v22150_v37 = vld [vmem:[%s24552_s23 + $0x208] ss:$16 sps:$4 sm:$0xff]  }
0x22ee   : > { %v11317_v18 = vadd.f32 %v11316_v53, %v11306_v4  ;;  %v11323_v60 = vadd.f32 %v11322_v51, %v11311_v23  ;;  %v11272_v23 = vld [vmem:[%s27349_s24] sm:$0x3f]  ;;  %v11273_v51 = vld [vmem:[%s27350_s29] sm:$0x3f] }
0x22ef   : > { %v11406_v57 = vrot.slane %v11273_v51, %v25085_v48  ;;  %v11414_v43 = vrot.slane %v11273_v51, %v25401_v25  ;;  %v11410_v19 = vrot.slane %v11273_v51, %v25396_v44 }
0x22f0   : > { %v11318_v55 = vadd.f32 %v11317_v18, %v11307_v26  ;;  %v11324_v20 = vadd.f32 %v11323_v60, %v11312_v9  ;;  %v11355_v26 = vrot.slane %v11272_v23, %v25168_v5  ;;  %v11351_v18 = vrot.slane %v11272_v23, %v25163_v2 }
0x22f1   : > { %v11363_v9 = vrot.slane %v11272_v23, %v25085_v48  ;;  %v11359_v60 = vrot.slane %v11272_v23, %v25081_v45 }
0x22f2   : > { %v11319_v15 = vadd.f32 %v11318_v55, %v11308_v32  ;;  %v11325_v7 = vadd.f32 %v11324_v20, %v11313_v58  ;;  %v11371_v32 = vrot.slane %v11272_v23, %v25401_v25  ;;  %v11398_v58 = vrot.slane %v11273_v51, %v25168_v5 }
0x22f3   : > { %v11394_v20 = vrot.slane %v11273_v51, %v25163_v2 }
0x22f4   : > { %11320 = vadd.xlane.f32.xlu0 %v11319_v15  ;;  %v11326_v62 = vadd.f32 %v11325_v7, %v11314_v3  ;;  %v11402_v15 = vrot.slane %v11273_v51, %v25081_v45  ;;  %v11367_v3 = vrot.slane %v11272_v23, %v25396_v44  ;;  %v22153_v51 = vld [vmem:[%s24552_s23 + $0x220] ss:$16 sps:$4 sm:$0xff]  }
0x22f6   : > { %11327 = vadd.xlane.f32.xlu1 %v11326_v62 }
0x2381   : > { %v11321_v13 = vpop.xlane.xlu0 %11320 }
0x2382   : > { %v11329_v61 = vmul.f32 0.0013020834, %v11321_v13 }
0x2383   : > { %v11328_v56 = vpop.xlane.xlu1 %11327 }
0x2384   : > { %v11331_v38 = vadd.f32 1e-12, %v11329_v61  ;;  %v11330_v4 = vmul.f32 0.0013020834, %v11328_v56 }
0x2386   : > { %22675 = vrsqrt.f32 %v11331_v38  ;;  %v11332_v53 = vadd.f32 1e-12, %v11330_v4  ;;  %v22155_v4 = vld [vmem:[%s24552_s23 + $0x224] ss:$16 sps:$4 sm:$0xff]  }
0x2388   : > { %22677 = vrsqrt.f32 %v11332_v53  ;;  %v22158_v53 = vld [vmem:[%s24552_s23 + $0x22c] ss:$16 sps:$4 sm:$0xff]  }
0x2390   : > { %v22676_v55 = vpop.eup %22675 }
0x2391   : > { %v11336_v7 = vmul.f32 %v22676_v55, %v26316_v17  ;;  %v11335_v62 = vmul.f32 %v22676_v55, %v26313_v10  ;;  %v11338_v49 = vmul.f32 %v22676_v55, %v26322_v28  ;;  %v11337_v33 = vmul.f32 %v22676_v55, %v26319_v11 }
0x2392   : > { %v11340_v63 = vmul.f32 %v22676_v55, %v26350_v27  ;;  %v22678_v36 = vpop.eup %22677  ;;  %v11339_v17 = vmul.f32 %v22676_v55, %v26335_v40  ;;  %v22167_v55 = vld [vmem:[%s24552_s23 + $0x264] ss:$16 sps:$4 sm:$0xff]  }
0x2393   : > { %v11379_v24 = vmul.f32 %v11355_v26, %v11336_v7  ;;  %v11378_v47 = vmul.f32 %v11351_v18, %v11335_v62  ;;  %v11380_v52 = vmul.f32 %v11359_v60, %v11337_v33  ;;  %v11342_v10 = vmul.f32 %v22678_v36, %v26332_v39  ;;  %v22176_v7 = vld [vmem:[%s24552_s23 + $0x28c] ss:$16 sps:$4 sm:$0xff]   ;;  %v22171_v62 = vld [vmem:[%s24552_s23 + $0x280] ss:$16 sps:$4 sm:$0xff]   ;;  %v22179_v33 = vld [vmem:[%s24552_s23 + $0x2a4] ss:$16 sps:$4 sm:$0xff]  }
0x2394   : > { %v11341_v28 = vmul.f32 %v22678_v36, %v26329_v21  ;;  %v11344_v11 = vmul.f32 %v22678_v36, %v26343_v22  ;;  %v11343_v12 = vmul.f32 %v22678_v36, %v26340_v42  ;;  %v11381_v30 = vmul.f32 %v11363_v9, %v11338_v49  ;;  %v22174_v49 = vld [vmem:[%s24552_s23 + $0x288] ss:$16 sps:$4 sm:$0xff]  }
0x2395   : > { %v26424_v41 = vadd.f32 %v11398_v58, %v11379_v24  ;;  %v26426_v27 = vadd.f32 %v11394_v20, %v11378_v47  ;;  %v26428_v50 = vadd.f32 %v11402_v15, %v11380_v52  ;;  %v11385_v1 = vmul.f32 %v11355_v26, %v11342_v10  ;;  %v22156_v26 = vld [vmem:[%s24552_s23 + $0x228] ss:$16 sps:$4 sm:$0xff]   ;;  %v22183_v24 = vld [vmem:[%s24552_s23 + $0x2c0] ss:$16 sps:$4 sm:$0xff]   ;;  %v22191_v52 = vld [vmem:[%s24552_s23 + $0x2e4] ss:$16 sps:$4 sm:$0xff]  }
0x2396   : > { %v11384_v46 = vmul.f32 %v11351_v18, %v11341_v28  ;;  %v11387_v34 = vmul.f32 %v11363_v9, %v11344_v11  ;;  %v11386_v40 = vmul.f32 %v11359_v60, %v11343_v12  ;;  %v11346_v39 = vmul.f32 %v22678_v36, %v26362_v0  ;;  %v22147_v0 = vld [vmem:[%s24552_s23 + $0x200] ss:$16 sps:$4 sm:$0xff]   ;;  %v22161_v18 = vld [vmem:[%s24552_s23 + $0x244] ss:$16 sps:$4 sm:$0xff]   ;;  %v22164_v9 = vld [vmem:[%s24552_s23 + $0x24c] ss:$16 sps:$4 sm:$0xff]  }
0x2397   : > { %v11383_v21 = vmul.f32 %v11371_v32, %v11340_v63  ;;  %v11345_v22 = vmul.f32 %v22678_v36, %v26355_v31  ;;  %v11382_v14 = vmul.f32 %v11367_v3, %v11339_v17  ;;  %v26432_v42 = vadd.f32 %v11398_v58, %v11385_v1  ;;  %v22159_v60 = vld [vmem:[%s24552_s23 + $0x240] ss:$16 sps:$4 sm:$0xff]   ;;  %v22170_v58 = vld [vmem:[%s24552_s23 + $0x26c] ss:$16 sps:$4 sm:$0xff]   ;;  %v22186_v47 = vld [vmem:[%s24552_s23 + $0x2c8] ss:$16 sps:$4 sm:$0xff]  }
0x2398   : > { %v26434_v6 = vadd.f32 %v11394_v20, %v11384_v46  ;;  %v26436_v59 = vadd.f32 %v11406_v57, %v11387_v34  ;;  %v26438_v8 = vadd.f32 %v11402_v15, %v11386_v40  ;;  %v11389_v54 = vmul.f32 %v11371_v32, %v11346_v39  ;;  %v22162_v32 = vld [vmem:[%s24552_s23 + $0x248] ss:$16 sps:$4 sm:$0xff]   ;;  %v22165_v20 = vld [vmem:[%s24552_s23 + $0x260] ss:$16 sps:$4 sm:$0xff]   ;;  %v22188_v36 = vld [vmem:[%s24552_s23 + $0x2cc] ss:$16 sps:$4 sm:$0xff]  }
0x2399   : > { %v26440_v16 = vadd.f32 %v11414_v43, %v11383_v21  ;;  %v11388_v35 = vmul.f32 %v11367_v3, %v11345_v22  ;;  %v26442_v29 = vadd.f32 %v11410_v19, %v11382_v14  ;;  %v11627_v31 = vpack.c.bf16 %v26432_v42, %v26424_v41  ;;  %v22168_v15 = vld [vmem:[%s24552_s23 + $0x268] ss:$16 sps:$4 sm:$0xff]   ;;  %v22173_v3 = vld [vmem:[%s24552_s23 + $0x284] ss:$16 sps:$4 sm:$0xff]   ;;  %v22177_v63 = vld [vmem:[%s24552_s23 + $0x2a0] ss:$16 sps:$4 sm:$0xff]  }
0x239a   : > { %v11626_v13 = vpack.c.bf16 %v26434_v6, %v26426_v27  ;;  %v26450_v61 = vadd.f32 %v11406_v57, %v11381_v30  ;;  %v26452_v38 = vadd.f32 %v11414_v43, %v11389_v54  ;;  %v22182_v57 = vld [vmem:[%s24552_s23 + $0x2ac] ss:$16 sps:$4 sm:$0xff]   ;;  %v22180_v43 = vld [vmem:[%s24552_s23 + $0x2a8] ss:$16 sps:$4 sm:$0xff]   ;;  %v22189_v10 = vld [vmem:[%s24552_s23 + $0x2e0] ss:$16 sps:$4 sm:$0xff]  }
0x239b   : > { %v26454_v56 = vadd.f32 %v11410_v19, %v11388_v35  ;;  %12645 = vmatprep.mubr.bf16.mxu1 %v11627_v31  ;;  %12774 = vmatprep.mubr.bf16.mxu0 %v11627_v31  ;;  %v22185_v19 = vld [vmem:[%s24552_s23 + $0x2c4] ss:$16 sps:$4 sm:$0xff]   ;;  %v22194_v17 = vld [vmem:[%s24552_s23 + $0x2ec] ss:$16 sps:$4 sm:$0xff]   ;;  %v22192_v28 = vld [vmem:[%s24552_s23 + $0x2e8] ss:$16 sps:$4 sm:$0xff]  }
0x239c   : > { %12646 = vmatmul.mubr.bf16.vlgmr.msra.gmra.mrb[116].mxu1 %v11626_v13  ;;  %12775 = vmatmul.mubr.bf16.vlgmr.msra.gmra.mrb[28].mxu0 %v11626_v13  ;;  %v11629_v23 = vpack.c.bf16 %v26436_v59, %v26450_v61  ;;  %v22197_v11 = vld [vmem:[%s24552_s23 + $0x304] ss:$16 sps:$4 sm:$0xff]   ;;  %v22200_v12 = vld [vmem:[%s24552_s23 + $0x30c] ss:$16 sps:$4 sm:$0xff]   ;;  %v22195_v30 = vld [vmem:[%s24552_s23 + $0x300] ss:$16 sps:$4 sm:$0xff]  }
0x239d   : > { %12657 = vmatpush1.bf16.msra.mxu1 %v22147_v0  ;;  %12786 = vmatpush1.bf16.msra.mxu0 %v22150_v37  ;;  %v22198_v1 = vld [vmem:[%s24552_s23 + $0x308] ss:$16 sps:$4 sm:$0xff]   ;;  %v22203_v46 = vld [vmem:[%s24552_s23 + $0x324] ss:$16 sps:$4 sm:$0xff]   ;;  %v22206_v34 = vld [vmem:[%s24552_s23 + $0x32c] ss:$16 sps:$4 sm:$0xff]  }
0x239e   : > { %12688 = vmatprep.mubr.bf16.mxu1 %v11629_v23  ;;  %12817 = vmatprep.mubr.bf16.mxu0 %v11629_v23  ;;  %v22201_v40 = vld [vmem:[%s24552_s23 + $0x320] ss:$16 sps:$4 sm:$0xff]   ;;  %v22204_v39 = vld [vmem:[%s24552_s23 + $0x328] ss:$16 sps:$4 sm:$0xff]   ;;  %v22209_v21 = vld [vmem:[%s24552_s23 + $0x344] ss:$16 sps:$4 sm:$0xff]  }
0x239f   : > { %12658 = vmatprep.subr.bf16.mxu1 %v22155_v4  ;;  %12787 = vmatprep.subr.bf16.mxu0 %v22158_v53  ;;  %v22212_v22 = vld [vmem:[%s24552_s23 + $0x34c] ss:$16 sps:$4 sm:$0xff]   ;;  %v22207_v14 = vld [vmem:[%s24552_s23 + $0x340] ss:$16 sps:$4 sm:$0xff]   ;;  %v22210_v54 = vld [vmem:[%s24552_s23 + $0x348] ss:$16 sps:$4 sm:$0xff]  }
0x23a0   : > { %v22215_v35 = vld [vmem:[%s24552_s23 + $0x364] ss:$16 sps:$4 sm:$0xff]   ;;  %v22218_v31 = vld [vmem:[%s24552_s23 + $0x36c] ss:$16 sps:$4 sm:$0xff]   ;;  %v22213_v0 = vld [vmem:[%s24552_s23 + $0x360] ss:$16 sps:$4 sm:$0xff]  }
0x23a1   : > { %12659 = vmatpush1.bf16.msra.mxu1 %v22153_v51  ;;  %12788 = vmatpush1.bf16.msra.mxu0 %v22156_v26  ;;  %v22216_v37 = vld [vmem:[%s24552_s23 + $0x368] ss:$16 sps:$4 sm:$0xff]   ;;  %v22221_v13 = vld [vmem:[%s24552_s23 + $0x384] ss:$16 sps:$4 sm:$0xff]   ;;  %v22224_v4 = vld [vmem:[%s24552_s23 + $0x38c] ss:$16 sps:$4 sm:$0xff]  }
0x23a2   : > { %12660 = vmatprep.subr.bf16.mxu1 %v22161_v18  ;;  %12789 = vmatprep.subr.bf16.mxu0 %v22164_v9  ;;  %v22219_v53 = vld [vmem:[%s24552_s23 + $0x380] ss:$16 sps:$4 sm:$0xff]   ;;  %v22222_v23 = vld [vmem:[%s24552_s23 + $0x388] ss:$16 sps:$4 sm:$0xff]   ;;  %v22227_v51 = vld [vmem:[%s24552_s23 + $0x3a4] ss:$16 sps:$4 sm:$0xff]  }
0x23a3   : > { %v22230_v26 = vld [vmem:[%s24552_s23 + $0x3ac] ss:$16 sps:$4 sm:$0xff]   ;;  %v22225_v18 = vld [vmem:[%s24552_s23 + $0x3a0] ss:$16 sps:$4 sm:$0xff]   ;;  %v22228_v9 = vld [vmem:[%s24552_s23 + $0x3a8] ss:$16 sps:$4 sm:$0xff]  }
0x23a5   : > { %12661 = vmatpush1.bf16.msra.mxu1 %v22159_v60  ;;  %12790 = vmatpush1.bf16.msra.mxu0 %v22162_v32  ;;  %v22233_v60 = vld [vmem:[%s24552_s23 + $0x3c4] ss:$16 sps:$4 sm:$0xff]   ;;  %v22236_v32 = vld [vmem:[%s24552_s23 + $0x3cc] ss:$16 sps:$4 sm:$0xff]  }
0x23a6   : > { %12662 = vmatprep.subr.bf16.mxu1 %v22167_v55  ;;  %12791 = vmatprep.subr.bf16.mxu0 %v22170_v58  ;;  %v22231_v55 = vld [vmem:[%s24552_s23 + $0x3c0] ss:$16 sps:$4 sm:$0xff]   ;;  %v22234_v58 = vld [vmem:[%s24552_s23 + $0x3c8] ss:$16 sps:$4 sm:$0xff]  }
0x23a9   : > { %12663 = vmatpush1.bf16.msra.mxu1 %v22165_v20  ;;  %12792 = vmatpush1.bf16.msra.mxu0 %v22168_v15  ;;  %v22239_v20 = vld [vmem:[%s24552_s23 + $0x3e4] ss:$16 sps:$4 sm:$0xff]   ;;  %v22242_v15 = vld [vmem:[%s24552_s23 + $0x3ec] ss:$16 sps:$4 sm:$0xff]  }
0x23aa   : > { %12664 = vmatprep.subr.bf16.mxu1 %v22173_v3  ;;  %12793 = vmatprep.subr.bf16.mxu0 %v22176_v7  ;;  %v22237_v3 = vld [vmem:[%s24552_s23 + $0x3e0] ss:$16 sps:$4 sm:$0xff]   ;;  %v22240_v7 = vld [vmem:[%s24552_s23 + $0x3e8] ss:$16 sps:$4 sm:$0xff]  }
0x23ad   : > { %12665 = vmatpush1.bf16.msra.mxu1 %v22171_v62  ;;  %12794 = vmatpush1.bf16.msra.mxu0 %v22174_v49  ;;  %v22245_v62 = vld [vmem:[%s24552_s23 + $0x404] ss:$16 sps:$4 sm:$0xff]   ;;  %v22248_v49 = vld [vmem:[%s24552_s23 + $0x40c] ss:$16 sps:$4 sm:$0xff]  }
0x23ae   : > { %12666 = vmatprep.subr.bf16.mxu1 %v22179_v33  ;;  %12795 = vmatprep.subr.bf16.mxu0 %v22182_v57  ;;  %v22243_v33 = vld [vmem:[%s24552_s23 + $0x400] ss:$16 sps:$4 sm:$0xff]   ;;  %v11628_v57 = vpack.c.bf16 %v26438_v8, %v26428_v50 }
0x23b1   : > { %12667 = vmatpush1.bf16.msra.mxu1 %v22177_v63  ;;  %12796 = vmatpush1.bf16.msra.mxu0 %v22180_v43  ;;  %v22246_v63 = vld [vmem:[%s24552_s23 + $0x408] ss:$16 sps:$4 sm:$0xff]   ;;  %v11631_v43 = vpack.c.bf16 %v26452_v38, %v26440_v16 }
0x23b2   : > { %12668 = vmatprep.subr.bf16.mxu1 %v22185_v19  ;;  %12797 = vmatprep.subr.bf16.mxu0 %v22188_v36  ;;  %v22251_v19 = vld [vmem:[%s24552_s23 + $0x424] ss:$16 sps:$4 sm:$0xff]   ;;  %v22254_v36 = vld [vmem:[%s24552_s23 + $0x42c] ss:$16 sps:$4 sm:$0xff]  }
0x23b5   : > { %12669 = vmatpush1.bf16.msra.mxu1 %v22183_v24  ;;  %12798 = vmatpush1.bf16.msra.mxu0 %v22186_v47  ;;  %v22249_v24 = vld [vmem:[%s24552_s23 + $0x420] ss:$16 sps:$4 sm:$0xff]   ;;  %v22252_v47 = vld [vmem:[%s24552_s23 + $0x428] ss:$16 sps:$4 sm:$0xff]  }
0x23b6   : > { %12670 = vmatprep.subr.bf16.mxu1 %v22191_v52  ;;  %12799 = vmatprep.subr.bf16.mxu0 %v22194_v17  ;;  %v22257_v52 = vld [vmem:[%s24552_s23 + $0x444] ss:$16 sps:$4 sm:$0xff]   ;;  %v22260_v17 = vld [vmem:[%s24552_s23 + $0x44c] ss:$16 sps:$4 sm:$0xff]  }
0x23b9   : > { %12671 = vmatpush1.bf16.msra.mxu1 %v22189_v10  ;;  %12800 = vmatpush1.bf16.msra.mxu0 %v22192_v28  ;;  %v22255_v10 = vld [vmem:[%s24552_s23 + $0x440] ss:$16 sps:$4 sm:$0xff]   ;;  %v22258_v28 = vld [vmem:[%s24552_s23 + $0x448] ss:$16 sps:$4 sm:$0xff]  }
0x23ba   : > { %12672 = vmatprep.subr.bf16.mxu1 %v22197_v11  ;;  %12801 = vmatprep.subr.bf16.mxu0 %v22200_v12  ;;  %v22263_v11 = vld [vmem:[%s24552_s23 + $0x464] ss:$16 sps:$4 sm:$0xff]   ;;  %v22266_v12 = vld [vmem:[%s24552_s23 + $0x46c] ss:$16 sps:$4 sm:$0xff]  }
0x23bd   : > { %12673 = vmatpush1.bf16.msra.mxu1 %v22195_v30  ;;  %12802 = vmatpush1.bf16.msra.mxu0 %v22198_v1  ;;  %v22261_v30 = vld [vmem:[%s24552_s23 + $0x460] ss:$16 sps:$4 sm:$0xff]   ;;  %v22264_v1 = vld [vmem:[%s24552_s23 + $0x468] ss:$16 sps:$4 sm:$0xff]  }
0x23be   : > { %12674 = vmatprep.subr.bf16.mxu1 %v22203_v46  ;;  %12803 = vmatprep.subr.bf16.mxu0 %v22206_v34  ;;  %v22269_v46 = vld [vmem:[%s24552_s23 + $0x484] ss:$16 sps:$4 sm:$0xff]   ;;  %v22272_v34 = vld [vmem:[%s24552_s23 + $0x48c] ss:$16 sps:$4 sm:$0xff]  }
0x23c1   : > { %12675 = vmatpush1.bf16.msra.mxu1 %v22201_v40  ;;  %12804 = vmatpush1.bf16.msra.mxu0 %v22204_v39  ;;  %v22267_v40 = vld [vmem:[%s24552_s23 + $0x480] ss:$16 sps:$4 sm:$0xff]   ;;  %v22270_v39 = vld [vmem:[%s24552_s23 + $0x488] ss:$16 sps:$4 sm:$0xff]  }
0x23c2   : > { %12676 = vmatprep.subr.bf16.mxu1 %v22209_v21  ;;  %12805 = vmatprep.subr.bf16.mxu0 %v22212_v22  ;;  %v22275_v21 = vld [vmem:[%s24552_s23 + $0x4a4] ss:$16 sps:$4 sm:$0xff]   ;;  %v22278_v22 = vld [vmem:[%s24552_s23 + $0x4ac] ss:$16 sps:$4 sm:$0xff]  }
0x23c5   : > { %12677 = vmatpush1.bf16.msra.mxu1 %v22207_v14  ;;  %12806 = vmatpush1.bf16.msra.mxu0 %v22210_v54  ;;  %v22273_v14 = vld [vmem:[%s24552_s23 + $0x4a0] ss:$16 sps:$4 sm:$0xff]   ;;  %v22276_v54 = vld [vmem:[%s24552_s23 + $0x4a8] ss:$16 sps:$4 sm:$0xff]  }
0x23c6   : > { %12678 = vmatprep.subr.bf16.mxu1 %v22215_v35  ;;  %12807 = vmatprep.subr.bf16.mxu0 %v22218_v31  ;;  %v22281_v35 = vld [vmem:[%s24552_s23 + $0x4c4] ss:$16 sps:$4 sm:$0xff]   ;;  %v22284_v31 = vld [vmem:[%s24552_s23 + $0x4cc] ss:$16 sps:$4 sm:$0xff]  }
0x23c9   : > { %12679 = vmatpush1.bf16.msra.mxu1 %v22213_v0  ;;  %12808 = vmatpush1.bf16.msra.mxu0 %v22216_v37  ;;  %v22279_v0 = vld [vmem:[%s24552_s23 + $0x4c0] ss:$16 sps:$4 sm:$0xff]   ;;  %v22282_v37 = vld [vmem:[%s24552_s23 + $0x4c8] ss:$16 sps:$4 sm:$0xff]  }
0x23ca   : > { %12680 = vmatprep.subr.bf16.mxu1 %v22221_v13  ;;  %12809 = vmatprep.subr.bf16.mxu0 %v22224_v4  ;;  %v22287_v13 = vld [vmem:[%s24552_s23 + $0x4e4] ss:$16 sps:$4 sm:$0xff]   ;;  %v22290_v4 = vld [vmem:[%s24552_s23 + $0x4ec] ss:$16 sps:$4 sm:$0xff]  }
0x23cd   : > { %12681 = vmatpush1.bf16.msra.mxu1 %v22219_v53  ;;  %12810 = vmatpush1.bf16.msra.mxu0 %v22222_v23  ;;  %v22285_v53 = vld [vmem:[%s24552_s23 + $0x4e0] ss:$16 sps:$4 sm:$0xff]   ;;  %v22288_v23 = vld [vmem:[%s24552_s23 + $0x4e8] ss:$16 sps:$4 sm:$0xff]  }
0x23ce   : > { %12682 = vmatprep.subr.bf16.mxu1 %v22227_v51  ;;  %12811 = vmatprep.subr.bf16.mxu0 %v22230_v26  ;;  %v22293_v51 = vld [vmem:[%s24552_s23 + $0x504] ss:$16 sps:$4 sm:$0xff]   ;;  %v22296_v26 = vld [vmem:[%s24552_s23 + $0x50c] ss:$16 sps:$4 sm:$0xff]  }
0x23d1   : > { %12683 = vmatpush1.bf16.msra.mxu1 %v22225_v18  ;;  %12812 = vmatpush1.bf16.msra.mxu0 %v22228_v9  ;;  %v22291_v18 = vld [vmem:[%s24552_s23 + $0x500] ss:$16 sps:$4 sm:$0xff]   ;;  %v22294_v9 = vld [vmem:[%s24552_s23 + $0x508] ss:$16 sps:$4 sm:$0xff]  }
0x23d2   : > { %12684 = vmatprep.subr.bf16.mxu1 %v22233_v60  ;;  %12813 = vmatprep.subr.bf16.mxu0 %v22236_v32  ;;  %v22299_v60 = vld [vmem:[%s24552_s23 + $0x524] ss:$16 sps:$4 sm:$0xff]   ;;  %v22302_v32 = vld [vmem:[%s24552_s23 + $0x52c] ss:$16 sps:$4 sm:$0xff]  }
0x23d5   : > { %12685 = vmatpush1.bf16.msra.mxu1 %v22231_v55  ;;  %12814 = vmatpush1.bf16.msra.mxu0 %v22234_v58  ;;  %v22297_v55 = vld [vmem:[%s24552_s23 + $0x520] ss:$16 sps:$4 sm:$0xff]   ;;  %v22300_v58 = vld [vmem:[%s24552_s23 + $0x528] ss:$16 sps:$4 sm:$0xff]  }
0x23d6   : > { %12686 = vmatprep.subr.bf16.mxu1 %v22239_v20  ;;  %12815 = vmatprep.subr.bf16.mxu0 %v22242_v15  ;;  %v22305_v20 = vld [vmem:[%s24552_s23 + $0x544] ss:$16 sps:$4 sm:$0xff]   ;;  %v22308_v15 = vld [vmem:[%s24552_s23 + $0x54c] ss:$16 sps:$4 sm:$0xff]  }
0x23d9   : > { %12687 = vmatpush1.bf16.msra.mxu1 %v22237_v3  ;;  %12816 = vmatpush1.bf16.msra.mxu0 %v22240_v7  ;;  %v22303_v3 = vld [vmem:[%s24552_s23 + $0x540] ss:$16 sps:$4 sm:$0xff]   ;;  %v22306_v7 = vld [vmem:[%s24552_s23 + $0x548] ss:$16 sps:$4 sm:$0xff]  }
0x23da   : > { %12699 = vmatprep.subr.bf16.mxu1 %v22245_v62  ;;  %12828 = vmatprep.subr.bf16.mxu0 %v22248_v49  ;;  %v22311_v62 = vld [vmem:[%s24552_s23 + $0x564] ss:$16 sps:$4 sm:$0xff]   ;;  %v22314_v49 = vld [vmem:[%s24552_s23 + $0x56c] ss:$16 sps:$4 sm:$0xff]  }
0x23dc   : > { %12689 = vmatmul.mubr.bf16.vlgmr.msra.gmra.mrb[116].mxu1 %v11628_v57  ;;  %12818 = vmatmul.mubr.bf16.vlgmr.msra.gmra.mrb[28].mxu0 %v11628_v57  ;;  %v22312_v57 = vld [vmem:[%s24552_s23 + $0x568] ss:$16 sps:$4 sm:$0xff]  }
0x23dd   : > { %12700 = vmatpush1.bf16.msra.mxu1 %v22243_v33  ;;  %12731 = vmatprep.mubr.bf16.mxu1 %v11631_v43  ;;  %v22309_v33 = vld [vmem:[%s24552_s23 + $0x560] ss:$16 sps:$4 sm:$0xff]  }
0x23de   : > { %12829 = vmatpush1.bf16.msra.mxu0 %v22246_v63  ;;  %12860 = vmatprep.mubr.bf16.mxu0 %v11631_v43  ;;  %v22317_v63 = vld [vmem:[%s24552_s23 + $0x584] ss:$16 sps:$4 sm:$0xff]   ;;  %v22320_v43 = vld [vmem:[%s24552_s23 + $0x58c] ss:$16 sps:$4 sm:$0xff]  }
0x23df   : > { %12701 = vmatprep.subr.bf16.mxu1 %v22251_v19  ;;  %12830 = vmatprep.subr.bf16.mxu0 %v22254_v36  ;;  %v22315_v19 = vld [vmem:[%s24552_s23 + $0x580] ss:$16 sps:$4 sm:$0xff]   ;;  %v22318_v36 = vld [vmem:[%s24552_s23 + $0x588] ss:$16 sps:$4 sm:$0xff]  }
0x23e1   : > { %12702 = vmatpush1.bf16.msra.mxu1 %v22249_v24  ;;  %v22323_v24 = vld [vmem:[%s24552_s23 + $0x5a4] ss:$16 sps:$4 sm:$0xff]  }
0x23e2   : > { %12831 = vmatpush1.bf16.msra.mxu0 %v22252_v47  ;;  %12703 = vmatprep.subr.bf16.mxu1 %v22257_v52  ;;  %v22326_v47 = vld [vmem:[%s24552_s23 + $0x5ac] ss:$16 sps:$4 sm:$0xff]   ;;  %v22321_v52 = vld [vmem:[%s24552_s23 + $0x5a0] ss:$16 sps:$4 sm:$0xff]  }
0x23e3   : > { %12832 = vmatprep.subr.bf16.mxu0 %v22260_v17  ;;  %v22324_v17 = vld [vmem:[%s24552_s23 + $0x5a8] ss:$16 sps:$4 sm:$0xff]  }
0x23e5   : > { %12704 = vmatpush1.bf16.msra.mxu1 %v22255_v10  ;;  %v22329_v10 = vld [vmem:[%s24552_s23 + $0x5c4] ss:$16 sps:$4 sm:$0xff]  }
0x23e6   : > { %12833 = vmatpush1.bf16.msra.mxu0 %v22258_v28  ;;  %12705 = vmatprep.subr.bf16.mxu1 %v22263_v11  ;;  %v22332_v28 = vld [vmem:[%s24552_s23 + $0x5cc] ss:$16 sps:$4 sm:$0xff]   ;;  %v22327_v11 = vld [vmem:[%s24552_s23 + $0x5c0] ss:$16 sps:$4 sm:$0xff]  }
0x23e7   : > { %12834 = vmatprep.subr.bf16.mxu0 %v22266_v12  ;;  %v22330_v12 = vld [vmem:[%s24552_s23 + $0x5c8] ss:$16 sps:$4 sm:$0xff]  }
0x23e9   : > { %12706 = vmatpush1.bf16.msra.mxu1 %v22261_v30  ;;  %v22335_v30 = vld [vmem:[%s24552_s23 + $0x5e4] ss:$16 sps:$4 sm:$0xff]  }
0x23ea   : > { %12835 = vmatpush1.bf16.msra.mxu0 %v22264_v1  ;;  %12707 = vmatprep.subr.bf16.mxu1 %v22269_v46  ;;  %v22338_v1 = vld [vmem:[%s24552_s23 + $0x5ec] ss:$16 sps:$4 sm:$0xff]   ;;  %v22333_v46 = vld [vmem:[%s24552_s23 + $0x5e0] ss:$16 sps:$4 sm:$0xff]  }
0x23eb   : > { %12836 = vmatprep.subr.bf16.mxu0 %v22272_v34  ;;  %v22336_v34 = vld [vmem:[%s24552_s23 + $0x5e8] ss:$16 sps:$4 sm:$0xff]   ;;  %s27351_s23 = scalar_lea.vmem [#allocation18], %s24543_s19 }
0x23ed   : > { %12708 = vmatpush1.bf16.msra.mxu1 %v22267_v40  ;;  %v22341_v40 = vld [vmem:[%s24556_s18 + $0x4] ss:$24 sps:$4 sm:$0xff]  }
0x23ee   : > { %12837 = vmatpush1.bf16.msra.mxu0 %v22270_v39  ;;  %12709 = vmatprep.subr.bf16.mxu1 %v22275_v21  ;;  %v22344_v39 = vld [vmem:[%s24556_s18 + $0x14] ss:$24 sps:$4 sm:$0xff]   ;;  %v22339_v21 = vld [vmem:[%s24556_s18] ss:$24 sps:$4 sm:$0xff]  }
0x23ef   : > { %12838 = vmatprep.subr.bf16.mxu0 %v22278_v22  ;;  %v11630_v22 = vpack.c.bf16 %v26454_v56, %v26442_v29 }
0x23f1   : > { %12710 = vmatpush1.bf16.msra.mxu1 %v22273_v14  ;;  %v22342_v14 = vld [vmem:[%s24556_s18 + $0x10] ss:$24 sps:$4 sm:$0xff]  }
0x23f2   : > { %12839 = vmatpush1.bf16.msra.mxu0 %v22276_v54  ;;  %12711 = vmatprep.subr.bf16.mxu1 %v22281_v35  ;;  %v22347_v54 = vld [vmem:[%s24556_s18 + $0x34] ss:$24 sps:$4 sm:$0xff]   ;;  %v22350_v35 = vld [vmem:[%s24556_s18 + $0x44] ss:$24 sps:$4 sm:$0xff]  }
0x23f3   : > { %12840 = vmatprep.subr.bf16.mxu0 %v22284_v31  ;;  %v22345_v31 = vld [vmem:[%s24556_s18 + $0x30] ss:$24 sps:$4 sm:$0xff]  }
0x23f5   : > { %12712 = vmatpush1.bf16.msra.mxu1 %v22279_v0  ;;  %v22348_v0 = vld [vmem:[%s24556_s18 + $0x40] ss:$24 sps:$4 sm:$0xff]  }
0x23f6   : > { %12841 = vmatpush1.bf16.msra.mxu0 %v22282_v37  ;;  %12713 = vmatprep.subr.bf16.mxu1 %v22287_v13  ;;  %v22353_v37 = vld [vmem:[%s24556_s18 + $0x64] ss:$24 sps:$4 sm:$0xff]   ;;  %v22356_v13 = vld [vmem:[%s24556_s18 + $0x74] ss:$24 sps:$4 sm:$0xff]  }
0x23f7   : > { %12842 = vmatprep.subr.bf16.mxu0 %v22290_v4  ;;  %v22351_v4 = vld [vmem:[%s24556_s18 + $0x60] ss:$24 sps:$4 sm:$0xff]  }
0x23f9   : > { %12714 = vmatpush1.bf16.msra.mxu1 %v22285_v53  ;;  %v22354_v53 = vld [vmem:[%s24556_s18 + $0x70] ss:$24 sps:$4 sm:$0xff]  }
0x23fa   : > { %12843 = vmatpush1.bf16.msra.mxu0 %v22288_v23  ;;  %12715 = vmatprep.subr.bf16.mxu1 %v22293_v51  ;;  %v22359_v23 = vld [vmem:[%s24556_s18 + $0x94] ss:$24 sps:$4 sm:$0xff]   ;;  %v22362_v51 = vld [vmem:[%s24556_s18 + $0xa4] ss:$24 sps:$4 sm:$0xff]  }
0x23fb   : > { %12844 = vmatprep.subr.bf16.mxu0 %v22296_v26  ;;  %v22357_v26 = vld [vmem:[%s24556_s18 + $0x90] ss:$24 sps:$4 sm:$0xff]  }
0x23fd   : > { %12716 = vmatpush1.bf16.msra.mxu1 %v22291_v18  ;;  %v22360_v18 = vld [vmem:[%s24556_s18 + $0xa0] ss:$24 sps:$4 sm:$0xff]  }
0x23fe   : > { %12845 = vmatpush1.bf16.msra.mxu0 %v22294_v9  ;;  %12717 = vmatprep.subr.bf16.mxu1 %v22299_v60  ;;  %v22365_v9 = vld [vmem:[%s24556_s18 + $0xc4] ss:$24 sps:$4 sm:$0xff]   ;;  %v22368_v60 = vld [vmem:[%s24556_s18 + $0xd4] ss:$24 sps:$4 sm:$0xff]  }
0x23ff   : > { %12846 = vmatprep.subr.bf16.mxu0 %v22302_v32  ;;  %v22363_v32 = vld [vmem:[%s24556_s18 + $0xc0] ss:$24 sps:$4 sm:$0xff]  }
0x2401   : > { %12718 = vmatpush1.bf16.msra.mxu1 %v22297_v55  ;;  %v22366_v55 = vld [vmem:[%s24556_s18 + $0xd0] ss:$24 sps:$4 sm:$0xff]  }
0x2402   : > { %12847 = vmatpush1.bf16.msra.mxu0 %v22300_v58  ;;  %12719 = vmatprep.subr.bf16.mxu1 %v22305_v20  ;;  %v22371_v58 = vld [vmem:[%s24556_s18 + $0xf4] ss:$24 sps:$4 sm:$0xff]   ;;  %v22374_v20 = vld [vmem:[%s24556_s18 + $0x104] ss:$24 sps:$4 sm:$0xff]  }
0x2403   : > { %12848 = vmatprep.subr.bf16.mxu0 %v22308_v15  ;;  %v22369_v15 = vld [vmem:[%s24556_s18 + $0xf0] ss:$24 sps:$4 sm:$0xff]  }
0x2405   : > { %12720 = vmatpush1.bf16.msra.mxu1 %v22303_v3  ;;  %v22372_v3 = vld [vmem:[%s24556_s18 + $0x100] ss:$24 sps:$4 sm:$0xff]  }
0x2406   : > { %12849 = vmatpush1.bf16.msra.mxu0 %v22306_v7  ;;  %12721 = vmatprep.subr.bf16.mxu1 %v22311_v62  ;;  %v22377_v7 = vld [vmem:[%s24556_s18 + $0x124] ss:$24 sps:$4 sm:$0xff]   ;;  %v22380_v62 = vld [vmem:[%s24556_s18 + $0x134] ss:$24 sps:$4 sm:$0xff]  }
0x2407   : > { %12850 = vmatprep.subr.bf16.mxu0 %v22314_v49  ;;  %v22375_v49 = vld [vmem:[%s24556_s18 + $0x120] ss:$24 sps:$4 sm:$0xff]  }
0x2409   : > { %12722 = vmatpush1.bf16.msra.mxu1 %v22309_v33  ;;  %v22378_v33 = vld [vmem:[%s24556_s18 + $0x130] ss:$24 sps:$4 sm:$0xff]  }
0x240a   : > { %12851 = vmatpush1.bf16.msra.mxu0 %v22312_v57  ;;  %12723 = vmatprep.subr.bf16.mxu1 %v22317_v63  ;;  %v22383_v57 = vld [vmem:[%s24556_s18 + $0x154] ss:$24 sps:$4 sm:$0xff]   ;;  %v22386_v63 = vld [vmem:[%s24556_s18 + $0x164] ss:$24 sps:$4 sm:$0xff]  }
0x240b   : > { %12852 = vmatprep.subr.bf16.mxu0 %v22320_v43  ;;  %v22381_v43 = vld [vmem:[%s24556_s18 + $0x150] ss:$24 sps:$4 sm:$0xff]  }
0x240d   : > { %12724 = vmatpush1.bf16.msra.mxu1 %v22315_v19  ;;  %v22384_v19 = vld [vmem:[%s24556_s18 + $0x160] ss:$24 sps:$4 sm:$0xff]  }
0x240e   : > { %12853 = vmatpush1.bf16.msra.mxu0 %v22318_v36  ;;  %12725 = vmatprep.subr.bf16.mxu1 %v22323_v24  ;;  %v22389_v36 = vld [vmem:[%s24556_s18 + $0x184] ss:$24 sps:$4 sm:$0xff]   ;;  %v22392_v24 = vld [vmem:[%s24556_s18 + $0x194] ss:$24 sps:$4 sm:$0xff]  }
0x240f   : > { %12854 = vmatprep.subr.bf16.mxu0 %v22326_v47  ;;  %v22387_v47 = vld [vmem:[%s24556_s18 + $0x180] ss:$24 sps:$4 sm:$0xff]  }
0x2411   : > { %12726 = vmatpush1.bf16.msra.mxu1 %v22321_v52  ;;  %v22390_v52 = vld [vmem:[%s24556_s18 + $0x190] ss:$24 sps:$4 sm:$0xff]  }
0x2412   : > { %12855 = vmatpush1.bf16.msra.mxu0 %v22324_v17  ;;  %12727 = vmatprep.subr.bf16.mxu1 %v22329_v10  ;;  %v22395_v17 = vld [vmem:[%s24556_s18 + $0x1b4] ss:$24 sps:$4 sm:$0xff]   ;;  %v22398_v10 = vld [vmem:[%s24556_s18 + $0x1c4] ss:$24 sps:$4 sm:$0xff]  }
0x2413   : > { %12856 = vmatprep.subr.bf16.mxu0 %v22332_v28  ;;  %v22393_v28 = vld [vmem:[%s24556_s18 + $0x1b0] ss:$24 sps:$4 sm:$0xff]  }
0x2415   : > { %12728 = vmatpush1.bf16.msra.mxu1 %v22327_v11  ;;  %v22396_v11 = vld [vmem:[%s24556_s18 + $0x1c0] ss:$24 sps:$4 sm:$0xff]  }
0x2416   : > { %12857 = vmatpush1.bf16.msra.mxu0 %v22330_v12  ;;  %12729 = vmatprep.subr.bf16.mxu1 %v22335_v30  ;;  %v22401_v12 = vld [vmem:[%s24556_s18 + $0x1e4] ss:$24 sps:$4 sm:$0xff]   ;;  %v22404_v30 = vld [vmem:[%s24556_s18 + $0x1f4] ss:$24 sps:$4 sm:$0xff]  }
0x2417   : > { %12858 = vmatprep.subr.bf16.mxu0 %v22338_v1  ;;  %v22399_v1 = vld [vmem:[%s24556_s18 + $0x1e0] ss:$24 sps:$4 sm:$0xff]  }
0x2419   : > { %12730 = vmatpush1.bf16.msra.mxu1 %v22333_v46  ;;  %v22402_v46 = vld [vmem:[%s24556_s18 + $0x1f0] ss:$24 sps:$4 sm:$0xff]  }
0x241a   : > { %12859 = vmatpush1.bf16.msra.mxu0 %v22336_v34  ;;  %14131 = vmatprep.subr.bf16.mxu1 %v22341_v40  ;;  %v22407_v34 = vld [vmem:[%s24556_s18 + $0x214] ss:$24 sps:$4 sm:$0xff]   ;;  %v22410_v40 = vld [vmem:[%s24556_s18 + $0x224] ss:$24 sps:$4 sm:$0xff]  }
0x241b   : > { %14303 = vmatprep.subr.bf16.mxu0 %v22344_v39  ;;  %v22405_v39 = vld [vmem:[%s24556_s18 + $0x210] ss:$24 sps:$4 sm:$0xff]  }
0x241c   : > { %12732 = vmatmul.mubr.bf16.vlgmr.msra.gmra.mrb[116].mxu1 %v11630_v22 }
0x241d   : > { %12861 = vmatmul.mubr.bf16.vlgmr.msra.gmra.mrb[28].mxu0 %v11630_v22  ;;  %14132 = vmatpush1.bf16.msra.mxu1 %v22339_v21  ;;  %v22408_v21 = vld [vmem:[%s24556_s18 + $0x220] ss:$24 sps:$4 sm:$0xff]  }
0x241e   : > { %14304 = vmatpush1.bf16.msra.mxu0 %v22342_v14  ;;  %14133 = vmatprep.subr.bf16.mxu1 %v22347_v54  ;;  %v22411_v22 = vld [vmem:[%s24556_s18 + $0x240] ss:$24 sps:$4 sm:$0xff]   ;;  %v22413_v14 = vld [vmem:[%s24556_s18 + $0x244] ss:$24 sps:$4 sm:$0xff]   ;;  %v22414_v54 = vld [vmem:[%s24556_s18 + $0x250] ss:$24 sps:$4 sm:$0xff]  }
0x241f   : > { %14305 = vmatprep.subr.bf16.mxu0 %v22350_v35  ;;  %v22416_v35 = vld [vmem:[%s24556_s18 + $0x254] ss:$24 sps:$4 sm:$0xff]  }
0x2421   : > { %14134 = vmatpush1.bf16.msra.mxu1 %v22345_v31  ;;  %v22419_v31 = vld [vmem:[%s24556_s18 + $0x274] ss:$24 sps:$4 sm:$0xff]  }
0x2422   : > { %14306 = vmatpush1.bf16.msra.mxu0 %v22348_v0  ;;  %14135 = vmatprep.subr.bf16.mxu1 %v22353_v37  ;;  %v22422_v0 = vld [vmem:[%s24556_s18 + $0x284] ss:$24 sps:$4 sm:$0xff]   ;;  %v22417_v37 = vld [vmem:[%s24556_s18 + $0x270] ss:$24 sps:$4 sm:$0xff]  }
0x2423   : > { %14307 = vmatprep.subr.bf16.mxu0 %v22356_v13  ;;  %v22420_v13 = vld [vmem:[%s24556_s18 + $0x280] ss:$24 sps:$4 sm:$0xff]  }
0x2425   : > { %14136 = vmatpush1.bf16.msra.mxu1 %v22351_v4  ;;  %v22425_v4 = vld [vmem:[%s24556_s18 + $0x2a4] ss:$24 sps:$4 sm:$0xff]  }
0x2426   : > { %14308 = vmatpush1.bf16.msra.mxu0 %v22354_v53  ;;  %14137 = vmatprep.subr.bf16.mxu1 %v22359_v23  ;;  %v22428_v53 = vld [vmem:[%s24556_s18 + $0x2b4] ss:$24 sps:$4 sm:$0xff]   ;;  %v22423_v23 = vld [vmem:[%s24556_s18 + $0x2a0] ss:$24 sps:$4 sm:$0xff]  }
0x2427   : > { %14309 = vmatprep.subr.bf16.mxu0 %v22362_v51  ;;  %v22426_v51 = vld [vmem:[%s24556_s18 + $0x2b0] ss:$24 sps:$4 sm:$0xff]  }
0x2429   : > { %14138 = vmatpush1.bf16.msra.mxu1 %v22357_v26  ;;  %v22431_v26 = vld [vmem:[%s24556_s18 + $0x2d4] ss:$24 sps:$4 sm:$0xff]  }
0x242a   : > { %14310 = vmatpush1.bf16.msra.mxu0 %v22360_v18  ;;  %14139 = vmatprep.subr.bf16.mxu1 %v22365_v9  ;;  %v22434_v18 = vld [vmem:[%s24556_s18 + $0x2e4] ss:$24 sps:$4 sm:$0xff]   ;;  %v22429_v9 = vld [vmem:[%s24556_s18 + $0x2d0] ss:$24 sps:$4 sm:$0xff]  }
0x242b   : > { %14311 = vmatprep.subr.bf16.mxu0 %v22368_v60  ;;  %v22432_v60 = vld [vmem:[%s24556_s18 + $0x2e0] ss:$24 sps:$4 sm:$0xff]  }
0x242d   : > { %14140 = vmatpush1.bf16.msra.mxu1 %v22363_v32  ;;  %v22437_v32 = vld [vmem:[%s24556_s18 + $0x304] ss:$24 sps:$4 sm:$0xff]  }
0x242e   : > { %14312 = vmatpush1.bf16.msra.mxu0 %v22366_v55  ;;  %14141 = vmatprep.subr.bf16.mxu1 %v22371_v58  ;;  %v22440_v55 = vld [vmem:[%s24556_s18 + $0x314] ss:$24 sps:$4 sm:$0xff]   ;;  %v11625_v58 = vld [vmem:[%s24554_s27] sm:$0xf]  ;;  %s27352_s27 = scalar_lea.vmem [#allocation19], %s24543_s19 }
0x242f   : > { %14313 = vmatprep.subr.bf16.mxu0 %v22374_v20  ;;  %v11636_v20 = vrot.slane %v11625_v58, %v25163_v2 }
0x2431   : > { %14142 = vmatpush1.bf16.msra.mxu1 %v22369_v15  ;;  %v11644_v15 = vrot.slane %v11625_v58, %v25081_v45 }
0x2432   : > { %14314 = vmatpush1.bf16.msra.mxu0 %v22372_v3  ;;  %14143 = vmatprep.subr.bf16.mxu1 %v22377_v7  ;;  %v11640_v3 = vrot.slane %v11625_v58, %v25168_v5  ;;  %v11648_v7 = vrot.slane %v11625_v58, %v25085_v48 }
0x2433   : > { %14315 = vmatprep.subr.bf16.mxu0 %v22380_v62 }
0x2435   : > { %14144 = vmatpush1.bf16.msra.mxu1 %v22375_v49 }
0x2436   : > { %14316 = vmatpush1.bf16.msra.mxu0 %v22378_v33  ;;  %14145 = vmatprep.subr.bf16.mxu1 %v22383_v57 }
0x2437   : > { %14317 = vmatprep.subr.bf16.mxu0 %v22386_v63 }
0x2439   : > { %14146 = vmatpush1.bf16.msra.mxu1 %v22381_v43 }
0x243a   : > { %14318 = vmatpush1.bf16.msra.mxu0 %v22384_v19  ;;  %14147 = vmatprep.subr.bf16.mxu1 %v22389_v36 }
0x243b   : > { %14319 = vmatprep.subr.bf16.mxu0 %v22392_v24 }
0x243d   : > { %14148 = vmatpush1.bf16.msra.mxu1 %v22387_v47 }
0x243e   : > { %14320 = vmatpush1.bf16.msra.mxu0 %v22390_v52  ;;  %14149 = vmatprep.subr.bf16.mxu1 %v22395_v17 }
0x243f   : > { %14321 = vmatprep.subr.bf16.mxu0 %v22398_v10 }
0x2441   : > { %14150 = vmatpush1.bf16.msra.mxu1 %v22393_v28 }
0x2442   : > { %14322 = vmatpush1.bf16.msra.mxu0 %v22396_v11  ;;  %14151 = vmatprep.subr.bf16.mxu1 %v22401_v12 }
0x2443   : > { %14323 = vmatprep.subr.bf16.mxu0 %v22404_v30 }
0x2445   : > { %14152 = vmatpush1.bf16.msra.mxu1 %v22399_v1 }
0x2446   : > { %14324 = vmatpush1.bf16.msra.mxu0 %v22402_v46  ;;  %14153 = vmatprep.subr.bf16.mxu1 %v22407_v34 }
0x2447   : > { %14325 = vmatprep.subr.bf16.mxu0 %v22410_v40 }
0x2449   : > { %14154 = vmatpush1.bf16.msra.mxu1 %v22405_v39 }
0x244a   : > { %14326 = vmatpush1.bf16.msra.mxu0 %v22408_v21  ;;  %14155 = vmatprep.subr.bf16.mxu1 %v22413_v14 }
0x244b   : > { %14327 = vmatprep.subr.bf16.mxu0 %v22416_v35 }
0x244d   : > { %14156 = vmatpush1.bf16.msra.mxu1 %v22411_v22 }
0x244e   : > { %14328 = vmatpush1.bf16.msra.mxu0 %v22414_v54  ;;  %14157 = vmatprep.subr.bf16.mxu1 %v22419_v31 }
0x244f   : > { %14329 = vmatprep.subr.bf16.mxu0 %v22422_v0 }
0x2451   : > { %14158 = vmatpush1.bf16.msra.mxu1 %v22417_v37 }
0x2452   : > { %14330 = vmatpush1.bf16.msra.mxu0 %v22420_v13  ;;  %14159 = vmatprep.subr.bf16.mxu1 %v22425_v4 }
0x2453   : > { %14331 = vmatprep.subr.bf16.mxu0 %v22428_v53 }
0x2455   : > { %14160 = vmatpush1.bf16.msra.mxu1 %v22423_v23 }
0x2456   : > { %14332 = vmatpush1.bf16.msra.mxu0 %v22426_v51  ;;  %14161 = vmatprep.subr.bf16.mxu1 %v22431_v26 }
0x2457   : > { %14333 = vmatprep.subr.bf16.mxu0 %v22434_v18 }
0x2459   : > { %14162 = vmatpush1.bf16.msra.mxu1 %v22429_v9 }
0x245a   : > { %14334 = vmatpush1.bf16.msra.mxu0 %v22432_v60  ;;  %14174 = vmatprep.subr.bf16.mxu1 %v22437_v32 }
0x245b   : > { %14346 = vmatprep.subr.bf16.mxu0 %v22440_v55 }
0x24ef   : > { %v12733_v62 = vpop.f32.mrb[116].mxu1 }
0x24f0   : > { %v26659_v49 = vadd.f32 %v12733_v62, %v11636_v20  ;;  %v12862_v33 = vpop.f32.mrb[28].mxu0  ;;  %v12735_v57 = vpop.f32.mrb[117].mxu1 }
0x24f1   : > { %v26661_v63 = vadd.f32 %v12862_v33, %v11644_v15  ;;  %v26663_v43 = vadd.f32 %v12735_v57, %v11640_v3  ;;  %v12864_v19 = vpop.f32.mrb[29].mxu0  ;;  %v12737_v36 = vpop.f32.mrb[118].mxu1 }
0x24f2   : > { %v12879_v24 = vmul.f32 0.044715, %v26659_v49  ;;  %v26666_v47 = vadd.f32 %v12864_v19, %v11648_v7  ;;  %v19950_v52 = vadd.f32 %v12737_v36, %v11636_v20  ;;  %v12866_v17 = vpop.f32.mrb[30].mxu0  ;;  %v12739_v10 = vpop.f32.mrb[119].mxu1 }
0x24f3   : > { %v12881_v28 = vmul.f32 0.044715, %v26661_v63  ;;  %v12880_v11 = vmul.f32 0.044715, %v26663_v43  ;;  %v19954_v12 = vadd.f32 %v12866_v17, %v11644_v15  ;;  %v26670_v30 = vadd.f32 %v12739_v10, %v11640_v3  ;;  %v12868_v1 = vpop.f32.mrb[31].mxu0 }
0x24f4   : > { %v12887_v46 = vmul.f32 %v26659_v49, %v12879_v24  ;;  %v12882_v34 = vmul.f32 0.044715, %v26666_v47  ;;  %v12883_v40 = vmul.f32 0.044715, %v19950_v52  ;;  %v26674_v39 = vadd.f32 %v12868_v1, %v11648_v7 }
0x24f5   : > { %v12889_v21 = vmul.f32 %v26661_v63, %v12881_v28  ;;  %v12888_v22 = vmul.f32 %v26663_v43, %v12880_v11  ;;  %v12885_v14 = vmul.f32 0.044715, %v19954_v12  ;;  %v12884_v54 = vmul.f32 0.044715, %v26670_v30 }
0x24f6   : > { %v12895_v35 = vmul.f32 %v26659_v49, %v12887_v46  ;;  %v12890_v31 = vmul.f32 %v26666_v47, %v12882_v34  ;;  %v12891_v0 = vmul.f32 %v19950_v52, %v12883_v40  ;;  %v12886_v37 = vmul.f32 0.044715, %v26674_v39 }
0x24f7   : > { %v12897_v13 = vmul.f32 %v26661_v63, %v12889_v21  ;;  %v12896_v4 = vmul.f32 %v26663_v43, %v12888_v22  ;;  %v12893_v53 = vmul.f32 %v19954_v12, %v12885_v14  ;;  %v12892_v23 = vmul.f32 %v26670_v30, %v12884_v54 }
0x24f8   : > { %v12903_v51 = vadd.f32 %v26659_v49, %v12895_v35  ;;  %v12899_v26 = vmul.f32 %v19950_v52, %v12891_v0  ;;  %v12894_v18 = vmul.f32 %v26674_v39, %v12886_v37  ;;  %v12898_v58 = vmul.f32 %v26666_v47, %v12890_v31 }
0x24f9   : > { %v12905_v9 = vadd.f32 %v26661_v63, %v12897_v13  ;;  %v12901_v60 = vmul.f32 %v19954_v12, %v12893_v53  ;;  %v12900_v32 = vmul.f32 %v26670_v30, %v12892_v23  ;;  %v12904_v62 = vadd.f32 %v26663_v43, %v12896_v4 }
0x24fa   : > { %v12911_v55 = vmul.f32 0.7978846, %v12903_v51  ;;  %v12907_v20 = vadd.f32 %v19950_v52, %v12899_v26  ;;  %v12902_v15 = vmul.f32 %v26674_v39, %v12894_v18  ;;  %v12906_v17 = vadd.f32 %v26666_v47, %v12898_v58 }
0x24fb   : > { %v12913_v3 = vmul.f32 0.7978846, %v12905_v9  ;;  %v12909_v7 = vadd.f32 %v19954_v12, %v12901_v60  ;;  %v12908_v33 = vadd.f32 %v26670_v30, %v12900_v32  ;;  %v12912_v36 = vmul.f32 0.7978846, %v12904_v62  ;;  %v22438_v62 = vld [vmem:[%s24556_s18 + $0x310] ss:$24 sps:$4 sm:$0xff]  }
0x24fc   : > { %22679 = vtanh.f32 %v12911_v55  ;;  %v12915_v57 = vmul.f32 0.7978846, %v12907_v20  ;;  %v12910_v10 = vadd.f32 %v26674_v39, %v12902_v15  ;;  %v12914_v28 = vmul.f32 0.7978846, %v12906_v17  ;;  %v22449_v17 = vld [vmem:[%s24556_s18 + $0x364] ss:$24 sps:$4 sm:$0xff]  }
0x24fd   : > { %22681 = vtanh.f32 %v12913_v3  ;;  %v12917_v19 = vmul.f32 0.7978846, %v12909_v7  ;;  %v12916_v24 = vmul.f32 0.7978846, %v12908_v33  ;;  %v12871_v14 = vmul.f32 0.5, %v26659_v49 }
0x24fe   : > { %22683 = vtanh.f32 %v12915_v57  ;;  %v12918_v11 = vmul.f32 0.7978846, %v12910_v10  ;;  %v12875_v54 = vmul.f32 0.5, %v19950_v52  ;;  %v12873_v0 = vmul.f32 0.5, %v26661_v63  ;;  %v22435_v7 = vld [vmem:[%s24556_s18 + $0x300] ss:$24 sps:$4 sm:$0xff]  }
0x24ff   : > { %22685 = vtanh.f32 %v12917_v19  ;;  %v12877_v37 = vmul.f32 0.5, %v19954_v12  ;;  %v12872_v53 = vmul.f32 0.5, %v26663_v43  ;;  %v12876_v9 = vmul.f32 0.5, %v26670_v30  ;;  %v22446_v19 = vld [vmem:[%s24556_s18 + $0x344] ss:$24 sps:$4 sm:$0xff]  }
0x2500   : > { %22687 = vtanh.f32 %v12912_v36  ;;  %v12874_v63 = vmul.f32 0.5, %v26666_v47  ;;  %v12878_v43 = vmul.f32 0.5, %v26674_v39  ;;  %v22443_v39 = vld [vmem:[%s24556_s18 + $0x334] ss:$24 sps:$4 sm:$0xff]   ;;  %v22441_v36 = vld [vmem:[%s24556_s18 + $0x330] ss:$24 sps:$4 sm:$0xff]  }
0x2501   : > { %22689 = vtanh.f32 %v12916_v24  ;;  %v22444_v24 = vld [vmem:[%s24556_s18 + $0x340] ss:$24 sps:$4 sm:$0xff]   ;;  %v22452_v10 = vld [vmem:[%s24556_s18 + $0x374] ss:$24 sps:$4 sm:$0xff]  }
0x2502   : > { %22691 = vtanh.f32 %v12914_v28  ;;  %v22447_v28 = vld [vmem:[%s24556_s18 + $0x360] ss:$24 sps:$4 sm:$0xff]  }
0x2503   : > { %22693 = vtanh.f32 %v12918_v11  ;;  %v22450_v11 = vld [vmem:[%s24556_s18 + $0x370] ss:$24 sps:$4 sm:$0xff]  }
0x2506   : > { %v22680_v1 = vpop.eup %22679 }
0x2507   : > { %v22682_v46 = vpop.eup %22681  ;;  %v12927_v34 = vadd.f32 1.0, %v22680_v1  ;;  %v22455_v1 = vld [vmem:[%s24556_s18 + $0x394] ss:$24 sps:$4 sm:$0xff]  }
0x2508   : > { %v22684_v40 = vpop.eup %22683  ;;  %v12929_v21 = vadd.f32 1.0, %v22682_v46  ;;  %v22458_v46 = vld [vmem:[%s24556_s18 + $0x3a4] ss:$24 sps:$4 sm:$0xff]  }
0x2509   : > { %v22686_v22 = vpop.eup %22685  ;;  %v12931_v35 = vadd.f32 1.0, %v22684_v40  ;;  %v12935_v51 = vmul.f32 %v12927_v34, %v12871_v14  ;;  %v22453_v34 = vld [vmem:[%s24556_s18 + $0x390] ss:$24 sps:$4 sm:$0xff]   ;;  %v22456_v40 = vld [vmem:[%s24556_s18 + $0x3a0] ss:$24 sps:$4 sm:$0xff]  }
0x250a   : > { %v22688_v31 = vpop.eup %22687  ;;  %v12933_v13 = vadd.f32 1.0, %v22686_v22  ;;  %v12937_v49 = vmul.f32 %v12929_v21, %v12873_v0  ;;  %v22461_v21 = vld [vmem:[%s24556_s18 + $0x3c4] ss:$24 sps:$4 sm:$0xff]   ;;  %v22464_v22 = vld [vmem:[%s24556_s18 + $0x3d4] ss:$24 sps:$4 sm:$0xff]  }
0x250b   : > { %v22690_v4 = vpop.eup %22689  ;;  %v12928_v23 = vadd.f32 1.0, %v22688_v31  ;;  %v12939_v26 = vmul.f32 %v12931_v35, %v12875_v54  ;;  %v22459_v14 = vld [vmem:[%s24556_s18 + $0x3c0] ss:$24 sps:$4 sm:$0xff]   ;;  %v22462_v54 = vld [vmem:[%s24556_s18 + $0x3d0] ss:$24 sps:$4 sm:$0xff]  }
0x250c   : > { %v22692_v18 = vpop.eup %22691  ;;  %v12932_v60 = vadd.f32 1.0, %v22690_v4  ;;  %v12941_v52 = vmul.f32 %v12933_v13, %v12877_v37  ;;  %v22467_v35 = vld [vmem:[%s24556_s18 + $0x3f4] ss:$24 sps:$4 sm:$0xff]   ;;  %v22470_v31 = vld [vmem:[%s24556_s18 + $0x404] ss:$24 sps:$4 sm:$0xff]  }
0x250d   : > { %v22694_v32 = vpop.eup %22693  ;;  %v26699_v55 = vpack.c.bf16 %v12939_v26, %v12935_v51  ;;  %v12930_v12 = vadd.f32 1.0, %v22692_v18  ;;  %v12936_v58 = vmul.f32 %v12928_v23, %v12872_v53  ;;  %v22465_v0 = vld [vmem:[%s24556_s18 + $0x3f0] ss:$24 sps:$4 sm:$0xff]   ;;  %v22468_v37 = vld [vmem:[%s24556_s18 + $0x400] ss:$24 sps:$4 sm:$0xff]  }
0x250e   : > { %v12940_v20 = vmul.f32 %v12932_v60, %v12876_v9  ;;  %v12934_v15 = vadd.f32 1.0, %v22694_v32  ;;  %v26703_v3 = vpack.c.bf16 %v12941_v52, %v12937_v49  ;;  %v22473_v13 = vld [vmem:[%s24556_s18 + $0x424] ss:$24 sps:$4 sm:$0xff]   ;;  %v22476_v4 = vld [vmem:[%s24556_s18 + $0x434] ss:$24 sps:$4 sm:$0xff]  }
0x250f   : > { %v12938_v33 = vmul.f32 %v12930_v12, %v12874_v63  ;;  %v22471_v53 = vld [vmem:[%s24556_s18 + $0x420] ss:$24 sps:$4 sm:$0xff]   ;;  %v22474_v23 = vld [vmem:[%s24556_s18 + $0x430] ss:$24 sps:$4 sm:$0xff]   ;;  %v22479_v51 = vld [vmem:[%s24556_s18 + $0x454] ss:$24 sps:$4 sm:$0xff]  }
0x2510   : > { %v26705_v30 = vpack.c.bf16 %v12940_v20, %v12936_v58  ;;  %v12942_v57 = vmul.f32 %v12934_v15, %v12878_v43  ;;  %v22482_v26 = vld [vmem:[%s24556_s18 + $0x464] ss:$24 sps:$4 sm:$0xff]   ;;  %v22477_v18 = vld [vmem:[%s24556_s18 + $0x450] ss:$24 sps:$4 sm:$0xff]   ;;  %v22480_v9 = vld [vmem:[%s24556_s18 + $0x460] ss:$24 sps:$4 sm:$0xff]  }
0x2511   : > { %v22485_v60 = vld [vmem:[%s24556_s18 + $0x484] ss:$24 sps:$4 sm:$0xff]   ;;  %v22488_v49 = vld [vmem:[%s24556_s18 + $0x494] ss:$24 sps:$4 sm:$0xff]   ;;  %v22483_v52 = vld [vmem:[%s24556_s18 + $0x480] ss:$24 sps:$4 sm:$0xff]  }
0x2512   : > { %14163 = vmatprep.mubr.bf16.mxu1 %v26705_v30  ;;  %14335 = vmatprep.mubr.bf16.mxu0 %v26705_v30  ;;  %v26711_v47 = vpack.c.bf16 %v12942_v57, %v12938_v33  ;;  %v22486_v32 = vld [vmem:[%s24556_s18 + $0x490] ss:$24 sps:$4 sm:$0xff]   ;;  %v22491_v63 = vld [vmem:[%s24556_s18 + $0x4b4] ss:$24 sps:$4 sm:$0xff]   ;;  %v22494_v43 = vld [vmem:[%s24556_s18 + $0x4c4] ss:$24 sps:$4 sm:$0xff]  }
0x2513   : > { %14164 = vmatmul.mubr.bf16.vlgmr.msra.gmra.mrb[120].mxu1 %v26699_v55  ;;  %14336 = vmatmul.mubr.bf16.vlgmr.msra.gmra.mrb[32].mxu0 %v26699_v55  ;;  %v22489_v12 = vld [vmem:[%s24556_s18 + $0x4b0] ss:$24 sps:$4 sm:$0xff]   ;;  %v22492_v58 = vld [vmem:[%s24556_s18 + $0x4c0] ss:$24 sps:$4 sm:$0xff]   ;;  %v22497_v20 = vld [vmem:[%s24556_s18 + $0x4e4] ss:$24 sps:$4 sm:$0xff]  }
0x2514   : > { %14175 = vmatpush1.bf16.msra.mxu1 %v22435_v7  ;;  %14347 = vmatpush1.bf16.msra.mxu0 %v22438_v62  ;;  %v22500_v15 = vld [vmem:[%s24556_s18 + $0x4f4] ss:$24 sps:$4 sm:$0xff]   ;;  %v22495_v7 = vld [vmem:[%s24556_s18 + $0x4e0] ss:$24 sps:$4 sm:$0xff]   ;;  %v22498_v62 = vld [vmem:[%s24556_s18 + $0x4f0] ss:$24 sps:$4 sm:$0xff]  }
0x2515   : > { %14206 = vmatprep.mubr.bf16.mxu1 %v26711_v47  ;;  %14378 = vmatprep.mubr.bf16.mxu0 %v26711_v47  ;;  %v22503_v33 = vld [vmem:[%s24556_s18 + $0x514] ss:$24 sps:$4 sm:$0xff]   ;;  %v22506_v57 = vld [vmem:[%s24556_s18 + $0x524] ss:$24 sps:$4 sm:$0xff]  }
0x2516   : > { %14176 = vmatprep.subr.bf16.mxu1 %v22443_v39  ;;  %14348 = vmatprep.subr.bf16.mxu0 %v22446_v19  ;;  %v22501_v39 = vld [vmem:[%s24556_s18 + $0x510] ss:$24 sps:$4 sm:$0xff]   ;;  %v22504_v19 = vld [vmem:[%s24556_s18 + $0x520] ss:$24 sps:$4 sm:$0xff]  }
0x2518   : > { %14177 = vmatpush1.bf16.msra.mxu1 %v22441_v36  ;;  %14349 = vmatpush1.bf16.msra.mxu0 %v22444_v24  ;;  %v22509_v36 = vld [vmem:[%s24556_s18 + $0x544] ss:$24 sps:$4 sm:$0xff]   ;;  %v22512_v24 = vld [vmem:[%s24556_s18 + $0x554] ss:$24 sps:$4 sm:$0xff]  }
0x2519   : > { %14178 = vmatprep.subr.bf16.mxu1 %v22449_v17  ;;  %14350 = vmatprep.subr.bf16.mxu0 %v22452_v10  ;;  %v22507_v17 = vld [vmem:[%s24556_s18 + $0x540] ss:$24 sps:$4 sm:$0xff]   ;;  %v22510_v10 = vld [vmem:[%s24556_s18 + $0x550] ss:$24 sps:$4 sm:$0xff]  }
0x251c   : > { %14179 = vmatpush1.bf16.msra.mxu1 %v22447_v28  ;;  %14351 = vmatpush1.bf16.msra.mxu0 %v22450_v11  ;;  %v22515_v28 = vld [vmem:[%s24556_s18 + $0x574] ss:$24 sps:$4 sm:$0xff]   ;;  %v22518_v11 = vld [vmem:[%s24556_s18 + $0x584] ss:$24 sps:$4 sm:$0xff]  }
0x251d   : > { %14180 = vmatprep.subr.bf16.mxu1 %v22455_v1  ;;  %14352 = vmatprep.subr.bf16.mxu0 %v22458_v46  ;;  %v22513_v1 = vld [vmem:[%s24556_s18 + $0x570] ss:$24 sps:$4 sm:$0xff]   ;;  %v22516_v46 = vld [vmem:[%s24556_s18 + $0x580] ss:$24 sps:$4 sm:$0xff]  }
0x2520   : > { %14181 = vmatpush1.bf16.msra.mxu1 %v22453_v34  ;;  %14353 = vmatpush1.bf16.msra.mxu0 %v22456_v40  ;;  %v22521_v34 = vld [vmem:[%s24556_s18 + $0x5a4] ss:$24 sps:$4 sm:$0xff]   ;;  %v22524_v40 = vld [vmem:[%s24556_s18 + $0x5b4] ss:$24 sps:$4 sm:$0xff]  }
0x2521   : > { %14182 = vmatprep.subr.bf16.mxu1 %v22461_v21  ;;  %14354 = vmatprep.subr.bf16.mxu0 %v22464_v22  ;;  %v22519_v21 = vld [vmem:[%s24556_s18 + $0x5a0] ss:$24 sps:$4 sm:$0xff]   ;;  %v22522_v22 = vld [vmem:[%s24556_s18 + $0x5b0] ss:$24 sps:$4 sm:$0xff]  }
0x2524   : > { %14183 = vmatpush1.bf16.msra.mxu1 %v22459_v14  ;;  %14355 = vmatpush1.bf16.msra.mxu0 %v22462_v54  ;;  %v22527_v14 = vld [vmem:[%s24556_s18 + $0x5d4] ss:$24 sps:$4 sm:$0xff]   ;;  %v22530_v54 = vld [vmem:[%s24556_s18 + $0x5e4] ss:$24 sps:$4 sm:$0xff]  }
0x2525   : > { %14184 = vmatprep.subr.bf16.mxu1 %v22467_v35  ;;  %14356 = vmatprep.subr.bf16.mxu0 %v22470_v31  ;;  %v22525_v35 = vld [vmem:[%s24556_s18 + $0x5d0] ss:$24 sps:$4 sm:$0xff]   ;;  %v22528_v31 = vld [vmem:[%s24556_s18 + $0x5e0] ss:$24 sps:$4 sm:$0xff]  }
0x2528   : > { %14185 = vmatpush1.bf16.msra.mxu1 %v22465_v0  ;;  %14357 = vmatpush1.bf16.msra.mxu0 %v22468_v37  ;;  %v22533_v0 = vld [vmem:[%s24556_s18 + $0xc] ss:$24 sps:$4 sm:$0xff]   ;;  %v22531_v37 = vld [vmem:[%s24556_s18 + $0x8] ss:$24 sps:$4 sm:$0xff]  }
0x2529   : > { %14186 = vmatprep.subr.bf16.mxu1 %v22473_v13  ;;  %14358 = vmatprep.subr.bf16.mxu0 %v22476_v4  ;;  %v22536_v13 = vld [vmem:[%s24556_s18 + $0x3c] ss:$24 sps:$4 sm:$0xff]   ;;  %v22534_v4 = vld [vmem:[%s24556_s18 + $0x38] ss:$24 sps:$4 sm:$0xff]  }
0x252c   : > { %14187 = vmatpush1.bf16.msra.mxu1 %v22471_v53  ;;  %14359 = vmatpush1.bf16.msra.mxu0 %v22474_v23  ;;  %v22539_v53 = vld [vmem:[%s24556_s18 + $0x6c] ss:$24 sps:$4 sm:$0xff]   ;;  %v22537_v23 = vld [vmem:[%s24556_s18 + $0x68] ss:$24 sps:$4 sm:$0xff]  }
0x252d   : > { %14188 = vmatprep.subr.bf16.mxu1 %v22479_v51  ;;  %14360 = vmatprep.subr.bf16.mxu0 %v22482_v26  ;;  %v22542_v51 = vld [vmem:[%s24556_s18 + $0x9c] ss:$24 sps:$4 sm:$0xff]   ;;  %v22540_v26 = vld [vmem:[%s24556_s18 + $0x98] ss:$24 sps:$4 sm:$0xff]  }
0x2530   : > { %14189 = vmatpush1.bf16.msra.mxu1 %v22477_v18  ;;  %14361 = vmatpush1.bf16.msra.mxu0 %v22480_v9  ;;  %v22545_v18 = vld [vmem:[%s24556_s18 + $0xcc] ss:$24 sps:$4 sm:$0xff]   ;;  %v22543_v9 = vld [vmem:[%s24556_s18 + $0xc8] ss:$24 sps:$4 sm:$0xff]  }
0x2531   : > { %14190 = vmatprep.subr.bf16.mxu1 %v22485_v60  ;;  %14362 = vmatprep.subr.bf16.mxu0 %v22488_v49  ;;  %v22546_v60 = vld [vmem:[%s24556_s18 + $0xf8] ss:$24 sps:$4 sm:$0xff]   ;;  %v22551_v49 = vld [vmem:[%s24556_s18 + $0x12c] ss:$24 sps:$4 sm:$0xff]  }
0x2534   : > { %14191 = vmatpush1.bf16.msra.mxu1 %v22483_v52  ;;  %14363 = vmatpush1.bf16.msra.mxu0 %v22486_v32  ;;  %v22549_v52 = vld [vmem:[%s24556_s18 + $0x128] ss:$24 sps:$4 sm:$0xff]   ;;  %v22554_v32 = vld [vmem:[%s24556_s18 + $0x15c] ss:$24 sps:$4 sm:$0xff]  }
0x2535   : > { %14192 = vmatprep.subr.bf16.mxu1 %v22491_v63  ;;  %14364 = vmatprep.subr.bf16.mxu0 %v22494_v43  ;;  %v22552_v63 = vld [vmem:[%s24556_s18 + $0x158] ss:$24 sps:$4 sm:$0xff]   ;;  %v22557_v43 = vld [vmem:[%s24556_s18 + $0x18c] ss:$24 sps:$4 sm:$0xff]  }
0x2538   : > { %14193 = vmatpush1.bf16.msra.mxu1 %v22489_v12  ;;  %14365 = vmatpush1.bf16.msra.mxu0 %v22492_v58  ;;  %v22555_v12 = vld [vmem:[%s24556_s18 + $0x188] ss:$24 sps:$4 sm:$0xff]   ;;  %v22560_v58 = vld [vmem:[%s24556_s18 + $0x1bc] ss:$24 sps:$4 sm:$0xff]  }
0x2539   : > { %14194 = vmatprep.subr.bf16.mxu1 %v22497_v20  ;;  %14366 = vmatprep.subr.bf16.mxu0 %v22500_v15  ;;  %v22558_v20 = vld [vmem:[%s24556_s18 + $0x1b8] ss:$24 sps:$4 sm:$0xff]   ;;  %v22563_v15 = vld [vmem:[%s24556_s18 + $0x1ec] ss:$24 sps:$4 sm:$0xff]  }
0x253c   : > { %14195 = vmatpush1.bf16.msra.mxu1 %v22495_v7  ;;  %14367 = vmatpush1.bf16.msra.mxu0 %v22498_v62  ;;  %v22561_v7 = vld [vmem:[%s24556_s18 + $0x1e8] ss:$24 sps:$4 sm:$0xff]   ;;  %v22566_v62 = vld [vmem:[%s24556_s18 + $0x21c] ss:$24 sps:$4 sm:$0xff]  }
0x253d   : > { %14196 = vmatprep.subr.bf16.mxu1 %v22503_v33  ;;  %14368 = vmatprep.subr.bf16.mxu0 %v22506_v57  ;;  %v22564_v33 = vld [vmem:[%s24556_s18 + $0x218] ss:$24 sps:$4 sm:$0xff]   ;;  %v22569_v57 = vld [vmem:[%s24556_s18 + $0x24c] ss:$24 sps:$4 sm:$0xff]  }
0x2540   : > { %14197 = vmatpush1.bf16.msra.mxu1 %v22501_v39  ;;  %14369 = vmatpush1.bf16.msra.mxu0 %v22504_v19  ;;  %v22567_v39 = vld [vmem:[%s24556_s18 + $0x248] ss:$24 sps:$4 sm:$0xff]   ;;  %v22572_v19 = vld [vmem:[%s24556_s18 + $0x27c] ss:$24 sps:$4 sm:$0xff]  }
0x2541   : > { %14198 = vmatprep.subr.bf16.mxu1 %v22509_v36  ;;  %14370 = vmatprep.subr.bf16.mxu0 %v22512_v24  ;;  %v22570_v36 = vld [vmem:[%s24556_s18 + $0x278] ss:$24 sps:$4 sm:$0xff]   ;;  %v22575_v24 = vld [vmem:[%s24556_s18 + $0x2ac] ss:$24 sps:$4 sm:$0xff]  }
0x2544   : > { %14199 = vmatpush1.bf16.msra.mxu1 %v22507_v17  ;;  %14371 = vmatpush1.bf16.msra.mxu0 %v22510_v10  ;;  %v22573_v17 = vld [vmem:[%s24556_s18 + $0x2a8] ss:$24 sps:$4 sm:$0xff]   ;;  %v22578_v10 = vld [vmem:[%s24556_s18 + $0x2dc] ss:$24 sps:$4 sm:$0xff]  }
0x2545   : > { %14200 = vmatprep.subr.bf16.mxu1 %v22515_v28  ;;  %14372 = vmatprep.subr.bf16.mxu0 %v22518_v11  ;;  %v22576_v28 = vld [vmem:[%s24556_s18 + $0x2d8] ss:$24 sps:$4 sm:$0xff]   ;;  %v22581_v11 = vld [vmem:[%s24556_s18 + $0x30c] ss:$24 sps:$4 sm:$0xff]  }
0x2548   : > { %14201 = vmatpush1.bf16.msra.mxu1 %v22513_v1  ;;  %14373 = vmatpush1.bf16.msra.mxu0 %v22516_v46  ;;  %v22579_v1 = vld [vmem:[%s24556_s18 + $0x308] ss:$24 sps:$4 sm:$0xff]   ;;  %v22584_v46 = vld [vmem:[%s24556_s18 + $0x33c] ss:$24 sps:$4 sm:$0xff]  }
0x2549   : > { %14202 = vmatprep.subr.bf16.mxu1 %v22521_v34  ;;  %14374 = vmatprep.subr.bf16.mxu0 %v22524_v40  ;;  %v22582_v34 = vld [vmem:[%s24556_s18 + $0x338] ss:$24 sps:$4 sm:$0xff]   ;;  %v22587_v40 = vld [vmem:[%s24556_s18 + $0x36c] ss:$24 sps:$4 sm:$0xff]  }
0x254c   : > { %14203 = vmatpush1.bf16.msra.mxu1 %v22519_v21  ;;  %14375 = vmatpush1.bf16.msra.mxu0 %v22522_v22  ;;  %v22585_v21 = vld [vmem:[%s24556_s18 + $0x368] ss:$24 sps:$4 sm:$0xff]   ;;  %v22590_v22 = vld [vmem:[%s24556_s18 + $0x39c] ss:$24 sps:$4 sm:$0xff]  }
0x254d   : > { %14204 = vmatprep.subr.bf16.mxu1 %v22527_v14  ;;  %14376 = vmatprep.subr.bf16.mxu0 %v22530_v54  ;;  %v22588_v14 = vld [vmem:[%s24556_s18 + $0x398] ss:$24 sps:$4 sm:$0xff]   ;;  %v22591_v54 = vld [vmem:[%s24556_s18 + $0x3c8] ss:$24 sps:$4 sm:$0xff]  }
0x2550   : > { %14205 = vmatpush1.bf16.msra.mxu1 %v22525_v35  ;;  %14377 = vmatpush1.bf16.msra.mxu0 %v22528_v31  ;;  %v22594_v35 = vld [vmem:[%s24556_s18 + $0x3f8] ss:$24 sps:$4 sm:$0xff]   ;;  %v22599_v31 = vld [vmem:[%s24556_s18 + $0x42c] ss:$24 sps:$4 sm:$0xff]  }
0x2551   : > { %14217 = vmatprep.subr.bf16.mxu1 %v22533_v0  ;;  %v22597_v0 = vld [vmem:[%s24556_s18 + $0x428] ss:$24 sps:$4 sm:$0xff]  }
0x2553   : > { %14207 = vmatmul.mubr.bf16.vlgmr.msra.gmra.mrb[120].mxu1 %v26703_v3  ;;  %14379 = vmatmul.mubr.bf16.vlgmr.msra.gmra.mrb[32].mxu0 %v26703_v3 }
0x2554   : > { %14218 = vmatpush1.bf16.msra.mxu1 %v22531_v37  ;;  %14249 = vmatprep.mubr.bf16.mxu1 %v26705_v30  ;;  %v22548_v30 = vld [vmem:[%s24556_s18 + $0xfc] ss:$24 sps:$4 sm:$0xff]  }
0x2555   : > { %14219 = vmatprep.subr.bf16.mxu1 %v22536_v13  ;;  %v22602_v37 = vld [vmem:[%s24556_s18 + $0x45c] ss:$24 sps:$4 sm:$0xff]   ;;  %v22600_v13 = vld [vmem:[%s24556_s18 + $0x458] ss:$24 sps:$4 sm:$0xff]  }
0x2558   : > { %14220 = vmatpush1.bf16.msra.mxu1 %v22534_v4  ;;  %v22605_v4 = vld [vmem:[%s24556_s18 + $0x48c] ss:$24 sps:$4 sm:$0xff]  }
0x2559   : > { %14221 = vmatprep.subr.bf16.mxu1 %v22539_v53  ;;  %v22603_v53 = vld [vmem:[%s24556_s18 + $0x488] ss:$24 sps:$4 sm:$0xff]  }
0x255c   : > { %14222 = vmatpush1.bf16.msra.mxu1 %v22537_v23  ;;  %v22608_v23 = vld [vmem:[%s24556_s18 + $0x4bc] ss:$24 sps:$4 sm:$0xff]  }
0x255d   : > { %14223 = vmatprep.subr.bf16.mxu1 %v22542_v51  ;;  %v22606_v51 = vld [vmem:[%s24556_s18 + $0x4b8] ss:$24 sps:$4 sm:$0xff]  }
0x2560   : > { %14224 = vmatpush1.bf16.msra.mxu1 %v22540_v26  ;;  %v22611_v26 = vld [vmem:[%s24556_s18 + $0x4ec] ss:$24 sps:$4 sm:$0xff]  }
0x2561   : > { %14225 = vmatprep.subr.bf16.mxu1 %v22545_v18  ;;  %v22609_v18 = vld [vmem:[%s24556_s18 + $0x4e8] ss:$24 sps:$4 sm:$0xff]  }
0x2564   : > { %14226 = vmatpush1.bf16.msra.mxu1 %v22543_v9  ;;  %v22614_v9 = vld [vmem:[%s24556_s18 + $0x51c] ss:$24 sps:$4 sm:$0xff]  }
0x2565   : > { %14227 = vmatprep.subr.bf16.mxu1 %v22548_v30  ;;  %v22612_v30 = vld [vmem:[%s24556_s18 + $0x518] ss:$24 sps:$4 sm:$0xff]  }
0x2568   : > { %14228 = vmatpush1.bf16.msra.mxu1 %v22546_v60  ;;  %v22617_v60 = vld [vmem:[%s24556_s18 + $0x54c] ss:$24 sps:$4 sm:$0xff]  }
0x2569   : > { %14229 = vmatprep.subr.bf16.mxu1 %v22551_v49  ;;  %v22615_v49 = vld [vmem:[%s24556_s18 + $0x548] ss:$24 sps:$4 sm:$0xff]  }
0x256c   : > { %14230 = vmatpush1.bf16.msra.mxu1 %v22549_v52  ;;  %v22620_v52 = vld [vmem:[%s24556_s18 + $0x57c] ss:$24 sps:$4 sm:$0xff]  }
0x256d   : > { %14231 = vmatprep.subr.bf16.mxu1 %v22554_v32  ;;  %v22618_v32 = vld [vmem:[%s24556_s18 + $0x578] ss:$24 sps:$4 sm:$0xff]  }
0x2570   : > { %14232 = vmatpush1.bf16.msra.mxu1 %v22552_v63  ;;  %v22623_v63 = vld [vmem:[%s24556_s18 + $0x5ac] ss:$24 sps:$4 sm:$0xff]  }
0x2571   : > { %14233 = vmatprep.subr.bf16.mxu1 %v22557_v43  ;;  %v22621_v43 = vld [vmem:[%s24556_s18 + $0x5a8] ss:$24 sps:$4 sm:$0xff]  }
0x2574   : > { %14234 = vmatpush1.bf16.msra.mxu1 %v22555_v12  ;;  %v22626_v12 = vld [vmem:[%s24556_s18 + $0x5dc] ss:$24 sps:$4 sm:$0xff]  }
0x2575   : > { %14235 = vmatprep.subr.bf16.mxu1 %v22560_v58  ;;  %v22624_v58 = vld [vmem:[%s24556_s18 + $0x5d8] ss:$24 sps:$4 sm:$0xff]  }
0x2578   : > { %14236 = vmatpush1.bf16.msra.mxu1 %v22558_v20 }
0x2579   : > { %14237 = vmatprep.subr.bf16.mxu1 %v22563_v15 }
0x257c   : > { %14238 = vmatpush1.bf16.msra.mxu1 %v22561_v7 }
0x257d   : > { %14239 = vmatprep.subr.bf16.mxu1 %v22566_v62 }
0x2580   : > { %14240 = vmatpush1.bf16.msra.mxu1 %v22564_v33 }
0x2581   : > { %14241 = vmatprep.subr.bf16.mxu1 %v22569_v57 }
0x2584   : > { %14242 = vmatpush1.bf16.msra.mxu1 %v22567_v39 }
0x2585   : > { %14243 = vmatprep.subr.bf16.mxu1 %v22572_v19 }
0x2588   : > { %14244 = vmatpush1.bf16.msra.mxu1 %v22570_v36  ;;  %v13135_v36 = vld [vmem:[%s27351_s23] sm:$0x3f] }
0x2589   : > { %14245 = vmatprep.subr.bf16.mxu1 %v22575_v24  ;;  %v13144_v24 = vrot.slane %v13135_v36, %v25163_v2 }
0x258c   : > { %14246 = vmatpush1.bf16.msra.mxu1 %v22573_v17  ;;  %v13148_v17 = vrot.slane %v13135_v36, %v25168_v5 }
0x258d   : > { %14247 = vmatprep.subr.bf16.mxu1 %v22578_v10 }
0x2590   : > { %14248 = vmatpush1.bf16.msra.mxu1 %v22576_v28 }
0x2591   : > { %14260 = vmatprep.subr.bf16.mxu1 %v22581_v11 }
0x2593   : > { %14250 = vmatmul.mubr.bf16.vlgmr.msra.gmra.mrb[124].mxu1 %v26699_v55  ;;  %v22593_v55 = vld [vmem:[%s24556_s18 + $0x3cc] ss:$24 sps:$4 sm:$0xff]  }
0x2594   : > { %14261 = vmatpush1.bf16.msra.mxu1 %v22579_v1  ;;  %14292 = vmatprep.mubr.bf16.mxu1 %v26711_v47  ;;  %v22596_v47 = vld [vmem:[%s24556_s18 + $0x3fc] ss:$24 sps:$4 sm:$0xff]   ;;  %s27353_s18 = scalar_lea.vmem [#allocation20], %s24543_s19  ;;  %s27354_s19 = sld [smem:[#allocation37_spill]] }
0x2595   : > { %14262 = vmatprep.subr.bf16.mxu1 %v22584_v46  ;;  %v13156_v46 = vrot.slane %v13135_v36, %v25085_v48 }
0x2598   : > { %14263 = vmatpush1.bf16.msra.mxu1 %v22582_v34 }
0x2599   : > { %14264 = vmatprep.subr.bf16.mxu1 %v22587_v40  ;;  %v13160_v40 = vrot.slane %v13135_v36, %v25396_v44 }
0x259a   : > { %p19276_p8 = scmp.ne.s32.totalorder %s27354_s19, 1 }
0x259b   : > { %vm14595_vm3 = vcmask (!%p19276_p8), 1040384   ;;  %s27355_s2 = sld [smem:[#allocation54_spill]] (!%p19276_p8)  ;;  %s27356_s23 = sld [smem:[#allocation56_spill]] (!%p19276_p8)  ;;  %vm23853_vm4 = vmmov (!%p19276_p8), 0   ;;  %vm17301_vm5 = vcmask (!%p19276_p8), 523264   ;;  %vm17345_vm6 = vcmask (!%p19276_p8), 9216  }
0x259c   : > { %14265 = vmatpush1.bf16.msra.mxu1 %v22585_v21 }
0x259d   : > { %14266 = vmatprep.subr.bf16.mxu1 %v22590_v22  ;;  %v13164_v22 = vrot.slane %v13135_v36, %v25401_v25 }
0x25a0   : > { %14267 = vmatpush1.bf16.msra.mxu1 %v22588_v14 }
0x25a1   : > { %14268 = vmatprep.subr.bf16.mxu1 %v22593_v55 }
0x25a4   : > { %14269 = vmatpush1.bf16.msra.mxu1 %v22591_v54 }
0x25a5   : > { %14270 = vmatprep.subr.bf16.mxu1 %v22596_v47 }
0x25a8   : > { %14271 = vmatpush1.bf16.msra.mxu1 %v22594_v35 }
0x25a9   : > { %14272 = vmatprep.subr.bf16.mxu1 %v22599_v31 }
0x25ac   : > { %14273 = vmatpush1.bf16.msra.mxu1 %v22597_v0 }
0x25ad   : > { %14274 = vmatprep.subr.bf16.mxu1 %v22602_v37 }
0x25b0   : > { %14275 = vmatpush1.bf16.msra.mxu1 %v22600_v13 }
0x25b1   : > { %14276 = vmatprep.subr.bf16.mxu1 %v22605_v4 }
0x25b4   : > { %14277 = vmatpush1.bf16.msra.mxu1 %v22603_v53 }
0x25b5   : > { %14278 = vmatprep.subr.bf16.mxu1 %v22608_v23 }
0x25b8   : > { %14279 = vmatpush1.bf16.msra.mxu1 %v22606_v51 }
0x25b9   : > { %14280 = vmatprep.subr.bf16.mxu1 %v22611_v26 }
0x25bc   : > { %14281 = vmatpush1.bf16.msra.mxu1 %v22609_v18 }
0x25bd   : > { %14282 = vmatprep.subr.bf16.mxu1 %v22614_v9 }
0x25c0   : > { %14283 = vmatpush1.bf16.msra.mxu1 %v22612_v30 }
0x25c1   : > { %14284 = vmatprep.subr.bf16.mxu1 %v22617_v60 }
0x25c4   : > { %14285 = vmatpush1.bf16.msra.mxu1 %v22615_v49 }
0x25c5   : > { %14286 = vmatprep.subr.bf16.mxu1 %v22620_v52 }
0x25c8   : > { %14287 = vmatpush1.bf16.msra.mxu1 %v22618_v32 }
0x25c9   : > { %14288 = vmatprep.subr.bf16.mxu1 %v22623_v63 }
0x25cc   : > { %14289 = vmatpush1.bf16.msra.mxu1 %v22621_v43 }
0x25cd   : > { %14290 = vmatprep.subr.bf16.mxu1 %v22626_v12 }
0x25d0   : > { %14291 = vmatpush1.bf16.msra.mxu1 %v22624_v58 }
0x25d3   : > { %14293 = vmatmul.mubr.bf16.vlgmr.msra.gmra.mrb[124].mxu1 %v26703_v3  ;;  %v13152_v3 = vrot.slane %v13135_v36, %v25081_v45 }
0x2626   : > { %v14208_v20 = vpop.f32.mrb[120].mxu1  ;;  %v14380_v15 = vpop.f32.mrb[32].mxu0 }
0x2627   : > { %v14210_v7 = vpop.f32.mrb[121].mxu1  ;;  %v14382_v62 = vpop.f32.mrb[33].mxu0  ;;  %v19956_v10 = vadd.f32 %v14208_v20, %v13144_v24  ;;  %v19964_v37 = vadd.f32 %v14380_v15, %v13160_v40 }
0x2628   : > { %v14212_v33 = vpop.f32.mrb[122].mxu1  ;;  %v14384_v57 = vpop.f32.mrb[34].mxu0  ;;  %v19957_v28 = vadd.f32 %v14210_v7, %v13148_v17  ;;  %v19965_v23 = vadd.f32 %v14382_v62, %v13164_v22 }
0x2629   : > { %v14214_v39 = vpop.f32.mrb[123].mxu1  ;;  %v14386_v19 = vpop.f32.mrb[35].mxu0  ;;  %v19958_v11 = vadd.f32 %v14212_v33, %v13144_v24  ;;  %v14389_v34 = vadd.f32 %v19956_v10, %v26426_v27  ;;  %v19966_v26 = vadd.f32 %v14384_v57, %v13160_v40  ;;  %v14393_v30 = vadd.f32 %v19964_v37, %v26442_v29 }
0x262a   : > { %v19959_v1 = vadd.f32 %v14214_v39, %v13148_v17  ;;  %v14390_v21 = vadd.f32 %v19957_v28, %v26424_v41  ;;  %v19967_v60 = vadd.f32 %v14386_v19, %v13164_v22 }
0x262b   : > { %v14395_v55 = vadd.f32 %v19958_v11, %v26434_v6  ;;  %v14399_v32 = vadd.f32 %v19966_v26, %v26454_v56 }
0x262c   : > { %v14396_v54 = vadd.f32 %v19959_v1, %v26432_v42  ;;  %v14403_v13 = vadd.f32 %v14390_v21, %v14389_v34 }
0x262e   : > { %v14410_v18 = vadd.f32 %v14396_v54, %v14395_v55 }
0x26a6   : > { %v14294_v14 = vpop.f32.mrb[124].mxu1 }
0x26a7   : > { %v19960_v47 = vadd.f32 %v14294_v14, %v13152_v3  ;;  %v14296_v35 = vpop.f32.mrb[125].mxu1 }
0x26a8   : > { %v19961_v31 = vadd.f32 %v14296_v35, %v13156_v46  ;;  %v14298_v0 = vpop.f32.mrb[126].mxu1 }
0x26a9   : > { %v14391_v4 = vadd.f32 %v19960_v47, %v26428_v50  ;;  %v19962_v27 = vadd.f32 %v14298_v0, %v13152_v3  ;;  %v14300_v53 = vpop.f32.mrb[127].mxu1  ;;  %v14394_v50 = vadd.f32 %v19965_v23, %v26440_v16 }
0x26aa   : > { %v14392_v41 = vadd.f32 %v19961_v31, %v26450_v61  ;;  %v19963_v51 = vadd.f32 %v14300_v53, %v13156_v46  ;;  %v14400_v61 = vadd.f32 %v19967_v60, %v26452_v38 }
0x26ab   : > { %v14404_v9 = vadd.f32 %v14403_v13, %v14391_v4  ;;  %v14397_v6 = vadd.f32 %v19962_v27, %v26438_v8 }
0x26ac   : > { %v14398_v42 = vadd.f32 %v19963_v51, %v26436_v59 }
0x26ad   : > { %v14405_v49 = vadd.f32 %v14404_v9, %v14392_v41  ;;  %v14411_v52 = vadd.f32 %v14410_v18, %v14397_v6 }
0x26af   : > { %v14412_v63 = vadd.f32 %v14411_v52, %v14398_v42  ;;  %v14406_v43 = vadd.f32 %v14405_v49, %v14393_v30 }
0x26b1   : > { %v14407_v12 = vadd.f32 %v14406_v43, %v14394_v50  ;;  %v14413_v58 = vadd.f32 %v14412_v63, %v14399_v32 }
0x26b3   : > { %14408 = vadd.xlane.f32.xlu0 %v14407_v12  ;;  %v14414_v20 = vadd.f32 %v14413_v58, %v14400_v61 }
0x26b5   : > { %14415 = vadd.xlane.f32.xlu1 %v14414_v20 }
0x2740   : > { %v14409_v8 = vpop.xlane.xlu0 %14408 }
0x2741   : > { %v14417_v59 = vmul.f32 0.0013020834, %v14409_v8 }
0x2742   : > { %v14416_v15 = vpop.xlane.xlu1 %14415 }
0x2743   : > { %v14418_v29 = vmul.f32 0.0013020834, %v14416_v15  ;;  %v14419_v7 = vsub.f32 %v14389_v34, %v14417_v59  ;;  %v14420_v62 = vsub.f32 %v14390_v21, %v14417_v59  ;;  %v14421_v33 = vsub.f32 %v14391_v4, %v14417_v59 }
0x2744   : > { %v14422_v57 = vsub.f32 %v14392_v41, %v14417_v59  ;;  %v14423_v38 = vsub.f32 %v14393_v30, %v14417_v59  ;;  %v14424_v1 = vsub.f32 %v14394_v50, %v14417_v59 }
0x2745   : > { %v14431_v16 = vmul.f32 %v14419_v7, %v14419_v7  ;;  %v14432_v39 = vmul.f32 %v14420_v62, %v14420_v62  ;;  %v26867_v56 = vsub.f32 %v14395_v55, %v14418_v29  ;;  %v26869_v19 = vsub.f32 %v14396_v54, %v14418_v29 }
0x2746   : > { %v14433_v36 = vmul.f32 %v14421_v33, %v14421_v33  ;;  %v26871_v17 = vsub.f32 %v14397_v6, %v14418_v29  ;;  %v26873_v10 = vsub.f32 %v14398_v42, %v14418_v29  ;;  %v14434_v3 = vmul.f32 %v14422_v57, %v14422_v57  ;;  %v14401_v6 = vld [vmem:[%s27352_s27] sm:$0x3f]  ;;  %v14402_v42 = vld [vmem:[%s27353_s18] sm:$0x3f] }
0x2747   : > { %v14443_v24 = vadd.f32 %v14432_v39, %v14431_v16  ;;  %v14437_v28 = vmul.f32 %v26867_v56, %v26867_v56  ;;  %v14438_v11 = vmul.f32 %v26869_v19, %v26869_v19  ;;  %v26879_v34 = vsub.f32 %v14399_v32, %v14418_v29 }
0x2748   : > { %v14439_v40 = vmul.f32 %v26871_v17, %v26871_v17  ;;  %v14435_v22 = vmul.f32 %v14423_v38, %v14423_v38  ;;  %v26883_v55 = vsub.f32 %v14400_v61, %v14418_v29  ;;  %v14440_v54 = vmul.f32 %v26873_v10, %v26873_v10 }
0x2749   : > { %v14444_v46 = vadd.f32 %v14443_v24, %v14433_v36  ;;  %v14450_v21 = vadd.f32 %v14438_v11, %v14437_v28  ;;  %v14436_v35 = vmul.f32 %v14424_v1, %v14424_v1  ;;  %v14441_v0 = vmul.f32 %v26879_v34, %v26879_v34 }
0x274a   : > { %v14442_v4 = vmul.f32 %v26883_v55, %v26883_v55  ;;  %v14479_v30 = vrot.slane %v14401_v6, %v25163_v2  ;;  %v14483_v60 = vrot.slane %v14401_v6, %v25168_v5  ;;  %v14487_v49 = vrot.slane %v14401_v6, %v25081_v45 }
0x274b   : > { %v14445_v14 = vadd.f32 %v14444_v46, %v14434_v3  ;;  %v14451_v47 = vadd.f32 %v14450_v21, %v14439_v40  ;;  %v14491_v52 = vrot.slane %v14401_v6, %v25085_v48  ;;  %v14495_v50 = vrot.slane %v14401_v6, %v25396_v44 }
0x274c   : > { %v14522_v32 = vrot.slane %v14402_v42, %v25163_v2  ;;  %v14526_v43 = vrot.slane %v14402_v42, %v25168_v5  ;;  %v14530_v61 = vrot.slane %v14402_v42, %v25081_v45  ;;  %v14534_v12 = vrot.slane %v14402_v42, %v25085_v48 }
0x274d   : > { %v14446_v31 = vadd.f32 %v14445_v14, %v14435_v22  ;;  %v14452_v37 = vadd.f32 %v14451_v47, %v14440_v54  ;;  %v14499_v58 = vrot.slane %v14401_v6, %v25401_v25  ;;  %v14538_v29 = vrot.slane %v14402_v42, %v25396_v44 }
0x274e   : > { %v14542_v16 = vrot.slane %v14402_v42, %v25401_v25  ;;  %v22718_v42 = vld [vmem:[#allocation21 + $0x34] ss:$24 sps:$4 sm:$0xff] (!%p19276_p8)  }
0x274f   : > { %v14447_v13 = vadd.f32 %v14446_v31, %v14436_v35  ;;  %v14453_v27 = vadd.f32 %v14452_v37, %v14441_v0 }
0x2751   : > { %14448 = vadd.xlane.f32.xlu0 %v14447_v13  ;;  %v14454_v53 = vadd.f32 %v14453_v27, %v14442_v4 }
0x2753   : > { %14455 = vadd.xlane.f32.xlu1 %v14454_v53 }
0x27de   : > { %v14449_v23 = vpop.xlane.xlu0 %14448 }
0x27df   : > { %v14457_v41 = vmul.f32 0.0013020834, %v14449_v23 }
0x27e0   : > { %v14456_v26 = vpop.xlane.xlu1 %14455 }
0x27e1   : > { %v14459_v51 = vadd.f32 1e-12, %v14457_v41  ;;  %v14458_v18 = vmul.f32 0.0013020834, %v14456_v26 }
0x27e3   : > { %22695 = vrsqrt.f32 %v14459_v51  ;;  %v14460_v9 = vadd.f32 1e-12, %v14458_v18  ;;  %v22714_v51 = vld [vmem:[#allocation21 + $0x304] ss:$24 sps:$4 sm:$0xff] (!%p19276_p8)   ;;  %v22716_v18 = vld [vmem:[#allocation21] ss:$24 sps:$4 sm:$0xff] (!%p19276_p8)  }
0x27e4   : > { %16409 = vmatprep.subr.bf16.mxu0 (!%p19276_p8), %v22714_v51  ;;  %v22782_v51 = vld [vmem:[#allocation21 + $0x210] ss:$24 sps:$4 sm:$0xff] (!%p19276_p8)  }
0x27e5   : > { %22697 = vrsqrt.f32 %v14460_v9  ;;  %v22717_v9 = vld [vmem:[#allocation21 + $0x300] ss:$24 sps:$4 sm:$0xff] (!%p19276_p8)  }
0x27e6   : > { %16410 = vmatpush1.bf16.msra.mxu0 (!%p19276_p8), %v22717_v9  ;;  %v22786_v9 = vld [vmem:[#allocation21 + $0x544] ss:$24 sps:$4 sm:$0xff] (!%p19276_p8)  }
0x27ed   : > { %v22696_v63 = vpop.eup %22695 }
0x27ee   : > { %v14463_v20 = vmul.f32 %v22696_v63, %v14419_v7  ;;  %v14464_v8 = vmul.f32 %v22696_v63, %v14420_v62  ;;  %v14465_v59 = vmul.f32 %v22696_v63, %v14421_v33  ;;  %v14466_v15 = vmul.f32 %v22696_v63, %v14422_v57 }
0x27ef   : > { %v14467_v39 = vmul.f32 %v22696_v63, %v14423_v38  ;;  %v14468_v36 = vmul.f32 %v22696_v63, %v14424_v1  ;;  %v22698_v24 = vpop.eup %22697  ;;  %v22724_v63 = vld [vmem:[#allocation21 + $0x64] ss:$24 sps:$4 sm:$0xff] (!%p19276_p8)  }
0x27f0   : > { %v14506_v28 = vmul.f32 %v14479_v30, %v14463_v20  ;;  %v14507_v11 = vmul.f32 %v14483_v60, %v14464_v8  ;;  %v14508_v3 = vmul.f32 %v14487_v49, %v14465_v59  ;;  %v14509_v46 = vmul.f32 %v14491_v52, %v14466_v15  ;;  %v22732_v20 = vld [vmem:[#allocation21 + $0x394] ss:$24 sps:$4 sm:$0xff] (!%p19276_p8)   ;;  %v22734_v8 = vld [vmem:[#allocation21 + $0x90] ss:$24 sps:$4 sm:$0xff] (!%p19276_p8)   ;;  %v22736_v15 = vld [vmem:[#allocation21 + $0xc4] ss:$24 sps:$4 sm:$0xff] (!%p19276_p8)  }
0x27f1   : > { %v14510_v40 = vmul.f32 %v14495_v50, %v14467_v39  ;;  %v14511_v21 = vmul.f32 %v14499_v58, %v14468_v36  ;;  %v14469_v22 = vmul.f32 %v22698_v24, %v26867_v56  ;;  %v14470_v7 = vmul.f32 %v22698_v24, %v26869_v19  ;;  %v22735_v59 = vld [vmem:[#allocation21 + $0x390] ss:$24 sps:$4 sm:$0xff] (!%p19276_p8)   ;;  %v22741_v39 = vld [vmem:[#allocation21 + $0x3c0] ss:$24 sps:$4 sm:$0xff] (!%p19276_p8)   ;;  %v22742_v36 = vld [vmem:[#allocation21 + $0xf4] ss:$24 sps:$4 sm:$0xff] (!%p19276_p8)  }
0x27f2   : > { %v26909_v62 = vadd.f32 %v14522_v32, %v14506_v28  ;;  %v14550_v33 = vadd.f32 %v14526_v43, %v14507_v11  ;;  %v26911_v57 = vadd.f32 %v14530_v61, %v14508_v3  ;;  %v14552_v14 = vadd.f32 %v14534_v12, %v14509_v46  ;;  %v22746_v28 = vld [vmem:[#allocation21 + $0xf0] ss:$24 sps:$4 sm:$0xff] (!%p19276_p8)   ;;  %v22748_v3 = vld [vmem:[#allocation21 + $0x124] ss:$24 sps:$4 sm:$0xff] (!%p19276_p8)  }
0x27f3   : > { %v26913_v54 = vadd.f32 %v14538_v29, %v14510_v40  ;;  %v26915_v38 = vadd.f32 %v14542_v16, %v14511_v21  ;;  %v14471_v1 = vmul.f32 %v22698_v24, %v26871_v17  ;;  %v14472_v47 = vmul.f32 %v22698_v24, %v26873_v10  ;;  %v22747_v11 = vld [vmem:[#allocation21 + $0x3f0] ss:$24 sps:$4 sm:$0xff] (!%p19276_p8)   ;;  %v22750_v46 = vld [vmem:[#allocation21 + $0x424] ss:$24 sps:$4 sm:$0xff] (!%p19276_p8)   ;;  %v22752_v40 = vld [vmem:[#allocation21 + $0x120] ss:$24 sps:$4 sm:$0xff] (!%p19276_p8)  }
0x27f4   : > { %14561 = vst [vmem:[#allocation2] sm:$0xff] %v26909_v62  ;;  %14562 = vst [vmem:[#allocation2 + $0x8] sm:$0xff] %v14550_v33  ;;  %v14473_v56 = vmul.f32 %v22698_v24, %v26879_v34  ;;  %v14474_v19 = vmul.f32 %v22698_v24, %v26883_v55  ;;  %v14512_v35 = vmul.f32 %v14479_v30, %v14469_v22  ;;  %v22712_v55 = vld [vmem:[#allocation21 + $0x4] ss:$24 sps:$4 sm:$0xff] (!%p19276_p8)   ;;  %v22744_v24 = vld [vmem:[#allocation21 + $0x3f4] ss:$24 sps:$4 sm:$0xff] (!%p19276_p8)  }
0x27f5   : > { %14563 = vst [vmem:[#allocation2 + $0x10] sm:$0xff] %v26911_v57  ;;  %14564 = vst [vmem:[#allocation2 + $0x18] sm:$0xff] %v14552_v14  ;;  %v14513_v31 = vmul.f32 %v14483_v60, %v14470_v7  ;;  %v14514_v0 = vmul.f32 %v14487_v49, %v14471_v1  ;;  %v14515_v17 = vmul.f32 %v14491_v52, %v14472_v47  ;;  %14576 = sbr.rel (%p19276_p8) target bundleno = 11530 (0x2d0a), region = 188  ;;  %16368 = vmatprep.subr.bf16.mxu1 (!%p19276_p8), %v22712_v55  ;;  %v22720_v49 = vld [vmem:[#allocation21 + $0x334] ss:$24 sps:$4 sm:$0xff] (!%p19276_p8)  }
0x27f6   : > { %14565 = vst [vmem:[#allocation2 + $0x20] sm:$0xff] %v26913_v54  ;;  %14566 = vst [vmem:[#allocation2 + $0x28] sm:$0xff] %v26915_v38  ;;  %v14516_v37 = vmul.f32 %v14495_v50, %v14473_v56  ;;  %v14517_v10 = vmul.f32 %v14499_v58, %v14474_v19  ;;  %v26925_v13 = vadd.f32 %v14522_v32, %v14512_v35  ;;  %16369 = vmatpush1.bf16.msra.mxu1 (!%p19276_p8), %v22716_v18  ;;  %v22722_v52 = vld [vmem:[#allocation21 + $0x30] ss:$24 sps:$4 sm:$0xff] (!%p19276_p8)   ;;  %v22730_v58 = vld [vmem:[#allocation21 + $0x94] ss:$24 sps:$4 sm:$0xff] (!%p19276_p8)  }
0x27f7   : > { %v14556_v4 = vadd.f32 %v14526_v43, %v14513_v31  ;;  %v26927_v27 = vadd.f32 %v14530_v61, %v14514_v0  ;;  %v14558_v53 = vadd.f32 %v14534_v12, %v14515_v17  ;;  %16370 = vmatprep.subr.bf16.mxu1 (!%p19276_p8), %v22718_v42  ;;  %v22723_v32 = vld [vmem:[#allocation21 + $0x330] ss:$24 sps:$4 sm:$0xff] (!%p19276_p8)   ;;  %16411 = vmatprep.subr.bf16.mxu0 (!%p19276_p8), %v22720_v49  ;;  %v22726_v43 = vld [vmem:[#allocation21 + $0x364] ss:$24 sps:$4 sm:$0xff] (!%p19276_p8)   ;;  %v22728_v61 = vld [vmem:[#allocation21 + $0x60] ss:$24 sps:$4 sm:$0xff] (!%p19276_p8)  }
0x27f8   : > { %v26929_v23 = vadd.f32 %v14538_v29, %v14516_v37  ;;  %v26931_v34 = vadd.f32 %v14542_v16, %v14517_v10  ;;  %14567 = vst [vmem:[#allocation2 + $0x30] sm:$0xff] %v26925_v13  ;;  %v22729_v12 = vld [vmem:[#allocation21 + $0x360] ss:$24 sps:$4 sm:$0xff] (!%p19276_p8)   ;;  %16412 = vmatpush1.bf16.msra.mxu0 (!%p19276_p8), %v22723_v32  ;;  %v22738_v29 = vld [vmem:[#allocation21 + $0x3c4] ss:$24 sps:$4 sm:$0xff] (!%p19276_p8)  }
0x27f9   : > { %14568 = vst [vmem:[#allocation2 + $0x38] sm:$0xff] %v14556_v4  ;;  %14569 = vst [vmem:[#allocation2 + $0x40] sm:$0xff] %v26927_v27  ;;  %v14584_v41 = vrot.slane (!%p19276_p8), %v14556_v4, 7  ;;  %v14586_v26 = vrot.slane (!%p19276_p8), %v14558_v53, 7  ;;  %16413 = vmatprep.subr.bf16.mxu0 (!%p19276_p8), %v22726_v43  ;;  %v22740_v16 = vld [vmem:[#allocation21 + $0xc0] ss:$24 sps:$4 sm:$0xff] (!%p19276_p8)  }
0x27fa   : > { %14570 = vst [vmem:[#allocation2 + $0x48] sm:$0xff] %v14558_v53  ;;  %14571 = vst [vmem:[#allocation2 + $0x50] sm:$0xff] %v26929_v23  ;;  %16371 = vmatpush1.bf16.msra.mxu1 (!%p19276_p8), %v22722_v52  ;;  %v22753_v21 = vld [vmem:[#allocation21 + $0x420] ss:$24 sps:$4 sm:$0xff] (!%p19276_p8)   ;;  %v22754_v22 = vld [vmem:[#allocation21 + $0x154] ss:$24 sps:$4 sm:$0xff] (!%p19276_p8)  }
0x27fb   : > { %14572 = vst [vmem:[#allocation2 + $0x58] sm:$0xff] %v26931_v34  ;;  %v14597_v6 = vsel (!%p19276_p8), %vm14595_vm3, %v14550_v33, %v14584_v41  ;;  %v14599_v60 = vsel (!%p19276_p8), %vm14595_vm3, %v14552_v14, %v14586_v26  ;;  %16372 = vmatprep.subr.bf16.mxu1 (!%p19276_p8), %v22724_v63  ;;  %v22756_v7 = vld [vmem:[#allocation21 + $0x454] ss:$24 sps:$4 sm:$0xff] (!%p19276_p8)   ;;  %v22758_v33 = vld [vmem:[#allocation21 + $0x150] ss:$24 sps:$4 sm:$0xff] (!%p19276_p8)  }
0x27fc   : > { %v26939_v30 = vpack.c.bf16 %v14597_v6, %v14597_v6  ;;  %v26942_v50 = vpack.c.bf16 %v14599_v60, %v14599_v60  ;;  %16414 = vmatpush1.bf16.msra.mxu0 %v22729_v12  ;;  %v22759_v14 = vld [vmem:[#allocation21 + $0x450] ss:$24 sps:$4 sm:$0xff]   ;;  %v22760_v1 = vld [vmem:[#allocation21 + $0x184] ss:$24 sps:$4 sm:$0xff]   ;;  %v22764_v56 = vld [vmem:[#allocation21 + $0x180] ss:$24 sps:$4 sm:$0xff]  }
0x27fd   : > { %16415 = vmatprep.subr.bf16.mxu0 %v22732_v20  ;;  %v22762_v47 = vld [vmem:[#allocation21 + $0x484] ss:$24 sps:$4 sm:$0xff]   ;;  %v22765_v19 = vld [vmem:[#allocation21 + $0x480] ss:$24 sps:$4 sm:$0xff]   ;;  %v22766_v35 = vld [vmem:[#allocation21 + $0x1b4] ss:$24 sps:$4 sm:$0xff]  }
0x27fe   : > { %16400 = vmatprep.mubr.bf16.mxu1 %v26939_v30  ;;  %16441 = vmatprep.mubr.bf16.mxu0 %v26942_v50  ;;  %v22768_v31 = vld [vmem:[#allocation21 + $0x4b4] ss:$24 sps:$4 sm:$0xff]   ;;  %v22770_v0 = vld [vmem:[#allocation21 + $0x1b0] ss:$24 sps:$4 sm:$0xff]   ;;  %v22772_v37 = vld [vmem:[#allocation21 + $0x1e4] ss:$24 sps:$4 sm:$0xff]  }
0x27ff   : > { %16373 = vmatpush1.bf16.msra.mxu1 %v22728_v61  ;;  %v22771_v17 = vld [vmem:[#allocation21 + $0x4b0] ss:$24 sps:$4 sm:$0xff]   ;;  %v22774_v10 = vld [vmem:[#allocation21 + $0x4e4] ss:$24 sps:$4 sm:$0xff]   ;;  %v22776_v4 = vld [vmem:[#allocation21 + $0x1e0] ss:$24 sps:$4 sm:$0xff]  }
0x2800   : > { %16374 = vmatprep.subr.bf16.mxu1 %v22730_v58  ;;  %16416 = vmatpush1.bf16.msra.mxu0 %v22735_v59  ;;  %v22777_v53 = vld [vmem:[#allocation21 + $0x4e0] ss:$24 sps:$4 sm:$0xff]   ;;  %v22778_v55 = vld [vmem:[#allocation21 + $0x214] ss:$24 sps:$4 sm:$0xff]   ;;  %v22783_v26 = vld [vmem:[#allocation21 + $0x510] ss:$24 sps:$4 sm:$0xff]  }
0x2801   : > { %16417 = vmatprep.subr.bf16.mxu0 %v22738_v29  ;;  %v22780_v41 = vld [vmem:[#allocation21 + $0x514] ss:$24 sps:$4 sm:$0xff]   ;;  %v22784_v18 = vld [vmem:[#allocation21 + $0x244] ss:$24 sps:$4 sm:$0xff]   ;;  %v22788_v6 = vld [vmem:[#allocation21 + $0x240] ss:$24 sps:$4 sm:$0xff]  }
0x2802   : > { %v22789_v42 = vld [vmem:[#allocation21 + $0x540] ss:$24 sps:$4 sm:$0xff]   ;;  %v22790_v60 = vld [vmem:[#allocation21 + $0x274] ss:$24 sps:$4 sm:$0xff]   ;;  %v22794_v52 = vld [vmem:[#allocation21 + $0x270] ss:$24 sps:$4 sm:$0xff]  }
0x2803   : > { %16375 = vmatpush1.bf16.msra.mxu1 %v22734_v8  ;;  %v22792_v49 = vld [vmem:[#allocation21 + $0x574] ss:$24 sps:$4 sm:$0xff]   ;;  %v22795_v32 = vld [vmem:[#allocation21 + $0x570] ss:$24 sps:$4 sm:$0xff]   ;;  %v22796_v63 = vld [vmem:[#allocation21 + $0x2a4] ss:$24 sps:$4 sm:$0xff]  }
0x2804   : > { %16376 = vmatprep.subr.bf16.mxu1 %v22736_v15  ;;  %16418 = vmatpush1.bf16.msra.mxu0 %v22741_v39  ;;  %v22798_v43 = vld [vmem:[#allocation21 + $0x5a4] ss:$24 sps:$4 sm:$0xff]   ;;  %v22800_v61 = vld [vmem:[#allocation21 + $0x2a0] ss:$24 sps:$4 sm:$0xff]   ;;  %v22802_v58 = vld [vmem:[#allocation21 + $0x2d4] ss:$24 sps:$4 sm:$0xff]  }
0x2805   : > { %16419 = vmatprep.subr.bf16.mxu0 %v22744_v24  ;;  %v22801_v12 = vld [vmem:[#allocation21 + $0x5a0] ss:$24 sps:$4 sm:$0xff]   ;;  %v14583_v20 = vrot.slane %v26925_v13, 7  ;;  %v14585_v8 = vrot.slane %v26927_v27, 7  ;;  %v22804_v59 = vld [vmem:[#allocation21 + $0x5d4] ss:$24 sps:$4 sm:$0xff]  }
0x2806   : > { %v22806_v15 = vld [vmem:[#allocation21 + $0x2d0] ss:$24 sps:$4 sm:$0xff]   ;;  %v22810_v39 = vld [vmem:[#allocation21 + $0x604] ss:$24 sps:$4 sm:$0xff]   ;;  %v22808_v27 = vld [vmem:[#allocation21 + $0x600] ss:$24 sps:$4 sm:$0xff]  }
0x2807   : > { %16377 = vmatpush1.bf16.msra.mxu1 %v22740_v16  ;;  %v22807_v29 = vld [vmem:[#allocation21 + $0x5d0] ss:$24 sps:$4 sm:$0xff]   ;;  %v14588_v16 = vrot.slane %v26931_v34, 7  ;;  %v14598_v24 = vsel %vm14595_vm3, %v26911_v57, %v14585_v8  ;;  %v22813_v13 = vld [vmem:[#allocation21 + $0xc] ss:$24 sps:$4 sm:$0xff]  }
0x2808   : > { %16378 = vmatprep.subr.bf16.mxu1 %v22742_v36  ;;  %16420 = vmatpush1.bf16.msra.mxu0 %v22747_v11  ;;  %v14596_v36 = vsel %vm14595_vm3, %v26909_v62, %v14583_v20  ;;  %v22819_v62 = vld [vmem:[#allocation21 + $0x3c] ss:$24 sps:$4 sm:$0xff]   ;;  %v22814_v57 = vld [vmem:[#allocation21 + $0x630] ss:$24 sps:$4 sm:$0xff]   ;;  %v22868_v20 = vld [vmem:[#allocation21 + $0x7e0] ss:$24 sps:$4 sm:$0xff]  }
0x2809   : > { %16421 = vmatprep.subr.bf16.mxu0 %v22750_v46  ;;  %v26953_v11 = vpack.c.bf16 %v14596_v36, %v14596_v36  ;;  %v14601_v34 = vsel %vm14595_vm3, %v26915_v38, %v14588_v16  ;;  %v22816_v46 = vld [vmem:[#allocation21 + $0x634] ss:$24 sps:$4 sm:$0xff]   ;;  %v22871_v8 = vld [vmem:[#allocation21 + $0x1e8] ss:$24 sps:$4 sm:$0xff]   ;;  %v22877_v16 = vld [vmem:[#allocation21 + $0x218] ss:$24 sps:$4 sm:$0xff]  }
0x280a   : > { %v22825_v38 = vld [vmem:[#allocation21 + $0x6c] ss:$24 sps:$4 sm:$0xff]  }
0x280b   : > { %16379 = vmatpush1.bf16.msra.mxu1 %v22746_v28  ;;  %v22811_v28 = vld [vmem:[#allocation21 + $0x8] ss:$24 sps:$4 sm:$0xff]   ;;  %v22885_v36 = vld [vmem:[#allocation21 + $0x24c] ss:$24 sps:$4 sm:$0xff]  }
0x280c   : > { %16380 = vmatprep.subr.bf16.mxu1 %v22748_v3  ;;  %16422 = vmatpush1.bf16.msra.mxu0 %v22753_v21  ;;  %v26955_v3 = vpack.c.bf16 %v14598_v24, %v14598_v24  ;;  %v22817_v21 = vld [vmem:[#allocation21 + $0x38] ss:$24 sps:$4 sm:$0xff]  }
0x280d   : > { %16423 = vmatprep.subr.bf16.mxu0 %v22756_v7  ;;  %v22820_v7 = vld [vmem:[#allocation21 + $0x660] ss:$24 sps:$4 sm:$0xff]  }
0x280e   : > { %v22880_v24 = vld [vmem:[#allocation21 + $0x840] ss:$24 sps:$4 sm:$0xff]  }
0x280f   : > { %16381 = vmatpush1.bf16.msra.mxu1 %v22752_v40  ;;  %v26959_v40 = vpack.c.bf16 %v14601_v34, %v14601_v34  ;;  %v22886_v34 = vld [vmem:[#allocation21 + $0x870] ss:$24 sps:$4 sm:$0xff]  }
0x2810   : > { %16382 = vmatprep.subr.bf16.mxu1 %v22754_v22  ;;  %16424 = vmatpush1.bf16.msra.mxu0 %v22759_v14  ;;  %v22822_v22 = vld [vmem:[#allocation21 + $0x664] ss:$24 sps:$4 sm:$0xff]   ;;  %v22828_v14 = vld [vmem:[#allocation21 + $0x694] ss:$24 sps:$4 sm:$0xff]  }
0x2811   : > { %16425 = vmatprep.subr.bf16.mxu0 %v22762_v47  ;;  %v22826_v47 = vld [vmem:[#allocation21 + $0x690] ss:$24 sps:$4 sm:$0xff]  }
0x2813   : > { %16383 = vmatpush1.bf16.msra.mxu1 %v22758_v33  ;;  %v22823_v33 = vld [vmem:[#allocation21 + $0x68] ss:$24 sps:$4 sm:$0xff]  }
0x2814   : > { %16384 = vmatprep.subr.bf16.mxu1 %v22760_v1  ;;  %16426 = vmatpush1.bf16.msra.mxu0 %v22765_v19  ;;  %v22831_v1 = vld [vmem:[#allocation21 + $0x9c] ss:$24 sps:$4 sm:$0xff]  }
0x2815   : > { %16427 = vmatprep.subr.bf16.mxu0 %v22768_v31  ;;  %v22834_v19 = vld [vmem:[#allocation21 + $0x6c4] ss:$24 sps:$4 sm:$0xff]   ;;  %v22832_v31 = vld [vmem:[#allocation21 + $0x6c0] ss:$24 sps:$4 sm:$0xff]  }
0x2817   : > { %16385 = vmatpush1.bf16.msra.mxu1 %v22764_v56  ;;  %v22829_v56 = vld [vmem:[#allocation21 + $0x98] ss:$24 sps:$4 sm:$0xff]  }
0x2818   : > { %16386 = vmatprep.subr.bf16.mxu1 %v22766_v35  ;;  %16428 = vmatpush1.bf16.msra.mxu0 %v22771_v17  ;;  %v22837_v35 = vld [vmem:[#allocation21 + $0xcc] ss:$24 sps:$4 sm:$0xff]  }
0x2819   : > { %16429 = vmatprep.subr.bf16.mxu0 %v22774_v10  ;;  %v22840_v17 = vld [vmem:[#allocation21 + $0x6f4] ss:$24 sps:$4 sm:$0xff]   ;;  %v22838_v10 = vld [vmem:[#allocation21 + $0x6f0] ss:$24 sps:$4 sm:$0xff]  }
0x281b   : > { %16387 = vmatpush1.bf16.msra.mxu1 %v22770_v0  ;;  %v22835_v0 = vld [vmem:[#allocation21 + $0xc8] ss:$24 sps:$4 sm:$0xff]  }
0x281c   : > { %16388 = vmatprep.subr.bf16.mxu1 %v22772_v37  ;;  %16430 = vmatpush1.bf16.msra.mxu0 %v22777_v53  ;;  %v22843_v37 = vld [vmem:[#allocation21 + $0xfc] ss:$24 sps:$4 sm:$0xff]  }
0x281d   : > { %16431 = vmatprep.subr.bf16.mxu0 %v22780_v41  ;;  %v22846_v53 = vld [vmem:[#allocation21 + $0x724] ss:$24 sps:$4 sm:$0xff]   ;;  %v22844_v41 = vld [vmem:[#allocation21 + $0x720] ss:$24 sps:$4 sm:$0xff]  }
0x281f   : > { %16389 = vmatpush1.bf16.msra.mxu1 %v22776_v4  ;;  %v22841_v4 = vld [vmem:[#allocation21 + $0xf8] ss:$24 sps:$4 sm:$0xff]  }
0x2820   : > { %16390 = vmatprep.subr.bf16.mxu1 %v22778_v55  ;;  %16432 = vmatpush1.bf16.msra.mxu0 %v22783_v26  ;;  %v22849_v55 = vld [vmem:[#allocation21 + $0x12c] ss:$24 sps:$4 sm:$0xff]  }
0x2821   : > { %16433 = vmatprep.subr.bf16.mxu0 %v22786_v9  ;;  %v22852_v26 = vld [vmem:[#allocation21 + $0x754] ss:$24 sps:$4 sm:$0xff]   ;;  %v22850_v9 = vld [vmem:[#allocation21 + $0x750] ss:$24 sps:$4 sm:$0xff]  }
0x2823   : > { %16391 = vmatpush1.bf16.msra.mxu1 %v22782_v51  ;;  %v22847_v51 = vld [vmem:[#allocation21 + $0x128] ss:$24 sps:$4 sm:$0xff]  }
0x2824   : > { %16392 = vmatprep.subr.bf16.mxu1 %v22784_v18  ;;  %16434 = vmatpush1.bf16.msra.mxu0 %v22789_v42  ;;  %v22855_v18 = vld [vmem:[#allocation21 + $0x15c] ss:$24 sps:$4 sm:$0xff]  }
0x2825   : > { %16435 = vmatprep.subr.bf16.mxu0 %v22792_v49  ;;  %v22858_v42 = vld [vmem:[#allocation21 + $0x784] ss:$24 sps:$4 sm:$0xff]   ;;  %v22856_v49 = vld [vmem:[#allocation21 + $0x780] ss:$24 sps:$4 sm:$0xff]  }
0x2827   : > { %16393 = vmatpush1.bf16.msra.mxu1 %v22788_v6  ;;  %v22853_v6 = vld [vmem:[#allocation21 + $0x158] ss:$24 sps:$4 sm:$0xff]  }
0x2828   : > { %16394 = vmatprep.subr.bf16.mxu1 %v22790_v60  ;;  %16436 = vmatpush1.bf16.msra.mxu0 %v22795_v32  ;;  %v22861_v60 = vld [vmem:[#allocation21 + $0x18c] ss:$24 sps:$4 sm:$0xff]  }
0x2829   : > { %16437 = vmatprep.subr.bf16.mxu0 %v22798_v43  ;;  %v22864_v32 = vld [vmem:[#allocation21 + $0x7b4] ss:$24 sps:$4 sm:$0xff]   ;;  %v22862_v43 = vld [vmem:[#allocation21 + $0x7b0] ss:$24 sps:$4 sm:$0xff]  }
0x282b   : > { %16395 = vmatpush1.bf16.msra.mxu1 %v22794_v52  ;;  %v22859_v52 = vld [vmem:[#allocation21 + $0x188] ss:$24 sps:$4 sm:$0xff]  }
0x282c   : > { %16396 = vmatprep.subr.bf16.mxu1 %v22796_v63  ;;  %16438 = vmatpush1.bf16.msra.mxu0 %v22801_v12  ;;  %v22867_v63 = vld [vmem:[#allocation21 + $0x1bc] ss:$24 sps:$4 sm:$0xff]  }
0x282d   : > { %16439 = vmatprep.subr.bf16.mxu0 %v22804_v59  ;;  %v22870_v12 = vld [vmem:[#allocation21 + $0x7e4] ss:$24 sps:$4 sm:$0xff]   ;;  %v22876_v59 = vld [vmem:[#allocation21 + $0x814] ss:$24 sps:$4 sm:$0xff]  }
0x282f   : > { %16397 = vmatpush1.bf16.msra.mxu1 %v22800_v61  ;;  %v22865_v61 = vld [vmem:[#allocation21 + $0x1b8] ss:$24 sps:$4 sm:$0xff]  }
0x2830   : > { %16398 = vmatprep.subr.bf16.mxu1 %v22802_v58  ;;  %16440 = vmatpush1.bf16.msra.mxu0 %v22807_v29  ;;  %v22873_v58 = vld [vmem:[#allocation21 + $0x1ec] ss:$24 sps:$4 sm:$0xff]   ;;  %v22874_v29 = vld [vmem:[#allocation21 + $0x810] ss:$24 sps:$4 sm:$0xff]  }
0x2831   : > { %16450 = vmatprep.subr.bf16.mxu0 %v22810_v39  ;;  %v22882_v39 = vld [vmem:[#allocation21 + $0x844] ss:$24 sps:$4 sm:$0xff]  }
0x2833   : > { %16399 = vmatpush1.bf16.msra.mxu1 %v22806_v15  ;;  %16442 = vmatmul.mubr.bf16.vlgmr.msra.gmra.mrb[0].mxu0 %v26955_v3  ;;  %v22879_v15 = vld [vmem:[#allocation21 + $0x21c] ss:$24 sps:$4 sm:$0xff]  }
0x2834   : > { %16491 = vmatprep.subr.bf16.mxu1 %v22813_v13  ;;  %16451 = vmatpush1.bf16.msra.mxu0 %v22808_v27  ;;  %v22883_v13 = vld [vmem:[#allocation21 + $0x248] ss:$24 sps:$4 sm:$0xff]   ;;  %v22888_v27 = vld [vmem:[#allocation21 + $0x874] ss:$24 sps:$4 sm:$0xff]  }
0x2835   : > { %16452 = vmatprep.subr.bf16.mxu0 %v22816_v46  ;;  %16482 = vmatprep.mubr.bf16.mxu0 %v26959_v40  ;;  %v22889_v46 = vld [vmem:[#allocation21 + $0x278] ss:$24 sps:$4 sm:$0xff]  }
0x2836   : > { %16401 = vmatmul.mubr.bf16.vlgmr.msra.gmra.mrb[0].mxu1 %v26953_v11 }
0x2837   : > { %16492 = vmatpush1.bf16.msra.mxu1 %v22811_v28  ;;  %16523 = vmatprep.mubr.bf16.mxu1 %v26939_v30  ;;  %v22891_v28 = vld [vmem:[#allocation21 + $0x27c] ss:$24 sps:$4 sm:$0xff]  }
0x2838   : > { %16493 = vmatprep.subr.bf16.mxu1 %v22819_v62  ;;  %16453 = vmatpush1.bf16.msra.mxu0 %v22814_v57  ;;  %v22894_v62 = vld [vmem:[#allocation21 + $0x8a4] ss:$24 sps:$4 sm:$0xff]  }
0x2839   : > { %16454 = vmatprep.subr.bf16.mxu0 %v22822_v22  ;;  %v22897_v57 = vld [vmem:[#allocation21 + $0x2ac] ss:$24 sps:$4 sm:$0xff]   ;;  %v22895_v22 = vld [vmem:[#allocation21 + $0x2a8] ss:$24 sps:$4 sm:$0xff]  }
0x283b   : > { %16494 = vmatpush1.bf16.msra.mxu1 %v22817_v21  ;;  %v22892_v21 = vld [vmem:[#allocation21 + $0x8a0] ss:$24 sps:$4 sm:$0xff]  }
0x283c   : > { %16495 = vmatprep.subr.bf16.mxu1 %v22825_v38  ;;  %16455 = vmatpush1.bf16.msra.mxu0 %v22820_v7  ;;  %v22900_v38 = vld [vmem:[#allocation21 + $0x8d4] ss:$24 sps:$4 sm:$0xff]   ;;  %v14587_v7 = vrot.slane %v26929_v23, 7 }
0x283d   : > { %16456 = vmatprep.subr.bf16.mxu0 %v22828_v14  ;;  %v22898_v14 = vld [vmem:[#allocation21 + $0x8d0] ss:$24 sps:$4 sm:$0xff]   ;;  %v22912_v23 = vld [vmem:[#allocation21 + $0x33c] ss:$24 sps:$4 sm:$0xff]  }
0x283f   : > { %16496 = vmatpush1.bf16.msra.mxu1 %v22823_v33  ;;  %v22903_v33 = vld [vmem:[#allocation21 + $0x2dc] ss:$24 sps:$4 sm:$0xff]  }
0x2840   : > { %16497 = vmatprep.subr.bf16.mxu1 %v22831_v1  ;;  %16457 = vmatpush1.bf16.msra.mxu0 %v22826_v47  ;;  %v22901_v1 = vld [vmem:[#allocation21 + $0x2d8] ss:$24 sps:$4 sm:$0xff]   ;;  %v14600_v47 = vsel %vm14595_vm3, %v26913_v54, %v14587_v7  ;;  %v22978_v7 = vld [vmem:[#allocation21 + $0x54c] ss:$24 sps:$4 sm:$0xff]  }
0x2841   : > { %16458 = vmatprep.subr.bf16.mxu0 %v22834_v19  ;;  %v22909_v19 = vld [vmem:[#allocation21 + $0x14] ss:$24 sps:$4 sm:$0xff]   ;;  %v22913_v54 = vld [vmem:[#allocation21 + $0x40] ss:$24 sps:$4 sm:$0xff]  }
0x2843   : > { %16498 = vmatpush1.bf16.msra.mxu1 %v22829_v56  ;;  %v22906_v56 = vld [vmem:[#allocation21 + $0x30c] ss:$24 sps:$4 sm:$0xff]  }
0x2844   : > { %16499 = vmatprep.subr.bf16.mxu1 %v22837_v35  ;;  %16459 = vmatpush1.bf16.msra.mxu0 %v22832_v31  ;;  %v26968_v35 = vpack.c.bf16 %v14600_v47, %v14600_v47  ;;  %v22904_v31 = vld [vmem:[#allocation21 + $0x308] ss:$24 sps:$4 sm:$0xff]   ;;  %v22984_v47 = vld [vmem:[#allocation21 + $0x57c] ss:$24 sps:$4 sm:$0xff]  }
0x2845   : > { %16460 = vmatprep.subr.bf16.mxu0 %v22840_v17  ;;  %v22915_v17 = vld [vmem:[#allocation21 + $0x44] ss:$24 sps:$4 sm:$0xff]  }
0x2847   : > { %16500 = vmatpush1.bf16.msra.mxu1 %v22835_v0  ;;  %v22907_v0 = vld [vmem:[#allocation21 + $0x10] ss:$24 sps:$4 sm:$0xff]  }
0x2848   : > { %16501 = vmatprep.subr.bf16.mxu1 %v22843_v37  ;;  %16461 = vmatpush1.bf16.msra.mxu0 %v22838_v10  ;;  %v22910_v37 = vld [vmem:[#allocation21 + $0x338] ss:$24 sps:$4 sm:$0xff]   ;;  %v22918_v10 = vld [vmem:[#allocation21 + $0x36c] ss:$24 sps:$4 sm:$0xff]  }
0x2849   : > { %16462 = vmatprep.subr.bf16.mxu0 %v22846_v53  ;;  %v22916_v53 = vld [vmem:[#allocation21 + $0x368] ss:$24 sps:$4 sm:$0xff]  }
0x284b   : > { %16502 = vmatpush1.bf16.msra.mxu1 %v22841_v4  ;;  %v22921_v4 = vld [vmem:[#allocation21 + $0x74] ss:$24 sps:$4 sm:$0xff]  }
0x284c   : > { %16503 = vmatprep.subr.bf16.mxu1 %v22849_v55  ;;  %16463 = vmatpush1.bf16.msra.mxu0 %v22844_v41  ;;  %v22919_v55 = vld [vmem:[#allocation21 + $0x70] ss:$24 sps:$4 sm:$0xff]   ;;  %v22924_v41 = vld [vmem:[#allocation21 + $0x39c] ss:$24 sps:$4 sm:$0xff]  }
0x284d   : > { %16464 = vmatprep.subr.bf16.mxu0 %v22852_v26  ;;  %v22922_v26 = vld [vmem:[#allocation21 + $0x398] ss:$24 sps:$4 sm:$0xff]  }
0x284f   : > { %16504 = vmatpush1.bf16.msra.mxu1 %v22847_v51  ;;  %v22927_v51 = vld [vmem:[#allocation21 + $0xa4] ss:$24 sps:$4 sm:$0xff]  }
0x2850   : > { %16505 = vmatprep.subr.bf16.mxu1 %v22855_v18  ;;  %16465 = vmatpush1.bf16.msra.mxu0 %v22850_v9  ;;  %v22925_v18 = vld [vmem:[#allocation21 + $0xa0] ss:$24 sps:$4 sm:$0xff]   ;;  %v22930_v9 = vld [vmem:[#allocation21 + $0x3cc] ss:$24 sps:$4 sm:$0xff]  }
0x2851   : > { %16466 = vmatprep.subr.bf16.mxu0 %v22858_v42  ;;  %v22928_v42 = vld [vmem:[#allocation21 + $0x3c8] ss:$24 sps:$4 sm:$0xff]  }
0x2853   : > { %16506 = vmatpush1.bf16.msra.mxu1 %v22853_v6  ;;  %v22933_v6 = vld [vmem:[#allocation21 + $0xd4] ss:$24 sps:$4 sm:$0xff]  }
0x2854   : > { %16507 = vmatprep.subr.bf16.mxu1 %v22861_v60  ;;  %16467 = vmatpush1.bf16.msra.mxu0 %v22856_v49  ;;  %v22931_v60 = vld [vmem:[#allocation21 + $0xd0] ss:$24 sps:$4 sm:$0xff]   ;;  %v22939_v49 = vld [vmem:[#allocation21 + $0x104] ss:$24 sps:$4 sm:$0xff]  }
0x2855   : > { %16468 = vmatprep.subr.bf16.mxu0 %v22864_v32  ;;  %v22937_v32 = vld [vmem:[#allocation21 + $0x100] ss:$24 sps:$4 sm:$0xff]  }
0x2857   : > { %16508 = vmatpush1.bf16.msra.mxu1 %v22859_v52  ;;  %v22934_v52 = vld [vmem:[#allocation21 + $0x3f8] ss:$24 sps:$4 sm:$0xff]  }
0x2858   : > { %16509 = vmatprep.subr.bf16.mxu1 %v22867_v63  ;;  %16469 = vmatpush1.bf16.msra.mxu0 %v22862_v43  ;;  %v22942_v63 = vld [vmem:[#allocation21 + $0x42c] ss:$24 sps:$4 sm:$0xff]  }
0x2859   : > { %16470 = vmatprep.subr.bf16.mxu0 %v22870_v12  ;;  %v22945_v43 = vld [vmem:[#allocation21 + $0x134] ss:$24 sps:$4 sm:$0xff]   ;;  %v22943_v12 = vld [vmem:[#allocation21 + $0x130] ss:$24 sps:$4 sm:$0xff]  }
0x285b   : > { %16510 = vmatpush1.bf16.msra.mxu1 %v22865_v61  ;;  %v22940_v61 = vld [vmem:[#allocation21 + $0x428] ss:$24 sps:$4 sm:$0xff]  }
0x285c   : > { %16511 = vmatprep.subr.bf16.mxu1 %v22873_v58  ;;  %16471 = vmatpush1.bf16.msra.mxu0 %v22868_v20  ;;  %v22948_v58 = vld [vmem:[#allocation21 + $0x45c] ss:$24 sps:$4 sm:$0xff]  }
0x285d   : > { %16472 = vmatprep.subr.bf16.mxu0 %v22876_v59  ;;  %v22951_v20 = vld [vmem:[#allocation21 + $0x164] ss:$24 sps:$4 sm:$0xff]   ;;  %v22949_v59 = vld [vmem:[#allocation21 + $0x160] ss:$24 sps:$4 sm:$0xff]  }
0x285f   : > { %16512 = vmatpush1.bf16.msra.mxu1 %v22871_v8  ;;  %v22946_v8 = vld [vmem:[#allocation21 + $0x458] ss:$24 sps:$4 sm:$0xff]  }
0x2860   : > { %16513 = vmatprep.subr.bf16.mxu1 %v22879_v15  ;;  %16473 = vmatpush1.bf16.msra.mxu0 %v22874_v29  ;;  %v22954_v15 = vld [vmem:[#allocation21 + $0x48c] ss:$24 sps:$4 sm:$0xff]  }
0x2861   : > { %16474 = vmatprep.subr.bf16.mxu0 %v22882_v39  ;;  %v22957_v29 = vld [vmem:[#allocation21 + $0x194] ss:$24 sps:$4 sm:$0xff]   ;;  %v22955_v39 = vld [vmem:[#allocation21 + $0x190] ss:$24 sps:$4 sm:$0xff]  }
0x2863   : > { %16514 = vmatpush1.bf16.msra.mxu1 %v22877_v16  ;;  %v22952_v16 = vld [vmem:[#allocation21 + $0x488] ss:$24 sps:$4 sm:$0xff]  }
0x2864   : > { %16515 = vmatprep.subr.bf16.mxu1 %v22885_v36  ;;  %16475 = vmatpush1.bf16.msra.mxu0 %v22880_v24  ;;  %v22960_v36 = vld [vmem:[#allocation21 + $0x4bc] ss:$24 sps:$4 sm:$0xff]  }
0x2865   : > { %16476 = vmatprep.subr.bf16.mxu0 %v22888_v27  ;;  %v22963_v24 = vld [vmem:[#allocation21 + $0x1c4] ss:$24 sps:$4 sm:$0xff]   ;;  %v22961_v27 = vld [vmem:[#allocation21 + $0x1c0] ss:$24 sps:$4 sm:$0xff]  }
0x2867   : > { %16516 = vmatpush1.bf16.msra.mxu1 %v22883_v13  ;;  %v22958_v13 = vld [vmem:[#allocation21 + $0x4b8] ss:$24 sps:$4 sm:$0xff]  }
0x2868   : > { %16517 = vmatprep.subr.bf16.mxu1 %v22891_v28  ;;  %16477 = vmatpush1.bf16.msra.mxu0 %v22886_v34  ;;  %v22966_v28 = vld [vmem:[#allocation21 + $0x4ec] ss:$24 sps:$4 sm:$0xff]  }
0x2869   : > { %16478 = vmatprep.subr.bf16.mxu0 %v22894_v62  ;;  %v22969_v34 = vld [vmem:[#allocation21 + $0x1f4] ss:$24 sps:$4 sm:$0xff]   ;;  %v22967_v62 = vld [vmem:[#allocation21 + $0x1f0] ss:$24 sps:$4 sm:$0xff]  }
0x286b   : > { %16518 = vmatpush1.bf16.msra.mxu1 %v22889_v46  ;;  %v22964_v46 = vld [vmem:[#allocation21 + $0x4e8] ss:$24 sps:$4 sm:$0xff]  }
0x286c   : > { %16519 = vmatprep.subr.bf16.mxu1 %v22897_v57  ;;  %16479 = vmatpush1.bf16.msra.mxu0 %v22892_v21  ;;  %v22972_v57 = vld [vmem:[#allocation21 + $0x51c] ss:$24 sps:$4 sm:$0xff]  }
0x286d   : > { %16480 = vmatprep.subr.bf16.mxu0 %v22900_v38  ;;  %v22975_v21 = vld [vmem:[#allocation21 + $0x224] ss:$24 sps:$4 sm:$0xff]   ;;  %v22973_v38 = vld [vmem:[#allocation21 + $0x220] ss:$24 sps:$4 sm:$0xff]  }
0x286f   : > { %16520 = vmatpush1.bf16.msra.mxu1 %v22895_v22  ;;  %v22970_v22 = vld [vmem:[#allocation21 + $0x518] ss:$24 sps:$4 sm:$0xff]  }
0x2870   : > { %16521 = vmatprep.subr.bf16.mxu1 %v22903_v33  ;;  %16481 = vmatpush1.bf16.msra.mxu0 %v22898_v14  ;;  %v22981_v33 = vld [vmem:[#allocation21 + $0x254] ss:$24 sps:$4 sm:$0xff]   ;;  %v22976_v14 = vld [vmem:[#allocation21 + $0x548] ss:$24 sps:$4 sm:$0xff]  }
0x2871   : > { %16614 = vmatprep.subr.bf16.mxu0 %v22909_v19  ;;  %v22982_v19 = vld [vmem:[#allocation21 + $0x578] ss:$24 sps:$4 sm:$0xff]  }
0x2873   : > { %16522 = vmatpush1.bf16.msra.mxu1 %v22901_v1  ;;  %16483 = vmatmul.mubr.bf16.vlgmr.msra.gmra.mrb[0].mxu0 %v26968_v35  ;;  %v22979_v1 = vld [vmem:[#allocation21 + $0x250] ss:$24 sps:$4 sm:$0xff]  }
0x2874   : > { %16532 = vmatprep.subr.bf16.mxu1 %v22906_v56  ;;  %16615 = vmatpush1.bf16.msra.mxu0 %v22907_v0  ;;  %v22987_v56 = vld [vmem:[#allocation21 + $0x284] ss:$24 sps:$4 sm:$0xff]  }
0x2875   : > { %16616 = vmatprep.subr.bf16.mxu0 %v22915_v17  ;;  %16646 = vmatprep.mubr.bf16.mxu0 %v26939_v30  ;;  %v22936_v30 = vld [vmem:[#allocation21 + $0x3fc] ss:$24 sps:$4 sm:$0xff]   ;;  %v22990_v0 = vld [vmem:[#allocation21 + $0x5ac] ss:$24 sps:$4 sm:$0xff]   ;;  %v22988_v17 = vld [vmem:[#allocation21 + $0x5a8] ss:$24 sps:$4 sm:$0xff]  }
0x2876   : > { %16524 = vmatmul.mubr.bf16.vlgmr.msra.gmra.mrb[4].mxu1 %v26953_v11 }
0x2877   : > { %16533 = vmatpush1.bf16.msra.mxu1 %v22904_v31  ;;  %16564 = vmatprep.mubr.bf16.mxu1 %v26942_v50  ;;  %v22985_v31 = vld [vmem:[#allocation21 + $0x280] ss:$24 sps:$4 sm:$0xff]  }
0x2878   : > { %16534 = vmatprep.subr.bf16.mxu1 %v22912_v23  ;;  %16617 = vmatpush1.bf16.msra.mxu0 %v22913_v54  ;;  %v22993_v23 = vld [vmem:[#allocation21 + $0x2b4] ss:$24 sps:$4 sm:$0xff]  }
0x2879   : > { %16618 = vmatprep.subr.bf16.mxu0 %v22921_v4  ;;  %v22996_v54 = vld [vmem:[#allocation21 + $0x5dc] ss:$24 sps:$4 sm:$0xff]   ;;  %v22994_v4 = vld [vmem:[#allocation21 + $0x5d8] ss:$24 sps:$4 sm:$0xff]  }
0x287b   : > { %16535 = vmatpush1.bf16.msra.mxu1 %v22910_v37  ;;  %v22991_v37 = vld [vmem:[#allocation21 + $0x2b0] ss:$24 sps:$4 sm:$0xff]  }
0x287c   : > { %16536 = vmatprep.subr.bf16.mxu1 %v22918_v10  ;;  %16619 = vmatpush1.bf16.msra.mxu0 %v22919_v55  ;;  %v22999_v10 = vld [vmem:[#allocation21 + $0x2e4] ss:$24 sps:$4 sm:$0xff]  }
0x287d   : > { %16620 = vmatprep.subr.bf16.mxu0 %v22927_v51  ;;  %v23002_v55 = vld [vmem:[#allocation21 + $0x60c] ss:$24 sps:$4 sm:$0xff]   ;;  %v23000_v51 = vld [vmem:[#allocation21 + $0x608] ss:$24 sps:$4 sm:$0xff]  }
0x287f   : > { %16537 = vmatpush1.bf16.msra.mxu1 %v22916_v53  ;;  %v22997_v53 = vld [vmem:[#allocation21 + $0x2e0] ss:$24 sps:$4 sm:$0xff]  }
0x2880   : > { %16538 = vmatprep.subr.bf16.mxu1 %v22924_v41  ;;  %16621 = vmatpush1.bf16.msra.mxu0 %v22925_v18  ;;  %v23005_v41 = vld [vmem:[#allocation21 + $0x314] ss:$24 sps:$4 sm:$0xff]  }
0x2881   : > { %16622 = vmatprep.subr.bf16.mxu0 %v22933_v6  ;;  %v23008_v18 = vld [vmem:[#allocation21 + $0x63c] ss:$24 sps:$4 sm:$0xff]   ;;  %v23006_v6 = vld [vmem:[#allocation21 + $0x638] ss:$24 sps:$4 sm:$0xff]  }
0x2883   : > { %16539 = vmatpush1.bf16.msra.mxu1 %v22922_v26  ;;  %v23003_v26 = vld [vmem:[#allocation21 + $0x310] ss:$24 sps:$4 sm:$0xff]  }
0x2884   : > { %16540 = vmatprep.subr.bf16.mxu1 %v22930_v9  ;;  %16623 = vmatpush1.bf16.msra.mxu0 %v22931_v60  ;;  %v23011_v9 = vld [vmem:[#allocation21 + $0x344] ss:$24 sps:$4 sm:$0xff]  }
0x2885   : > { %16624 = vmatprep.subr.bf16.mxu0 %v22939_v49  ;;  %v23014_v60 = vld [vmem:[#allocation21 + $0x66c] ss:$24 sps:$4 sm:$0xff]   ;;  %v23012_v49 = vld [vmem:[#allocation21 + $0x668] ss:$24 sps:$4 sm:$0xff]  }
0x2887   : > { %16541 = vmatpush1.bf16.msra.mxu1 %v22928_v42  ;;  %v23009_v42 = vld [vmem:[#allocation21 + $0x340] ss:$24 sps:$4 sm:$0xff]  }
0x2888   : > { %16542 = vmatprep.subr.bf16.mxu1 %v22936_v30  ;;  %16625 = vmatpush1.bf16.msra.mxu0 %v22937_v32  ;;  %v23017_v30 = vld [vmem:[#allocation21 + $0x374] ss:$24 sps:$4 sm:$0xff]  }
0x2889   : > { %16626 = vmatprep.subr.bf16.mxu0 %v22945_v43  ;;  %v23020_v32 = vld [vmem:[#allocation21 + $0x69c] ss:$24 sps:$4 sm:$0xff]   ;;  %v23021_v43 = vld [vmem:[#allocation21 + $0x3a0] ss:$24 sps:$4 sm:$0xff]  }
0x288b   : > { %16543 = vmatpush1.bf16.msra.mxu1 %v22934_v52  ;;  %v23015_v52 = vld [vmem:[#allocation21 + $0x370] ss:$24 sps:$4 sm:$0xff]  }
0x288c   : > { %16544 = vmatprep.subr.bf16.mxu1 %v22942_v63  ;;  %16627 = vmatpush1.bf16.msra.mxu0 %v22943_v12  ;;  %v23018_v63 = vld [vmem:[#allocation21 + $0x698] ss:$24 sps:$4 sm:$0xff]   ;;  %v23029_v12 = vld [vmem:[#allocation21 + $0x3d4] ss:$24 sps:$4 sm:$0xff]  }
0x288d   : > { %16628 = vmatprep.subr.bf16.mxu0 %v22951_v20  ;;  %v23027_v20 = vld [vmem:[#allocation21 + $0x3d0] ss:$24 sps:$4 sm:$0xff]  }
0x288f   : > { %16545 = vmatpush1.bf16.msra.mxu1 %v22940_v61  ;;  %v23026_v61 = vld [vmem:[#allocation21 + $0x6cc] ss:$24 sps:$4 sm:$0xff]  }
0x2890   : > { %16546 = vmatprep.subr.bf16.mxu1 %v22948_v58  ;;  %16629 = vmatpush1.bf16.msra.mxu0 %v22949_v59  ;;  %v23024_v58 = vld [vmem:[#allocation21 + $0x6c8] ss:$24 sps:$4 sm:$0xff]   ;;  %v23035_v59 = vld [vmem:[#allocation21 + $0x404] ss:$24 sps:$4 sm:$0xff]  }
0x2891   : > { %16630 = vmatprep.subr.bf16.mxu0 %v22957_v29  ;;  %v23038_v29 = vld [vmem:[#allocation21 + $0x72c] ss:$24 sps:$4 sm:$0xff]  }
0x2893   : > { %16547 = vmatpush1.bf16.msra.mxu1 %v22946_v8  ;;  %v23032_v8 = vld [vmem:[#allocation21 + $0x6fc] ss:$24 sps:$4 sm:$0xff]  }
0x2894   : > { %16548 = vmatprep.subr.bf16.mxu1 %v22954_v15  ;;  %16631 = vmatpush1.bf16.msra.mxu0 %v22955_v39  ;;  %v23033_v15 = vld [vmem:[#allocation21 + $0x400] ss:$24 sps:$4 sm:$0xff]  }
0x2895   : > { %16632 = vmatprep.subr.bf16.mxu0 %v22963_v24  ;;  %v23036_v39 = vld [vmem:[#allocation21 + $0x728] ss:$24 sps:$4 sm:$0xff]   ;;  %v23044_v24 = vld [vmem:[#allocation21 + $0x75c] ss:$24 sps:$4 sm:$0xff]  }
0x2897   : > { %16549 = vmatpush1.bf16.msra.mxu1 %v22952_v16  ;;  %v23041_v16 = vld [vmem:[#allocation21 + $0x434] ss:$24 sps:$4 sm:$0xff]  }
0x2898   : > { %16550 = vmatprep.subr.bf16.mxu1 %v22960_v36  ;;  %16633 = vmatpush1.bf16.msra.mxu0 %v22961_v27  ;;  %v23039_v36 = vld [vmem:[#allocation21 + $0x430] ss:$24 sps:$4 sm:$0xff]  }
0x2899   : > { %16634 = vmatprep.subr.bf16.mxu0 %v22969_v34  ;;  %v23042_v27 = vld [vmem:[#allocation21 + $0x758] ss:$24 sps:$4 sm:$0xff]   ;;  %v23050_v34 = vld [vmem:[#allocation21 + $0x78c] ss:$24 sps:$4 sm:$0xff]  }
0x289b   : > { %16551 = vmatpush1.bf16.msra.mxu1 %v22958_v13  ;;  %v23047_v13 = vld [vmem:[#allocation21 + $0x464] ss:$24 sps:$4 sm:$0xff]  }
0x289c   : > { %16552 = vmatprep.subr.bf16.mxu1 %v22966_v28  ;;  %16635 = vmatpush1.bf16.msra.mxu0 %v22967_v62  ;;  %v23045_v28 = vld [vmem:[#allocation21 + $0x460] ss:$24 sps:$4 sm:$0xff]  }
0x289d   : > { %16636 = vmatprep.subr.bf16.mxu0 %v22975_v21  ;;  %v23048_v62 = vld [vmem:[#allocation21 + $0x788] ss:$24 sps:$4 sm:$0xff]   ;;  %v23056_v21 = vld [vmem:[#allocation21 + $0x7bc] ss:$24 sps:$4 sm:$0xff]  }
0x289f   : > { %16553 = vmatpush1.bf16.msra.mxu1 %v22964_v46  ;;  %v23053_v46 = vld [vmem:[#allocation21 + $0x494] ss:$24 sps:$4 sm:$0xff]  }
0x28a0   : > { %16554 = vmatprep.subr.bf16.mxu1 %v22972_v57  ;;  %16637 = vmatpush1.bf16.msra.mxu0 %v22973_v38  ;;  %v23051_v57 = vld [vmem:[#allocation21 + $0x490] ss:$24 sps:$4 sm:$0xff]  }
0x28a1   : > { %16638 = vmatprep.subr.bf16.mxu0 %v22981_v33  ;;  %v23054_v38 = vld [vmem:[#allocation21 + $0x7b8] ss:$24 sps:$4 sm:$0xff]   ;;  %v23062_v33 = vld [vmem:[#allocation21 + $0x7ec] ss:$24 sps:$4 sm:$0xff]  }
0x28a3   : > { %16555 = vmatpush1.bf16.msra.mxu1 %v22970_v22  ;;  %v23059_v22 = vld [vmem:[#allocation21 + $0x4c4] ss:$24 sps:$4 sm:$0xff]  }
0x28a4   : > { %16556 = vmatprep.subr.bf16.mxu1 %v22978_v7  ;;  %16639 = vmatpush1.bf16.msra.mxu0 %v22979_v1  ;;  %v23057_v7 = vld [vmem:[#allocation21 + $0x4c0] ss:$24 sps:$4 sm:$0xff]  }
0x28a5   : > { %16640 = vmatprep.subr.bf16.mxu0 %v22987_v56  ;;  %v23060_v1 = vld [vmem:[#allocation21 + $0x7e8] ss:$24 sps:$4 sm:$0xff]   ;;  %v23068_v56 = vld [vmem:[#allocation21 + $0x81c] ss:$24 sps:$4 sm:$0xff]  }
0x28a7   : > { %16557 = vmatpush1.bf16.msra.mxu1 %v22976_v14  ;;  %v23065_v14 = vld [vmem:[#allocation21 + $0x4f4] ss:$24 sps:$4 sm:$0xff]  }
0x28a8   : > { %16558 = vmatprep.subr.bf16.mxu1 %v22984_v47  ;;  %16641 = vmatpush1.bf16.msra.mxu0 %v22985_v31  ;;  %v23063_v47 = vld [vmem:[#allocation21 + $0x4f0] ss:$24 sps:$4 sm:$0xff]  }
0x28a9   : > { %16642 = vmatprep.subr.bf16.mxu0 %v22993_v23  ;;  %v23066_v31 = vld [vmem:[#allocation21 + $0x818] ss:$24 sps:$4 sm:$0xff]   ;;  %v23074_v23 = vld [vmem:[#allocation21 + $0x84c] ss:$24 sps:$4 sm:$0xff]  }
0x28ab   : > { %16559 = vmatpush1.bf16.msra.mxu1 %v22982_v19  ;;  %v23071_v19 = vld [vmem:[#allocation21 + $0x524] ss:$24 sps:$4 sm:$0xff]  }
0x28ac   : > { %16560 = vmatprep.subr.bf16.mxu1 %v22990_v0  ;;  %16643 = vmatpush1.bf16.msra.mxu0 %v22991_v37  ;;  %v23069_v0 = vld [vmem:[#allocation21 + $0x520] ss:$24 sps:$4 sm:$0xff]  }
0x28ad   : > { %16644 = vmatprep.subr.bf16.mxu0 %v22999_v10  ;;  %v23072_v37 = vld [vmem:[#allocation21 + $0x848] ss:$24 sps:$4 sm:$0xff]   ;;  %v23080_v10 = vld [vmem:[#allocation21 + $0x87c] ss:$24 sps:$4 sm:$0xff]  }
0x28af   : > { %16561 = vmatpush1.bf16.msra.mxu1 %v22988_v17  ;;  %v23077_v17 = vld [vmem:[#allocation21 + $0x554] ss:$24 sps:$4 sm:$0xff]  }
0x28b0   : > { %16562 = vmatprep.subr.bf16.mxu1 %v22996_v54  ;;  %16645 = vmatpush1.bf16.msra.mxu0 %v22997_v53  ;;  %v23075_v54 = vld [vmem:[#allocation21 + $0x550] ss:$24 sps:$4 sm:$0xff]  }
0x28b1   : > { %16655 = vmatprep.subr.bf16.mxu0 %v23005_v41  ;;  %v23078_v53 = vld [vmem:[#allocation21 + $0x878] ss:$24 sps:$4 sm:$0xff]   ;;  %v23086_v41 = vld [vmem:[#allocation21 + $0x8ac] ss:$24 sps:$4 sm:$0xff]  }
0x28b3   : > { %16563 = vmatpush1.bf16.msra.mxu1 %v22994_v4  ;;  %16647 = vmatmul.mubr.bf16.vlgmr.msra.gmra.mrb[4].mxu0 %v26953_v11  ;;  %v23023_v11 = vld [vmem:[#allocation21 + $0x3a4] ss:$24 sps:$4 sm:$0xff]  }
0x28b4   : > { %16573 = vmatprep.subr.bf16.mxu1 %v23002_v55  ;;  %16656 = vmatpush1.bf16.msra.mxu0 %v23003_v26  ;;  %v23083_v4 = vld [vmem:[#allocation21 + $0x584] ss:$24 sps:$4 sm:$0xff]   ;;  %v23081_v55 = vld [vmem:[#allocation21 + $0x580] ss:$24 sps:$4 sm:$0xff]  }
0x28b5   : > { %16657 = vmatprep.subr.bf16.mxu0 %v23011_v9  ;;  %16687 = vmatprep.mubr.bf16.mxu0 %v26942_v50  ;;  %v23030_v50 = vld [vmem:[#allocation21 + $0x6f8] ss:$24 sps:$4 sm:$0xff]   ;;  %v23084_v26 = vld [vmem:[#allocation21 + $0x8a8] ss:$24 sps:$4 sm:$0xff]   ;;  %v23092_v9 = vld [vmem:[#allocation21 + $0x8dc] ss:$24 sps:$4 sm:$0xff]  }
0x28b6   : > { %16565 = vmatmul.mubr.bf16.vlgmr.msra.gmra.mrb[4].mxu1 %v26955_v3 }
0x28b7   : > { %16574 = vmatpush1.bf16.msra.mxu1 %v23000_v51  ;;  %16605 = vmatprep.mubr.bf16.mxu1 %v26959_v40  ;;  %v23089_v51 = vld [vmem:[#allocation21 + $0x5b4] ss:$24 sps:$4 sm:$0xff]  }
0x28b8   : > { %16575 = vmatprep.subr.bf16.mxu1 %v23008_v18  ;;  %16658 = vmatpush1.bf16.msra.mxu0 %v23009_v42  ;;  %v23087_v18 = vld [vmem:[#allocation21 + $0x5b0] ss:$24 sps:$4 sm:$0xff]  }
0x28b9   : > { %16659 = vmatprep.subr.bf16.mxu0 %v23017_v30  ;;  %v23090_v42 = vld [vmem:[#allocation21 + $0x8d8] ss:$24 sps:$4 sm:$0xff]   ;;  %v23098_v30 = vld [vmem:[#allocation21 + $0x614] ss:$24 sps:$4 sm:$0xff]  }
0x28bb   : > { %16576 = vmatpush1.bf16.msra.mxu1 %v23006_v6  ;;  %v23095_v6 = vld [vmem:[#allocation21 + $0x5e4] ss:$24 sps:$4 sm:$0xff]  }
0x28bc   : > { %16577 = vmatprep.subr.bf16.mxu1 %v23014_v60  ;;  %16660 = vmatpush1.bf16.msra.mxu0 %v23015_v52  ;;  %v23093_v60 = vld [vmem:[#allocation21 + $0x5e0] ss:$24 sps:$4 sm:$0xff]   ;;  %v23096_v52 = vld [vmem:[#allocation21 + $0x610] ss:$24 sps:$4 sm:$0xff]  }
0x28bd   : > { %16661 = vmatprep.subr.bf16.mxu0 %v23023_v11  ;;  %v23161_v11 = vld [vmem:[%s27355_s2 + $0x80] sm:$0xff]  }
0x28bf   : > { %16578 = vmatpush1.bf16.msra.mxu1 %v23012_v49  ;;  %v23160_v49 = vld [vmem:[%s27355_s2 + $0xc0] sm:$0xff]  }
0x28c0   : > { %16579 = vmatprep.subr.bf16.mxu1 %v23020_v32  ;;  %16662 = vmatpush1.bf16.msra.mxu0 %v23021_v43  ;;  %v23101_v32 = vld [vmem:[#allocation21 + $0x644] ss:$24 sps:$4 sm:$0xff]   ;;  %v23099_v43 = vld [vmem:[#allocation21 + $0x640] ss:$24 sps:$4 sm:$0xff]  }
0x28c1   : > { %16663 = vmatprep.subr.bf16.mxu0 %v23029_v12  ;;  %v23163_v12 = vld [vmem:[%s27355_s2 + $0x88] sm:$0xff]  }
0x28c3   : > { %16580 = vmatpush1.bf16.msra.mxu1 %v23018_v63  ;;  %v23162_v63 = vld [vmem:[%s27355_s2 + $0xc8] sm:$0xff]  }
0x28c4   : > { %16581 = vmatprep.subr.bf16.mxu1 %v23026_v61  ;;  %16664 = vmatpush1.bf16.msra.mxu0 %v23027_v20  ;;  %v23104_v61 = vld [vmem:[#allocation21 + $0x674] ss:$24 sps:$4 sm:$0xff]   ;;  %v23102_v20 = vld [vmem:[#allocation21 + $0x670] ss:$24 sps:$4 sm:$0xff]  }
0x28c5   : > { %16665 = vmatprep.subr.bf16.mxu0 %v23035_v59  ;;  %v23105_v59 = vld [vmem:[#allocation21 + $0x6a0] ss:$24 sps:$4 sm:$0xff]  }
0x28c7   : > { %16582 = vmatpush1.bf16.msra.mxu1 %v23024_v58  ;;  %v23164_v58 = vld [vmem:[%s27355_s2 + $0xd0] sm:$0xff]  }
0x28c8   : > { %16583 = vmatprep.subr.bf16.mxu1 %v23032_v8  ;;  %16666 = vmatpush1.bf16.msra.mxu0 %v23033_v15  ;;  %v23166_v8 = vld [vmem:[%s27355_s2 + $0xd8] sm:$0xff]  }
0x28c9   : > { %16667 = vmatprep.subr.bf16.mxu0 %v23041_v16  ;;  %v23167_v15 = vld [vmem:[%s27355_s2 + $0x98] sm:$0xff]  }
0x28ca   : > { %v23113_v16 = vld [vmem:[#allocation21 + $0x704] ss:$24 sps:$4 sm:$0xff]  }
0x28cb   : > { %16584 = vmatpush1.bf16.msra.mxu1 %v23030_v50  ;;  %v23110_v50 = vld [vmem:[#allocation21 + $0x6d4] ss:$24 sps:$4 sm:$0xff]  }
0x28cc   : > { %16585 = vmatprep.subr.bf16.mxu1 %v23038_v29  ;;  %16668 = vmatpush1.bf16.msra.mxu0 %v23039_v36  ;;  %v23108_v29 = vld [vmem:[#allocation21 + $0x6d0] ss:$24 sps:$4 sm:$0xff]   ;;  %v23116_v36 = vld [vmem:[#allocation21 + $0x734] ss:$24 sps:$4 sm:$0xff]  }
0x28cd   : > { %16669 = vmatprep.subr.bf16.mxu0 %v23047_v13 }
0x28cf   : > { %16586 = vmatpush1.bf16.msra.mxu1 %v23036_v39  ;;  %v23111_v39 = vld [vmem:[#allocation21 + $0x700] ss:$24 sps:$4 sm:$0xff]  }
0x28d0   : > { %16587 = vmatprep.subr.bf16.mxu1 %v23044_v24  ;;  %16670 = vmatpush1.bf16.msra.mxu0 %v23045_v28 }
0x28d1   : > { %16671 = vmatprep.subr.bf16.mxu0 %v23053_v46 }
0x28d3   : > { %16588 = vmatpush1.bf16.msra.mxu1 %v23042_v27  ;;  %v23114_v27 = vld [vmem:[#allocation21 + $0x730] ss:$24 sps:$4 sm:$0xff]  }
0x28d4   : > { %16589 = vmatprep.subr.bf16.mxu1 %v23050_v34  ;;  %16672 = vmatpush1.bf16.msra.mxu0 %v23051_v57  ;;  %v23119_v34 = vld [vmem:[#allocation21 + $0x764] ss:$24 sps:$4 sm:$0xff]   ;;  %v23122_v57 = vld [vmem:[#allocation21 + $0x794] ss:$24 sps:$4 sm:$0xff]  }
0x28d5   : > { %16673 = vmatprep.subr.bf16.mxu0 %v23059_v22  ;;  %v23125_v22 = vld [vmem:[#allocation21 + $0x7c4] ss:$24 sps:$4 sm:$0xff]  }
0x28d7   : > { %16590 = vmatpush1.bf16.msra.mxu1 %v23048_v62  ;;  %v23117_v62 = vld [vmem:[#allocation21 + $0x760] ss:$24 sps:$4 sm:$0xff]  }
0x28d8   : > { %16591 = vmatprep.subr.bf16.mxu1 %v23056_v21  ;;  %16674 = vmatpush1.bf16.msra.mxu0 %v23057_v7  ;;  %v23120_v21 = vld [vmem:[#allocation21 + $0x790] ss:$24 sps:$4 sm:$0xff]   ;;  %v23128_v7 = vld [vmem:[#allocation21 + $0x7f4] ss:$24 sps:$4 sm:$0xff]  }
0x28d9   : > { %16675 = vmatprep.subr.bf16.mxu0 %v23065_v14  ;;  %v23131_v14 = vld [vmem:[#allocation21 + $0x824] ss:$24 sps:$4 sm:$0xff]  }
0x28db   : > { %16592 = vmatpush1.bf16.msra.mxu1 %v23054_v38  ;;  %v23123_v38 = vld [vmem:[#allocation21 + $0x7c0] ss:$24 sps:$4 sm:$0xff]  }
0x28dc   : > { %16593 = vmatprep.subr.bf16.mxu1 %v23062_v33  ;;  %16676 = vmatpush1.bf16.msra.mxu0 %v23063_v47  ;;  %v23126_v33 = vld [vmem:[#allocation21 + $0x7f0] ss:$24 sps:$4 sm:$0xff]   ;;  %v23134_v47 = vld [vmem:[#allocation21 + $0x854] ss:$24 sps:$4 sm:$0xff]  }
0x28dd   : > { %16677 = vmatprep.subr.bf16.mxu0 %v23071_v19  ;;  %v23137_v19 = vld [vmem:[#allocation21 + $0x884] ss:$24 sps:$4 sm:$0xff]  }
0x28df   : > { %16594 = vmatpush1.bf16.msra.mxu1 %v23060_v1  ;;  %v23129_v1 = vld [vmem:[#allocation21 + $0x820] ss:$24 sps:$4 sm:$0xff]  }
0x28e0   : > { %16595 = vmatprep.subr.bf16.mxu1 %v23068_v56  ;;  %16678 = vmatpush1.bf16.msra.mxu0 %v23069_v0  ;;  %v23132_v56 = vld [vmem:[#allocation21 + $0x850] ss:$24 sps:$4 sm:$0xff]   ;;  %v23140_v0 = vld [vmem:[#allocation21 + $0x8b4] ss:$24 sps:$4 sm:$0xff]  }
0x28e1   : > { %16679 = vmatprep.subr.bf16.mxu0 %v23077_v17  ;;  %v23143_v17 = vld [vmem:[#allocation21 + $0x8e4] ss:$24 sps:$4 sm:$0xff]  }
0x28e3   : > { %16596 = vmatpush1.bf16.msra.mxu1 %v23066_v31  ;;  %v23135_v31 = vld [vmem:[#allocation21 + $0x880] ss:$24 sps:$4 sm:$0xff]  }
0x28e4   : > { %16597 = vmatprep.subr.bf16.mxu1 %v23074_v23  ;;  %16680 = vmatpush1.bf16.msra.mxu0 %v23075_v54  ;;  %v23138_v23 = vld [vmem:[#allocation21 + $0x8b0] ss:$24 sps:$4 sm:$0xff]   ;;  %v23144_v54 = vld [vmem:[%s27355_s2 + $0x40] sm:$0xff]  }
0x28e5   : > { %16681 = vmatprep.subr.bf16.mxu0 %v23083_v4  ;;  %v23146_v4 = vld [vmem:[%s27355_s2 + $0x48] sm:$0xff]  }
0x28e7   : > { %16598 = vmatpush1.bf16.msra.mxu1 %v23072_v37  ;;  %v23141_v37 = vld [vmem:[#allocation21 + $0x8e0] ss:$24 sps:$4 sm:$0xff]  }
0x28e8   : > { %16599 = vmatprep.subr.bf16.mxu1 %v23080_v10  ;;  %16682 = vmatpush1.bf16.msra.mxu0 %v23081_v55  ;;  %v23145_v10 = vld [vmem:[%s27355_s2] sm:$0xff]   ;;  %v23148_v55 = vld [vmem:[%s27355_s2 + $0x50] sm:$0xff]  }
0x28e9   : > { %16683 = vmatprep.subr.bf16.mxu0 %v23089_v51  ;;  %v23151_v51 = vld [vmem:[%s27355_s2 + $0x18] sm:$0xff]  }
0x28eb   : > { %16600 = vmatpush1.bf16.msra.mxu1 %v23078_v53  ;;  %v23147_v53 = vld [vmem:[%s27355_s2 + $0x8] sm:$0xff]  }
0x28ec   : > { %16601 = vmatprep.subr.bf16.mxu1 %v23086_v41  ;;  %16684 = vmatpush1.bf16.msra.mxu0 %v23087_v18  ;;  %v23149_v41 = vld [vmem:[%s27355_s2 + $0x10] sm:$0xff]   ;;  %v27037_v18 = vld [vmem:[#allocation22] sm:$0x3f] }
0x28ed   : > { %16685 = vmatprep.subr.bf16.mxu0 %v23095_v6  ;;  %v14901_v6 = vrot.slane %v27037_v18, %v25163_v2  ;;  %v23156_v2 = vld [vmem:[%s27355_s2 + $0x70] sm:$0xff]  }
0x28ef   : > { %16602 = vmatpush1.bf16.msra.mxu1 %v23084_v26  ;;  %v23152_v26 = vld [vmem:[%s27355_s2 + $0x60] sm:$0xff]  }
0x28f0   : > { %16603 = vmatprep.subr.bf16.mxu1 %v23092_v9  ;;  %16686 = vmatpush1.bf16.msra.mxu0 %v23093_v60  ;;  %v23153_v9 = vld [vmem:[%s27355_s2 + $0x20] sm:$0xff]   ;;  %v14905_v60 = vrot.slane %v27037_v18, %v25168_v5 }
0x28f1   : > { %16696 = vmatprep.subr.bf16.mxu0 %v23098_v30  ;;  %v23155_v30 = vld [vmem:[%s27355_s2 + $0x28] sm:$0xff]  }
0x28f3   : > { %16604 = vmatpush1.bf16.msra.mxu1 %v23090_v42  ;;  %16688 = vmatmul.mubr.bf16.vlgmr.msra.gmra.mrb[4].mxu0 %v26955_v3  ;;  %v23107_v3 = vld [vmem:[#allocation21 + $0x6a4] ss:$24 sps:$4 sm:$0xff]   ;;  %v23154_v42 = vld [vmem:[%s27355_s2 + $0x68] sm:$0xff]  }
0x28f4   : > { %19695 = vmatprep.subr.bf16.mxu1 %v23160_v49  ;;  %16697 = vmatpush1.bf16.msra.mxu0 %v23096_v52 }
0x28f5   : > { %16728 = vmatprep.mubr.bf16.mxu0 %v26959_v40  ;;  %16698 = vmatprep.subr.bf16.mxu0 %v23101_v32  ;;  %v23165_v40 = vld [vmem:[%s27355_s2 + $0x90] sm:$0xff]  }
0x28f6   : > { %16606 = vmatmul.mubr.bf16.vlgmr.msra.gmra.mrb[4].mxu1 %v26968_v35 }
0x28f7   : > { %19696 = vmatpush3.bf16.msra.mxu1 %v23161_v11  ;;  %v23168_v11 = vld [vmem:[%s27355_s2 + $0xe0] sm:$0xff]  }
0x28f8   : > { %19697 = vmatprep.subr.bf16.mxu1 %v23162_v63  ;;  %16699 = vmatpush1.bf16.msra.mxu0 %v23099_v43  ;;  %v23169_v43 = vld [vmem:[%s27355_s2 + $0xa0] sm:$0xff]  }
0x28f9   : > { %16700 = vmatprep.subr.bf16.mxu0 %v23104_v61 }
0x28fb   : > { %19698 = vmatpush3.bf16.msra.mxu1 %v23163_v12 }
0x28fc   : > { %19699 = vmatprep.subr.bf16.mxu1 %v23164_v58  ;;  %16701 = vmatpush1.bf16.msra.mxu0 %v23102_v20  ;;  %v23157_v58 = vld [vmem:[%s27355_s2 + $0x30] sm:$0xff]  }
0x28fd   : > { %16702 = vmatprep.subr.bf16.mxu0 %v23107_v3  ;;  %v23158_v3 = vld [vmem:[%s27355_s2 + $0x78] sm:$0xff]  }
0x28ff   : > { %19700 = vmatpush3.bf16.msra.mxu1 %v23165_v40  ;;  %v23170_v40 = vld [vmem:[%s27355_s2 + $0xe8] sm:$0xff]  }
0x2900   : > { %19701 = vmatprep.subr.bf16.mxu1 %v23166_v8  ;;  %16703 = vmatpush1.bf16.msra.mxu0 %v23105_v59  ;;  %v23171_v8 = vld [vmem:[%s27355_s2 + $0xa8] sm:$0xff]   ;;  %v23159_v59 = vld [vmem:[%s27355_s2 + $0x38] sm:$0xff]  }
0x2901   : > { %16704 = vmatprep.subr.bf16.mxu0 %v23110_v50  ;;  %v23172_v50 = vld [vmem:[%s27355_s2 + $0xf0] sm:$0xff]  }
0x2903   : > { %19702 = vmatpush3.bf16.msra.mxu1 %v23167_v15  ;;  %v23173_v15 = vld [vmem:[%s27355_s2 + $0xb0] sm:$0xff]  }
0x2904   : > { %16705 = vmatpush1.bf16.msra.mxu0 %v23108_v29  ;;  %19703 = vmatprep.subr.bf16.mxu1 %v23168_v11  ;;  %v23174_v29 = vld [vmem:[%s27355_s2 + $0xf8] sm:$0xff]  }
0x2905   : > { %16706 = vmatprep.subr.bf16.mxu0 %v23113_v16 }
0x2907   : > { %19704 = vmatpush3.bf16.msra.mxu1 %v23169_v43  ;;  %v23193_v43 = vld [vmem:[%s27356_s23 + $0x8] sm:$0xff]  }
0x2908   : > { %16707 = vmatpush1.bf16.msra.mxu0 %v23111_v39  ;;  %19705 = vmatprep.subr.bf16.mxu1 %v23170_v40  ;;  %v23175_v39 = vld [vmem:[%s27355_s2 + $0xb8] sm:$0xff]  }
0x2909   : > { %v27005_v24 = vpop.f32.mrb[0].mxu1  ;;  %16708 = vmatprep.subr.bf16.mxu0 %v23116_v36 }
0x290a   : > { %v27007_v13 = vpop.f32.mrb[1].mxu1  ;;  %v16403_v49 = vadd.f32 %v27005_v24, %v14901_v6 }
0x290b   : > { %v16406_v28 = vpop.f32.mrb[2].mxu1  ;;  %v16405_v52 = vadd.f32 %v27007_v13, %v14905_v60  ;;  %19706 = vmatpush3.bf16.msra.mxu1 %v23171_v8 }
0x290c   : > { %v16407_v46 = vpop.f32.mrb[3].mxu1  ;;  %16709 = vmatpush1.bf16.msra.mxu0 %v23114_v27  ;;  %19707 = vmatprep.subr.bf16.mxu1 %v23172_v50  ;;  %v23176_v27 = vld [vmem:[%s27355_s2 + $0x140] sm:$0xff]   ;;  %v14909_v28 = vrot.slane %v27037_v18, %v25081_v45  ;;  %v23178_v45 = vld [vmem:[%s27355_s2 + $0x148] sm:$0xff]  }
0x290d   : > { %16710 = vmatprep.subr.bf16.mxu0 %v23119_v34  ;;  %v14913_v34 = vrot.slane %v27037_v18, %v25085_v48  ;;  %v23179_v48 = vld [vmem:[%s27355_s2 + $0x108] sm:$0xff]  }
0x290f   : > { %19708 = vmatpush3.bf16.msra.mxu1 %v23173_v15 }
0x2910   : > { %16711 = vmatpush1.bf16.msra.mxu0 %v23117_v62  ;;  %19709 = vmatprep.subr.bf16.mxu1 %v23174_v29 }
0x2911   : > { %16712 = vmatprep.subr.bf16.mxu0 %v23122_v57 }
0x2913   : > { %19710 = vmatpush3.bf16.msra.mxu1 %v23175_v39 }
0x2914   : > { %16713 = vmatpush1.bf16.msra.mxu0 %v23120_v21  ;;  %19717 = vmatprep.subr.bf16.mxu1 %v23176_v27 }
0x2915   : > { %16714 = vmatprep.subr.bf16.mxu0 %v23125_v22 }
0x2918   : > { %16715 = vmatpush1.bf16.msra.mxu0 %v23123_v38 }
0x2919   : > { %16716 = vmatprep.subr.bf16.mxu0 %v23128_v7 }
0x291c   : > { %16717 = vmatpush1.bf16.msra.mxu0 %v23126_v33 }
0x291d   : > { %16718 = vmatprep.subr.bf16.mxu0 %v23131_v14 }
0x2920   : > { %16719 = vmatpush1.bf16.msra.mxu0 %v23129_v1  ;;  %v23177_v1 = vld [vmem:[%s27355_s2 + $0x100] sm:$0xff]  }
0x2921   : > { %16720 = vmatprep.subr.bf16.mxu0 %v23134_v47 }
0x2924   : > { %16721 = vmatpush1.bf16.msra.mxu0 %v23132_v56  ;;  %v23180_v56 = vld [vmem:[%s27355_s2 + $0x150] sm:$0xff]  }
0x2925   : > { %16722 = vmatprep.subr.bf16.mxu0 %v23137_v19  ;;  %v23181_v19 = vld [vmem:[%s27355_s2 + $0x110] sm:$0xff]  }
0x2928   : > { %16723 = vmatpush1.bf16.msra.mxu0 %v23135_v31  ;;  %v23182_v31 = vld [vmem:[%s27355_s2 + $0x158] sm:$0xff]  }
0x2929   : > { %16724 = vmatprep.subr.bf16.mxu0 %v23140_v0  ;;  %v23183_v0 = vld [vmem:[%s27355_s2 + $0x118] sm:$0xff]  }
0x292c   : > { %16725 = vmatpush1.bf16.msra.mxu0 %v23138_v23  ;;  %v23184_v23 = vld [vmem:[%s27355_s2 + $0x160] sm:$0xff]  }
0x292d   : > { %16726 = vmatprep.subr.bf16.mxu0 %v23143_v17  ;;  %v23185_v17 = vld [vmem:[%s27355_s2 + $0x120] sm:$0xff]  }
0x2930   : > { %16727 = vmatpush1.bf16.msra.mxu0 %v23141_v37  ;;  %v23186_v37 = vld [vmem:[%s27355_s2 + $0x168] sm:$0xff]  }
0x2931   : > { %19673 = vmatprep.subr.bf16.mxu0 %v23144_v54  ;;  %v23187_v54 = vld [vmem:[%s27355_s2 + $0x128] sm:$0xff]  }
0x2933   : > { %16729 = vmatmul.mubr.bf16.vlgmr.msra.gmra.mrb[4].mxu0 %v26968_v35  ;;  %v23150_v35 = vld [vmem:[%s27355_s2 + $0x58] sm:$0xff]  }
0x2934   : > { %19674 = vmatpush3.bf16.msra.mxu0 %v23145_v10  ;;  %v23188_v10 = vld [vmem:[%s27355_s2 + $0x170] sm:$0xff]  }
0x2935   : > { %19675 = vmatprep.subr.bf16.mxu0 %v23146_v4  ;;  %v23189_v4 = vld [vmem:[%s27355_s2 + $0x130] sm:$0xff]  }
0x2938   : > { %19676 = vmatpush3.bf16.msra.mxu0 %v23147_v53  ;;  %v23190_v53 = vld [vmem:[%s27355_s2 + $0x178] sm:$0xff]  }
0x2939   : > { %19677 = vmatprep.subr.bf16.mxu0 %v23148_v55  ;;  %v23191_v55 = vld [vmem:[%s27355_s2 + $0x138] sm:$0xff]  }
0x293c   : > { %19678 = vmatpush3.bf16.msra.mxu0 %v23149_v41  ;;  %v14917_v41 = vrot.slane %v27037_v18, %v25396_v44 }
0x293d   : > { %19679 = vmatprep.subr.bf16.mxu0 %v23150_v35  ;;  %v14921_v35 = vrot.slane %v27037_v18, %v25401_v25  ;;  %v23192_v25 = vld [vmem:[%s27356_s23] sm:$0xff]   ;;  %v23852_v18 = vmov 0.0  }
0x2940   : > { %19680 = vmatpush3.bf16.msra.mxu0 %v23151_v51 }
0x2941   : > { %19681 = vmatprep.subr.bf16.mxu0 %v23152_v26 }
0x2944   : > { %19682 = vmatpush3.bf16.msra.mxu0 %v23153_v9 }
0x2945   : > { %19683 = vmatprep.subr.bf16.mxu0 %v23154_v42 }
0x2946   : > { %v16484_v32 = vpop.f32.mrb[0].mxu0 }
0x2947   : > { %v20093_v5 = vadd.f32 %v16484_v32, %v16403_v49  ;;  %v16486_v63 = vpop.f32.mrb[1].mxu0 }
0x2948   : > { %v20095_v61 = vadd.f32 %v16486_v63, %v16405_v52  ;;  %v16488_v12 = vpop.f32.mrb[2].mxu0  ;;  %19684 = vmatpush3.bf16.msra.mxu0 %v23155_v30 }
0x2949   : > { %23196 = vtanh.f32 %v20093_v5  ;;  %v16489_v20 = vpop.f32.mrb[3].mxu0  ;;  %19685 = vmatprep.subr.bf16.mxu0 %v23156_v2  ;;  %v23195_v12 = vld [vmem:[%s27356_s23 + $0x18] sm:$0xff]  }
0x294a   : > { %23198 = vtanh.f32 %v20095_v61  ;;  %v23194_v61 = vld [vmem:[%s27356_s23 + $0x10] sm:$0xff]  }
0x294c   : > { %19686 = vmatpush3.bf16.msra.mxu0 %v23157_v58  ;;  %v19565_v58 = vld [vmem:[#allocation24] ss:$0 sm:$0xff] }
0x294d   : > { %19687 = vmatprep.subr.bf16.mxu0 %v23158_v3 }
0x2950   : > { %19688 = vmatpush3.bf16.msra.mxu0 %v23159_v59 }
0x2953   : > { %v23197_v16 = vpop.eup %23196 }
0x2954   : > { %v23199_v36 = vpop.eup %23198  ;;  %v16840_v13 = vpack.c.bf16 %v23197_v16, %v23197_v16 }
0x2955   : > { %v16841_v24 = vpack.c.bf16 %v23199_v36, %v23199_v36 }
0x2957   : > { %17172 = vmatprep.mubr.bf16.mxu0 %v16841_v24 }
0x2958   : > { %17173 = vmatmul.mubr.bf16.vlgmr.msra.gmra.mrb[8].mxu0 %v16840_v13 }
0x29c9   : > { %v16607_v46 = vpop.f32.mrb[4].mxu1 }
0x29ca   : > { %v20096_v62 = vadd.f32 %v16607_v46, %v14909_v28  ;;  %v16609_v57 = vpop.f32.mrb[5].mxu1 }
0x29cb   : > { %v20097_v21 = vadd.f32 %v16609_v57, %v14913_v34  ;;  %v16611_v22 = vpop.f32.mrb[6].mxu1  ;;  %v19614_v34 = vld [vmem:[#allocation25] ss:$0 sm:$0xff] }
0x29cc   : > { %23200 = vtanh.f32 %v20096_v62  ;;  %v16612_v38 = vpop.f32.mrb[7].mxu1 }
0x29cd   : > { %23202 = vtanh.f32 %v20097_v21 }
0x29d6   : > { %v23201_v7 = vpop.eup %23200 }
0x29d7   : > { %v23203_v33 = vpop.eup %23202  ;;  %v16842_v47 = vpack.c.bf16 %v23201_v7, %v23201_v7 }
0x29d8   : > { %v16843_v14 = vpack.c.bf16 %v23203_v33, %v23203_v33 }
0x29da   : > { %17212 = vmatprep.mubr.bf16.mxu1 %v16843_v14 }
0x29db   : > { %17213 = vmatmul.mubr.bf16.vlgmr.msra.gmra.mrb[8].mxu1 %v16842_v47 }
0x29dc   : > { %19718 = vmatpush3.bf16.msra.mxu1 %v23177_v1 }
0x29dd   : > { %19719 = vmatprep.subr.bf16.mxu1 %v23178_v45 }
0x29e0   : > { %19720 = vmatpush3.bf16.msra.mxu1 %v23179_v48 }
0x29e1   : > { %19721 = vmatprep.subr.bf16.mxu1 %v23180_v56 }
0x29e4   : > { %19722 = vmatpush3.bf16.msra.mxu1 %v23181_v19 }
0x29e5   : > { %19723 = vmatprep.subr.bf16.mxu1 %v23182_v31 }
0x29e8   : > { %19724 = vmatpush3.bf16.msra.mxu1 %v23183_v0 }
0x29e9   : > { %19725 = vmatprep.subr.bf16.mxu1 %v23184_v23 }
0x29ec   : > { %19726 = vmatpush3.bf16.msra.mxu1 %v23185_v17 }
0x29ed   : > { %19727 = vmatprep.subr.bf16.mxu1 %v23186_v37 }
0x29f0   : > { %19728 = vmatpush3.bf16.msra.mxu1 %v23187_v54 }
0x29f1   : > { %19729 = vmatprep.subr.bf16.mxu1 %v23188_v10 }
0x29f4   : > { %19730 = vmatpush3.bf16.msra.mxu1 %v23189_v4 }
0x29f5   : > { %19731 = vmatprep.subr.bf16.mxu1 %v23190_v53 }
0x29f8   : > { %19732 = vmatpush3.bf16.msra.mxu1 %v23191_v55 }
0x29f9   : > { %19888 = vmatprep.subr.bf16.mxu1 %v23852_v18 }
0x2a06   : > { %v16730_v51 = vpop.f32.mrb[4].mxu0 }
0x2a07   : > { %v20098_v26 = vadd.f32 %v16730_v51, %v14917_v41  ;;  %v16732_v9 = vpop.f32.mrb[5].mxu0 }
0x2a08   : > { %v20099_v6 = vadd.f32 %v16732_v9, %v14921_v35  ;;  %v16734_v42 = vpop.f32.mrb[6].mxu0 }
0x2a09   : > { %23204 = vtanh.f32 %v20098_v26  ;;  %v16735_v60 = vpop.f32.mrb[7].mxu0 }
0x2a0a   : > { %23206 = vtanh.f32 %v20099_v6 }
0x2a13   : > { %v23205_v30 = vpop.eup %23204 }
0x2a14   : > { %v23207_v49 = vpop.eup %23206  ;;  %v16844_v52 = vpack.c.bf16 %v23205_v30, %v23205_v30 }
0x2a15   : > { %v16845_v2 = vpack.c.bf16 %v23207_v49, %v23207_v49 }
0x2a17   : > { %17252 = vmatprep.mubr.bf16.mxu1 %v16845_v2 }
0x2a18   : > { %17253 = vmatmul.mubr.bf16.vlgmr.msra.gmra.mrb[12].mxu1 %v16844_v52 }
0x2a19   : > { %19889 = vmatpush3.bf16.msra.mxu1 %v23192_v25  ;;  %19896 = vmatprep.mubr.msk.bf16.mxu1 %vm23853_vm4, %v23852_v18 }
0x2a1a   : > { %19890 = vmatprep.subr.bf16.mxu1 %v23852_v18 }
0x2a1d   : > { %19891 = vmatpush3.bf16.msra.mxu1 %v23193_v43 }
0x2a1e   : > { %19892 = vmatprep.subr.bf16.mxu1 %v23852_v18 }
0x2a21   : > { %19893 = vmatpush3.bf16.msra.mxu1 %v23194_v61 }
0x2a22   : > { %19894 = vmatprep.subr.bf16.mxu1 %v23852_v18 }
0x2a25   : > { %19895 = vmatpush3.bf16.msra.mxu1 %v23195_v12 }
0x2a2b   : > { %v19689_v32 = vpop.f32.mrb[8].mxu0 }
0x2a2c   : > { %v19690_v11 = vpop.f32.mrb[9].mxu0 }
0x2a2d   : > { %v19691_v44 = vadd.f32 %v19690_v11, %v19689_v32  ;;  %v19692_v5 = vpop.f32.mrb[10].mxu0 }
0x2a2e   : > { %v19693_v63 = vpop.f32.mrb[11].mxu0 }
0x2a2f   : > { %v17175_v40 = vadd.f32 %v19691_v44, %v19565_v58 }
0x2aae   : > { %v19711_v20 = vpop.f32.mrb[8].mxu1 }
0x2aaf   : > { %v19712_v3 = vpop.f32.mrb[9].mxu1 }
0x2ab0   : > { %v19713_v8 = vadd.f32 %v19712_v3, %v19711_v20  ;;  %v19714_v59 = vpop.f32.mrb[10].mxu1 }
0x2ab1   : > { %v19715_v50 = vpop.f32.mrb[11].mxu1 }
0x2ab2   : > { %v17215_v15 = vadd.f32 %v19713_v8, %v17175_v40 }
0x2aeb   : > { %v19733_v29 = vpop.f32.mrb[12].mxu1 }
0x2aec   : > { %v19734_v16 = vpop.f32.mrb[13].mxu1 }
0x2aed   : > { %v19735_v39 = vadd.f32 %v19734_v16, %v19733_v29  ;;  %v19736_v36 = vpop.f32.mrb[14].mxu1 }
0x2aee   : > { %v19737_v24 = vpop.f32.mrb[15].mxu1 }
0x2aef   : > { %v17255_v13 = vadd.f32 %v19735_v39, %v17215_v15 }
0x2af1   : > { %v17260_v27 = vmax.f32 %v17255_v13, 0.0 }
0x2af3   : > { %v17270_v28 = vpack.c.bf16 %v17260_v27, %v17260_v27 }
0x2af5   : > { %19897 = vmatmul.mubr.msk.bf16.vlgmr.msra.gmra.mrb[16].mxu1 %vm17301_vm5, %v17270_v28 }
0x2bc8   : > { %v17339_v46 = vpop.f32.mrb[16].mxu1 }
0x2bc9   : > { %v17340_v62 = vadd.f32 %v19614_v34, %v17339_v46  ;;  %v19898_v57 = vpop.f32.mrb[17].mxu1 }
0x2bca   : > { %v17342_v21 = vpop.f32.mrb[18].mxu1 }
0x2bcb   : > { %v19899_v22 = vpop.f32.mrb[19].mxu1  ;;  %v17346_v38 = vsel %vm17345_vm6, %v17340_v62, -inf }
0x2bcc   : > { %17347 = vmax.xlane.f32.xlu0 %v17346_v38 }
0x2c59   : > { %v17348_v7 = vpop.xlane.xlu0 %17347 }
0x2c5a   : > { %v17349_v33 = vsub.f32 %v17340_v62, %v17348_v7 }
0x2c5c   : > { %v17350_v14 = vmul.f32 1.442695, %v17349_v33 }
0x2c5e   : > { %23208 = vpow2.f32 %v17350_v14 }
0x2c68   : > { %v23209_v1 = vpop.eup %23208 }
0x2c69   : > { %v17352_v47 = vsel %vm17345_vm6, %v23209_v1, 0.0 }
0x2c6a   : > { %17353 = vadd.xlane.f32.xlu0 %v17352_v47 }
0x2cf7   : > { %v17354_v45 = vpop.xlane.xlu0 %17353 }
0x2cf8   : > { %23210 = vlog2.f32 %v17354_v45 }
0x2d02   : > { %v23211_v48 = vpop.eup %23210 }
0x2d03   : > { %v17356_v56 = vmul.f32 0.6931472, %v23211_v48 }
0x2d05   : > { %v17357_v19 = vadd.f32 %v17356_v56, %v17348_v7 }
0x2d07   : > { %v17358_v31 = vsub.f32 %v17340_v62, %v17357_v19 }
0x2d09   : > { %17359 = vst.msk [vmem:[#allocation27] sm:$0x3] %vm17345_vm6, %v17358_v31 }
0x2d0a PF: > { %s27357_s4 = sld [smem:[#allocation37_spill]]  ;;  %s23854_s28 = smov [#allocation27]  }
0x2d0b   : > { %s17367_s22 = sshll.u32 %s23854_s28, 4  ;;  %s17368_s22 = int_to_ptr.vmem [resolvable:$true] %s17367_s22 }
0x2d0c   : > { %s23740_s1 = scalar_lea.vmem %s17368_s22, 32  ;;  %p23747_p5 = scmp.lt.s32.totalorder %s17368_s22, %s17368_s22 }
0x2d0d   : > { %p23741_p0 = scmp.ne.s32.totalorder %s17368_s22, %s23740_s1  ;;  %p23748_p11 = scmp.lt.s32.totalorder %s23740_s1, %s23740_s1 }
0x2d0f   : > { %p23749_p13 = por %p23748_p11, %p23747_p5 }
0x2d10   : > { %p20268_p2 = scmp.eq.s32.totalorder %s27357_s4, 1 }
0x2d12   : > { %p23742_p7 = pnand %p23741_p0, %p20268_p2 }
0x2d14   : > { %p23743_p12 = pneg %p23742_p7 }
0x2d16   : > { %p23750_p3 = pnand %p23749_p13, %p23743_p12 }
0x2d18   : > { %23753 = shalt.err (!%p23750_p3)
}
0x2d19   : > { %s27358_s30 = sld [smem:[#allocation58_spill]] }
0x2d1f   : > { %s27359_s25 = smov %s27358_s30  ;;  %s23754_s24 = scalar_lea.hbm %s27358_s30, 32 }
0x2d20   : > { %p23755_p6 = scmp.ne.s32.totalorder %s27359_s25, %s23754_s24  ;;  %p23760_p10 = scmp.lt.u32.totalorder %s23754_s24, %s27359_s25 }
0x2d22   : > { %p23756_p4 = pnand %p23755_p6, %p20268_p2 }
0x2d24   : > { %p23757_p9 = pneg %p23756_p4 }
0x2d26   : > { %p23762_p1 = pnand %p23760_p10, %p23757_p9 }
0x2d28   : > { %23765 = shalt.err (!%p23762_p1)
}
0x2d29   : > { %20196 = dma.vmem_to_hbm [thread:$0]  (%p20268_p2), %s17368_s22, 32, %s27359_s25, [#allocation6]  }
0x2d2a   : > { %23807 = dma.done.wait (%p20268_p2), [#allocation6], 32  }
0x2d2b   : > { %23809 = vsyncadd (%p20268_p2), [#allocation6], 4294967264 }
0x2d2c PF: > { %s27360_s30 = sld [smem:[#allocation40_spill]]  ;;  %s27361_s3 = sld [smem:[#allocation35_spill]] }
0x2d2d   : > { %s27362_s28 = sld [smem:[#allocation36_spill]]  ;;  %s27363_s29 = sld [smem:[#allocation41_spill]] }
0x2d32   : > { %p34_p8 = scmp.ge.s32.totalorder %s27360_s30, 4  }
0x2d34   :  { %36 = sbr.rel (!%p34_p8) target bundleno = 24 (0x18), region = 297 }
0x2d3b   :  { %17380 = vsyncpa [#allocation5], 1 }
0x2d3c   :  { %17382 = vsyncpa [#allocation5 + $0x1], 1 }
0x2d3d   :  { %17383 = vsyncpa [#allocation8], 1 }
0x2d3e   :  { %17384 = vsyncpa [#allocation23], 1 }
0x2d3f   :  { %17385 = vsyncpa [#allocation26], 1 }
0x2d40   :  { %17386 = vsyncpa [#allocation6], 1 }
0x2d41   :  { %17388 = vsyncpa [#allocation6 + $0x1], 1 }

</bundles_post_ra>
